<compile_context>
chip_gen: v5e
topology: v5e:2x2
jax: 0.10.0
libtpu: 0.0.40
codegen_flags: <defaults>
</compile_context>

<pallas_src>
import numpy as np

import jax
import jax.numpy as jnp
from jax import lax
from jax.experimental import pallas as pl
from jax.experimental.pallas import tpu as pltpu

K_SIZE = 3        # args.k_size
STRIDE = 1        # args.stride (kernel assumes stride == 1)
BN_EPS = 1e-5
MXU_DTYPE = jnp.bfloat16

# Spatial bookkeeping for 24x24 input, k=3, stride=1 (=> fc in_size = 64*4*4):
#   conv1: 24 -> 22, conv2: 22 -> 20, pool: 20 -> 10, conv3: 10 -> 8, pool: 8 -> 4.
H_IN = 24
P0 = H_IN              # row pitch of the conv1/conv2 stage (input width)
L1 = 536               # conv1 pitched rows kept (>= 2*P0 + 2 + 20*P0 = 530 read by conv2)
L2 = 20 * P0           # conv2 pitched rows (480)
P2 = 10                # row pitch after pool2 (compact 10x10)
L3 = 8 * P2            # conv3 pitched rows (80)
X_ROWS = 600           # padded flat-input rows (>= 2*P0 + 2 + L1 = 586)
P2_ROWS = 112          # pooled2 rows incl. zero tail (>= 2*P2 + 2 + L3 = 102)
D2_LEN = L2 - 1 - P0   # 455: length of the 2x2-window max vector for pool2
D3_LEN = L3 - 1 - P2   # 69:  length of the 2x2-window max vector for pool3


def _pool_select_matrix(out_hw, in_pitch, d_len, out_rows):
    """0/1 matrix S so that (S @ d)[ph*out_hw + pw] = d[2*ph*in_pitch + 2*pw].

    d[i] already holds the max over the 2x2 window whose top-left flat index is i,
    so S both downsamples (stride 2) and compacts the pitched layout. Extra rows
    beyond out_hw*out_hw stay zero (finite padding for the next conv's reads).
    """
    s = np.zeros((out_rows, d_len), np.float32)
    for ph in range(out_hw):
        for pw in range(out_hw):
            s[ph * out_hw + pw, 2 * ph * in_pitch + 2 * pw] = 1.0
    return jnp.asarray(s)


_SEL2 = _pool_select_matrix(10, P0, D2_LEN, P2_ROWS)   # (112, 455)
_SEL3 = _pool_select_matrix(4, P2, D3_LEN, 16)         # (16, 69)


# ---------------------------------------------------------------------------
# Fused Pallas kernel: conv1+ReLU -> conv2+ReLU+BN+pool -> conv3+ReLU+BN+pool
# ---------------------------------------------------------------------------
def _cnn_fused_kernel(x_ref, w1_ref, b1_ref,
                      w2_ref, b2_ref, s2_ref, t2_ref,
                      w3_ref, b3_ref, s3_ref, t3_ref,
                      sel2_ref, sel3_ref, o_ref):
    f32 = jnp.float32

    # ---- conv1 (1->16) + ReLU: Cin == 1, so 9 shifted VPU multiply-adds. ------
    x0 = x_ref[0]                                    # (X_ROWS, 1) f32, pitch P0
    w1 = w1_ref[...]                                 # (9, 16)
    acc1 = jnp.zeros((L1, 16), f32)
    for t in range(9):
        kh, kw = divmod(t, 3)
        s = kh * P0 + kw
        acc1 = acc1 + x0[s:s + L1, :] * w1[t:t + 1, :]
    y1 = jnp.maximum(acc1 + b1_ref[...], 0.0)        # pitched (L1, 16), valid 22x22
    y1b = y1.astype(MXU_DTYPE)

    # ---- conv2 (16->32) + ReLU + folded BN: 9 shifted MXU matmuls. ------------
    acc2 = jnp.zeros((L2, 32), f32)
    for t in range(9):
        kh, kw = divmod(t, 3)
        s = kh * P0 + kw
        acc2 = acc2 + jnp.dot(y1b[s:s + L2, :], w2_ref[t],
                              preferred_element_type=f32)
    y2 = jnp.maximum(acc2 + b2_ref[...], 0.0) * s2_ref[...] + t2_ref[...]

    # ---- maxpool 2x2 -> compact 10x10 via pairwise max + selection matmul. ----
    m2 = jnp.maximum(y2[0:L2 - 1, :], y2[1:L2, :])           # max over the kw pair
    d2 = jnp.maximum(m2[0:D2_LEN, :], m2[P0:L2 - 1, :])      # max over the kh pair
    p2 = jnp.dot(sel2_ref[...], d2, preferred_element_type=f32)   # (P2_ROWS, 32)
    p2b = p2.astype(MXU_DTYPE)

    # ---- conv3 (32->64) + ReLU + folded BN: 9 shifted MXU matmuls. ------------
    acc3 = jnp.zeros((L3, 64), f32)
    for t in range(9):
        kh, kw = divmod(t, 3)
        s = kh * P2 + kw
        acc3 = acc3 + jnp.dot(p2b[s:s + L3, :], w3_ref[t],
                              preferred_element_type=f32)
    y3 = jnp.maximum(acc3 + b3_ref[...], 0.0) * s3_ref[...] + t3_ref[...]

    # ---- maxpool 2x2 -> compact 4x4 (rows ordered h*4 + w, lanes = channels). -
    m3 = jnp.maximum(y3[0:L3 - 1, :], y3[1:L3, :])
    d3 = jnp.maximum(m3[0:D3_LEN, :], m3[P2:L3 - 1, :])
    p3 = jnp.dot(sel3_ref[...], d3, preferred_element_type=f32)   # (16, 64)

    # TODO(synk): Dropout is identity here (inference semantics); BN uses running stats.
    o_ref[0] = p3.astype(o_ref.dtype)


# ---------------------------------------------------------------------------
# Parameter plumbing (host-side layout only) + wrapper
# ---------------------------------------------------------------------------
def _row(v):
    return v.reshape(1, -1).astype(jnp.float32)


def _bn_fold(gamma, beta, mean, var):
    s = gamma / jnp.sqrt(var + BN_EPS)
    return _row(s), _row(beta - mean * s)


def _conv_taps(w_oihw, dtype):
    # PyTorch OIHW -> (KH*KW, I, O), matching the kernel's shifted-matmul tap order.
    o, i, kh, kw = w_oihw.shape
    return jnp.transpose(w_oihw, (2, 3, 1, 0)).reshape(kh * kw, i, o).astype(dtype)


def _const_spec(*shape):
    zeros = (0,) * len(shape)
    return pl.BlockSpec(shape, lambda n: zeros)


def cnn_forward_pallas(x_nchw, P):
    N, C, H, W = x_nchw.shape
    assert (C, H, W) == (1, H_IN, H_IN) and K_SIZE == 3 and STRIDE == 1, \
        "kernel is specialized to 1x24x24 input, k=3, stride=1 (fc expects 64*4*4)"
    f32 = jnp.float32

    # Flat pitched input (row = h*24 + w, lane dim = channel), zero-padded so the
    # shifted conv1 reads stay in bounds (padding is finite -> safe for 0*x selects).
    x_flat = x_nchw.astype(f32).reshape(N, H_IN * H_IN, 1)
    x_flat = jnp.pad(x_flat, ((0, 0), (0, X_ROWS - H_IN * H_IN), (0, 0)))

    w1 = _conv_taps(P["w1"], f32).reshape(9, 16)     # VPU path stays f32
    w2 = _conv_taps(P["w2"], MXU_DTYPE)              # (9, 16, 32) bf16
    w3 = _conv_taps(P["w3"], MXU_DTYPE)              # (9, 32, 64) bf16
    b1, b2, b3 = _row(P["b1"]), _row(P["b2"]), _row(P["b3"])
    s2, t2 = _bn_fold(P["bn2_g"], P["bn2_b"], P["bn2_m"], P["bn2_v"])
    s3, t3 = _bn_fold(P["bn3_g"], P["bn3_b"], P["bn3_m"], P["bn3_v"])

    pooled = pl.pallas_call(
        _cnn_fused_kernel,
        out_shape=jax.ShapeDtypeStruct((N, 16, 64), f32),
        grid=(N,),
        in_specs=[
            pl.BlockSpec((1, X_ROWS, 1), lambda n: (n, 0, 0)),
            _const_spec(9, 16), _const_spec(1, 16),
            _const_spec(9, 16, 32), _const_spec(1, 32),
            _const_spec(1, 32), _const_spec(1, 32),
            _const_spec(9, 32, 64), _const_spec(1, 64),
            _const_spec(1, 64), _const_spec(1, 64),
            _const_spec(P2_ROWS, D2_LEN), _const_spec(16, D3_LEN),
        ],
        out_specs=pl.BlockSpec((1, 16, 64), lambda n: (n, 0, 0)),
        compiler_params=pltpu.CompilerParams(dimension_semantics=("parallel",)),
    )(x_flat, w1, b1, w2, b2, s2, t2, w3, b3, s3, t3, _SEL2, _SEL3)

    # torch.flatten(x, 1) is (C,H,W)-ordered: fold that permutation into the fc
    # weight once, then the tiny fc runs as a plain XLA dot (no extra Pallas launch).
    wfc = jnp.transpose(P["wfc"].reshape(10, 64, 4, 4), (2, 3, 1, 0)).reshape(16 * 64, 10)
    flat = pooled.reshape(N, 16 * 64)                # rows already in (h, w, c) order
    return jnp.dot(flat, wfc, precision=lax.Precision.HIGHEST) + P["bfc"][None, :]


# ---------------------------------------------------------------------------
# Pure-JAX reference (mirrors the PyTorch forward in eval mode)
# ---------------------------------------------------------------------------
def cnn_forward_ref(x_nchw, P):
    def conv(x, w, b):
        y = lax.conv_general_dilated(
            x, w, (STRIDE, STRIDE), "VALID",
            dimension_numbers=("NCHW", "OIHW", "NCHW"),
            precision=lax.Precision.HIGHEST)
        return y + b[None, :, None, None]

    def bn(x, g, b_, m, v):
        return (x - m[None, :, None, None]) / jnp.sqrt(v[None, :, None, None] + BN_EPS) \
               * g[None, :, None, None] + b_[None, :, None, None]

    def pool(x):
        n, c, h, w = x.shape
        return x.reshape(n, c, h // 2, 2, w // 2, 2).max(axis=(3, 5))

    y = jnp.maximum(conv(x_nchw, P["w1"], P["b1"]), 0.0)
    y = jnp.maximum(conv(y, P["w2"], P["b2"]), 0.0)
    y = pool(bn(y, P["bn2_g"], P["bn2_b"], P["bn2_m"], P["bn2_v"]))
    y = jnp.maximum(conv(y, P["w3"], P["b3"]), 0.0)
    y = pool(bn(y, P["bn3_g"], P["bn3_b"], P["bn3_m"], P["bn3_v"]))
    flat = y.reshape(y.shape[0], -1)
    return jnp.dot(flat, P["wfc"].T, precision=lax.Precision.HIGHEST) + P["bfc"]


# ---------------------------------------------------------------------------
# Deterministic synthetic parameters (shapes from CNNModel.__init__)
# ---------------------------------------------------------------------------
def init_params(key):
    ks = jax.random.split(key, 16)
    return {
        "w1": jax.random.normal(ks[0], (16, 1, K_SIZE, K_SIZE), jnp.float32) * 0.2,
        "b1": jax.random.normal(ks[1], (16,), jnp.float32) * 0.1,
        "w2": jax.random.normal(ks[2], (32, 16, K_SIZE, K_SIZE), jnp.float32) * 0.05,
        "b2": jax.random.normal(ks[3], (32,), jnp.float32) * 0.1,
        "w3": jax.random.normal(ks[4], (64, 32, K_SIZE, K_SIZE), jnp.float32) * 0.05,
        "b3": jax.random.normal(ks[5], (64,), jnp.float32) * 0.1,
        "bn2_g": 1.0 + 0.1 * jax.random.normal(ks[6], (32,), jnp.float32),
        "bn2_b": 0.1 * jax.random.normal(ks[7], (32,), jnp.float32),
        "bn2_m": 0.1 * jax.random.normal(ks[8], (32,), jnp.float32),
        "bn2_v": jax.random.uniform(ks[9], (32,), jnp.float32, 0.5, 1.5),
        "bn3_g": 1.0 + 0.1 * jax.random.normal(ks[10], (64,), jnp.float32),
        "bn3_b": 0.1 * jax.random.normal(ks[11], (64,), jnp.float32),
        "bn3_m": 0.1 * jax.random.normal(ks[12], (64,), jnp.float32),
        "bn3_v": jax.random.uniform(ks[13], (64,), jnp.float32, 0.5, 1.5),
        "wfc": jax.random.normal(ks[14], (10, 64 * 4 * 4), jnp.float32) * 0.03,
        "bfc": jax.random.normal(ks[15], (10,), jnp.float32) * 0.1,
    }


if __name__ == "__main__":
    key = jax.random.PRNGKey(0)
    kx, kp = jax.random.split(key)
    # 24x24 input, k=3, stride=1 => 22 -> 20 -> pool 10 -> 8 -> pool 4 => 64*4*4 features.
    x = jax.random.normal(kx, (2, 1, 24, 24), jnp.float32)
    P = init_params(kp)

    out = jax.jit(cnn_forward_pallas)(x, P)
    out = jax.block_until_ready(out)
    assert out.shape == (2, 10)

    ref = cnn_forward_ref(x, P)
    max_err = float(jnp.max(jnp.abs(out - ref)))
    assert max_err < 5e-2, f"mismatch vs reference, max abs err = {max_err}"

    print("KERNEL_OK")
</pallas_src>

<mosaic_0001>
module attributes {stable_mosaic.version = 11 : i64} {
  func.func @_cnn_fused_kernel(%arg0: i32, %arg1: memref<1x600x1xf32, #tpu.memory_space<vmem>>, %arg2: memref<9x16xf32, #tpu.memory_space<vmem>>, %arg3: memref<1x16xf32, #tpu.memory_space<vmem>>, %arg4: memref<9x16x32xbf16, #tpu.memory_space<vmem>>, %arg5: memref<1x32xf32, #tpu.memory_space<vmem>>, %arg6: memref<1x32xf32, #tpu.memory_space<vmem>>, %arg7: memref<1x32xf32, #tpu.memory_space<vmem>>, %arg8: memref<9x32x64xbf16, #tpu.memory_space<vmem>>, %arg9: memref<1x64xf32, #tpu.memory_space<vmem>>, %arg10: memref<1x64xf32, #tpu.memory_space<vmem>>, %arg11: memref<1x64xf32, #tpu.memory_space<vmem>>, %arg12: memref<112x455xf32, #tpu.memory_space<vmem>>, %arg13: memref<16x69xf32, #tpu.memory_space<vmem>>, %arg14: memref<1x16x64xf32, #tpu.memory_space<vmem>>) attributes {dimension_semantics = [#tpu.dimension_semantics<parallel>], iteration_bounds = array<i64: 2>, scalar_prefetch = 0 : i64, scratch_operands = 0 : i64, tpu.core_type = #tpu.core_type<tc>, window_params = [{transform_indices = @transform_0, window_bounds = array<i64: 1, 600, 1>}, {pipeline_mode = #tpu.pipeline_mode<synchronous>, transform_indices = @transform_1, window_bounds = array<i64: 9, 16>}, {pipeline_mode = #tpu.pipeline_mode<synchronous>, transform_indices = @transform_2, window_bounds = array<i64: 1, 16>}, {pipeline_mode = #tpu.pipeline_mode<synchronous>, transform_indices = @transform_3, window_bounds = array<i64: 9, 16, 32>}, {pipeline_mode = #tpu.pipeline_mode<synchronous>, transform_indices = @transform_4, window_bounds = array<i64: 1, 32>}, {pipeline_mode = #tpu.pipeline_mode<synchronous>, transform_indices = @transform_5, window_bounds = array<i64: 1, 32>}, {pipeline_mode = #tpu.pipeline_mode<synchronous>, transform_indices = @transform_6, window_bounds = array<i64: 1, 32>}, {pipeline_mode = #tpu.pipeline_mode<synchronous>, transform_indices = @transform_7, window_bounds = array<i64: 9, 32, 64>}, {pipeline_mode = #tpu.pipeline_mode<synchronous>, transform_indices = @transform_8, window_bounds = array<i64: 1, 64>}, {pipeline_mode = #tpu.pipeline_mode<synchronous>, transform_indices = @transform_9, window_bounds = array<i64: 1, 64>}, {pipeline_mode = #tpu.pipeline_mode<synchronous>, transform_indices = @transform_10, window_bounds = array<i64: 1, 64>}, {pipeline_mode = #tpu.pipeline_mode<synchronous>, transform_indices = @transform_11, window_bounds = array<i64: 112, 455>}, {pipeline_mode = #tpu.pipeline_mode<synchronous>, transform_indices = @transform_12, window_bounds = array<i64: 16, 69>}, {transform_indices = @transform_13, window_bounds = array<i64: 1, 16, 64>}]} {
    %c0 = arith.constant 0 : index
    %c0_0 = arith.constant 0 : index
    %c0_1 = arith.constant 0 : index
    %0 = vector.load %arg1[%c0, %c0_0, %c0_1] : memref<1x600x1xf32, #tpu.memory_space<vmem>>, vector<1x600x1xf32>
    %1 = vector.shape_cast %0 : vector<1x600x1xf32> to vector<600x1xf32>
    %c0_2 = arith.constant 0 : index
    %c0_3 = arith.constant 0 : index
    %2 = vector.load %arg2[%c0_2, %c0_3] : memref<9x16xf32, #tpu.memory_space<vmem>>, vector<9x16xf32>
    %cst = arith.constant 0.000000e+00 : f32
    %3 = vector.broadcast %cst : f32 to vector<536x16xf32>
    %4 = vector.extract_strided_slice %1 {offsets = [0, 0], sizes = [536, 1], strides = [1, 1]} : vector<600x1xf32> to vector<536x1xf32>
    %5 = vector.extract_strided_slice %2 {offsets = [0, 0], sizes = [1, 16], strides = [1, 1]} : vector<9x16xf32> to vector<1x16xf32>
    %6 = vector.broadcast %4 : vector<536x1xf32> to vector<536x16xf32>
    %7 = vector.broadcast %5 : vector<1x16xf32> to vector<536x16xf32>
    %8 = arith.mulf %6, %7 : vector<536x16xf32>
    %9 = arith.addf %3, %8 : vector<536x16xf32>
    %10 = vector.extract_strided_slice %1 {offsets = [1, 0], sizes = [536, 1], strides = [1, 1]} : vector<600x1xf32> to vector<536x1xf32>
    %11 = vector.extract_strided_slice %2 {offsets = [1, 0], sizes = [1, 16], strides = [1, 1]} : vector<9x16xf32> to vector<1x16xf32>
    %12 = vector.broadcast %10 : vector<536x1xf32> to vector<536x16xf32>
    %13 = vector.broadcast %11 : vector<1x16xf32> to vector<536x16xf32>
    %14 = arith.mulf %12, %13 : vector<536x16xf32>
    %15 = arith.addf %9, %14 : vector<536x16xf32>
    %16 = vector.extract_strided_slice %1 {offsets = [2, 0], sizes = [536, 1], strides = [1, 1]} : vector<600x1xf32> to vector<536x1xf32>
    %17 = vector.extract_strided_slice %2 {offsets = [2, 0], sizes = [1, 16], strides = [1, 1]} : vector<9x16xf32> to vector<1x16xf32>
    %18 = vector.broadcast %16 : vector<536x1xf32> to vector<536x16xf32>
    %19 = vector.broadcast %17 : vector<1x16xf32> to vector<536x16xf32>
    %20 = arith.mulf %18, %19 : vector<536x16xf32>
    %21 = arith.addf %15, %20 : vector<536x16xf32>
    %22 = vector.extract_strided_slice %1 {offsets = [24, 0], sizes = [536, 1], strides = [1, 1]} : vector<600x1xf32> to vector<536x1xf32>
    %23 = vector.extract_strided_slice %2 {offsets = [3, 0], sizes = [1, 16], strides = [1, 1]} : vector<9x16xf32> to vector<1x16xf32>
    %24 = vector.broadcast %22 : vector<536x1xf32> to vector<536x16xf32>
    %25 = vector.broadcast %23 : vector<1x16xf32> to vector<536x16xf32>
    %26 = arith.mulf %24, %25 : vector<536x16xf32>
    %27 = arith.addf %21, %26 : vector<536x16xf32>
    %28 = vector.extract_strided_slice %1 {offsets = [25, 0], sizes = [536, 1], strides = [1, 1]} : vector<600x1xf32> to vector<536x1xf32>
    %29 = vector.extract_strided_slice %2 {offsets = [4, 0], sizes = [1, 16], strides = [1, 1]} : vector<9x16xf32> to vector<1x16xf32>
    %30 = vector.broadcast %28 : vector<536x1xf32> to vector<536x16xf32>
    %31 = vector.broadcast %29 : vector<1x16xf32> to vector<536x16xf32>
    %32 = arith.mulf %30, %31 : vector<536x16xf32>
    %33 = arith.addf %27, %32 : vector<536x16xf32>
    %34 = vector.extract_strided_slice %1 {offsets = [26, 0], sizes = [536, 1], strides = [1, 1]} : vector<600x1xf32> to vector<536x1xf32>
    %35 = vector.extract_strided_slice %2 {offsets = [5, 0], sizes = [1, 16], strides = [1, 1]} : vector<9x16xf32> to vector<1x16xf32>
    %36 = vector.broadcast %34 : vector<536x1xf32> to vector<536x16xf32>
    %37 = vector.broadcast %35 : vector<1x16xf32> to vector<536x16xf32>
    %38 = arith.mulf %36, %37 : vector<536x16xf32>
    %39 = arith.addf %33, %38 : vector<536x16xf32>
    %40 = vector.extract_strided_slice %1 {offsets = [48, 0], sizes = [536, 1], strides = [1, 1]} : vector<600x1xf32> to vector<536x1xf32>
    %41 = vector.extract_strided_slice %2 {offsets = [6, 0], sizes = [1, 16], strides = [1, 1]} : vector<9x16xf32> to vector<1x16xf32>
    %42 = vector.broadcast %40 : vector<536x1xf32> to vector<536x16xf32>
    %43 = vector.broadcast %41 : vector<1x16xf32> to vector<536x16xf32>
    %44 = arith.mulf %42, %43 : vector<536x16xf32>
    %45 = arith.addf %39, %44 : vector<536x16xf32>
    %46 = vector.extract_strided_slice %1 {offsets = [49, 0], sizes = [536, 1], strides = [1, 1]} : vector<600x1xf32> to vector<536x1xf32>
    %47 = vector.extract_strided_slice %2 {offsets = [7, 0], sizes = [1, 16], strides = [1, 1]} : vector<9x16xf32> to vector<1x16xf32>
    %48 = vector.broadcast %46 : vector<536x1xf32> to vector<536x16xf32>
    %49 = vector.broadcast %47 : vector<1x16xf32> to vector<536x16xf32>
    %50 = arith.mulf %48, %49 : vector<536x16xf32>
    %51 = arith.addf %45, %50 : vector<536x16xf32>
    %52 = vector.extract_strided_slice %1 {offsets = [50, 0], sizes = [536, 1], strides = [1, 1]} : vector<600x1xf32> to vector<536x1xf32>
    %53 = vector.extract_strided_slice %2 {offsets = [8, 0], sizes = [1, 16], strides = [1, 1]} : vector<9x16xf32> to vector<1x16xf32>
    %54 = vector.broadcast %52 : vector<536x1xf32> to vector<536x16xf32>
    %55 = vector.broadcast %53 : vector<1x16xf32> to vector<536x16xf32>
    %56 = arith.mulf %54, %55 : vector<536x16xf32>
    %57 = arith.addf %51, %56 : vector<536x16xf32>
    %c0_4 = arith.constant 0 : index
    %c0_5 = arith.constant 0 : index
    %58 = vector.load %arg3[%c0_4, %c0_5] : memref<1x16xf32, #tpu.memory_space<vmem>>, vector<1x16xf32>
    %59 = vector.broadcast %58 : vector<1x16xf32> to vector<536x16xf32>
    %60 = arith.addf %57, %59 : vector<536x16xf32>
    %cst_6 = arith.constant 0.000000e+00 : f32
    %61 = vector.broadcast %cst_6 : f32 to vector<536x16xf32>
    %62 = arith.maximumf %60, %61 : vector<536x16xf32>
    %63 = arith.truncf %62 : vector<536x16xf32> to vector<536x16xbf16>
    %cst_7 = arith.constant 0.000000e+00 : f32
    %64 = vector.broadcast %cst_7 : f32 to vector<480x32xf32>
    %65 = vector.extract_strided_slice %63 {offsets = [0, 0], sizes = [480, 16], strides = [1, 1]} : vector<536x16xbf16> to vector<480x16xbf16>
    %c0_8 = arith.constant 0 : index
    %c0_9 = arith.constant 0 : index
    %c0_10 = arith.constant 0 : index
    %66 = vector.load %arg4[%c0_8, %c0_9, %c0_10] : memref<9x16x32xbf16, #tpu.memory_space<vmem>>, vector<1x16x32xbf16>
    %67 = vector.shape_cast %66 : vector<1x16x32xbf16> to vector<16x32xbf16>
    %cst_11 = arith.constant dense<0.000000e+00> : vector<480x32xf32>
    %68 = tpu.matmul %65, %67, %cst_11 {dimension_numbers = #tpu.dot_dimension_numbers<[1], [0], [0], [1], [0, 0, 1, 1], [], []>} : vector<480x16xbf16>, vector<16x32xbf16>, vector<480x32xf32> -> vector<480x32xf32>
    %69 = arith.addf %64, %68 : vector<480x32xf32>
    %70 = vector.extract_strided_slice %63 {offsets = [1, 0], sizes = [480, 16], strides = [1, 1]} : vector<536x16xbf16> to vector<480x16xbf16>
    %c1 = arith.constant 1 : index
    %c0_12 = arith.constant 0 : index
    %c0_13 = arith.constant 0 : index
    %71 = vector.load %arg4[%c1, %c0_12, %c0_13] : memref<9x16x32xbf16, #tpu.memory_space<vmem>>, vector<1x16x32xbf16>
    %72 = vector.shape_cast %71 : vector<1x16x32xbf16> to vector<16x32xbf16>
    %cst_14 = arith.constant dense<0.000000e+00> : vector<480x32xf32>
    %73 = tpu.matmul %70, %72, %cst_14 {dimension_numbers = #tpu.dot_dimension_numbers<[1], [0], [0], [1], [0, 0, 1, 1], [], []>} : vector<480x16xbf16>, vector<16x32xbf16>, vector<480x32xf32> -> vector<480x32xf32>
    %74 = arith.addf %69, %73 : vector<480x32xf32>
    %75 = vector.extract_strided_slice %63 {offsets = [2, 0], sizes = [480, 16], strides = [1, 1]} : vector<536x16xbf16> to vector<480x16xbf16>
    %c2 = arith.constant 2 : index
    %c0_15 = arith.constant 0 : index
    %c0_16 = arith.constant 0 : index
    %76 = vector.load %arg4[%c2, %c0_15, %c0_16] : memref<9x16x32xbf16, #tpu.memory_space<vmem>>, vector<1x16x32xbf16>
    %77 = vector.shape_cast %76 : vector<1x16x32xbf16> to vector<16x32xbf16>
    %cst_17 = arith.constant dense<0.000000e+00> : vector<480x32xf32>
    %78 = tpu.matmul %75, %77, %cst_17 {dimension_numbers = #tpu.dot_dimension_numbers<[1], [0], [0], [1], [0, 0, 1, 1], [], []>} : vector<480x16xbf16>, vector<16x32xbf16>, vector<480x32xf32> -> vector<480x32xf32>
    %79 = arith.addf %74, %78 : vector<480x32xf32>
    %80 = vector.extract_strided_slice %63 {offsets = [24, 0], sizes = [480, 16], strides = [1, 1]} : vector<536x16xbf16> to vector<480x16xbf16>
    %c3 = arith.constant 3 : index
    %c0_18 = arith.constant 0 : index
    %c0_19 = arith.constant 0 : index
    %81 = vector.load %arg4[%c3, %c0_18, %c0_19] : memref<9x16x32xbf16, #tpu.memory_space<vmem>>, vector<1x16x32xbf16>
    %82 = vector.shape_cast %81 : vector<1x16x32xbf16> to vector<16x32xbf16>
    %cst_20 = arith.constant dense<0.000000e+00> : vector<480x32xf32>
    %83 = tpu.matmul %80, %82, %cst_20 {dimension_numbers = #tpu.dot_dimension_numbers<[1], [0], [0], [1], [0, 0, 1, 1], [], []>} : vector<480x16xbf16>, vector<16x32xbf16>, vector<480x32xf32> -> vector<480x32xf32>
    %84 = arith.addf %79, %83 : vector<480x32xf32>
    %85 = vector.extract_strided_slice %63 {offsets = [25, 0], sizes = [480, 16], strides = [1, 1]} : vector<536x16xbf16> to vector<480x16xbf16>
    %c4 = arith.constant 4 : index
    %c0_21 = arith.constant 0 : index
    %c0_22 = arith.constant 0 : index
    %86 = vector.load %arg4[%c4, %c0_21, %c0_22] : memref<9x16x32xbf16, #tpu.memory_space<vmem>>, vector<1x16x32xbf16>
    %87 = vector.shape_cast %86 : vector<1x16x32xbf16> to vector<16x32xbf16>
    %cst_23 = arith.constant dense<0.000000e+00> : vector<480x32xf32>
    %88 = tpu.matmul %85, %87, %cst_23 {dimension_numbers = #tpu.dot_dimension_numbers<[1], [0], [0], [1], [0, 0, 1, 1], [], []>} : vector<480x16xbf16>, vector<16x32xbf16>, vector<480x32xf32> -> vector<480x32xf32>
    %89 = arith.addf %84, %88 : vector<480x32xf32>
    %90 = vector.extract_strided_slice %63 {offsets = [26, 0], sizes = [480, 16], strides = [1, 1]} : vector<536x16xbf16> to vector<480x16xbf16>
    %c5 = arith.constant 5 : index
    %c0_24 = arith.constant 0 : index
    %c0_25 = arith.constant 0 : index
    %91 = vector.load %arg4[%c5, %c0_24, %c0_25] : memref<9x16x32xbf16, #tpu.memory_space<vmem>>, vector<1x16x32xbf16>
    %92 = vector.shape_cast %91 : vector<1x16x32xbf16> to vector<16x32xbf16>
    %cst_26 = arith.constant dense<0.000000e+00> : vector<480x32xf32>
    %93 = tpu.matmul %90, %92, %cst_26 {dimension_numbers = #tpu.dot_dimension_numbers<[1], [0], [0], [1], [0, 0, 1, 1], [], []>} : vector<480x16xbf16>, vector<16x32xbf16>, vector<480x32xf32> -> vector<480x32xf32>
    %94 = arith.addf %89, %93 : vector<480x32xf32>
    %95 = vector.extract_strided_slice %63 {offsets = [48, 0], sizes = [480, 16], strides = [1, 1]} : vector<536x16xbf16> to vector<480x16xbf16>
    %c6 = arith.constant 6 : index
    %c0_27 = arith.constant 0 : index
    %c0_28 = arith.constant 0 : index
    %96 = vector.load %arg4[%c6, %c0_27, %c0_28] : memref<9x16x32xbf16, #tpu.memory_space<vmem>>, vector<1x16x32xbf16>
    %97 = vector.shape_cast %96 : vector<1x16x32xbf16> to vector<16x32xbf16>
    %cst_29 = arith.constant dense<0.000000e+00> : vector<480x32xf32>
    %98 = tpu.matmul %95, %97, %cst_29 {dimension_numbers = #tpu.dot_dimension_numbers<[1], [0], [0], [1], [0, 0, 1, 1], [], []>} : vector<480x16xbf16>, vector<16x32xbf16>, vector<480x32xf32> -> vector<480x32xf32>
    %99 = arith.addf %94, %98 : vector<480x32xf32>
    %100 = vector.extract_strided_slice %63 {offsets = [49, 0], sizes = [480, 16], strides = [1, 1]} : vector<536x16xbf16> to vector<480x16xbf16>
    %c7 = arith.constant 7 : index
    %c0_30 = arith.constant 0 : index
    %c0_31 = arith.constant 0 : index
    %101 = vector.load %arg4[%c7, %c0_30, %c0_31] : memref<9x16x32xbf16, #tpu.memory_space<vmem>>, vector<1x16x32xbf16>
    %102 = vector.shape_cast %101 : vector<1x16x32xbf16> to vector<16x32xbf16>
    %cst_32 = arith.constant dense<0.000000e+00> : vector<480x32xf32>
    %103 = tpu.matmul %100, %102, %cst_32 {dimension_numbers = #tpu.dot_dimension_numbers<[1], [0], [0], [1], [0, 0, 1, 1], [], []>} : vector<480x16xbf16>, vector<16x32xbf16>, vector<480x32xf32> -> vector<480x32xf32>
    %104 = arith.addf %99, %103 : vector<480x32xf32>
    %105 = vector.extract_strided_slice %63 {offsets = [50, 0], sizes = [480, 16], strides = [1, 1]} : vector<536x16xbf16> to vector<480x16xbf16>
    %c8 = arith.constant 8 : index
    %c0_33 = arith.constant 0 : index
    %c0_34 = arith.constant 0 : index
    %106 = vector.load %arg4[%c8, %c0_33, %c0_34] : memref<9x16x32xbf16, #tpu.memory_space<vmem>>, vector<1x16x32xbf16>
    %107 = vector.shape_cast %106 : vector<1x16x32xbf16> to vector<16x32xbf16>
    %cst_35 = arith.constant dense<0.000000e+00> : vector<480x32xf32>
    %108 = tpu.matmul %105, %107, %cst_35 {dimension_numbers = #tpu.dot_dimension_numbers<[1], [0], [0], [1], [0, 0, 1, 1], [], []>} : vector<480x16xbf16>, vector<16x32xbf16>, vector<480x32xf32> -> vector<480x32xf32>
    %109 = arith.addf %104, %108 : vector<480x32xf32>
    %c0_36 = arith.constant 0 : index
    %c0_37 = arith.constant 0 : index
    %110 = vector.load %arg5[%c0_36, %c0_37] : memref<1x32xf32, #tpu.memory_space<vmem>>, vector<1x32xf32>
    %111 = vector.broadcast %110 : vector<1x32xf32> to vector<480x32xf32>
    %112 = arith.addf %109, %111 : vector<480x32xf32>
    %cst_38 = arith.constant 0.000000e+00 : f32
    %113 = vector.broadcast %cst_38 : f32 to vector<480x32xf32>
    %114 = arith.maximumf %112, %113 : vector<480x32xf32>
    %c0_39 = arith.constant 0 : index
    %c0_40 = arith.constant 0 : index
    %115 = vector.load %arg6[%c0_39, %c0_40] : memref<1x32xf32, #tpu.memory_space<vmem>>, vector<1x32xf32>
    %116 = vector.broadcast %115 : vector<1x32xf32> to vector<480x32xf32>
    %117 = arith.mulf %114, %116 : vector<480x32xf32>
    %c0_41 = arith.constant 0 : index
    %c0_42 = arith.constant 0 : index
    %118 = vector.load %arg7[%c0_41, %c0_42] : memref<1x32xf32, #tpu.memory_space<vmem>>, vector<1x32xf32>
    %119 = vector.broadcast %118 : vector<1x32xf32> to vector<480x32xf32>
    %120 = arith.addf %117, %119 : vector<480x32xf32>
    %121 = vector.extract_strided_slice %120 {offsets = [0, 0], sizes = [479, 32], strides = [1, 1]} : vector<480x32xf32> to vector<479x32xf32>
    %122 = vector.extract_strided_slice %120 {offsets = [1, 0], sizes = [479, 32], strides = [1, 1]} : vector<480x32xf32> to vector<479x32xf32>
    %123 = arith.maximumf %121, %122 : vector<479x32xf32>
    %124 = vector.extract_strided_slice %123 {offsets = [0, 0], sizes = [455, 32], strides = [1, 1]} : vector<479x32xf32> to vector<455x32xf32>
    %125 = vector.extract_strided_slice %123 {offsets = [24, 0], sizes = [455, 32], strides = [1, 1]} : vector<479x32xf32> to vector<455x32xf32>
    %126 = arith.maximumf %124, %125 : vector<455x32xf32>
    %c0_43 = arith.constant 0 : index
    %c0_44 = arith.constant 0 : index
    %127 = vector.load %arg12[%c0_43, %c0_44] : memref<112x455xf32, #tpu.memory_space<vmem>>, vector<112x455xf32>
    %cst_45 = arith.constant dense<0.000000e+00> : vector<112x32xf32>
    %128 = tpu.matmul %127, %126, %cst_45 {dimension_numbers = #tpu.dot_dimension_numbers<[1], [0], [0], [1], [0, 0, 1, 1], [], []>} : vector<112x455xf32>, vector<455x32xf32>, vector<112x32xf32> -> vector<112x32xf32>
    %129 = arith.truncf %128 : vector<112x32xf32> to vector<112x32xbf16>
    %cst_46 = arith.constant 0.000000e+00 : f32
    %130 = vector.broadcast %cst_46 : f32 to vector<80x64xf32>
    %131 = vector.extract_strided_slice %129 {offsets = [0, 0], sizes = [80, 32], strides = [1, 1]} : vector<112x32xbf16> to vector<80x32xbf16>
    %c0_47 = arith.constant 0 : index
    %c0_48 = arith.constant 0 : index
    %c0_49 = arith.constant 0 : index
    %132 = vector.load %arg8[%c0_47, %c0_48, %c0_49] : memref<9x32x64xbf16, #tpu.memory_space<vmem>>, vector<1x32x64xbf16>
    %133 = vector.shape_cast %132 : vector<1x32x64xbf16> to vector<32x64xbf16>
    %cst_50 = arith.constant dense<0.000000e+00> : vector<80x64xf32>
    %134 = tpu.matmul %131, %133, %cst_50 {dimension_numbers = #tpu.dot_dimension_numbers<[1], [0], [0], [1], [0, 0, 1, 1], [], []>} : vector<80x32xbf16>, vector<32x64xbf16>, vector<80x64xf32> -> vector<80x64xf32>
    %135 = arith.addf %130, %134 : vector<80x64xf32>
    %136 = vector.extract_strided_slice %129 {offsets = [1, 0], sizes = [80, 32], strides = [1, 1]} : vector<112x32xbf16> to vector<80x32xbf16>
    %c1_51 = arith.constant 1 : index
    %c0_52 = arith.constant 0 : index
    %c0_53 = arith.constant 0 : index
    %137 = vector.load %arg8[%c1_51, %c0_52, %c0_53] : memref<9x32x64xbf16, #tpu.memory_space<vmem>>, vector<1x32x64xbf16>
    %138 = vector.shape_cast %137 : vector<1x32x64xbf16> to vector<32x64xbf16>
    %cst_54 = arith.constant dense<0.000000e+00> : vector<80x64xf32>
    %139 = tpu.matmul %136, %138, %cst_54 {dimension_numbers = #tpu.dot_dimension_numbers<[1], [0], [0], [1], [0, 0, 1, 1], [], []>} : vector<80x32xbf16>, vector<32x64xbf16>, vector<80x64xf32> -> vector<80x64xf32>
    %140 = arith.addf %135, %139 : vector<80x64xf32>
    %141 = vector.extract_strided_slice %129 {offsets = [2, 0], sizes = [80, 32], strides = [1, 1]} : vector<112x32xbf16> to vector<80x32xbf16>
    %c2_55 = arith.constant 2 : index
    %c0_56 = arith.constant 0 : index
    %c0_57 = arith.constant 0 : index
    %142 = vector.load %arg8[%c2_55, %c0_56, %c0_57] : memref<9x32x64xbf16, #tpu.memory_space<vmem>>, vector<1x32x64xbf16>
    %143 = vector.shape_cast %142 : vector<1x32x64xbf16> to vector<32x64xbf16>
    %cst_58 = arith.constant dense<0.000000e+00> : vector<80x64xf32>
    %144 = tpu.matmul %141, %143, %cst_58 {dimension_numbers = #tpu.dot_dimension_numbers<[1], [0], [0], [1], [0, 0, 1, 1], [], []>} : vector<80x32xbf16>, vector<32x64xbf16>, vector<80x64xf32> -> vector<80x64xf32>
    %145 = arith.addf %140, %144 : vector<80x64xf32>
    %146 = vector.extract_strided_slice %129 {offsets = [10, 0], sizes = [80, 32], strides = [1, 1]} : vector<112x32xbf16> to vector<80x32xbf16>
    %c3_59 = arith.constant 3 : index
    %c0_60 = arith.constant 0 : index
    %c0_61 = arith.constant 0 : index
    %147 = vector.load %arg8[%c3_59, %c0_60, %c0_61] : memref<9x32x64xbf16, #tpu.memory_space<vmem>>, vector<1x32x64xbf16>
    %148 = vector.shape_cast %147 : vector<1x32x64xbf16> to vector<32x64xbf16>
    %cst_62 = arith.constant dense<0.000000e+00> : vector<80x64xf32>
    %149 = tpu.matmul %146, %148, %cst_62 {dimension_numbers = #tpu.dot_dimension_numbers<[1], [0], [0], [1], [0, 0, 1, 1], [], []>} : vector<80x32xbf16>, vector<32x64xbf16>, vector<80x64xf32> -> vector<80x64xf32>
    %150 = arith.addf %145, %149 : vector<80x64xf32>
    %151 = vector.extract_strided_slice %129 {offsets = [11, 0], sizes = [80, 32], strides = [1, 1]} : vector<112x32xbf16> to vector<80x32xbf16>
    %c4_63 = arith.constant 4 : index
    %c0_64 = arith.constant 0 : index
    %c0_65 = arith.constant 0 : index
    %152 = vector.load %arg8[%c4_63, %c0_64, %c0_65] : memref<9x32x64xbf16, #tpu.memory_space<vmem>>, vector<1x32x64xbf16>
    %153 = vector.shape_cast %152 : vector<1x32x64xbf16> to vector<32x64xbf16>
    %cst_66 = arith.constant dense<0.000000e+00> : vector<80x64xf32>
    %154 = tpu.matmul %151, %153, %cst_66 {dimension_numbers = #tpu.dot_dimension_numbers<[1], [0], [0], [1], [0, 0, 1, 1], [], []>} : vector<80x32xbf16>, vector<32x64xbf16>, vector<80x64xf32> -> vector<80x64xf32>
    %155 = arith.addf %150, %154 : vector<80x64xf32>
    %156 = vector.extract_strided_slice %129 {offsets = [12, 0], sizes = [80, 32], strides = [1, 1]} : vector<112x32xbf16> to vector<80x32xbf16>
    %c5_67 = arith.constant 5 : index
    %c0_68 = arith.constant 0 : index
    %c0_69 = arith.constant 0 : index
    %157 = vector.load %arg8[%c5_67, %c0_68, %c0_69] : memref<9x32x64xbf16, #tpu.memory_space<vmem>>, vector<1x32x64xbf16>
    %158 = vector.shape_cast %157 : vector<1x32x64xbf16> to vector<32x64xbf16>
    %cst_70 = arith.constant dense<0.000000e+00> : vector<80x64xf32>
    %159 = tpu.matmul %156, %158, %cst_70 {dimension_numbers = #tpu.dot_dimension_numbers<[1], [0], [0], [1], [0, 0, 1, 1], [], []>} : vector<80x32xbf16>, vector<32x64xbf16>, vector<80x64xf32> -> vector<80x64xf32>
    %160 = arith.addf %155, %159 : vector<80x64xf32>
    %161 = vector.extract_strided_slice %129 {offsets = [20, 0], sizes = [80, 32], strides = [1, 1]} : vector<112x32xbf16> to vector<80x32xbf16>
    %c6_71 = arith.constant 6 : index
    %c0_72 = arith.constant 0 : index
    %c0_73 = arith.constant 0 : index
    %162 = vector.load %arg8[%c6_71, %c0_72, %c0_73] : memref<9x32x64xbf16, #tpu.memory_space<vmem>>, vector<1x32x64xbf16>
    %163 = vector.shape_cast %162 : vector<1x32x64xbf16> to vector<32x64xbf16>
    %cst_74 = arith.constant dense<0.000000e+00> : vector<80x64xf32>
    %164 = tpu.matmul %161, %163, %cst_74 {dimension_numbers = #tpu.dot_dimension_numbers<[1], [0], [0], [1], [0, 0, 1, 1], [], []>} : vector<80x32xbf16>, vector<32x64xbf16>, vector<80x64xf32> -> vector<80x64xf32>
    %165 = arith.addf %160, %164 : vector<80x64xf32>
    %166 = vector.extract_strided_slice %129 {offsets = [21, 0], sizes = [80, 32], strides = [1, 1]} : vector<112x32xbf16> to vector<80x32xbf16>
    %c7_75 = arith.constant 7 : index
    %c0_76 = arith.constant 0 : index
    %c0_77 = arith.constant 0 : index
    %167 = vector.load %arg8[%c7_75, %c0_76, %c0_77] : memref<9x32x64xbf16, #tpu.memory_space<vmem>>, vector<1x32x64xbf16>
    %168 = vector.shape_cast %167 : vector<1x32x64xbf16> to vector<32x64xbf16>
    %cst_78 = arith.constant dense<0.000000e+00> : vector<80x64xf32>
    %169 = tpu.matmul %166, %168, %cst_78 {dimension_numbers = #tpu.dot_dimension_numbers<[1], [0], [0], [1], [0, 0, 1, 1], [], []>} : vector<80x32xbf16>, vector<32x64xbf16>, vector<80x64xf32> -> vector<80x64xf32>
    %170 = arith.addf %165, %169 : vector<80x64xf32>
    %171 = vector.extract_strided_slice %129 {offsets = [22, 0], sizes = [80, 32], strides = [1, 1]} : vector<112x32xbf16> to vector<80x32xbf16>
    %c8_79 = arith.constant 8 : index
    %c0_80 = arith.constant 0 : index
    %c0_81 = arith.constant 0 : index
    %172 = vector.load %arg8[%c8_79, %c0_80, %c0_81] : memref<9x32x64xbf16, #tpu.memory_space<vmem>>, vector<1x32x64xbf16>
    %173 = vector.shape_cast %172 : vector<1x32x64xbf16> to vector<32x64xbf16>
    %cst_82 = arith.constant dense<0.000000e+00> : vector<80x64xf32>
    %174 = tpu.matmul %171, %173, %cst_82 {dimension_numbers = #tpu.dot_dimension_numbers<[1], [0], [0], [1], [0, 0, 1, 1], [], []>} : vector<80x32xbf16>, vector<32x64xbf16>, vector<80x64xf32> -> vector<80x64xf32>
    %175 = arith.addf %170, %174 : vector<80x64xf32>
    %c0_83 = arith.constant 0 : index
    %c0_84 = arith.constant 0 : index
    %176 = vector.load %arg9[%c0_83, %c0_84] : memref<1x64xf32, #tpu.memory_space<vmem>>, vector<1x64xf32>
    %177 = vector.broadcast %176 : vector<1x64xf32> to vector<80x64xf32>
    %178 = arith.addf %175, %177 : vector<80x64xf32>
    %cst_85 = arith.constant 0.000000e+00 : f32
    %179 = vector.broadcast %cst_85 : f32 to vector<80x64xf32>
    %180 = arith.maximumf %178, %179 : vector<80x64xf32>
    %c0_86 = arith.constant 0 : index
    %c0_87 = arith.constant 0 : index
    %181 = vector.load %arg10[%c0_86, %c0_87] : memref<1x64xf32, #tpu.memory_space<vmem>>, vector<1x64xf32>
    %182 = vector.broadcast %181 : vector<1x64xf32> to vector<80x64xf32>
    %183 = arith.mulf %180, %182 : vector<80x64xf32>
    %c0_88 = arith.constant 0 : index
    %c0_89 = arith.constant 0 : index
    %184 = vector.load %arg11[%c0_88, %c0_89] : memref<1x64xf32, #tpu.memory_space<vmem>>, vector<1x64xf32>
    %185 = vector.broadcast %184 : vector<1x64xf32> to vector<80x64xf32>
    %186 = arith.addf %183, %185 : vector<80x64xf32>
    %187 = vector.extract_strided_slice %186 {offsets = [0, 0], sizes = [79, 64], strides = [1, 1]} : vector<80x64xf32> to vector<79x64xf32>
    %188 = vector.extract_strided_slice %186 {offsets = [1, 0], sizes = [79, 64], strides = [1, 1]} : vector<80x64xf32> to vector<79x64xf32>
    %189 = arith.maximumf %187, %188 : vector<79x64xf32>
    %190 = vector.extract_strided_slice %189 {offsets = [0, 0], sizes = [69, 64], strides = [1, 1]} : vector<79x64xf32> to vector<69x64xf32>
    %191 = vector.extract_strided_slice %189 {offsets = [10, 0], sizes = [69, 64], strides = [1, 1]} : vector<79x64xf32> to vector<69x64xf32>
    %192 = arith.maximumf %190, %191 : vector<69x64xf32>
    %c0_90 = arith.constant 0 : index
    %c0_91 = arith.constant 0 : index
    %193 = vector.load %arg13[%c0_90, %c0_91] : memref<16x69xf32, #tpu.memory_space<vmem>>, vector<16x69xf32>
    %cst_92 = arith.constant dense<0.000000e+00> : vector<16x64xf32>
    %194 = tpu.matmul %193, %192, %cst_92 {dimension_numbers = #tpu.dot_dimension_numbers<[1], [0], [0], [1], [0, 0, 1, 1], [], []>} : vector<16x69xf32>, vector<69x64xf32>, vector<16x64xf32> -> vector<16x64xf32>
    %c0_93 = arith.constant 0 : index
    %c0_94 = arith.constant 0 : index
    %c0_95 = arith.constant 0 : index
    %195 = vector.load %arg14[%c0_93, %c0_94, %c0_95] : memref<1x16x64xf32, #tpu.memory_space<vmem>>, vector<1x16x64xf32>
    %196 = vector.shape_cast %195 : vector<1x16x64xf32> to vector<16x64xf32>
    %197 = vector.shape_cast %194 : vector<16x64xf32> to vector<1x16x64xf32>
    tpu.vector_store %arg14[%c0_93, %c0_94, %c0_95], %197 {strides = array<i32>} : memref<1x16x64xf32, #tpu.memory_space<vmem>>, vector<1x16x64xf32>,
    return
  }
  func.func @transform_0(%arg0: i32) -> (i32, i32, i32) {
    %c0_i32 = arith.constant 0 : i32
    %c0_i32_0 = arith.constant 0 : i32
    %c0_i32_1 = arith.constant 0 : i32
    return %arg0, %c0_i32, %c0_i32_0 : i32, i32, i32
  }
  func.func @transform_1(%arg0: i32) -> (i32, i32) {
    %c0_i32 = arith.constant 0 : i32
    %c0_i32_0 = arith.constant 0 : i32
    %c0_i32_1 = arith.constant 0 : i32
    return %c0_i32, %c0_i32_0 : i32, i32
  }
  func.func @transform_2(%arg0: i32) -> (i32, i32) {
    %c0_i32 = arith.constant 0 : i32
    %c0_i32_0 = arith.constant 0 : i32
    %c0_i32_1 = arith.constant 0 : i32
    return %c0_i32, %c0_i32_0 : i32, i32
  }
  func.func @transform_3(%arg0: i32) -> (i32, i32, i32) {
    %c0_i32 = arith.constant 0 : i32
    %c0_i32_0 = arith.constant 0 : i32
    %c0_i32_1 = arith.constant 0 : i32
    %c0_i32_2 = arith.constant 0 : i32
    return %c0_i32, %c0_i32_0, %c0_i32_1 : i32, i32, i32
  }
  func.func @transform_4(%arg0: i32) -> (i32, i32) {
    %c0_i32 = arith.constant 0 : i32
    %c0_i32_0 = arith.constant 0 : i32
    %c0_i32_1 = arith.constant 0 : i32
    return %c0_i32, %c0_i32_0 : i32, i32
  }
  func.func @transform_5(%arg0: i32) -> (i32, i32) {
    %c0_i32 = arith.constant 0 : i32
    %c0_i32_0 = arith.constant 0 : i32
    %c0_i32_1 = arith.constant 0 : i32
    return %c0_i32, %c0_i32_0 : i32, i32
  }
  func.func @transform_6(%arg0: i32) -> (i32, i32) {
    %c0_i32 = arith.constant 0 : i32
    %c0_i32_0 = arith.constant 0 : i32
    %c0_i32_1 = arith.constant 0 : i32
    return %c0_i32, %c0_i32_0 : i32, i32
  }
  func.func @transform_7(%arg0: i32) -> (i32, i32, i32) {
    %c0_i32 = arith.constant 0 : i32
    %c0_i32_0 = arith.constant 0 : i32
    %c0_i32_1 = arith.constant 0 : i32
    %c0_i32_2 = arith.constant 0 : i32
    return %c0_i32, %c0_i32_0, %c0_i32_1 : i32, i32, i32
  }
  func.func @transform_8(%arg0: i32) -> (i32, i32) {
    %c0_i32 = arith.constant 0 : i32
    %c0_i32_0 = arith.constant 0 : i32
    %c0_i32_1 = arith.constant 0 : i32
    return %c0_i32, %c0_i32_0 : i32, i32
  }
  func.func @transform_9(%arg0: i32) -> (i32, i32) {
    %c0_i32 = arith.constant 0 : i32
    %c0_i32_0 = arith.constant 0 : i32
    %c0_i32_1 = arith.constant 0 : i32
    return %c0_i32, %c0_i32_0 : i32, i32
  }
  func.func @transform_10(%arg0: i32) -> (i32, i32) {
    %c0_i32 = arith.constant 0 : i32
    %c0_i32_0 = arith.constant 0 : i32
    %c0_i32_1 = arith.constant 0 : i32
    return %c0_i32, %c0_i32_0 : i32, i32
  }
  func.func @transform_11(%arg0: i32) -> (i32, i32) {
    %c0_i32 = arith.constant 0 : i32
    %c0_i32_0 = arith.constant 0 : i32
    %c0_i32_1 = arith.constant 0 : i32
    return %c0_i32, %c0_i32_0 : i32, i32
  }
  func.func @transform_12(%arg0: i32) -> (i32, i32) {
    %c0_i32 = arith.constant 0 : i32
    %c0_i32_0 = arith.constant 0 : i32
    %c0_i32_1 = arith.constant 0 : i32
    return %c0_i32, %c0_i32_0 : i32, i32
  }
  func.func @transform_13(%arg0: i32) -> (i32, i32, i32) {
    %c0_i32 = arith.constant 0 : i32
    %c0_i32_0 = arith.constant 0 : i32
    %c0_i32_1 = arith.constant 0 : i32
    return %arg0, %c0_i32, %c0_i32_0 : i32, i32, i32
  }
}

</mosaic_0001>

<bundles_post_ra>
// kernel: cnn_forward_pallas.1
= control target key start
LH: loop header
LB: loop body
LE: loop exit
PB: predicated region body
PF: predicated region fallthrough
CT: control target
= control target key end

     0   :  { %s9953_s25 = smov 0   ;;  %s18336_s0 = inlined_call_operand.vmem [shape: f32[2,600,1], index: 0, kind: input, shape index: {}]   ;;  %s18337_s1 = inlined_call_operand.vmem [shape: f32[9,16], index: 1, kind: input, shape index: {}]   ;;  %s18338_s2 = inlined_call_operand.vmem [shape: f32[1,16], index: 2, kind: input, shape index: {}]   ;;  %s18339_s3 = inlined_call_operand.vmem [shape: bf16[9,16,32], index: 3, kind: input, shape index: {}]   ;;  %s18340_s4 = inlined_call_operand.vmem [shape: f32[1,32], index: 4, kind: input, shape index: {}]   ;;  %s18341_s5 = inlined_call_operand.vmem [shape: f32[1,32], index: 5, kind: input, shape index: {}]   ;;  %s18342_s6 = inlined_call_operand.vmem [shape: f32[1,32], index: 6, kind: input, shape index: {}]   ;;  %s18343_s7 = inlined_call_operand.vmem [shape: bf16[9,32,64], index: 7, kind: input, shape index: {}]   ;;  %s18344_s8 = inlined_call_operand.vmem [shape: f32[1,64], index: 8, kind: input, shape index: {}]   ;;  %s18345_s9 = inlined_call_operand.vmem [shape: f32[1,64], index: 9, kind: input, shape index: {}]   ;;  %s18346_s10 = inlined_call_operand.vmem [shape: f32[1,64], index: 10, kind: input, shape index: {}]   ;;  %s18347_s11 = inlined_call_operand.vmem [shape: f32[112,455], index: 11, kind: input, shape index: {}]   ;;  %s18348_s12 = inlined_call_operand.vmem [shape: f32[16,69], index: 12, kind: input, shape index: {}]   ;;  %s18349_s13 = inlined_call_operand.vmem [shape: f32[2,16,64], index: 13, kind: output, shape index: {}]  }
   0x1 LB: > { %s9309_s26 = sadd.s32 4294967295, %s9880_s25   ;;  %p9313_p0 = scmp.ge.s32.totalorder %s9880_s25, 1  ;;  %s9880_s25 = sphi %s9953_s25, %s23_s25  }
   0x2   : > { %p387_p1 = scmp.lt.s32.totalorder %s9880_s25, 3 }
   0x4   : > { %p388_p2 = pnand %p9313_p0, %p387_p1 }
   0x6   : > { %391 = sbr.rel (%p388_p2) target bundleno = 2854 (0xb26), region = 72 }
   0xb   : > { %p431_p3 = scmp.lt.s32.totalorder %s9309_s26, 1  ;;  %v9882_v0 = vmov 0   ;;  %v516_v54 = vld [vmem:[%s18337_s1] sm:$0xff]  ;;  %vm1130_vm0 = vcmask 1046528   ;;  %vm1537_vm1 = vcmask 1045504   ;;  %vm4345_vm3 = vcmask 130048  }
   0xc   : > { %9851 = vset.pattern.permute.xlu2 %v9882_v0  ;;  %9850 = vset.pattern.permute.xlu1 %v9882_v0  ;;  %v10031_v57 = vperm.slane %v516_v54, 1  ;;  %v10043_v62 = vperm.slane %v516_v54, 2  ;;  %v10045_v63 = vperm.slane %v516_v54, 4  ;;  %vm4094_vm2 = vsmask.f32 7424 }
   0xd   : > { %9849 = vset.pattern.permute.xlu0 %v9882_v0  ;;  %s20617_s26 = smov (!%p431_p3, %s9309_s26), 1  ;;  %vm7891_vm4 = vcmask 580608   ;;  %vm8275_vm5 = vcmask 261120   ;;  %vm8568_vm6 = vsmask.f32 6400  ;;  %vm8987_vm8 = vcmask 1044480  }
   0xe   : > { %s9839_s27 = smul.u32 600, %s20617_s26  ;;  %18903 = vst [vmem:[#allocation3_spill] sm:$0xff] %v10043_v62  ;;  %vm8877_vm7 = vsmask.f32 5376  ;;  %vm9217_vm9 = vcmask 564224   ;;  %s9808_s20 = sshll.u32 %s20617_s26, 4 }
   0xf   : > { %18904 = vst [vmem:[#allocation4_spill] sm:$0xff] %v10045_v63  ;;  %s440_s23 = scalar_lea.vmem %s18349_s13, %s9808_s20  ;;  %vm9251_vm10 = vcmask 523264  }
  0x10   : > { %s9967_s30 = scalar_lea.vmem %s18336_s0, %s9839_s27 }
  0x11   : > { %v446_v1 = vld [vmem:[%s9967_s30 + $0x20] sm:$0xff]  ;;  %v444_v2 = vld [vmem:[%s9967_s30 + $0x10] sm:$0xff]  ;;  %v447_v4 = vld [vmem:[%s9967_s30 + $0x28] sm:$0xff] }
  0x12   : > { %v442_v3 = vld [vmem:[%s9967_s30] sm:$0xff]  ;;  %540 = vperm.xlu2 %9851, %v446_v1   ;;  %530 = vperm.xlu1 %9850, %v444_v2   ;;  %v445_v5 = vld [vmem:[%s9967_s30 + $0x18] sm:$0xff]  ;;  %v443_v6 = vld [vmem:[%s9967_s30 + $0x8] sm:$0xff]  ;;  %v10049_v2 = vperm.slane %v516_v54, 5 }
  0x13   : > { %520 = vperm.xlu0 %9849, %v442_v3   ;;  %v450_v7 = vld [vmem:[%s9967_s30 + $0x40] sm:$0xff]  ;;  %v449_v8 = vld [vmem:[%s9967_s30 + $0x38] sm:$0xff]  ;;  %v448_v9 = vld [vmem:[%s9967_s30 + $0x30] sm:$0xff] }
  0x14   : > { %v453_v10 = vld [vmem:[%s9967_s30 + $0x58] sm:$0xff]  ;;  %v452_v11 = vld [vmem:[%s9967_s30 + $0x50] sm:$0xff]  ;;  %v451_v12 = vld [vmem:[%s9967_s30 + $0x48] sm:$0xff]  ;;  %18905 = vst [vmem:[#allocation5_spill] sm:$0xff] %v10049_v2 }
  0x15   : > { %v456_v13 = vld [vmem:[%s9967_s30 + $0x70] sm:$0xff]  ;;  %v455_v14 = vld [vmem:[%s9967_s30 + $0x68] sm:$0xff]  ;;  %v454_v15 = vld [vmem:[%s9967_s30 + $0x60] sm:$0xff] }
  0x16   : > { %v459_v16 = vld [vmem:[%s9967_s30 + $0x88] sm:$0xff]  ;;  %v458_v17 = vld [vmem:[%s9967_s30 + $0x80] sm:$0xff]  ;;  %v457_v18 = vld [vmem:[%s9967_s30 + $0x78] sm:$0xff] }
  0x17   : > { %v462_v19 = vld [vmem:[%s9967_s30 + $0xa0] sm:$0xff]  ;;  %v461_v20 = vld [vmem:[%s9967_s30 + $0x98] sm:$0xff]  ;;  %v460_v21 = vld [vmem:[%s9967_s30 + $0x90] sm:$0xff] }
  0x18   : > { %v465_v22 = vld [vmem:[%s9967_s30 + $0xb8] sm:$0xff]  ;;  %v464_v23 = vld [vmem:[%s9967_s30 + $0xb0] sm:$0xff]  ;;  %v463_v24 = vld [vmem:[%s9967_s30 + $0xa8] sm:$0xff] }
  0x19   : > { %v468_v25 = vld [vmem:[%s9967_s30 + $0xd0] sm:$0xff]  ;;  %v467_v26 = vld [vmem:[%s9967_s30 + $0xc8] sm:$0xff]  ;;  %v466_v27 = vld [vmem:[%s9967_s30 + $0xc0] sm:$0xff] }
  0x1a   : > { %545 = vperm.xlu2 %9851, %v447_v4   ;;  %535 = vperm.xlu1 %9850, %v445_v5   ;;  %v471_v28 = vld [vmem:[%s9967_s30 + $0xe8] sm:$0xff]  ;;  %v470_v29 = vld [vmem:[%s9967_s30 + $0xe0] sm:$0xff]  ;;  %v469_v30 = vld [vmem:[%s9967_s30 + $0xd8] sm:$0xff] }
  0x1b   : > { %525 = vperm.xlu0 %9849, %v443_v6   ;;  %v474_v31 = vld [vmem:[%s9967_s30 + $0x100] sm:$0xff]  ;;  %v473_v32 = vld [vmem:[%s9967_s30 + $0xf8] sm:$0xff]  ;;  %v472_v33 = vld [vmem:[%s9967_s30 + $0xf0] sm:$0xff] }
  0x1c   : > { %v477_v34 = vld [vmem:[%s9967_s30 + $0x118] sm:$0xff]  ;;  %v476_v35 = vld [vmem:[%s9967_s30 + $0x110] sm:$0xff]  ;;  %v475_v36 = vld [vmem:[%s9967_s30 + $0x108] sm:$0xff] }
  0x1d   : > { %v480_v37 = vld [vmem:[%s9967_s30 + $0x130] sm:$0xff]  ;;  %v479_v38 = vld [vmem:[%s9967_s30 + $0x128] sm:$0xff]  ;;  %v478_v39 = vld [vmem:[%s9967_s30 + $0x120] sm:$0xff] }
  0x1e   : > { %v483_v40 = vld [vmem:[%s9967_s30 + $0x148] sm:$0xff]  ;;  %v482_v41 = vld [vmem:[%s9967_s30 + $0x140] sm:$0xff]  ;;  %v481_v42 = vld [vmem:[%s9967_s30 + $0x138] sm:$0xff] }
  0x1f   : > { %v486_v43 = vld [vmem:[%s9967_s30 + $0x160] sm:$0xff]  ;;  %v485_v44 = vld [vmem:[%s9967_s30 + $0x158] sm:$0xff]  ;;  %v484_v45 = vld [vmem:[%s9967_s30 + $0x150] sm:$0xff] }
  0x20   : > { %v489_v47 = vld [vmem:[%s9967_s30 + $0x178] sm:$0xff]  ;;  %v488_v48 = vld [vmem:[%s9967_s30 + $0x170] sm:$0xff]  ;;  %v487_v49 = vld [vmem:[%s9967_s30 + $0x168] sm:$0xff] }
  0x21   : > { %v492_v52 = vld [vmem:[%s9967_s30 + $0x190] sm:$0xff]  ;;  %v491_v53 = vld [vmem:[%s9967_s30 + $0x188] sm:$0xff]  ;;  %v490_v55 = vld [vmem:[%s9967_s30 + $0x180] sm:$0xff] }
  0x22   : > { %560 = vperm.xlu2 %9851, %v450_v7   ;;  %555 = vperm.xlu1 %9850, %v449_v8   ;;  %v496_v0 = vld [vmem:[%s9967_s30 + $0x1b0] sm:$0xff]  ;;  %v494_v1 = vld [vmem:[%s9967_s30 + $0x1a0] sm:$0xff]  ;;  %v493_v3 = vld [vmem:[%s9967_s30 + $0x198] sm:$0xff]  ;;  %v10062_v8 = vperm.slane %v516_v54, 0 }
  0x23   : > { %550 = vperm.xlu0 %9849, %v448_v9  }
  0x24   : > { %18907 = vst [vmem:[#allocation7_spill] sm:$0xff] %v10062_v8 }
  0x2a   : > { %575 = vperm.xlu2 %9851, %v453_v10   ;;  %570 = vperm.xlu1 %9850, %v452_v11  }
  0x2b   : > { %565 = vperm.xlu0 %9849, %v451_v12  }
  0x32   : > { %590 = vperm.xlu2 %9851, %v456_v13   ;;  %585 = vperm.xlu1 %9850, %v455_v14  }
  0x33   : > { %580 = vperm.xlu0 %9849, %v454_v15  }
  0x3a   : > { %605 = vperm.xlu2 %9851, %v459_v16   ;;  %600 = vperm.xlu1 %9850, %v458_v17  }
  0x3b   : > { %595 = vperm.xlu0 %9849, %v457_v18   ;;  %v10091_v18 = vperm.slane %v516_v54, 3 }
  0x3d   : > { %18910 = vst [vmem:[#allocation10_spill] sm:$0xff] %v10091_v18 }
  0x42   : > { %620 = vperm.xlu2 %9851, %v462_v19   ;;  %615 = vperm.xlu1 %9850, %v461_v20   ;;  %v10093_v19 = vperm.slane %v516_v54, 7 }
  0x43   : > { %610 = vperm.xlu0 %9849, %v460_v21  }
  0x44   : > { %18911 = vst [vmem:[#allocation11_spill] sm:$0xff] %v10093_v19 }
  0x4a   : > { %635 = vperm.xlu2 %9851, %v465_v22   ;;  %630 = vperm.xlu1 %9850, %v464_v23   ;;  %v10100_v22 = vld [vmem:[%s18337_s1 + $0x8] ss:$0 sm:$0xff] }
  0x4b   : > { %625 = vperm.xlu0 %9849, %v463_v24  }
  0x52   : > { %650 = vperm.xlu2 %9851, %v468_v25   ;;  %645 = vperm.xlu1 %9850, %v467_v26   ;;  %v499_v25 = vld [vmem:[%s9967_s30 + $0x1c8] sm:$0xff]  ;;  %v498_v26 = vld [vmem:[%s9967_s30 + $0x1c0] sm:$0xff] }
  0x53   : > { %640 = vperm.xlu0 %9849, %v466_v27  }
  0x5a   : > { %665 = vperm.xlu2 %9851, %v471_v28   ;;  %660 = vperm.xlu1 %9850, %v470_v29  }
  0x5b   : > { %655 = vperm.xlu0 %9849, %v469_v30   ;;  %v10108_v30 = vperm.slane %v516_v54, 6 }
  0x5d   : > { %18912 = vst [vmem:[#allocation12_spill] sm:$0xff] %v10108_v30 }
  0x62   : > { %680 = vperm.xlu2 %9851, %v474_v31   ;;  %675 = vperm.xlu1 %9850, %v473_v32   ;;  %v497_v31 = vld [vmem:[%s9967_s30 + $0x1b8] sm:$0xff] }
  0x63   : > { %670 = vperm.xlu0 %9849, %v472_v33  }
  0x6a   : > { %695 = vperm.xlu2 %9851, %v477_v34   ;;  %690 = vperm.xlu1 %9850, %v476_v35  }
  0x6b   : > { %685 = vperm.xlu0 %9849, %v475_v36  }
  0x6c   : > { %v10014_v46 = vpop.permute.xlu2 %540 }
  0x6d   : > { %v10035_v58 = vmul.f32 %v10031_v57, %v10014_v46  ;;  %v10055_v5 = vmul.f32 %v10043_v62, %v10014_v46  ;;  %v10066_v9 = vmul.f32 %v10045_v63, %v10014_v46  ;;  %v858_v12 = vmul.f32 %v10062_v8, %v10014_v46 }
  0x6e   : > { %v10078_v13 = vmul.f32 %v10049_v2, %v10014_v46 }
  0x6f   : > { %v18357_v4 = vrot.slane %v10035_v58, 1  ;;  %v18356_v15 = vrot.slane %v10055_v5, 2  ;;  %v18355_v20 = vrot.slane %v10066_v9, 1 }
  0x70   : > { %v18354_v27 = vrot.slane %v10078_v13, 2 }
  0x72   : > { %710 = vperm.xlu2 %9851, %v480_v37   ;;  %705 = vperm.xlu1 %9850, %v479_v38   ;;  %v10133_v38 = vmul.f32 %v10091_v18, %v10014_v46 }
  0x73   : > { %700 = vperm.xlu0 %9849, %v478_v39  }
  0x74   : > { %v10019_v50 = vpop.permute.xlu2 %545 }
  0x75   : > { %v10039_v59 = vmul.f32 %v10031_v57, %v10019_v50  ;;  %v10060_v7 = vmul.f32 %v10043_v62, %v10019_v50  ;;  %v10070_v10 = vmul.f32 %v10045_v63, %v10019_v50  ;;  %v10082_v14 = vmul.f32 %v10049_v2, %v10019_v50 }
  0x76   : > { %v10137_v39 = vmul.f32 %v10062_v8, %v10019_v50 }
  0x77   : > { %18902 = vst [vmem:[#allocation2_spill] sm:$0xff] %v10039_v59  ;;  %v18353_v6 = vrot.slane %v10039_v59, 1  ;;  %v18352_v17 = vrot.slane %v10060_v7, 2  ;;  %v18351_v21 = vrot.slane %v10070_v10, 1  ;;  %v18350_v29 = vrot.slane %v10082_v14, 2 }
  0x78   : > { %18906 = vst [vmem:[#allocation6_spill] sm:$0xff] %v10060_v7 }
  0x79   : > { %18908 = vst [vmem:[#allocation8_spill] sm:$0xff] %v10070_v10  ;;  %v1141_v16 = vsel %vm1130_vm0, %v18357_v4, %v18353_v6  ;;  %v1548_v32 = vsel %vm1537_vm1, %v18356_v15, %v18352_v17  ;;  %v10166_v46 = vsel %vm1537_vm1, %v18354_v27, %v18350_v29  ;;  %v501_v6 = vld [vmem:[%s9967_s30 + $0x1d8] sm:$0xff]  ;;  %v495_v27 = vld [vmem:[%s9967_s30 + $0x1a8] sm:$0xff] }
  0x7a   : > { %725 = vperm.xlu2 %9851, %v483_v40   ;;  %720 = vperm.xlu1 %9850, %v482_v41   ;;  %18909 = vst [vmem:[#allocation9_spill] sm:$0xff] %v10082_v14  ;;  %v1337_v28 = vadd.f32 %v1141_v16, %v858_v12  ;;  %v10141_v40 = vmul.f32 %v10091_v18, %v10019_v50 }
  0x7b   : > { %715 = vperm.xlu0 %9849, %v481_v42   ;;  %18917 = vst [vmem:[#allocation17_spill] sm:$0xff] %v10137_v39  ;;  %v10151_v42 = vsel %vm1130_vm0, %v18355_v20, %v18351_v21  ;;  %v500_v20 = vld [vmem:[%s9967_s30 + $0x1d0] sm:$0xff] }
  0x7c   : > { %v561_v60 = vpop.permute.xlu2 %560 }
  0x7d   : > { %v10117_v33 = vmul.f32 %v10031_v57, %v561_v60  ;;  %v10120_v34 = vmul.f32 %v10043_v62, %v561_v60  ;;  %v10123_v35 = vmul.f32 %v10045_v63, %v561_v60  ;;  %v10126_v36 = vmul.f32 %v10049_v2, %v561_v60 }
  0x7e   : > { %v10129_v37 = vmul.f32 %v10093_v19, %v561_v60  ;;  %v10144_v41 = vmul.f32 %v10100_v22, %v561_v60  ;;  %v10172_v50 = vmul.f32 %v10108_v30, %v561_v60 }
  0x7f   : > { %18913 = vst [vmem:[#allocation13_spill] sm:$0xff] %v10120_v34 }
  0x80   : > { %18914 = vst [vmem:[#allocation14_spill] sm:$0xff] %v10123_v35 }
  0x81   : > { %18915 = vst [vmem:[#allocation15_spill] sm:$0xff] %v10126_v36 }
  0x82   : > { %740 = vperm.xlu2 %9851, %v486_v43   ;;  %735 = vperm.xlu1 %9850, %v485_v44   ;;  %18916 = vst [vmem:[#allocation16_spill] sm:$0xff] %v10129_v37  ;;  %v10153_v43 = vadd.f32 %v1548_v32, %v1337_v28  ;;  %v10156_v44 = vmul.f32 %v10062_v8, %v561_v60 }
  0x83   : > { %730 = vperm.xlu0 %9849, %v484_v45   ;;  %18918 = vst [vmem:[#allocation18_spill] sm:$0xff] %v10144_v41  ;;  %v10159_v45 = vmul.f32 %v10091_v18, %v561_v60 }
  0x84   : > { %v10021_v51 = vpop.permute.xlu1 %530  ;;  %v576_v23 = vpop.permute.xlu2 %575  ;;  %18920 = vst [vmem:[#allocation20_spill] sm:$0xff] %v10172_v50 }
  0x85   : > { %v10029_v56 = vpop.permute.xlu0 %520  ;;  %18919 = vst [vmem:[#allocation19_spill] sm:$0xff] %v10159_v45  ;;  %v10189_v60 = vmul.f32 %v10093_v19, %v576_v23  ;;  %v10192_v12 = vmul.f32 %v10100_v22, %v576_v23  ;;  %v10195_v16 = vmul.f32 %v10062_v8, %v576_v23  ;;  %v10205_v28 = vmul.f32 %v10031_v57, %v10021_v51 }
  0x86   : > { %v10212_v32 = vmul.f32 %v10043_v62, %v10021_v51  ;;  %v856_v21 = vmul.f32 %v10062_v8, %v10021_v51  ;;  %v854_v4 = vmul.f32 %v10062_v8, %v10029_v56 }
  0x87   : > { %18923 = vst [vmem:[#allocation23_spill] sm:$0xff] %v10189_v60 }
  0x88   : > { %18924 = vst [vmem:[#allocation24_spill] sm:$0xff] %v10192_v12 }
  0x8a   : > { %755 = vperm.xlu2 %9851, %v489_v47   ;;  %750 = vperm.xlu1 %9850, %v488_v48  }
  0x8b   : > { %745 = vperm.xlu0 %9849, %v487_v49   ;;  %v10218_v49 = vmul.f32 %v10043_v62, %v10029_v56 }
  0x8c   : > { %v10041_v61 = vpop.permute.xlu1 %535 }
  0x8d   : > { %v10072_v11 = vpop.permute.xlu0 %525  ;;  %v997_v17 = vmul.f32 %v10031_v57, %v10041_v61  ;;  %v857_v45 = vmul.f32 %v10062_v8, %v10041_v61  ;;  %v1958_v41 = vmul.f32 %v10045_v63, %v10041_v61  ;;  %v2364_v50 = vmul.f32 %v10049_v2, %v10041_v61 }
  0x8e   : > { %v855_v10 = vmul.f32 %v10062_v8, %v10072_v11 }
  0x92   : > { %770 = vperm.xlu2 %9851, %v492_v52   ;;  %765 = vperm.xlu1 %9850, %v491_v53   ;;  %v994_v53 = vmul.f32 %v10031_v57, %v10029_v56  ;;  %v1538_v56 = vrot.slane %v10218_v49, 2 }
  0x93   : > { %760 = vperm.xlu0 %9849, %v490_v55   ;;  %v10179_v55 = vmul.f32 %v10031_v57, %v576_v23 }
  0x94   : > { %v10102_v24 = vpop.permute.xlu1 %555  ;;  %v1131_v15 = vrot.slane %v994_v53, 1  ;;  %v1404_v53 = vmul.f32 %v10043_v62, %v10041_v61 }
  0x95   : > { %v10174_v52 = vpop.permute.xlu0 %550  ;;  %v18934_v36 = vrot.slane %v10179_v55, 1 }
  0x96   : > { %18921 = vst [vmem:[#allocation21_spill] sm:$0xff] %v10174_v52  ;;  %v1543_v14 = vrot.slane %v1404_v53, 2  ;;  %v2500_v53 = vrot.slane %v2364_v50, 2 }
  0x9a   : > { %790 = vperm.xlu2 %9851, %v496_v0   ;;  %780 = vperm.xlu1 %9850, %v494_v1   ;;  %v10182_v0 = vmul.f32 %v10043_v62, %v576_v23  ;;  %v10220_v1 = vpop.permute.xlu2 %590 }
  0x9b   : > { %775 = vperm.xlu0 %9849, %v493_v3   ;;  %v10186_v3 = vmul.f32 %v10045_v63, %v576_v23  ;;  %18927 = vst [vmem:[#allocation27_spill] sm:$0xff] %v10220_v1  ;;  %v10241_v51 = vmul.f32 %v10031_v57, %v10220_v1  ;;  %v10245_v29 = vmul.f32 %v10043_v62, %v10220_v1 }
  0x9c   : > { %v10222_v54 = vpop.permute.xlu1 %570  ;;  %v10267_v49 = vmul.f32 %v10049_v2, %v10220_v1  ;;  %v10279_v60 = vmul.f32 %v10093_v19, %v10220_v1 }
  0x9d   : > { %18922 = vst [vmem:[#allocation22_spill] sm:$0xff] %v10186_v3  ;;  %v1004_v48 = vmul.f32 %v10031_v57, %v10222_v54  ;;  %v864_v47 = vmul.f32 %v10062_v8, %v10222_v54  ;;  %v10302_v7 = vmul.f32 %v10043_v62, %v10222_v54 }
  0x9e   : > { %18928 = vst [vmem:[#allocation28_spill] sm:$0xff] %v10222_v54 }
  0x9f   : > { %v1150_v12 = vrot.slane %v1004_v48, 1  ;;  %18931 = vst [vmem:[#allocation31_spill] sm:$0xff] %v10267_v49 }
  0xa0   : > { %18933 = vst [vmem:[#allocation33_spill] sm:$0xff] %v10279_v60 }
  0xa1   : > { %v1153_v35 = vsel %vm1130_vm0, %v1150_v12, %v18934_v36  ;;  %v2094_v36 = vrot.slane %v1958_v41, 1 }
  0xa2   : > { %805 = vperm.xlu2 %9851, %v499_v25   ;;  %800 = vperm.xlu1 %9850, %v498_v26   ;;  %v10198_v25 = vmul.f32 %v10091_v18, %v576_v23  ;;  %v10201_v26 = vmul.f32 %v10049_v2, %v576_v23 }
  0xa3   : > { %795 = vperm.xlu0 %9849, %v497_v31   ;;  %v10208_v31 = vmul.f32 %v10108_v30, %v576_v23  ;;  %v1134_v23 = vrot.slane %v10205_v28, 1  ;;  %v1136_v28 = vrot.slane %v997_v17, 1  ;;  %v1343_v17 = vadd.f32 %v1153_v35, %v864_v47 }
  0xa4   : > { %18925 = vst [vmem:[#allocation25_spill] sm:$0xff] %v10201_v26  ;;  %v995_v26 = vmul.f32 %v10031_v57, %v10072_v11  ;;  %v18935_v35 = vrot.slane %v10035_v58, 1  ;;  %v18936_v58 = vrot.slane %v10117_v33, 1 }
  0xa5   : > { %18926 = vst [vmem:[#allocation26_spill] sm:$0xff] %v10208_v31  ;;  %v10273_v31 = vpop.permute.xlu0 %565  ;;  %v1137_v48 = vsel %vm1130_vm0, %v1134_v23, %v1136_v28 }
  0xa6   : > { %18932 = vst [vmem:[#allocation32_spill] sm:$0xff] %v10273_v31  ;;  %v1132_v37 = vrot.slane %v995_v26, 1  ;;  %v1003_v60 = vmul.f32 %v10031_v57, %v10273_v31  ;;  %v1139_v47 = vsel %vm1130_vm0, %v1136_v28, %v18935_v35  ;;  %v1402_v26 = vmul.f32 %v10043_v62, %v10072_v11 }
  0xa7   : > { %v1335_v59 = vadd.f32 %v1137_v48, %v856_v21  ;;  %v1336_v11 = vadd.f32 %v1139_v47, %v857_v45  ;;  %v1818_v48 = vmul.f32 %v10091_v18, %v10041_v61  ;;  %v18940_v45 = vrot.slane %v10212_v32, 2 }
  0xa8   : > { %v1148_v39 = vrot.slane %v1003_v60, 1  ;;  %v1133_v52 = vsel %vm1130_vm0, %v1131_v15, %v1132_v37  ;;  %v1135_v54 = vsel %vm1130_vm0, %v1132_v37, %v1134_v23  ;;  %v1557_v60 = vrot.slane %v10302_v7, 2 }
  0xa9   : > { %v1539_v15 = vrot.slane %v1402_v26, 2  ;;  %v18939_v23 = vrot.slane %v10120_v34, 2  ;;  %v1544_v7 = vsel %vm1537_vm1, %v18940_v45, %v1543_v14  ;;  %v18941_v47 = vrot.slane %v10055_v5, 2 }
  0xaa   : > { %815 = vperm.xlu2 %9851, %v501_v6   ;;  %785 = vperm.xlu1 %9850, %v495_v27   ;;  %v10253_v6 = vmul.f32 %v10062_v8, %v10220_v1  ;;  %v10257_v27 = vmul.f32 %v10091_v18, %v10220_v1  ;;  %v1149_v28 = vsel %vm1130_vm0, %v18936_v58, %v1148_v39  ;;  %v18942_v58 = vrot.slane %v10066_v9, 1 }
  0xab   : > { %810 = vperm.xlu0 %9849, %v500_v20   ;;  %v10263_v20 = vmul.f32 %v10045_v63, %v10220_v1  ;;  %v10295_v1 = vmul.f32 %v10043_v62, %v10273_v31  ;;  %v1151_v35 = vsel %vm1130_vm0, %v1148_v39, %v1150_v12  ;;  %v1341_v21 = vadd.f32 %v1149_v28, %v10156_v44 }
  0xac   : > { %18929 = vst [vmem:[#allocation29_spill] sm:$0xff] %v10253_v6  ;;  %v10323_v6 = vpop.permute.xlu2 %605  ;;  %v1333_v44 = vadd.f32 %v1133_v52, %v854_v4  ;;  %v1334_v12 = vadd.f32 %v1135_v54, %v855_v10  ;;  %v1546_v61 = vsel %vm1537_vm1, %v1543_v14, %v18941_v47  ;;  %v1742_v26 = vadd.f32 %v1544_v7, %v1335_v59 }
  0xad   : > { %18930 = vst [vmem:[#allocation30_spill] sm:$0xff] %v10257_v27  ;;  %v863_v27 = vmul.f32 %v10062_v8, %v10273_v31  ;;  %v18938_v37 = vrot.slane %v10295_v1, 2  ;;  %v2096_v28 = vsel %vm1130_vm0, %v2094_v36, %v18942_v58  ;;  %v10346_v4 = vadd.f32 %v1546_v61, %v1336_v11 }
  0xae   : > { %18937 = vst [vmem:[#allocation34_spill] sm:$0xff] %v10323_v6  ;;  %v10350_v5 = vmul.f32 %v10031_v57, %v10323_v6  ;;  %v10354_v59 = vmul.f32 %v10043_v62, %v10323_v6  ;;  %v18945_v9 = vrot.slane %v10182_v0, 2  ;;  %v18946_v14 = vmov %v18940_v45  ;;  %v502_v45 = vld [vmem:[%s9967_s30 + $0x1e0] sm:$0xff] }
  0xaf   : > { %v1342_v41 = vadd.f32 %v1151_v35, %v863_v27  ;;  %v1556_v39 = vsel %vm1537_vm1, %v18939_v23, %v18938_v37  ;;  %v18943_v35 = vrot.slane %v10078_v13, 2  ;;  %v10344_v23 = vpop.permute.xlu1 %585  ;;  %v1540_v13 = vsel %vm1537_vm1, %v1538_v56, %v1539_v15  ;;  %v504_v56 = vld [vmem:[%s9967_s30 + $0x1f0] sm:$0xff] }
  0xb0   : > { %v1748_v27 = vadd.f32 %v1556_v39, %v1341_v21  ;;  %18944 = vst [vmem:[#allocation35_spill] sm:$0xff] %v10344_v23  ;;  %v1560_v10 = vsel %vm1537_vm1, %v1557_v60, %v18945_v9  ;;  %v1542_v52 = vsel %vm1537_vm1, %v1539_v15, %v18946_v14  ;;  %v10365_v54 = vmul.f32 %v10045_v63, %v10323_v6  ;;  %v503_v15 = vld [vmem:[%s9967_s30 + $0x1e8] sm:$0xff] }
  0xb1   : > { %v10342_v37 = vsel %vm1537_vm1, %v2500_v53, %v18943_v35  ;;  %v1750_v36 = vadd.f32 %v1560_v10, %v1343_v17  ;;  %v9810_v53 = vld [vmem:[%s18339_s3 + $0x8] sm:$0xff]  ;;  %v1740_v11 = vadd.f32 %v1540_v13, %v1333_v44  ;;  %v1741_v21 = vadd.f32 %v1542_v52, %v1334_v12  ;;  %v10399_v13 = vpop.permute.xlu0 %580 }
  0xb2   : > { %v10372_v39 = vmul.f32 %v10062_v8, %v10323_v6  ;;  %v1007_v32 = vmul.f32 %v10031_v57, %v10344_v23  ;;  %v10380_v7 = vadd.f32 %v10141_v40, %v1742_v26  ;;  %v10384_v17 = vmul.f32 %v10091_v18, %v10323_v6  ;;  %4443 = vmatpush.bf16.msra.mxu0 %v9810_v53 }
  0xb3   : > { %v1828_v44 = vmul.f32 %v10091_v18, %v10344_v23  ;;  %v1968_v12 = vmul.f32 %v10045_v63, %v10344_v23  ;;  %v10394_v58 = vmul.f32 %v10049_v2, %v10323_v6  ;;  %830 = vperm.xlu2 %9851, %v504_v56   ;;  %825 = vperm.xlu1 %9850, %v503_v15   ;;  %v18948_v61 = vrot.slane %v10241_v51, 1 }
  0xb4   : > { %v1156_v40 = vrot.slane %v1007_v32, 1  ;;  %v867_v35 = vmul.f32 %v10062_v8, %v10344_v23  ;;  %820 = vperm.xlu0 %9849, %v502_v45   ;;  %9836 = vmatpush.bf16.msra.mxu1 %v9810_v53  ;;  %v1885_v14 = vadd.f32 %v1818_v48, %v1740_v11  ;;  %v1886_v52 = vadd.f32 %v10133_v38, %v1741_v21 }
  0xb5   : > { %18947 = vst [vmem:[#allocation36_spill] sm:$0xff] %v10394_v58  ;;  %v1895_v9 = vadd.f32 %v1828_v44, %v1750_v36  ;;  %v2113_v10 = vrot.slane %v1968_v12, 1  ;;  %v18949_v56 = vrot.slane %v10295_v1, 2  ;;  %9837 = vmatpush.bf16.msra.mxu3 %v9810_v53  ;;  %v18950_v36 = vrot.slane %v10263_v20, 1 }
  0xb6   : > { %v1159_v32 = vsel %vm1130_vm0, %v1156_v40, %v18948_v61  ;;  %v1893_v45 = vadd.f32 %v10198_v25, %v1748_v27  ;;  %v10414_v38 = vmul.f32 %v10031_v57, %v10102_v24  ;;  %v10418_v48 = vmul.f32 %v10043_v62, %v10102_v24 }
  0xb7   : > { %v1558_v15 = vsel %vm1537_vm1, %v18949_v56, %v1557_v60  ;;  %v1346_v26 = vadd.f32 %v1159_v32, %v867_v35  ;;  %v2116_v44 = vsel %vm1130_vm0, %v2113_v10, %v18950_v36  ;;  %v1006_v60 = vmul.f32 %v10031_v57, %v10399_v13 }
  0xb8   : > { %v1749_v12 = vadd.f32 %v1558_v15, %v1342_v41  ;;  %18951 = vst [vmem:[#allocation37_spill] sm:$0xff] %v10418_v48  ;;  %v2306_v1 = vadd.f32 %v2116_v44, %v1895_v9  ;;  %v1822_v53 = vmul.f32 %v10091_v18, %v10102_v24  ;;  %v10426_v41 = vmul.f32 %v10043_v62, %v10399_v13 }
  0xb9   : > { %v1827_v25 = vmul.f32 %v10091_v18, %v10399_v13  ;;  %v1967_v27 = vmul.f32 %v10045_v63, %v10399_v13  ;;  %v2296_v11 = vadd.f32 %v2096_v28, %v1885_v14  ;;  %v10434_v21 = vmul.f32 %v10045_v63, %v10102_v24 }
  0xba   : > { %v1414_v61 = vmul.f32 %v10043_v62, %v10344_v23  ;;  %v1154_v35 = vrot.slane %v1006_v60, 1  ;;  %v866_v9 = vmul.f32 %v10062_v8, %v10399_v13  ;;  %v1561_v32 = vrot.slane %v10426_v41, 2 }
  0xbb   : > { %v1894_v56 = vadd.f32 %v1827_v25, %v1749_v12  ;;  %v2111_v15 = vrot.slane %v1967_v27, 1  ;;  %v2374_v28 = vmul.f32 %v10049_v2, %v10344_v23  ;;  %v18952_v14 = vrot.slane %v10179_v55, 1 }
  0xbc   : > { %v1157_v47 = vsel %vm1130_vm0, %v1154_v35, %v1156_v40  ;;  %v18953_v6 = vrot.slane %v10182_v0, 2  ;;  %v18954_v12 = vrot.slane %v10186_v3, 1  ;;  %v2297_v27 = vadd.f32 %v10151_v42, %v1886_v52 }
  0xbd   : > { %v1155_v44 = vsel %vm1130_vm0, %v18952_v14, %v1154_v35  ;;  %v1345_v50 = vadd.f32 %v1157_v47, %v866_v9  ;;  %v1563_v36 = vrot.slane %v1414_v61, 2  ;;  %v2114_v55 = vsel %vm1130_vm0, %v2111_v15, %v2113_v10  ;;  %v10546_v61 = vpop.permute.xlu0 %595 }
  0xbe   : > { %v1344_v60 = vadd.f32 %v1155_v44, %v10195_v16  ;;  %v1562_v41 = vsel %vm1537_vm1, %v18953_v6, %v1561_v32  ;;  %v2112_v25 = vsel %vm1130_vm0, %v18954_v12, %v2111_v15  ;;  %v10462_v16 = vmul.f32 %v10049_v2, %v10102_v24  ;;  %18967 = vst [vmem:[#allocation43_spill] sm:$0xff] %v10546_v61 }
  0xbf   : > { %v10457_v23 = vadd.f32 %v2112_v25, %v1893_v45  ;;  %v2305_v47 = vadd.f32 %v2114_v55, %v1894_v56  ;;  %v861_v6 = vmul.f32 %v10062_v8, %v10102_v24  ;;  %v18956_v35 = vrot.slane %v10117_v33, 1  ;;  %v10484_v33 = vpop.permute.xlu1 %600 }
  0xc0   : > { %v1751_v0 = vadd.f32 %v1562_v41, %v1344_v60  ;;  %v18957_v42 = vrot.slane %v10414_v38, 1  ;;  %v10473_v10 = vmul.f32 %v10093_v19, %v10102_v24  ;;  %v2519_v45 = vrot.slane %v2374_v28, 2  ;;  %18959 = vst [vmem:[#allocation40_spill] sm:$0xff] %v10484_v33 }
  0xc1   : > { %18955 = vst [vmem:[#allocation38_spill] sm:$0xff] %v10457_v23  ;;  %v10477_v9 = vadd.f32 %v1822_v53, %v10153_v43  ;;  %v10482_v15 = vmul.f32 %v10108_v30, %v10102_v24  ;;  %v10487_v14 = vadd.f32 %v10342_v37, %v2296_v11  ;;  %v10490_v44 = vadd.f32 %v10166_v46, %v2297_v27  ;;  %v18963_v11 = vld [vmem:[#allocation21_spill] sm:$0xff] }
  0xc2   : > { %v1147_v52 = vsel %vm1130_vm0, %v18957_v42, %v18956_v35  ;;  %v10494_v28 = vmul.f32 %v10049_v2, %v10399_v13  ;;  %v18961_v43 = vrot.slane %v10245_v29, 2  ;;  %v10504_v12 = vmul.f32 %v10100_v22, %v10102_v24 }
  0xc3   : > { %18958 = vst [vmem:[#allocation39_spill] sm:$0xff] %v10477_v9  ;;  %v10499_v60 = vadd.f32 %v1147_v52, %v861_v6  ;;  %v10509_v25 = vmul.f32 %v10062_v8, %v18963_v11  ;;  %v18964_v27 = vrot.slane %v10267_v49, 2  ;;  %v1010_v6 = vmul.f32 %v10031_v57, %v10484_v33 }
  0xc4   : > { %18960 = vst [vmem:[#allocation41_spill] sm:$0xff] %v10494_v28  ;;  %v1566_v53 = vsel %vm1537_vm1, %v1563_v36, %v18961_v43  ;;  %v1000_v35 = vmul.f32 %v10031_v57, %v18963_v11  ;;  %v1831_v24 = vmul.f32 %v10091_v18, %v10484_v33  ;;  %v10526_v52 = vmul.f32 %v10043_v62, %v18963_v11 }
  0xc5   : > { %18962 = vst [vmem:[#allocation42_spill] sm:$0xff] %v10499_v60  ;;  %v1753_v37 = vadd.f32 %v1566_v53, %v1346_v26  ;;  %v2522_v55 = vsel %vm1537_vm1, %v2519_v45, %v18964_v27  ;;  %v1971_v26 = vmul.f32 %v10045_v63, %v10484_v33  ;;  %v1821_v43 = vmul.f32 %v10091_v18, %v18963_v11  ;;  %v18969_v60 = vld [vmem:[#allocation30_spill] sm:$0xff] }
  0xc6   : > { %v10518_v42 = vadd.f32 %v2522_v55, %v2306_v1  ;;  %v1162_v27 = vrot.slane %v1010_v6, 1  ;;  %v870_v1 = vmul.f32 %v10062_v8, %v10484_v33  ;;  %v10536_v41 = vmul.f32 %v10045_v63, %v18963_v11 }
  0xc7   : > { %v1898_v55 = vadd.f32 %v1831_v24, %v1753_v37  ;;  %v2119_v46 = vrot.slane %v1971_v26, 1  ;;  %v10540_v56 = vmul.f32 %v10049_v2, %v18963_v11  ;;  %v18966_v40 = vrot.slane %v10350_v5, 1 }
  0xc8   : > { %18965 = vst [vmem:[#allocation21_spill] sm:$0xff] %v10518_v42  ;;  %v1564_v6 = vsel %vm1537_vm1, %v1561_v32, %v1563_v36  ;;  %v1142_v49 = vrot.slane %v1000_v35, 1  ;;  %v18968_v37 = vrot.slane %v10365_v54, 1  ;;  %v10553_v23 = vmul.f32 %v10043_v62, %v10484_v33 }
  0xc9   : > { %v1165_v53 = vsel %vm1130_vm0, %v1162_v27, %v18966_v40  ;;  %v1752_v26 = vadd.f32 %v1564_v6, %v1345_v50  ;;  %v1896_v48 = vadd.f32 %v18969_v60, %v1751_v0  ;;  %v18970_v40 = vrot.slane %v10494_v28, 2 }
  0xca   : > { %v1349_v42 = vadd.f32 %v1165_v53, %v870_v1  ;;  %v2122_v24 = vsel %vm1130_vm0, %v2119_v46, %v18968_v37  ;;  %v1009_v35 = vmul.f32 %v10031_v57, %v10546_v61  ;;  %v10565_v53 = vmul.f32 %v10043_v62, %v10546_v61 }
  0xcb   : > { %v2309_v3 = vadd.f32 %v2122_v24, %v1898_v55  ;;  %v2520_v32 = vsel %vm1537_vm1, %v18970_v40, %v2519_v45  ;;  %v1830_v50 = vmul.f32 %v10091_v18, %v10546_v61  ;;  %v10571_v0 = vadd.f32 %v1821_v43, %v10346_v4  ;;  %v18972_v24 = vld [vmem:[#allocation2_spill] sm:$0xff] }
  0xcc   : > { %v10559_v36 = vadd.f32 %v2520_v32, %v2305_v47  ;;  %v10575_v45 = vmul.f32 %v10108_v30, %v18963_v11  ;;  %v1970_v47 = vmul.f32 %v10045_v63, %v10546_v61  ;;  %v10581_v60 = vmul.f32 %v10093_v19, %v18963_v11 }
  0xcd   : > { %v1160_v55 = vrot.slane %v1009_v35, 1  ;;  %v1567_v6 = vrot.slane %v10565_v53, 2  ;;  %v1897_v37 = vadd.f32 %v1830_v50, %v1752_v26  ;;  %v18973_v40 = vrot.slane %v18972_v24, 1  ;;  %v10601_v24 = vpop.permute.xlu2 %620 }
  0xce   : > { %18971 = vst [vmem:[#allocation30_spill] sm:$0xff] %v10559_v36  ;;  %v10589_v43 = vmul.f32 %v10049_v2, %v10484_v33  ;;  %v869_v32 = vmul.f32 %v10062_v8, %v10546_v61  ;;  %v2117_v1 = vrot.slane %v1970_v47, 1  ;;  %v1569_v36 = vrot.slane %v10553_v23, 2 }
  0xcf   : > { %v1143_v4 = vsel %vm1130_vm0, %v18973_v40, %v1142_v49  ;;  %v18974_v28 = vrot.slane %v10241_v51, 1  ;;  %v1163_v26 = vsel %vm1130_vm0, %v1160_v55, %v1162_v27  ;;  %v18975_v53 = vrot.slane %v10245_v29, 2  ;;  %v18976_v40 = vld [vmem:[#allocation29_spill] sm:$0xff] }
  0xd0   : > { %v1348_v34 = vadd.f32 %v1163_v26, %v869_v32  ;;  %v18977_v9 = vrot.slane %v10263_v20, 1  ;;  %v2120_v23 = vsel %vm1130_vm0, %v2117_v1, %v2119_v46  ;;  %v2525_v20 = vrot.slane %v10589_v43, 2  ;;  %v18980_v26 = vld [vmem:[#allocation17_spill] sm:$0xff] }
  0xd1   : > { %v1161_v35 = vsel %vm1130_vm0, %v18974_v28, %v1160_v55  ;;  %v1568_v50 = vsel %vm1537_vm1, %v18975_v53, %v1567_v6  ;;  %v10611_v28 = vmul.f32 %v10100_v22, %v18963_v11  ;;  %v2308_v27 = vadd.f32 %v2120_v23, %v1897_v37  ;;  %v18982_v53 = vld [vmem:[#allocation6_spill] sm:$0xff] }
  0xd2   : > { %v1347_v33 = vadd.f32 %v1161_v35, %v18976_v40  ;;  %v2118_v47 = vsel %vm1130_vm0, %v18977_v9, %v2117_v1  ;;  %v18979_v55 = vrot.slane %v10414_v38, 1  ;;  %v1338_v46 = vadd.f32 %v1143_v4, %v18980_v26 }
  0xd3   : > { %v10613_v29 = vadd.f32 %v2118_v47, %v1896_v48  ;;  %v18981_v1 = vrot.slane %v10526_v52, 2  ;;  %v18983_v40 = vrot.slane %v18982_v53, 2  ;;  %v10629_v38 = vmul.f32 %v10062_v8, %v10601_v24  ;;  %v18991_v53 = vld [vmem:[#allocation28_spill] sm:$0xff] }
  0xd4   : > { %v1145_v35 = vsel %vm1130_vm0, %v1142_v49, %v18979_v55  ;;  %v1754_v9 = vadd.f32 %v1568_v50, %v1347_v33  ;;  %v10631_v49 = vpop.permute.xlu1 %615  ;;  %v10635_v37 = vmul.f32 %v10031_v57, %v10601_v24  ;;  %v10639_v33 = vmul.f32 %v10045_v63, %v10601_v24 }
  0xd5   : > { %18978 = vst [vmem:[#allocation2_spill] sm:$0xff] %v10613_v29  ;;  %v1550_v11 = vsel %vm1537_vm1, %v18983_v40, %v18981_v1  ;;  %v10643_v4 = vmul.f32 %v10049_v2, %v10546_v61  ;;  %v18988_v43 = vrot.slane %v10354_v59, 2  ;;  %v10649_v47 = vadd.f32 %v1145_v35, %v10509_v25 }
  0xd6   : > { %18984 = vst [vmem:[#allocation29_spill] sm:$0xff] %v10629_v38  ;;  %v10654_v55 = vmul.f32 %v10043_v62, %v10601_v24  ;;  %v10658_v1 = vmul.f32 %v10091_v18, %v10601_v24  ;;  %v10662_v40 = vmul.f32 %v10093_v19, %v18991_v53  ;;  %v1013_v35 = vmul.f32 %v10031_v57, %v10631_v49 }
  0xd7   : > { %18985 = vst [vmem:[#allocation17_spill] sm:$0xff] %v10635_v37  ;;  %v1572_v50 = vsel %vm1537_vm1, %v1569_v36, %v18988_v43  ;;  %v18992_v43 = vrot.slane %v10394_v58, 2  ;;  %v10669_v23 = vadd.f32 %v1550_v11, %v1338_v46  ;;  %v10682_v29 = vmul.f32 %v10100_v22, %v18991_v53 }
  0xd8   : > { %18986 = vst [vmem:[#allocation6_spill] sm:$0xff] %v10639_v33  ;;  %v1756_v26 = vadd.f32 %v1572_v50, %v1349_v42  ;;  %v1834_v42 = vmul.f32 %v10091_v18, %v10631_v49  ;;  %v1974_v50 = vmul.f32 %v10045_v63, %v10631_v49  ;;  %v10693_v51 = vmul.f32 %v10045_v63, %v10273_v31 }
  0xd9   : > { %18987 = vst [vmem:[#allocation44_spill] sm:$0xff] %v10643_v4  ;;  %v2528_v25 = vsel %vm1537_vm1, %v2525_v20, %v18992_v43  ;;  %v1168_v43 = vrot.slane %v1013_v35, 1  ;;  %v18994_v35 = vrot.slane %v10635_v37, 1  ;;  %v1570_v61 = vsel %vm1537_vm1, %v1567_v6, %v1569_v36 }
  0xda   : > { %18989 = vst [vmem:[#allocation45_spill] sm:$0xff] %v10649_v47  ;;  %v10671_v48 = vadd.f32 %v2528_v25, %v2309_v3  ;;  %v873_v3 = vmul.f32 %v10062_v8, %v10631_v49  ;;  %v1901_v46 = vadd.f32 %v1834_v42, %v1756_v26  ;;  %v2125_v11 = vrot.slane %v1974_v50, 1 }
  0xdb   : > { %18990 = vst [vmem:[#allocation46_spill] sm:$0xff] %v10658_v1  ;;  %v10688_v25 = vmul.f32 %v10108_v30, %v18991_v53  ;;  %v1171_v58 = vsel %vm1130_vm0, %v1168_v43, %v18994_v35  ;;  %v10702_v26 = vmul.f32 %v10049_v2, %v10273_v31  ;;  %v18996_v50 = vrot.slane %v10639_v33, 1 }
  0xdc   : > { %18993 = vst [vmem:[#allocation28_spill] sm:$0xff] %v10671_v48  ;;  %v10698_v48 = vpop.permute.xlu0 %610  ;;  %v10704_v42 = vadd.f32 %v1171_v58, %v873_v3  ;;  %v1755_v37 = vadd.f32 %v1570_v61, %v1348_v34  ;;  %v1899_v35 = vadd.f32 %v10384_v17, %v1754_v9  ;;  %v18997_v47 = vrot.slane %v10643_v4, 2  ;;  %v505_v58 = vld [vmem:[%s9967_s30 + $0x1f8] sm:$0xff] }
  0xdd   : > { %18995 = vst [vmem:[#allocation47_spill] sm:$0xff] %v10698_v48  ;;  %v2128_v32 = vsel %vm1130_vm0, %v2125_v11, %v18996_v50  ;;  %v1012_v50 = vmul.f32 %v10031_v57, %v10698_v48  ;;  %v10723_v36 = vmul.f32 %v10043_v62, %v10698_v48  ;;  %v2783_v34 = vmul.f32 %v10108_v30, %v10273_v31 }
  0xde   : > { %v10710_v38 = vadd.f32 %v2128_v32, %v1901_v46  ;;  %v2526_v1 = vsel %vm1537_vm1, %v18997_v47, %v2525_v20  ;;  %v2923_v17 = vmul.f32 %v10093_v19, %v10273_v31  ;;  %v1833_v61 = vmul.f32 %v10091_v18, %v10698_v48  ;;  %v507_v32 = vld [vmem:[%s9967_s30 + $0x208] sm:$0xff]  ;;  %v506_v20 = vld [vmem:[%s9967_s30 + $0x200] sm:$0xff]  ;;  %835 = vperm.xlu0 %9849, %v505_v58  }
  0xdf   : > { %v10717_v3 = vadd.f32 %v2526_v1, %v2308_v27  ;;  %v1973_v6 = vmul.f32 %v10045_v63, %v10698_v48  ;;  %v9811_v27 = vld [vmem:[%s18339_s3 + $0x10] sm:$0xff]  ;;  %v3329_v47 = vmul.f32 %v10100_v22, %v10273_v31  ;;  %v1166_v1 = vrot.slane %v1012_v50, 1  ;;  %845 = vperm.xlu2 %9851, %v507_v32   ;;  %840 = vperm.xlu1 %9850, %v506_v20  }
  0xe0   : > { %v872_v4 = vmul.f32 %v10062_v8, %v10698_v48  ;;  %v1900_v30 = vadd.f32 %v1833_v61, %v1755_v37  ;;  %9838 = vmatpush.bf16.msra.mxu2 %v9811_v27  ;;  %v10748_v9 = vmul.f32 %v10093_v19, %v10399_v13  ;;  %v18999_v50 = vrot.slane %v10350_v5, 1 }
  0xe1   : > { %18998 = vst [vmem:[#allocation48_spill] sm:$0xff] %v10717_v3  ;;  %v2123_v33 = vrot.slane %v1973_v6, 1  ;;  %v1169_v32 = vsel %vm1130_vm0, %v1166_v1, %v1168_v43  ;;  %v19000_v20 = vrot.slane %v10723_v36, 2  ;;  %v19001_v3 = vrot.slane %v10354_v59, 2 }
  0xe2   : > { %v1167_v46 = vsel %vm1130_vm0, %v18999_v50, %v1166_v1  ;;  %v10760_v61 = vadd.f32 %v1169_v32, %v872_v4  ;;  %v19002_v58 = vrot.slane %v10365_v54, 1  ;;  %v3061_v27 = vrot.slane %v2923_v17, 1  ;;  %v19005_v4 = vld [vmem:[#allocation8_spill] sm:$0xff] }
  0xe3   : > { %v1574_v31 = vsel %vm1537_vm1, %v19001_v3, %v19000_v20  ;;  %v1350_v37 = vadd.f32 %v1167_v46, %v10372_v39  ;;  %v2126_v5 = vsel %vm1130_vm0, %v2123_v33, %v2125_v11  ;;  %v3467_v50 = vrot.slane %v3329_v47, 2  ;;  %v19010_v46 = vld [vmem:[#allocation9_spill] sm:$0xff] }
  0xe4   : > { %v2124_v6 = vsel %vm1130_vm0, %v19002_v58, %v2123_v33  ;;  %v10768_v43 = vadd.f32 %v2126_v5, %v1900_v30  ;;  %v10772_v59 = vmul.f32 %v10100_v22, %v10399_v13  ;;  %v19004_v39 = vrot.slane %v10536_v41, 1 }
  0xe5   : > { %v10766_v19 = vadd.f32 %v2124_v6, %v1899_v35  ;;  %v10774_v3 = vadd.f32 %v1574_v31, %v1350_v37  ;;  %v19006_v54 = vrot.slane %v19005_v4, 1  ;;  %v19007_v33 = vrot.slane %v10434_v21, 1 }
  0xe6   : > { %v19008_v11 = vmov %v19004_v39  ;;  %v18412_v30 = vrot.slane %v10748_v9, 1  ;;  %v2847_v31 = vadd.f32 %v10575_v45, %v10487_v14  ;;  %v19009_v47 = vrot.slane %v10540_v56, 2 }
  0xe7   : > { %19003 = vst [vmem:[#allocation49_spill] sm:$0xff] %v10766_v19  ;;  %v2100_v1 = vsel %vm1130_vm0, %v19006_v54, %v19004_v39  ;;  %v2102_v35 = vsel %vm1130_vm0, %v19008_v11, %v19007_v33  ;;  %v19011_v32 = vrot.slane %v19010_v46, 2  ;;  %v19012_v37 = vrot.slane %v10462_v16, 2  ;;  %v19016_v39 = vld [vmem:[#allocation16_spill] sm:$0xff]  ;;  %v10816_v33 = vld [vmem:[%s18338_s2] ss:$0 sm:$0xff] }
  0xe8   : > { %v2298_v17 = vadd.f32 %v2100_v1, %v10380_v7  ;;  %v2299_v22 = vadd.f32 %v2102_v35, %v10571_v0  ;;  %v19013_v41 = vmov %v19009_v47  ;;  %v2848_v7 = vadd.f32 %v10482_v15, %v10490_v44 }
  0xe9   : > { %v2506_v20 = vsel %vm1537_vm1, %v19011_v32, %v19009_v47  ;;  %v2508_v58 = vsel %vm1537_vm1, %v19013_v41, %v19012_v37  ;;  %v19014_v0 = vrot.slane %v10473_v10, 1  ;;  %v19015_v6 = vrot.slane %v10581_v60, 1  ;;  %v19024_v32 = vld [vmem:[#allocation18_spill] sm:$0xff] }
  0xea   : > { %v2704_v45 = vadd.f32 %v2506_v20, %v2298_v17  ;;  %v2705_v5 = vadd.f32 %v2508_v58, %v2299_v22  ;;  %v19017_v4 = vrot.slane %v19016_v39, 1  ;;  %v19020_v60 = vrot.slane %v10662_v40, 1  ;;  %v19030_v39 = vld [vmem:[#allocation14_spill] sm:$0xff] }
  0xeb   : > { %v3058_v14 = vsel %vm1130_vm0, %v19015_v6, %v19014_v0  ;;  %v19018_v54 = vmov %v19014_v0  ;;  %v19021_v17 = vrot.slane %v10504_v12, 2  ;;  %v19022_v10 = vrot.slane %v10611_v28, 2 }
  0xec   : > { %v3060_v1 = vsel %vm1130_vm0, %v19018_v54, %v19017_v4  ;;  %v3258_v56 = vadd.f32 %v3058_v14, %v2847_v31  ;;  %v19019_v15 = vmov %v19017_v4  ;;  %v3064_v11 = vsel %vm1130_vm0, %v3061_v27, %v19020_v60  ;;  %v19023_v31 = vld [vmem:[#allocation20_spill] sm:$0xff] }
  0xed   : > { %v3062_v44 = vsel %vm1130_vm0, %v19019_v15, %v3061_v27  ;;  %v3259_v35 = vadd.f32 %v3060_v1, %v2848_v7  ;;  %v3464_v22 = vsel %vm1537_vm1, %v19022_v10, %v19021_v17  ;;  %v2849_v47 = vadd.f32 %v19023_v31, %v2704_v45  ;;  %v508_v31 = vld [vmem:[%s9967_s30 + $0x210] sm:$0xff] }
  0xee   : > { %v2850_v46 = vadd.f32 %v2783_v34, %v2705_v5  ;;  %v19025_v20 = vrot.slane %v19024_v32, 2  ;;  %v19026_v37 = vmov %v19021_v17  ;;  %v3664_v27 = vadd.f32 %v3464_v22, %v3258_v56  ;;  %v19029_v34 = vld [vmem:[#allocation19_spill] sm:$0xff]  ;;  %v510_v22 = vld [vmem:[%s9967_s30 + $0x220] sm:$0xff]  ;;  %850 = vperm.xlu0 %9849, %v508_v31  }
  0xef   : > { %v19028_v28 = vrot.slane %v10682_v29, 2  ;;  %v1890_v14 = vadd.f32 %v19029_v34, %v10669_v23  ;;  %v3260_v45 = vadd.f32 %v3062_v44, %v2849_v47  ;;  %v19031_v4 = vrot.slane %v19030_v39, 1  ;;  %v19036_v44 = vld [vmem:[#allocation15_spill] sm:$0xff]  ;;  %1809 = vperm.xlu2 %9851, %v510_v22   ;;  %v19048_v22 = vld [vmem:[#allocation24_spill] sm:$0xff] }
  0xf0   : > { %v3466_v41 = vsel %vm1537_vm1, %v19026_v37, %v19025_v20  ;;  %v19027_v58 = vmov %v19025_v20  ;;  %v3261_v5 = vadd.f32 %v3064_v11, %v2850_v46  ;;  %v3735_v12 = vadd.f32 %v10816_v33, %v3664_v27 }
  0xf1   : > { %v3468_v7 = vsel %vm1537_vm1, %v19027_v58, %v3467_v50  ;;  %v3470_v0 = vsel %vm1537_vm1, %v3467_v50, %v19028_v28  ;;  %v3665_v6 = vadd.f32 %v3466_v41, %v3259_v35  ;;  %v19032_v54 = vrot.slane %v10434_v21, 1  ;;  %v19035_v35 = vld [vmem:[#allocation39_spill] sm:$0xff]  ;;  %v509_v21 = vld [vmem:[%s9967_s30 + $0x218] sm:$0xff] }
  0xf2   : > { %v19033_v15 = vrot.slane %v10693_v51, 1  ;;  %v19034_v50 = vmov %v19031_v4  ;;  %v19037_v11 = vrot.slane %v19036_v44, 2  ;;  %v19038_v17 = vrot.slane %v10462_v16, 2  ;;  %990 = vperm.xlu1 %9850, %v509_v21   ;;  %v19041_v16 = vld [vmem:[#allocation23_spill] sm:$0xff] }
  0xf3   : > { %v2104_v1 = vsel %vm1130_vm0, %v19032_v54, %v19031_v4  ;;  %v3736_v56 = vadd.f32 %v10816_v33, %v3665_v6  ;;  %v3666_v47 = vadd.f32 %v3468_v7, %v3260_v45  ;;  %v3667_v46 = vadd.f32 %v3470_v0, %v3261_v5 }
  0xf4   : > { %v2106_v60 = vsel %vm1130_vm0, %v19034_v50, %v19033_v15  ;;  %v2300_v23 = vadd.f32 %v2104_v1, %v19035_v35  ;;  %v2510_v10 = vsel %vm1537_vm1, %v19038_v17, %v19037_v11  ;;  %v3802_v32 = vmax.f32 %v3735_v12, 0.0  ;;  %v19045_v50 = vld [vmem:[#allocation26_spill] sm:$0xff] }
  0xf5   : > { %v2301_v20 = vadd.f32 %v2106_v60, %v1890_v14  ;;  %v3803_v37 = vmax.f32 %v3736_v56, 0.0  ;;  %v19039_v41 = vrot.slane %v10702_v26, 2  ;;  %v19040_v27 = vmov %v19037_v11 }
  0xf6   : > { %v2706_v28 = vadd.f32 %v2510_v10, %v2300_v23  ;;  %v19042_v6 = vrot.slane %v19041_v16, 1  ;;  %v19043_v34 = vrot.slane %v10662_v40, 1  ;;  %v3737_v7 = vadd.f32 %v10816_v33, %v3666_v47 }
  0xf7   : > { %v2512_v58 = vsel %vm1537_vm1, %v19040_v27, %v19039_v41  ;;  %v3738_v0 = vadd.f32 %v10816_v33, %v3667_v46  ;;  %v3869_v14 = vpack.c.bf16 %v3802_v32, %v3802_v32  ;;  %v18408_v5 = vrot.slane %v10772_v59, 2 }
  0xf8   : > { %v3066_v39 = vsel %vm1130_vm0, %v19043_v34, %v19042_v6  ;;  %v2707_v45 = vadd.f32 %v2512_v58, %v2301_v20  ;;  %v3870_v12 = vpack.c.bf16 %v3803_v37, %v3803_v37  ;;  %v2851_v4 = vadd.f32 %v10688_v25, %v2706_v28 }
  0xf9   : > { %v19044_v54 = vmov %v19042_v6  ;;  %v3804_v1 = vmax.f32 %v3737_v7, 0.0  ;;  %v3805_v56 = vmax.f32 %v3738_v0, 0.0  ;;  %v4002_v15 = vunpack.c.l.b16 %v3869_v14  ;;  %v19053_v6 = vld [vmem:[#allocation13_spill] sm:$0xff]  ;;  %v10918_v14 = vpop.permute.xlu2 %635 }
  0xfa   : > { %v3068_v40 = vsel %vm1130_vm0, %v19044_v54, %v18412_v30  ;;  %v2852_v60 = vadd.f32 %v19045_v50, %v2707_v45  ;;  %v10886_v35 = vmul.f32 %v10049_v2, %v10601_v24  ;;  %v10890_v23 = vmul.f32 %v10043_v62, %v10631_v49 }
  0xfb   : > { %v4003_v25 = vunpack.c.l.b16 %v3870_v12  ;;  %v3262_v44 = vadd.f32 %v3066_v39, %v2851_v4  ;;  %v3871_v11 = vpack.c.bf16 %v3804_v1, %v3804_v1  ;;  %v10892_v17 = vpack.c.bf16 %v3805_v56, %v3805_v56  ;;  %v19055_v39 = vld [vmem:[#allocation37_spill] sm:$0xff]  ;;  %v19057_v4 = vld [vmem:[#allocation42_spill] sm:$0xff] }
  0xfc   : > { %19046 = vst [vmem:[#allocation8_spill] sm:$0xff] %v10886_v35  ;;  %v3263_v10 = vadd.f32 %v3068_v40, %v2852_v60  ;;  %v19049_v21 = vrot.slane %v19048_v22, 2  ;;  %v19050_v31 = vrot.slane %v10682_v29, 2  ;;  %v10901_v46 = vmul.f32 %v10049_v2, %v10631_v49 }
  0xfd   : > { %19047 = vst [vmem:[#allocation9_spill] sm:$0xff] %v10892_v17  ;;  %v10903_v32 = vpack.c.b16 %v4003_v25, %v4002_v15  ;;  %v1577_v27 = vrot.slane %v10654_v55, 2  ;;  %v4004_v58 = vunpack.c.l.b16 %v3871_v11  ;;  %v18406_v29 = vunpack.c.l.b16 %v10892_v17 }
  0xfe   : > { %v3472_v47 = vsel %vm1537_vm1, %v19050_v31, %v19049_v21  ;;  %v19052_v20 = vmov %v19049_v21  ;;  %v18407_v16 = vrot.slane %v10886_v35, 2  ;;  %v19054_v34 = vrot.slane %v19053_v6, 2 }
  0xff   : > { %19051 = vst [vmem:[#allocation16_spill] sm:$0xff] %v10903_v32  ;;  %v3474_v37 = vsel %vm1537_vm1, %v19052_v20, %v18408_v5  ;;  %v3668_v41 = vadd.f32 %v3472_v47, %v3262_v44  ;;  %v19056_v7 = vrot.slane %v19055_v39, 2  ;;  %v4098_v45 = vshll.u32 %v10903_v32, 16  ;;  %v511_v5 = vld [vmem:[%s9967_s30 + $0x228] sm:$0xff] }
 0x100   : > { %v3669_v28 = vadd.f32 %v3474_v37, %v3263_v10  ;;  %v1575_v40 = vrot.slane %v10890_v23, 2  ;;  %v10926_v1 = vpack.c.b16 %v18406_v29, %v4004_v58  ;;  %v1825_v15 = vmul.f32 %v10091_v18, %v18991_v53  ;;  %v10951_v37 = vpop.permute.xlu1 %630  ;;  %v513_v29 = vld [vmem:[%s9967_s30 + $0x238] sm:$0xff]  ;;  %1814 = vperm.xlu0 %9849, %v511_v5  }
 0x101   : > { %v1554_v0 = vsel %vm1537_vm1, %v19056_v7, %v19054_v34  ;;  %v3739_v12 = vadd.f32 %v10816_v33, %v3668_v41  ;;  %v2531_v50 = vrot.slane %v10901_v46, 2  ;;  %v4100_v60 = vrot.slane %v4098_v45, 1  ;;  %19061 = vst [vmem:[#allocation14_spill] sm:$0xff] %v10951_v37  ;;  %2771 = vperm.xlu2 %9851, %v513_v29  }
 0x102   : > { %v1747_v54 = vadd.f32 %v1554_v0, %v19057_v4  ;;  %19058 = vst [vmem:[#allocation20_spill] sm:$0xff] %v10926_v1  ;;  %v3740_v56 = vadd.f32 %v10816_v33, %v3669_v28  ;;  %v10934_v44 = vmul.f32 %v10031_v57, %v10918_v14  ;;  %v4096_v11 = vshrl.u32 %v10903_v32, 16  ;;  %v11084_v32 = vpop.permute.xlu2 %650 }
 0x103   : > { %v3806_v25 = vmax.f32 %v3739_v12, 0.0  ;;  %v4103_v23 = vshll.u32 %v10926_v1, 16  ;;  %v10940_v22 = vmul.f32 %v10045_v63, %v10918_v14  ;;  %v1578_v20 = vsel %vm1537_vm1, %v1575_v40, %v1577_v27 }
 0x104   : > { %v3807_v10 = vmax.f32 %v3740_v56, 0.0  ;;  %v4101_v31 = vor.u32 %v4100_v60, %v4096_v11  ;;  %v10955_v41 = vmul.f32 %v10045_v63, %v18991_v53  ;;  %v10959_v58 = vmul.f32 %v10049_v2, %v10698_v48 }
 0x105   : > { %v10942_v21 = vpack.c.bf16 %v3806_v25, %v3806_v25  ;;  %v10944_v47 = vrot.slane %v4103_v23, 1  ;;  %v1759_v28 = vadd.f32 %v1578_v20, %v10704_v42  ;;  %v2534_v6 = vsel %vm1537_vm1, %v2531_v50, %v18407_v16  ;;  %v512_v16 = vld [vmem:[%s9967_s30 + $0x230] sm:$0xff] }
 0x106   : > { %v10946_v46 = vpack.c.bf16 %v3807_v10, %v3807_v10  ;;  %19062 = vst [vmem:[#allocation39_spill] sm:$0xff] %v10959_v58  ;;  %v10970_v45 = vadd.f32 %v2534_v6, %v10710_v38  ;;  %v10974_v12 = vmul.f32 %v10049_v2, %v18991_v53  ;;  %v1016_v42 = vmul.f32 %v10031_v57, %v10951_v37 }
 0x107   : > { %19059 = vst [vmem:[#allocation18_spill] sm:$0xff] %v10942_v21  ;;  %v4106_v34 = vsel %vm4094_vm2, %v4101_v31, %v10944_v47  ;;  %v18405_v7 = vunpack.c.l.b16 %v10942_v21  ;;  %v1837_v4 = vmul.f32 %v10091_v18, %v10951_v37  ;;  %v1977_v56 = vmul.f32 %v10045_v63, %v10951_v37  ;;  %1954 = vperm.xlu1 %9850, %v512_v16  }
 0x108   : > { %19060 = vst [vmem:[#allocation19_spill] sm:$0xff] %v10946_v46  ;;  %v18404_v0 = vunpack.c.l.b16 %v10946_v46  ;;  %9323 = vmatmul.msk.bf16.vlgmr.msra.gmra.mxu0 %vm4345_vm3, %v4106_v34  ;;  %v10983_v60 = vadd.f32 %v1825_v15, %v1747_v54  ;;  %v18414_v38 = vrot.slane %v10934_v44, 1  ;;  %v18413_v25 = vrot.slane %v10940_v22, 1  ;;  %v19079_v46 = vld [vmem:[#allocation6_spill] sm:$0xff] }
 0x109   : > { %19063 = vst [vmem:[#allocation15_spill] sm:$0xff] %v10970_v45  ;;  %v18410_v11 = vrot.slane %v10959_v58, 2  ;;  %v1174_v23 = vrot.slane %v1016_v42, 1  ;;  %v1904_v10 = vadd.f32 %v1837_v4, %v1759_v28  ;;  %v2131_v31 = vrot.slane %v1977_v56, 1 }
 0x10a   : > { %v10991_v53 = vpack.c.b16 %v18404_v0, %v18405_v7  ;;  %v2107_v54 = vrot.slane %v10955_v41, 1  ;;  %v18409_v15 = vrot.slane %v10926_v1, 1  ;;  %v876_v6 = vmul.f32 %v10062_v8, %v10951_v37  ;;  %v11013_v7 = vpop.permute.xlu0 %625 }
 0x10b   : > { %v19065_v34 = vrot.slane %v19055_v39, 2  ;;  %v19066_v0 = vrot.slane %v10526_v52, 2  ;;  %v1177_v28 = vsel %vm1130_vm0, %v1174_v23, %v18414_v38  ;;  %v2134_v41 = vsel %vm1130_vm0, %v2131_v31, %v18413_v25  ;;  %19068 = vst [vmem:[#allocation26_spill] sm:$0xff] %v11013_v7 }
 0x10c   : > { %19064 = vst [vmem:[#allocation23_spill] sm:$0xff] %v10991_v53  ;;  %v18411_v20 = vrot.slane %v10991_v53, 1  ;;  %v19067_v4 = vrot.slane %v10723_v36, 2  ;;  %v1355_v39 = vadd.f32 %v1177_v28, %v876_v6  ;;  %v11029_v36 = vmul.f32 %v10043_v62, %v10951_v37 }
 0x10d   : > { %v1552_v42 = vsel %vm1537_vm1, %v19066_v0, %v19065_v34  ;;  %v11020_v0 = vadd.f32 %v2134_v41, %v1904_v10  ;;  %v2532_v6 = vsel %vm1537_vm1, %v18410_v11, %v2531_v50  ;;  %v11043_v28 = vmul.f32 %v10043_v62, %v11013_v7  ;;  %v19073_v50 = vld [vmem:[#allocation45_spill] sm:$0xff] }
 0x10e   : > { %v1576_v56 = vsel %vm1537_vm1, %v19067_v4, %v1575_v40  ;;  %v4828_v52 = vsel %vm1130_vm0, %v18409_v15, %v18411_v20  ;;  %v19069_v40 = vld [vmem:[#allocation46_spill] sm:$0xff]  ;;  %v11037_v10 = vadd.f32 %v2532_v6, %v10768_v43  ;;  %v1836_v41 = vmul.f32 %v10091_v18, %v11013_v7 }
 0x10f   : > { %v1758_v34 = vadd.f32 %v1576_v56, %v10760_v61  ;;  %9394 = vmatmul.msk.bf16.vlgmr.msra.gmra.mxu2 %vm4345_vm3, %v4828_v52  ;;  %v1902_v4 = vadd.f32 %v19069_v40, %v10774_v3  ;;  %v1015_v61 = vmul.f32 %v10031_v57, %v11013_v7  ;;  %v19071_v3 = vld [vmem:[#allocation22_spill] sm:$0xff]  ;;  %v1746_v29 = vadd.f32 %v1552_v42, %v19073_v50  ;;  %v19074_v40 = vld [vmem:[#allocation32_spill] sm:$0xff] }
 0x110   : > { %19070 = vst [vmem:[#allocation24_spill] sm:$0xff] %v11037_v10  ;;  %v19072_v56 = vrot.slane %v19071_v3, 1  ;;  %v1824_v43 = vmul.f32 %v10091_v18, %v19074_v40  ;;  %v1976_v6 = vmul.f32 %v10045_v63, %v11013_v7  ;;  %v11057_v15 = vmul.f32 %v10043_v62, %v10918_v14  ;;  %v19076_v40 = vld [vmem:[#allocation17_spill] sm:$0xff] }
 0x111   : > { %v1172_v11 = vrot.slane %v1015_v61, 1  ;;  %v1579_v16 = vrot.slane %v11043_v28, 2  ;;  %v1903_v20 = vadd.f32 %v1836_v41, %v1758_v34  ;;  %v11062_v3 = vmul.f32 %v10049_v2, %v10918_v14  ;;  %v19078_v41 = vld [vmem:[#allocation29_spill] sm:$0xff] }
 0x112   : > { %v2110_v52 = vsel %vm1130_vm0, %v2107_v54, %v19072_v56  ;;  %v11066_v42 = vmul.f32 %v10049_v2, %v10951_v37  ;;  %v875_v56 = vmul.f32 %v10062_v8, %v11013_v7  ;;  %v2129_v5 = vrot.slane %v1976_v6, 1  ;;  %v11157_v35 = vpop.permute.xlu0 %640 }
 0x113   : > { %19075 = vst [vmem:[#allocation13_spill] sm:$0xff] %v11062_v3  ;;  %v1581_v50 = vrot.slane %v11029_v36, 2  ;;  %v19077_v30 = vrot.slane %v19076_v40, 1  ;;  %v1175_v34 = vsel %vm1130_vm0, %v1172_v11, %v1174_v23  ;;  %v1580_v28 = vsel %vm1537_vm1, %v1577_v27, %v1579_v16 }
 0x114   : > { %v1354_v38 = vadd.f32 %v1175_v34, %v875_v56  ;;  %v19080_v21 = vrot.slane %v19079_v46, 1  ;;  %v2132_v6 = vsel %vm1130_vm0, %v2129_v5, %v2131_v31  ;;  %v2513_v36 = vrot.slane %v10974_v12, 2  ;;  %v11097_v12 = vld [vmem:[%s18337_s1 + $0x8] ss:$0 sm:$0xff]  ;;  %19094 = vst [vmem:[#allocation45_spill] sm:$0xff] %v11157_v35 }
 0x115   : > { %v1173_v61 = vsel %vm1130_vm0, %v19077_v30, %v1172_v11  ;;  %v1891_v40 = vadd.f32 %v1824_v43, %v1746_v29  ;;  %v2314_v11 = vadd.f32 %v2132_v6, %v1903_v20  ;;  %v19082_v55 = vrot.slane %v10693_v51, 1  ;;  %v19084_v31 = vld [vmem:[#allocation27_spill] sm:$0xff]  ;;  %v11104_v20 = vpop.permute.xlu1 %645  ;;  %v19087_v43 = vld [vmem:[#allocation33_spill] sm:$0xff] }
 0x116   : > { %v1353_v25 = vadd.f32 %v1173_v61, %v19078_v41  ;;  %v2130_v17 = vsel %vm1130_vm0, %v19080_v21, %v2129_v5  ;;  %v18421_v23 = vrot.slane %v11057_v15, 2  ;;  %v2537_v46 = vrot.slane %v11066_v42, 2  ;;  %v19083_v21 = vld [vmem:[#allocation25_spill] sm:$0xff]  ;;  %19085 = vst [vmem:[#allocation42_spill] sm:$0xff] %v11104_v20  ;;  %v19090_v42 = vld [vmem:[#allocation12_spill] sm:$0xff] }
 0x117   : > { %v11086_v30 = vadd.f32 %v2130_v17, %v1902_v4  ;;  %v2108_v27 = vsel %vm1130_vm0, %v19082_v55, %v2107_v54  ;;  %v18420_v61 = vrot.slane %v19083_v21, 2  ;;  %v11101_v17 = vmul.f32 %v11097_v12, %v19084_v31 }
 0x118   : > { %v1760_v56 = vadd.f32 %v1580_v28, %v1353_v25  ;;  %v2303_v51 = vadd.f32 %v2110_v52, %v10983_v60  ;;  %v18422_v54 = vrot.slane %v11062_v3, 2  ;;  %v11109_v25 = vmul.f32 %v10031_v57, %v11084_v32 }
 0x119   : > { %19081 = vst [vmem:[#allocation37_spill] sm:$0xff] %v11086_v30  ;;  %v11113_v4 = vmul.f32 %v10049_v2, %v11013_v7  ;;  %v1584_v29 = vsel %vm1537_vm1, %v1581_v50, %v18421_v23  ;;  %v2302_v5 = vadd.f32 %v2108_v27, %v1891_v40  ;;  %v11121_v60 = vmul.f32 %v10045_v63, %v11084_v32  ;;  %v514_v7 = vld [vmem:[%s9967_s30 + $0x240] sm:$0xff] }
 0x11a   : > { %v1762_v52 = vadd.f32 %v1584_v29, %v1355_v39  ;;  %v1838_v34 = vmul.f32 %v10091_v18, %v10918_v14  ;;  %v2516_v28 = vsel %vm1537_vm1, %v2513_v36, %v18420_v61  ;;  %v2540_v41 = vsel %vm1537_vm1, %v2537_v46, %v18422_v54  ;;  %v19089_v29 = vld [vmem:[#allocation35_spill] sm:$0xff]  ;;  %2776 = vperm.xlu0 %9849, %v514_v7  }
 0x11b   : > { %19086 = vst [vmem:[#allocation46_spill] sm:$0xff] %v11113_v4  ;;  %v1019_v6 = vmul.f32 %v10031_v57, %v11104_v20  ;;  %v2709_v40 = vadd.f32 %v2516_v28, %v2303_v51  ;;  %v11134_v55 = vadd.f32 %v2540_v41, %v11020_v0  ;;  %v1840_v39 = vmul.f32 %v10091_v18, %v11104_v20  ;;  %v19091_v41 = vld [vmem:[#allocation11_spill] sm:$0xff] }
 0x11c   : > { %v1980_v27 = vmul.f32 %v10045_v63, %v11104_v20  ;;  %v2787_v61 = vmul.f32 %v19090_v42, %v19089_v29  ;;  %v879_v0 = vmul.f32 %v10062_v8, %v11104_v20  ;;  %v2927_v3 = vmul.f32 %v19091_v41, %v19089_v29 }
 0x11d   : > { %19088 = vst [vmem:[#allocation22_spill] sm:$0xff] %v11134_v55  ;;  %v1180_v30 = vrot.slane %v1019_v6, 1  ;;  %v1907_v51 = vadd.f32 %v1840_v39, %v1762_v52  ;;  %v3333_v55 = vmul.f32 %v11097_v12, %v19089_v29  ;;  %v19092_v23 = vrot.slane %v10702_v26, 2 }
 0x11e   : > { %v2137_v28 = vrot.slane %v1980_v27, 1  ;;  %v19093_v6 = vrot.slane %v11109_v25, 1  ;;  %v19095_v39 = vrot.slane %v11121_v60, 1  ;;  %v1582_v45 = vsel %vm1537_vm1, %v1579_v16, %v1581_v50 }
 0x11f   : > { %v2514_v54 = vsel %vm1537_vm1, %v19092_v23, %v2513_v36  ;;  %v1761_v26 = vadd.f32 %v1582_v45, %v1354_v38  ;;  %v1905_v58 = vadd.f32 %v1838_v34, %v1760_v56  ;;  %v19096_v36 = vrot.slane %v11113_v4, 2 }
 0x120   : > { %v1183_v19 = vsel %vm1130_vm0, %v1180_v30, %v19093_v6  ;;  %v2708_v10 = vadd.f32 %v2514_v54, %v2302_v5  ;;  %v2140_v27 = vsel %vm1130_vm0, %v2137_v28, %v19095_v39  ;;  %v515_v6 = vld [vmem:[%s9967_s30 + $0x248] sm:$0xff]  ;;  %v1018_v5 = vmul.f32 %v10031_v57, %v11157_v35 }
 0x121   : > { %v11159_v52 = vadd.f32 %v1183_v19, %v879_v0  ;;  %v11165_v29 = vadd.f32 %v2140_v27, %v1907_v51  ;;  %v2538_v23 = vsel %vm1537_vm1, %v19096_v36, %v2537_v46  ;;  %v2786_v19 = vmul.f32 %v19090_v42, %v10399_v13  ;;  %2916 = vperm.xlu1 %9850, %v515_v6  }
 0x122   : > { %v11174_v54 = vadd.f32 %v2538_v23, %v2314_v11  ;;  %v11180_v16 = vmul.f32 %v10043_v62, %v11157_v35  ;;  %v877_v38 = vmul.f32 %v10062_v8, %v10918_v14  ;;  %v1839_v50 = vmul.f32 %v10091_v18, %v11157_v35 }
 0x123   : > { %v1979_v13 = vmul.f32 %v10045_v63, %v11157_v35  ;;  %v2854_v11 = vadd.f32 %v2787_v61, %v2709_v40  ;;  %v3069_v46 = vrot.slane %v2927_v3, 1  ;;  %v1178_v56 = vrot.slane %v1018_v5, 1 }
 0x124   : > { %19097 = vst [vmem:[#allocation32_spill] sm:$0xff] %v11174_v54  ;;  %v18430_v34 = vrot.slane %v11180_v16, 2  ;;  %v3475_v0 = vrot.slane %v3333_v55, 2  ;;  %v878_v51 = vmul.f32 %v10062_v8, %v11157_v35  ;;  %v1906_v39 = vadd.f32 %v1839_v50, %v1761_v26 }
 0x125   : > { %v2135_v27 = vrot.slane %v1979_v13, 1  ;;  %v2853_v36 = vadd.f32 %v2786_v19, %v2708_v10  ;;  %v19098_v23 = vrot.slane %v10934_v44, 1  ;;  %v1181_v45 = vsel %vm1130_vm0, %v1178_v56, %v1180_v30 }
 0x126   : > { %v19099_v7 = vrot.slane %v11057_v15, 2  ;;  %v11201_v40 = vadd.f32 %v1181_v45, %v878_v51  ;;  %v19100_v55 = vrot.slane %v10940_v22, 1  ;;  %v11209_v44 = vmul.f32 %v10043_v62, %v11104_v20 }
 0x127   : > { %v1179_v6 = vsel %vm1130_vm0, %v19098_v23, %v1178_v56  ;;  %v2138_v10 = vsel %vm1130_vm0, %v2135_v27, %v2137_v28  ;;  %v11213_v30 = vmul.f32 %v10049_v2, %v11104_v20  ;;  %v4107_v22 = vshrl.u32 %v10926_v1, 16 }
 0x128   : > { %v1586_v3 = vsel %vm1537_vm1, %v19099_v7, %v18430_v34  ;;  %v1356_v61 = vadd.f32 %v1179_v6, %v877_v38  ;;  %v2136_v26 = vsel %vm1130_vm0, %v19100_v55, %v2135_v27  ;;  %v11217_v19 = vadd.f32 %v2138_v10, %v1906_v39  ;;  %v11237_v39 = vpop.permute.xlu2 %665 }
 0x129   : > { %v11215_v15 = vadd.f32 %v2136_v26, %v1905_v58  ;;  %v4111_v45 = vshll.u32 %v10991_v53, 16  ;;  %v19102_v28 = vrot.slane %v10748_v9, 1  ;;  %v11228_v50 = vmul.f32 %v10043_v62, %v11084_v32 }
 0x12a   : > { %v11219_v5 = vadd.f32 %v1586_v3, %v1356_v61  ;;  %v11232_v58 = vmul.f32 %v10049_v2, %v11084_v32  ;;  %v19103_v13 = vrot.slane %v19087_v43, 1  ;;  %v4109_v27 = vor.u32 %v4107_v22, %v10944_v47  ;;  %v19106_v47 = vld [vmem:[#allocation34_spill] sm:$0xff] }
 0x12b   : > { %19101 = vst [vmem:[#allocation17_spill] sm:$0xff] %v11215_v15  ;;  %v3070_v38 = vsel %vm1130_vm0, %v19102_v28, %v3069_v46  ;;  %v11240_v9 = vrot.slane %v4111_v45, 1  ;;  %v19104_v6 = vrot.slane %v10772_v59, 2  ;;  %v1587_v3 = vrot.slane %v11209_v44, 2 }
 0x12c   : > { %v3072_v56 = vsel %vm1130_vm0, %v3069_v46, %v19103_v13  ;;  %v3264_v51 = vadd.f32 %v3070_v38, %v2853_v36  ;;  %v2543_v61 = vrot.slane %v11213_v30, 2  ;;  %v19105_v55 = vrot.slane %v11101_v17, 2  ;;  %v11281_v13 = vpop.permute.xlu1 %660 }
 0x12d   : > { %v3265_v23 = vadd.f32 %v3072_v56, %v2854_v11  ;;  %v3476_v7 = vsel %vm1537_vm1, %v19104_v6, %v3475_v0  ;;  %v11252_v26 = vmul.f32 %v19090_v42, %v19084_v31  ;;  %v11256_v11 = vmul.f32 %v19091_v41, %v19106_v47  ;;  %19110 = vst [vmem:[#allocation27_spill] sm:$0xff] %v11281_v13 }
 0x12e   : > { %v3478_v46 = vsel %vm1537_vm1, %v3475_v0, %v19105_v55  ;;  %v3670_v36 = vadd.f32 %v3476_v7, %v3264_v51  ;;  %v4114_v59 = vsel %vm4094_vm2, %v4109_v27, %v11240_v9  ;;  %v18429_v44 = vrot.slane %v11228_v50, 2 }
 0x12f   : > { %19107 = vst [vmem:[#allocation29_spill] sm:$0xff] %v11256_v11  ;;  %v3671_v10 = vadd.f32 %v3478_v46, %v3265_v23  ;;  %v18428_v30 = vrot.slane %v11232_v58, 2  ;;  %v11264_v0 = vmul.f32 %v10031_v57, %v11237_v39  ;;  %9324 = vmatmul.msk.bf16.gmra.mxu0 %vm4345_vm3, %v4114_v59  ;;  %v11270_v22 = vmul.f32 %v19090_v42, %v19106_v47 }
 0x130   : > { %v3741_v31 = vadd.f32 %v10816_v33, %v3670_v36  ;;  %v11274_v45 = vmul.f32 %v11097_v12, %v19106_v47  ;;  %v11278_v28 = vmul.f32 %v10045_v63, %v11237_v39  ;;  %v11285_v56 = vmul.f32 %v10049_v2, %v11157_v35  ;;  %v11341_v35 = vpop.permute.xlu0 %655 }
 0x131   : > { %19108 = vst [vmem:[#allocation6_spill] sm:$0xff] %v11270_v22  ;;  %v3742_v38 = vadd.f32 %v10816_v33, %v3671_v10  ;;  %v1590_v27 = vsel %vm1537_vm1, %v1587_v3, %v18429_v44  ;;  %v2546_v23 = vsel %vm1537_vm1, %v2543_v61, %v18428_v30  ;;  %v11298_v36 = vmul.f32 %v19091_v41, %v10601_v24 }
 0x132   : > { %19109 = vst [vmem:[#allocation25_spill] sm:$0xff] %v11274_v45  ;;  %v3808_v51 = vmax.f32 %v3741_v31, 0.0  ;;  %v1765_v55 = vadd.f32 %v1590_v27, %v11159_v52  ;;  %v2724_v46 = vadd.f32 %v2546_v23, %v11165_v29  ;;  %v18435_v47 = vrot.slane %v11264_v0, 1 }
 0x133   : > { %19111 = vst [vmem:[#allocation33_spill] sm:$0xff] %v11285_v56  ;;  %v3809_v7 = vmax.f32 %v3742_v38, 0.0  ;;  %v1022_v10 = vmul.f32 %v10031_v57, %v11281_v13  ;;  %v1843_v52 = vmul.f32 %v10091_v18, %v11281_v13  ;;  %v1983_v29 = vmul.f32 %v10045_v63, %v11281_v13 }
 0x134   : > { %19112 = vst [vmem:[#allocation35_spill] sm:$0xff] %v11298_v36  ;;  %v11301_v59 = vpack.c.bf16 %v3808_v51, %v3808_v51  ;;  %v2802_v51 = vmul.f32 %v19090_v42, %v11281_v13  ;;  %v11321_v31 = vmul.f32 %v11097_v12, %v10601_v24  ;;  %v1841_v38 = vmul.f32 %v10091_v18, %v11084_v32 }
 0x135   : > { %v11306_v30 = vpack.c.bf16 %v3809_v7, %v3809_v7  ;;  %v1186_v23 = vrot.slane %v1022_v10, 1  ;;  %v882_v7 = vmul.f32 %v10062_v8, %v11281_v13  ;;  %v1910_v44 = vadd.f32 %v1843_v52, %v1765_v55  ;;  %19121 = vst [vmem:[#allocation53_spill] sm:$0xff] %v11341_v35 }
 0x136   : > { %19113 = vst [vmem:[#allocation12_spill] sm:$0xff] %v11301_v59  ;;  %v2143_v34 = vrot.slane %v1983_v29, 1  ;;  %v11328_v27 = vadd.f32 %v2802_v51, %v2724_v46  ;;  %v880_v6 = vmul.f32 %v10062_v8, %v11084_v32  ;;  %v19117_v1 = vunpack.c.l.b16 %v11301_v59 }
 0x137   : > { %19114 = vst [vmem:[#allocation34_spill] sm:$0xff] %v11306_v30  ;;  %v1189_v10 = vsel %vm1130_vm0, %v1186_v23, %v18435_v47  ;;  %v19118_v55 = vunpack.c.l.b16 %v11306_v30  ;;  %v19120_v15 = vrot.slane %v11278_v28, 1  ;;  %v11345_v46 = vmul.f32 %v10043_v62, %v11237_v39 }
 0x138   : > { %19115 = vst [vmem:[#allocation50_spill] sm:$0xff] %v11321_v31  ;;  %v1361_v29 = vadd.f32 %v1189_v10, %v882_v7  ;;  %v19122_v47 = vrot.slane %v11180_v16, 2  ;;  %v1908_v30 = vadd.f32 %v1841_v38, %v11219_v5  ;;  %v19123_v10 = vrot.slane %v11285_v56, 2  ;;  %v19143_v31 = vld [vmem:[#allocation30_spill] sm:$0xff] }
 0x139   : > { %19116 = vst [vmem:[#allocation51_spill] sm:$0xff] %v11328_v27  ;;  %v11336_v52 = vpack.c.b16 %v19118_v55, %v19117_v1  ;;  %v2146_v54 = vsel %vm1130_vm0, %v2143_v34, %v19120_v15  ;;  %v11353_v1 = vmul.f32 %v10049_v2, %v11237_v39  ;;  %v1021_v5 = vmul.f32 %v10031_v57, %v11341_v35 }
 0x13a   : > { %v2321_v51 = vadd.f32 %v2146_v54, %v1910_v44  ;;  %v1588_v59 = vsel %vm1537_vm1, %v19122_v47, %v1587_v3  ;;  %v2544_v55 = vsel %vm1537_vm1, %v19123_v10, %v2543_v61  ;;  %v11362_v54 = vmul.f32 %v10043_v62, %v11281_v13 }
 0x13b   : > { %19119 = vst [vmem:[#allocation52_spill] sm:$0xff] %v11336_v52  ;;  %v18438_v7 = vrot.slane %v11336_v52, 1  ;;  %v1764_v15 = vadd.f32 %v1588_v59, %v11201_v40  ;;  %v2723_v16 = vadd.f32 %v2544_v55, %v11217_v19  ;;  %v11369_v3 = vmul.f32 %v10043_v62, %v11341_v35 }
 0x13c   : > { %v19124_v40 = vrot.slane %v10991_v53, 1  ;;  %v1842_v61 = vmul.f32 %v10091_v18, %v11341_v35  ;;  %v1982_v47 = vmul.f32 %v10045_v63, %v11341_v35  ;;  %v11382_v19 = vmul.f32 %v10049_v2, %v11341_v35 }
 0x13d   : > { %v11387_v59 = vmul.f32 %v10049_v2, %v11281_v13  ;;  %v1184_v38 = vrot.slane %v1021_v5, 1  ;;  %v1591_v10 = vrot.slane %v11369_v3, 2  ;;  %v2801_v55 = vmul.f32 %v19090_v42, %v11341_v35 }
 0x13e   : > { %v4830_v44 = vsel %vm1130_vm0, %v19124_v40, %v18438_v7  ;;  %v881_v40 = vmul.f32 %v10062_v8, %v11341_v35  ;;  %v1909_v7 = vadd.f32 %v1842_v61, %v1764_v15  ;;  %v2141_v27 = vrot.slane %v1982_v47, 1 }
 0x13f   : > { %9395 = vmatmul.msk.bf16.gmra.mxu2 %vm4345_vm3, %v4830_v44  ;;  %v18450_v56 = vrot.slane %v11382_v19, 2  ;;  %v19125_v20 = vrot.slane %v11109_v25, 1  ;;  %v1187_v13 = vsel %vm1130_vm0, %v1184_v38, %v1186_v23  ;;  %v19126_v5 = vrot.slane %v11228_v50, 2 }
 0x140   : > { %v11402_v4 = vadd.f32 %v2801_v55, %v2723_v16  ;;  %v1360_v22 = vadd.f32 %v1187_v13, %v881_v40  ;;  %v19128_v35 = vrot.slane %v11121_v60, 1  ;;  %v2144_v61 = vsel %vm1130_vm0, %v2141_v27, %v2143_v34  ;;  %v11426_v60 = vpop.permute.xlu2 %680  ;;  %v11446_v55 = vpop.permute.xlu1 %675 }
 0x141   : > { %v1185_v44 = vsel %vm1130_vm0, %v19125_v20, %v1184_v38  ;;  %v1592_v3 = vsel %vm1537_vm1, %v19126_v5, %v1591_v10  ;;  %v1593_v25 = vrot.slane %v11362_v54, 2  ;;  %v2320_v20 = vadd.f32 %v2144_v61, %v1909_v7  ;;  %19136 = vst [vmem:[#allocation59_spill] sm:$0xff] %v11446_v55 }
 0x142   : > { %19127 = vst [vmem:[#allocation54_spill] sm:$0xff] %v11402_v4  ;;  %v1359_v37 = vadd.f32 %v1185_v44, %v880_v6  ;;  %v2142_v15 = vsel %vm1130_vm0, %v19128_v35, %v2141_v27  ;;  %v19130_v50 = vrot.slane %v11232_v58, 2  ;;  %v19132_v6 = vld [vmem:[#allocation40_spill] sm:$0xff]  ;;  %v2549_v34 = vrot.slane %v11387_v59, 2 }
 0x143   : > { %v11409_v47 = vadd.f32 %v2142_v15, %v1908_v30  ;;  %v11420_v13 = vmul.f32 %v19091_v41, %v19132_v6  ;;  %v11424_v35 = vmul.f32 %v11097_v12, %v19132_v6  ;;  %v11432_v58 = vmul.f32 %v19090_v42, %v10601_v24  ;;  %v19137_v24 = vld [vmem:[#allocation41_spill] sm:$0xff] }
 0x144   : > { %v11416_v23 = vsel %vm1537_vm1, %v19130_v50, %v18450_v56  ;;  %v1766_v30 = vadd.f32 %v1592_v3, %v1359_v37  ;;  %v1595_v54 = vrot.slane %v11345_v46, 2  ;;  %v11439_v38 = vmul.f32 %v19091_v41, %v10918_v14 }
 0x145   : > { %19129 = vst [vmem:[#allocation55_spill] sm:$0xff] %v11409_v47  ;;  %v11443_v59 = vmul.f32 %v11097_v12, %v10918_v14  ;;  %v18449_v37 = vrot.slane %v11353_v1, 2  ;;  %v19138_v40 = vrot.slane %v19137_v24, 2  ;;  %v19139_v44 = vrot.slane %v19083_v21, 2 }
 0x146   : > { %19131 = vst [vmem:[#allocation56_spill] sm:$0xff] %v11416_v23  ;;  %v11457_v5 = vmul.f32 %v10031_v57, %v11426_v60  ;;  %v11461_v3 = vmul.f32 %v10045_v63, %v11426_v60  ;;  %v1596_v15 = vsel %vm1537_vm1, %v1593_v25, %v1595_v54  ;;  %v1025_v27 = vmul.f32 %v10031_v57, %v11446_v55 }
 0x147   : > { %19133 = vst [vmem:[#allocation40_spill] sm:$0xff] %v11432_v58  ;;  %v11453_v46 = vsel %vm1537_vm1, %v19139_v44, %v19138_v40  ;;  %v1768_v24 = vadd.f32 %v1596_v15, %v1361_v29  ;;  %v2552_v21 = vsel %vm1537_vm1, %v2549_v34, %v18449_v37  ;;  %v19140_v40 = vld [vmem:[#allocation43_spill] sm:$0xff]  ;;  %v1846_v29 = vmul.f32 %v10091_v18, %v11446_v55  ;;  %v11495_v58 = vpop.permute.xlu0 %670 }
 0x148   : > { %19134 = vst [vmem:[#allocation57_spill] sm:$0xff] %v11439_v38  ;;  %v2789_v44 = vmul.f32 %v19090_v42, %v19140_v40  ;;  %v11473_v16 = vmul.f32 %v19091_v41, %v19140_v40  ;;  %v2727_v7 = vadd.f32 %v2552_v21, %v2321_v51  ;;  %v11479_v61 = vmul.f32 %v11097_v12, %v19140_v40 }
 0x149   : > { %19135 = vst [vmem:[#allocation58_spill] sm:$0xff] %v11443_v59  ;;  %v1986_v15 = vmul.f32 %v10045_v63, %v11446_v55  ;;  %v2805_v50 = vmul.f32 %v19090_v42, %v11446_v55  ;;  %v1844_v37 = vmul.f32 %v10091_v18, %v11237_v39  ;;  %v18461_v51 = vrot.slane %v11457_v5, 1 }
 0x14a   : > { %v1192_v56 = vrot.slane %v1025_v27, 1  ;;  %v885_v40 = vmul.f32 %v10062_v8, %v11446_v55  ;;  %v1913_v23 = vadd.f32 %v1846_v29, %v1768_v24  ;;  %19142 = vst [vmem:[#allocation43_spill] sm:$0xff] %v11495_v58  ;;  %v2856_v36 = vadd.f32 %v2789_v44, %v19143_v31 }
 0x14b   : > { %v2149_v47 = vrot.slane %v1986_v15, 1  ;;  %v11493_v4 = vadd.f32 %v2805_v50, %v2727_v7  ;;  %v3073_v45 = vrot.slane %v11473_v16, 1  ;;  %v1594_v21 = vsel %vm1537_vm1, %v1591_v10, %v1593_v25 }
 0x14c   : > { %v1195_v11 = vsel %vm1130_vm0, %v1192_v56, %v18461_v51  ;;  %v19144_v48 = vrot.slane %v11461_v3, 1  ;;  %v1767_v7 = vadd.f32 %v1594_v21, %v1360_v22  ;;  %v1911_v50 = vadd.f32 %v1844_v37, %v1766_v30 }
 0x14d   : > { %19141 = vst [vmem:[#allocation41_spill] sm:$0xff] %v11493_v4  ;;  %v11503_v27 = vadd.f32 %v1195_v11, %v885_v40  ;;  %v3479_v29 = vrot.slane %v11479_v61, 2  ;;  %v19145_v31 = vrot.slane %v11382_v19, 2  ;;  %v1024_v44 = vmul.f32 %v10031_v57, %v11495_v58 }
 0x14e   : > { %v2152_v24 = vsel %vm1130_vm0, %v2149_v47, %v19144_v48  ;;  %v11518_v11 = vmul.f32 %v10043_v62, %v11495_v58  ;;  %v1845_v48 = vmul.f32 %v10091_v18, %v11495_v58  ;;  %v1985_v22 = vmul.f32 %v10045_v63, %v11495_v58 }
 0x14f   : > { %v11509_v15 = vadd.f32 %v2152_v24, %v1913_v23  ;;  %v2550_v16 = vsel %vm1537_vm1, %v19145_v31, %v2549_v34  ;;  %v883_v25 = vmul.f32 %v10062_v8, %v11237_v39  ;;  %v1190_v19 = vrot.slane %v1024_v44, 1 }
 0x150   : > { %v2726_v10 = vadd.f32 %v2550_v16, %v2320_v20  ;;  %v11528_v23 = vmul.f32 %v10049_v2, %v11495_v58  ;;  %v2804_v20 = vmul.f32 %v19090_v42, %v11495_v58  ;;  %v884_v34 = vmul.f32 %v10062_v8, %v11495_v58 }
 0x151   : > { %v18465_v30 = vrot.slane %v11518_v11, 2  ;;  %v1912_v37 = vadd.f32 %v1845_v48, %v1767_v7  ;;  %v2147_v61 = vrot.slane %v1985_v22, 1  ;;  %v19146_v21 = vrot.slane %v11264_v0, 1 }
 0x152   : > { %v1193_v24 = vsel %vm1130_vm0, %v1190_v19, %v1192_v56  ;;  %v18464_v31 = vrot.slane %v11528_v23, 2  ;;  %v11540_v16 = vadd.f32 %v2804_v20, %v2726_v10  ;;  %v19148_v7 = vrot.slane %v11278_v28, 1 }
 0x153   : > { %v1191_v40 = vsel %vm1130_vm0, %v19146_v21, %v1190_v19  ;;  %v11542_v51 = vadd.f32 %v1193_v24, %v884_v34  ;;  %v1598_v4 = vsel %vm1537_vm1, %v1595_v54, %v18465_v30  ;;  %v11552_v0 = vmul.f32 %v10043_v62, %v11446_v55 }
 0x154   : > { %19147 = vst [vmem:[#allocation30_spill] sm:$0xff] %v11540_v16  ;;  %v1362_v44 = vadd.f32 %v1191_v40, %v883_v25  ;;  %v2148_v48 = vsel %vm1130_vm0, %v19148_v7, %v2147_v61  ;;  %v2150_v56 = vsel %vm1130_vm0, %v2147_v61, %v2149_v47  ;;  %v19150_v10 = vrot.slane %v11353_v1, 2  ;;  %v19152_v1 = vld [vmem:[#allocation38_spill] sm:$0xff] }
 0x155   : > { %v11555_v22 = vadd.f32 %v2148_v48, %v1911_v50  ;;  %v11566_v28 = vmul.f32 %v10049_v2, %v11446_v55  ;;  %v11570_v19 = vadd.f32 %v2150_v56, %v1912_v37  ;;  %v4115_v20 = vshrl.u32 %v10991_v53, 16 }
 0x156   : > { %v11562_v25 = vsel %vm1537_vm1, %v19150_v10, %v18464_v31  ;;  %v11568_v54 = vadd.f32 %v1598_v4, %v1362_v44  ;;  %v11575_v47 = vmul.f32 %v10043_v62, %v11426_v60  ;;  %v4119_v50 = vshll.u32 %v11336_v52, 16 }
 0x157   : > { %19149 = vst [vmem:[#allocation60_spill] sm:$0xff] %v11555_v22  ;;  %v2710_v34 = vadd.f32 %v11453_v46, %v19152_v1  ;;  %v19153_v61 = vrot.slane %v11420_v13, 1  ;;  %v11585_v4 = vmul.f32 %v10049_v2, %v11426_v60  ;;  %v4117_v37 = vor.u32 %v4115_v20, %v11240_v9  ;;  %v11602_v9 = vpop.permute.xlu2 %695 }
 0x158   : > { %19151 = vst [vmem:[#allocation61_spill] sm:$0xff] %v11562_v25  ;;  %v19154_v40 = vrot.slane %v19087_v43, 1  ;;  %v11593_v7 = vmul.f32 %v19090_v42, %v10918_v14  ;;  %v11595_v46 = vrot.slane %v4119_v50, 1  ;;  %v19156_v56 = vrot.slane %v11424_v35, 2 }
 0x159   : > { %v3076_v21 = vsel %vm1130_vm0, %v3073_v45, %v19153_v61  ;;  %v2855_v48 = vadd.f32 %v11252_v26, %v2710_v34  ;;  %v1599_v43 = vrot.slane %v11552_v0, 2  ;;  %v11609_v20 = vmul.f32 %v19090_v42, %v11084_v32 }
 0x15a   : > { %v3074_v24 = vsel %vm1130_vm0, %v19154_v40, %v3073_v45  ;;  %v3267_v44 = vadd.f32 %v3076_v21, %v2856_v36  ;;  %19155 = vst [vmem:[#allocation38_spill] sm:$0xff] %v11593_v7  ;;  %v3482_v10 = vsel %vm1537_vm1, %v3479_v29, %v19156_v56  ;;  %v2555_v45 = vrot.slane %v11566_v28, 2 }
 0x15b   : > { %19157 = vst [vmem:[#allocation62_spill] sm:$0xff] %v11609_v20  ;;  %v4122_v26 = vsel %vm4094_vm2, %v4117_v37, %v11595_v46  ;;  %v3266_v50 = vadd.f32 %v3074_v24, %v2855_v48  ;;  %v18463_v34 = vrot.slane %v11575_v47, 2  ;;  %v18462_v61 = vrot.slane %v11585_v4, 2  ;;  %v11632_v48 = vpop.permute.xlu1 %690 }
 0x15c   : > { %v3673_v36 = vadd.f32 %v3482_v10, %v3267_v44  ;;  %9325 = vmatmul.msk.bf16.gmra.mxu0 %vm4345_vm3, %v4122_v26  ;;  %v19158_v0 = vrot.slane %v11101_v17, 2  ;;  %v11622_v40 = vmul.f32 %v19091_v41, %v11084_v32  ;;  %v11626_v37 = vmul.f32 %v11097_v12, %v11084_v32  ;;  %19161 = vst [vmem:[#allocation65_spill] sm:$0xff] %v11632_v48 }
 0x15d   : > { %v11630_v24 = vmul.f32 %v10031_v57, %v11602_v9  ;;  %v11636_v17 = vmul.f32 %v10045_v63, %v11602_v9  ;;  %v1602_v56 = vsel %vm1537_vm1, %v1599_v43, %v18463_v34  ;;  %v2558_v32 = vsel %vm1537_vm1, %v2555_v45, %v18462_v61 }
 0x15e   : > { %v3480_v28 = vsel %vm1537_vm1, %v19158_v0, %v3479_v29  ;;  %v3744_v21 = vadd.f32 %v10816_v33, %v3673_v36  ;;  %19159 = vst [vmem:[#allocation63_spill] sm:$0xff] %v11622_v40  ;;  %v11646_v10 = vmul.f32 %v19090_v42, %v19132_v6  ;;  %v11650_v36 = vmul.f32 %v19091_v41, %v11237_v39 }
 0x15f   : > { %19160 = vst [vmem:[#allocation64_spill] sm:$0xff] %v11626_v37  ;;  %v3672_v44 = vadd.f32 %v3480_v28, %v3266_v50  ;;  %v1771_v50 = vadd.f32 %v1602_v56, %v11503_v27  ;;  %v11656_v0 = vmul.f32 %v11097_v12, %v11237_v39  ;;  %v1028_v6 = vmul.f32 %v10031_v57, %v11632_v48 }
 0x160   : > { %v3811_v29 = vmax.f32 %v3744_v21, 0.0  ;;  %19162 = vst [vmem:[#allocation66_spill] sm:$0xff] %v11650_v36  ;;  %v2730_v21 = vadd.f32 %v2558_v32, %v11509_v15  ;;  %v18467_v14 = vrot.slane %v11630_v24, 1  ;;  %v1849_v61 = vmul.f32 %v10091_v18, %v11632_v48  ;;  %v11692_v32 = vpop.permute.xlu0 %685 }
 0x161   : > { %v3743_v26 = vadd.f32 %v10816_v33, %v3672_v44  ;;  %19163 = vst [vmem:[#allocation67_spill] sm:$0xff] %v11656_v0  ;;  %v1989_v33 = vmul.f32 %v10045_v63, %v11632_v48  ;;  %v888_v44 = vmul.f32 %v10062_v8, %v11632_v48  ;;  %v2808_v15 = vmul.f32 %v19090_v42, %v11632_v48 }
 0x162   : > { %v11658_v28 = vpack.c.bf16 %v3811_v29, %v3811_v29  ;;  %v1198_v29 = vrot.slane %v1028_v6, 1  ;;  %v886_v31 = vmul.f32 %v10062_v8, %v11426_v60  ;;  %v1847_v30 = vmul.f32 %v10091_v18, %v11426_v60  ;;  %19169 = vst [vmem:[#allocation71_spill] sm:$0xff] %v11692_v32 }
 0x163   : > { %v3810_v1 = vmax.f32 %v3743_v26, 0.0  ;;  %v1916_v26 = vadd.f32 %v1849_v61, %v1771_v50  ;;  %v2155_v34 = vrot.slane %v1989_v33, 1  ;;  %v11683_v6 = vadd.f32 %v2808_v15, %v2730_v21 }
 0x164   : > { %19164 = vst [vmem:[#allocation68_spill] sm:$0xff] %v11658_v28  ;;  %v1201_v27 = vsel %vm1130_vm0, %v1198_v29, %v18467_v14  ;;  %v19167_v25 = vrot.slane %v11636_v17, 1  ;;  %v19168_v50 = vrot.slane %v11518_v11, 2  ;;  %v11696_v22 = vmul.f32 %v10043_v62, %v11602_v9 }
 0x165   : > { %v11673_v56 = vpack.c.bf16 %v3810_v1, %v3810_v1  ;;  %19166 = vst [vmem:[#allocation70_spill] sm:$0xff] %v11683_v6  ;;  %v1367_v1 = vadd.f32 %v1201_v27, %v888_v44  ;;  %v11700_v21 = vmul.f32 %v10043_v62, %v11632_v48  ;;  %v1914_v44 = vadd.f32 %v1847_v30, %v11568_v54 }
 0x166   : > { %v2158_v61 = vsel %vm1130_vm0, %v2155_v34, %v19167_v25  ;;  %v1600_v33 = vsel %vm1537_vm1, %v19168_v50, %v1599_v43  ;;  %v19170_v25 = vunpack.c.l.b16 %v11658_v28  ;;  %v11711_v43 = vmul.f32 %v10049_v2, %v11632_v48 }
 0x167   : > { %19165 = vst [vmem:[#allocation69_spill] sm:$0xff] %v11673_v56  ;;  %v18468_v53 = vunpack.c.l.b16 %v11673_v56  ;;  %v2327_v15 = vadd.f32 %v2158_v61, %v1916_v26  ;;  %v1770_v27 = vadd.f32 %v1600_v33, %v11542_v51  ;;  %v19172_v50 = vrot.slane %v11528_v23, 2 }
 0x168   : > { %v1027_v51 = vmul.f32 %v10031_v57, %v11692_v32  ;;  %v11722_v61 = vmul.f32 %v10043_v62, %v11692_v32  ;;  %v1848_v33 = vmul.f32 %v10091_v18, %v11692_v32  ;;  %v1988_v30 = vmul.f32 %v10045_v63, %v11692_v32 }
 0x169   : > { %v11707_v11 = vpack.c.b16 %v19170_v25, %v18468_v53  ;;  %v2556_v14 = vsel %vm1537_vm1, %v19172_v50, %v2555_v45  ;;  %v11731_v23 = vmul.f32 %v10049_v2, %v11692_v32  ;;  %v2807_v54 = vmul.f32 %v19090_v42, %v11692_v32 }
 0x16a   : > { %v2729_v26 = vadd.f32 %v2556_v14, %v11570_v19  ;;  %v887_v19 = vmul.f32 %v10062_v8, %v11692_v32  ;;  %v1196_v45 = vrot.slane %v1027_v51, 1  ;;  %v18475_v14 = vrot.slane %v11722_v61, 2 }
 0x16b   : > { %19171 = vst [vmem:[#allocation72_spill] sm:$0xff] %v11707_v11  ;;  %v18471_v25 = vrot.slane %v11707_v11, 1  ;;  %v1915_v50 = vadd.f32 %v1848_v33, %v1770_v27  ;;  %v19173_v53 = vrot.slane %v11336_v52, 1  ;;  %v2153_v56 = vrot.slane %v1988_v30, 1 }
 0x16c   : > { %v11746_v16 = vadd.f32 %v2807_v54, %v2729_v26  ;;  %v11750_v20 = vmul.f32 %v10049_v2, %v11602_v9  ;;  %v19176_v27 = vrot.slane %v11457_v5, 1  ;;  %v1199_v33 = vsel %vm1130_vm0, %v1196_v45, %v1198_v29 }
 0x16d   : > { %v11743_v28 = vsel %vm1130_vm0, %v19173_v53, %v18471_v25  ;;  %v19177_v53 = vrot.slane %v11575_v47, 2  ;;  %v1366_v54 = vadd.f32 %v1199_v33, %v887_v19  ;;  %v19178_v25 = vrot.slane %v11461_v3, 1  ;;  %v11775_v19 = vpop.permute.xlu2 %710 }
 0x16e   : > { %19174 = vst [vmem:[#allocation73_spill] sm:$0xff] %v11743_v28  ;;  %9396 = vmatmul.msk.bf16.gmra.mxu2 %vm4345_vm3, %v11743_v28  ;;  %v1197_v51 = vsel %vm1130_vm0, %v19176_v27, %v1196_v45  ;;  %v2156_v28 = vsel %vm1130_vm0, %v2153_v56, %v2155_v34  ;;  %v1605_v5 = vrot.slane %v11700_v21, 2  ;;  %v19179_v29 = vrot.slane %v11731_v23, 2  ;;  %v19182_v34 = vld [vmem:[#allocation21_spill] sm:$0xff]  ;;  %v19185_v21 = vld [vmem:[#allocation31_spill] sm:$0xff] }
 0x16f   : > { %19175 = vst [vmem:[#allocation74_spill] sm:$0xff] %v11746_v16  ;;  %v1604_v26 = vsel %vm1537_vm1, %v19177_v53, %v18475_v14  ;;  %v1365_v30 = vadd.f32 %v1197_v51, %v886_v31  ;;  %v2154_v6 = vsel %vm1130_vm0, %v19178_v25, %v2153_v56  ;;  %v2326_v27 = vadd.f32 %v2156_v28, %v1915_v50  ;;  %v19183_v28 = vld [vmem:[#allocation44_spill] sm:$0xff] }
 0x170   : > { %v2325_v16 = vadd.f32 %v2154_v6, %v1914_v44  ;;  %v19180_v45 = vrot.slane %v11585_v4, 2  ;;  %19181 = vst [vmem:[#allocation75_spill] sm:$0xff] %v11775_v19  ;;  %v2561_v3 = vrot.slane %v11711_v43, 2  ;;  %v11780_v56 = vadd.f32 %v11646_v10, %v19182_v34  ;;  %v19191_v31 = vld [vmem:[#allocation28_spill] sm:$0xff] }
 0x171   : > { %v1772_v25 = vadd.f32 %v1604_v26, %v1365_v30  ;;  %v19184_v6 = vrot.slane %v19183_v28, 2  ;;  %v19186_v44 = vrot.slane %v19185_v21, 2  ;;  %v18474_v50 = vrot.slane %v11696_v22, 2  ;;  %v11800_v30 = vpop.permute.xlu1 %705  ;;  %v19190_v21 = vld [vmem:[#allocation47_spill] sm:$0xff] }
 0x172   : > { %v2560_v47 = vsel %vm1537_vm1, %v19180_v45, %v19179_v29  ;;  %v11794_v33 = vmul.f32 %v19090_v42, %v11237_v39  ;;  %v2793_v10 = vmul.f32 %v19090_v42, %v10631_v49  ;;  %v18473_v26 = vrot.slane %v11750_v20, 2  ;;  %19189 = vst [vmem:[#allocation31_spill] sm:$0xff] %v11800_v30 }
 0x173   : > { %v11787_v4 = vsel %vm1537_vm1, %v19186_v44, %v19184_v6  ;;  %v11790_v51 = vadd.f32 %v2560_v47, %v2325_v16  ;;  %v11805_v45 = vmul.f32 %v19091_v41, %v10631_v49  ;;  %v11809_v16 = vmul.f32 %v10031_v57, %v11775_v19 }
 0x174   : > { %19188 = vst [vmem:[#allocation44_spill] sm:$0xff] %v11794_v33  ;;  %v1608_v39 = vsel %vm1537_vm1, %v1605_v5, %v18474_v50  ;;  %v11816_v47 = vmul.f32 %v11097_v12, %v10631_v49  ;;  %v11820_v34 = vmul.f32 %v10045_v63, %v11775_v19  ;;  %v2564_v6 = vsel %vm1537_vm1, %v2561_v3, %v18473_v26 }
 0x175   : > { %19187 = vst [vmem:[#allocation21_spill] sm:$0xff] %v11790_v51  ;;  %v1774_v28 = vadd.f32 %v1608_v39, %v1367_v1  ;;  %v11827_v44 = vmul.f32 %v19091_v41, %v19190_v21  ;;  %v11831_v29 = vmul.f32 %v11097_v12, %v19190_v21  ;;  %v2733_v43 = vadd.f32 %v2564_v6, %v2327_v15 }
 0x176   : > { %v1031_v49 = vmul.f32 %v10031_v57, %v11800_v30  ;;  %v11836_v53 = vadd.f32 %v2793_v10, %v19191_v31  ;;  %v11840_v1 = vmul.f32 %v19090_v42, %v19190_v21  ;;  %v1852_v39 = vmul.f32 %v10091_v18, %v11800_v30 }
 0x177   : > { %v1992_v26 = vmul.f32 %v10045_v63, %v11800_v30  ;;  %v1850_v50 = vmul.f32 %v10091_v18, %v11602_v9  ;;  %v18486_v15 = vrot.slane %v11809_v16, 1  ;;  %v2811_v31 = vmul.f32 %v19090_v42, %v11800_v30 }
 0x178   : > { %v1204_v6 = vrot.slane %v1031_v49, 1  ;;  %v18487_v10 = vrot.slane %v11820_v34, 1  ;;  %v891_v21 = vmul.f32 %v10062_v8, %v11800_v30  ;;  %v1919_v14 = vadd.f32 %v1852_v39, %v1774_v28  ;;  %v11861_v49 = vpop.permute.xlu0 %700 }
 0x179   : > { %v2161_v51 = vrot.slane %v1992_v26, 1  ;;  %v11859_v37 = vadd.f32 %v2811_v31, %v2733_v43  ;;  %19193 = vst [vmem:[#allocation28_spill] sm:$0xff] %v11861_v49  ;;  %v19194_v26 = vrot.slane %v11722_v61, 2  ;;  %v1917_v39 = vadd.f32 %v1850_v50, %v1772_v25 }
 0x17a   : > { %v1207_v36 = vsel %vm1130_vm0, %v1204_v6, %v18486_v15  ;;  %v889_v33 = vmul.f32 %v10062_v8, %v11602_v9  ;;  %v19195_v31 = vrot.slane %v11731_v23, 2  ;;  %v1030_v15 = vmul.f32 %v10031_v57, %v11861_v49 }
 0x17b   : > { %19192 = vst [vmem:[#allocation47_spill] sm:$0xff] %v11859_v37  ;;  %v11863_v40 = vadd.f32 %v1207_v36, %v891_v21  ;;  %v2164_v59 = vsel %vm1130_vm0, %v2161_v51, %v18487_v10  ;;  %v1606_v28 = vsel %vm1537_vm1, %v19194_v26, %v1605_v5  ;;  %v11882_v61 = vmul.f32 %v10043_v62, %v11861_v49 }
 0x17c   : > { %v11873_v0 = vadd.f32 %v2164_v59, %v1919_v14  ;;  %v1773_v43 = vadd.f32 %v1606_v28, %v1366_v54  ;;  %v2562_v36 = vsel %vm1537_vm1, %v19195_v31, %v2561_v3  ;;  %v1851_v5 = vmul.f32 %v10091_v18, %v11861_v49 }
 0x17d   : > { %v2732_v21 = vadd.f32 %v2562_v36, %v2326_v27  ;;  %v11888_v59 = vmul.f32 %v10043_v62, %v11775_v19  ;;  %v1991_v23 = vmul.f32 %v10045_v63, %v11861_v49  ;;  %v11894_v14 = vmul.f32 %v10049_v2, %v11861_v49 }
 0x17e   : > { %v2810_v54 = vmul.f32 %v19090_v42, %v11861_v49  ;;  %v11900_v27 = vmul.f32 %v10043_v62, %v11800_v30  ;;  %v1202_v3 = vrot.slane %v1030_v15, 1  ;;  %v18492_v25 = vrot.slane %v11882_v61, 2 }
 0x17f   : > { %v1918_v50 = vadd.f32 %v1851_v5, %v1773_v43  ;;  %v890_v26 = vmul.f32 %v10062_v8, %v11861_v49  ;;  %v2159_v28 = vrot.slane %v1991_v23, 1  ;;  %v11910_v10 = vmul.f32 %v10049_v2, %v11800_v30 }
 0x180   : > { %v11906_v36 = vadd.f32 %v2810_v54, %v2732_v21  ;;  %v19197_v37 = vrot.slane %v11630_v24, 1  ;;  %v1205_v15 = vsel %vm1130_vm0, %v1202_v3, %v1204_v6  ;;  %v19198_v43 = vrot.slane %v11696_v22, 2 }
 0x181   : > { %v11921_v31 = vadd.f32 %v1205_v15, %v890_v26  ;;  %v19199_v21 = vrot.slane %v11636_v17, 1  ;;  %v19201_v6 = vrot.slane %v11750_v20, 2  ;;  %v19202_v17 = vld [vmem:[#allocation2_spill] sm:$0xff]  ;;  %v19203_v15 = vld [vmem:[#allocation29_spill] sm:$0xff]  ;;  %v11947_v20 = vmul.f32 %v10049_v2, %v11775_v19 }
 0x182   : > { %19196 = vst [vmem:[#allocation76_spill] sm:$0xff] %v11906_v36  ;;  %v1203_v7 = vsel %vm1130_vm0, %v19197_v37, %v1202_v3  ;;  %v1610_v5 = vsel %vm1537_vm1, %v19198_v43, %v18492_v25  ;;  %v2162_v36 = vsel %vm1130_vm0, %v2159_v28, %v2161_v51  ;;  %v19200_v37 = vrot.slane %v11894_v14, 2 }
 0x183   : > { %v1368_v23 = vadd.f32 %v1203_v7, %v889_v33  ;;  %v2160_v54 = vsel %vm1130_vm0, %v19199_v21, %v2159_v28  ;;  %v11927_v30 = vadd.f32 %v2162_v36, %v1918_v50  ;;  %v4123_v3 = vshrl.u32 %v11336_v52, 16 }
 0x184   : > { %v2328_v24 = vadd.f32 %v2160_v54, %v1917_v39  ;;  %v2566_v22 = vsel %vm1537_vm1, %v19201_v6, %v19200_v37  ;;  %v4127_v33 = vshll.u32 %v11707_v11, 16  ;;  %v2713_v26 = vadd.f32 %v11787_v4, %v19202_v17  ;;  %v19210_v37 = vld [vmem:[#allocation25_spill] sm:$0xff] }
 0x185   : > { %v11935_v7 = vadd.f32 %v1610_v5, %v1368_v23  ;;  %v19204_v51 = vrot.slane %v19203_v15, 1  ;;  %v19205_v39 = vrot.slane %v11420_v13, 1  ;;  %v19207_v36 = vrot.slane %v11827_v44, 1  ;;  %v19209_v13 = vld [vmem:[#allocation6_spill] sm:$0xff] }
 0x186   : > { %v11949_v28 = vadd.f32 %v2566_v22, %v2328_v24  ;;  %v4125_v23 = vor.u32 %v4123_v3, %v11595_v46  ;;  %v11958_v21 = vrot.slane %v4127_v33, 1  ;;  %v2858_v54 = vadd.f32 %v19209_v13, %v2713_v26 }
 0x187   : > { %v3078_v50 = vsel %vm1130_vm0, %v19205_v39, %v19204_v51  ;;  %v19208_v43 = vmov %v19204_v51  ;;  %v19211_v6 = vrot.slane %v19210_v37, 2  ;;  %v19212_v17 = vrot.slane %v11424_v35, 2 }
 0x188   : > { %19206 = vst [vmem:[#allocation2_spill] sm:$0xff] %v11949_v28  ;;  %v3080_v5 = vsel %vm1130_vm0, %v19208_v43, %v19207_v36  ;;  %v3268_v4 = vadd.f32 %v3078_v50, %v11780_v56  ;;  %v1611_v51 = vrot.slane %v11900_v27, 2  ;;  %v19213_v56 = vld [vmem:[#allocation48_spill] sm:$0xff]  ;;  %v2567_v3 = vrot.slane %v11910_v10, 2  ;;  %v11983_v36 = vpop.permute.xlu2 %725  ;;  %v11995_v43 = vld [vmem:[%s18338_s2] ss:$0 sm:$0xff] }
 0x189   : > { %v3484_v24 = vsel %vm1537_vm1, %v19212_v17, %v19211_v6  ;;  %v11971_v46 = vadd.f32 %v11840_v1, %v19213_v56  ;;  %v11976_v33 = vsel %vm4094_vm2, %v4125_v23, %v11958_v21  ;;  %v3269_v35 = vadd.f32 %v3080_v5, %v2858_v54  ;;  %19218 = vst [vmem:[#allocation25_spill] sm:$0xff] %v11995_v43  ;;  %v19220_v23 = vld [vmem:[#allocation14_spill] sm:$0xff]  ;;  %v12018_v56 = vpop.permute.xlu1 %720 }
 0x18a   : > { %v3674_v39 = vadd.f32 %v3484_v24, %v3268_v4  ;;  %19214 = vst [vmem:[#allocation29_spill] sm:$0xff] %v11976_v33  ;;  %v11980_v26 = vmul.f32 %v19091_v41, %v11426_v60  ;;  %v18490_v50 = vrot.slane %v11888_v59, 2  ;;  %9326 = vmatmul.msk.bf16.gmra.mxu0 %vm4345_vm3, %v11976_v33  ;;  %v19216_v1 = vrot.slane %v11831_v29, 2 }
 0x18b   : > { %v19217_v10 = vmov %v19211_v6  ;;  %v12000_v4 = vmul.f32 %v11097_v12, %v11426_v60  ;;  %v12004_v13 = vmul.f32 %v19090_v42, %v19220_v23  ;;  %v18491_v54 = vrot.slane %v11947_v20, 2  ;;  %19221 = vst [vmem:[#allocation14_spill] sm:$0xff] %v12018_v56 }
 0x18c   : > { %19215 = vst [vmem:[#allocation6_spill] sm:$0xff] %v11980_v26  ;;  %v3486_v27 = vsel %vm1537_vm1, %v19217_v10, %v19216_v1  ;;  %v3745_v5 = vadd.f32 %v11995_v43, %v3674_v39  ;;  %v12009_v6 = vmul.f32 %v19091_v41, %v19220_v23  ;;  %v12013_v17 = vmul.f32 %v11097_v12, %v19220_v23 }
 0x18d   : > { %19219 = vst [vmem:[#allocation48_spill] sm:$0xff] %v12000_v4  ;;  %v3675_v37 = vadd.f32 %v3486_v27, %v3269_v35  ;;  %v1614_v39 = vsel %vm1537_vm1, %v1611_v51, %v18490_v50  ;;  %v12022_v1 = vmul.f32 %v10031_v57, %v11983_v36  ;;  %v2570_v12 = vsel %vm1537_vm1, %v2567_v3, %v18491_v54  ;;  %v19222_v27 = vld [vmem:[#allocation26_spill] sm:$0xff] }
 0x18e   : > { %v3812_v24 = vmax.f32 %v3745_v5, 0.0  ;;  %v1777_v10 = vadd.f32 %v1614_v39, %v11863_v40  ;;  %v12031_v5 = vmul.f32 %v19090_v42, %v19222_v27  ;;  %v892_v23 = vmul.f32 %v10062_v8, %v11775_v19 }
 0x18f   : > { %v3746_v35 = vadd.f32 %v11995_v43, %v3675_v37  ;;  %v12037_v15 = vmul.f32 %v10045_v63, %v11983_v36  ;;  %v2736_v22 = vadd.f32 %v2570_v12, %v11873_v0  ;;  %v1034_v40 = vmul.f32 %v10031_v57, %v12018_v56 }
 0x190   : > { %v12040_v50 = vpack.c.bf16 %v3812_v24, %v3812_v24  ;;  %v1855_v39 = vmul.f32 %v10091_v18, %v12018_v56  ;;  %v1853_v54 = vmul.f32 %v10091_v18, %v11775_v19  ;;  %v12050_v25 = vmul.f32 %v10043_v62, %v11983_v36 }
 0x191   : > { %v3813_v37 = vmax.f32 %v3746_v35, 0.0  ;;  %v1995_v33 = vmul.f32 %v10045_v63, %v12018_v56  ;;  %v2814_v0 = vmul.f32 %v19090_v42, %v12018_v56  ;;  %v18508_v24 = vrot.slane %v12022_v1, 1 }
 0x192   : > { %19223 = vst [vmem:[#allocation26_spill] sm:$0xff] %v12040_v50  ;;  %v1210_v12 = vrot.slane %v1034_v40, 1  ;;  %v1922_v52 = vadd.f32 %v1855_v39, %v1777_v10  ;;  %v18511_v28 = vrot.slane %v12037_v15, 1  ;;  %v894_v49 = vmul.f32 %v10062_v8, %v12018_v56  ;;  %v12072_v40 = vpop.permute.xlu0 %715 }
 0x193   : > { %v12057_v35 = vpack.c.bf16 %v3813_v37, %v3813_v37  ;;  %v2167_v38 = vrot.slane %v1995_v33, 1  ;;  %v12062_v32 = vadd.f32 %v2814_v0, %v2736_v22  ;;  %v18510_v48 = vunpack.c.l.b16 %v12040_v50  ;;  %19227 = vst [vmem:[#allocation79_spill] sm:$0xff] %v12072_v40 }
 0x194   : > { %v1213_v55 = vsel %vm1130_vm0, %v1210_v12, %v18508_v24  ;;  %v19226_v37 = vrot.slane %v11882_v61, 2  ;;  %v12076_v39 = vmul.f32 %v10049_v2, %v11983_v36  ;;  %v1920_v24 = vadd.f32 %v1853_v54, %v11935_v7 }
 0x195   : > { %19224 = vst [vmem:[#allocation77_spill] sm:$0xff] %v12057_v35  ;;  %v18509_v58 = vunpack.c.l.b16 %v12057_v35  ;;  %v1373_v22 = vadd.f32 %v1213_v55, %v894_v49  ;;  %v2170_v33 = vsel %vm1130_vm0, %v2167_v38, %v18511_v28  ;;  %v12095_v55 = vmul.f32 %v10049_v2, %v12018_v56 }
 0x196   : > { %19225 = vst [vmem:[#allocation78_spill] sm:$0xff] %v12062_v32  ;;  %v1612_v10 = vsel %vm1537_vm1, %v19226_v37, %v1611_v51  ;;  %v12090_v51 = vmul.f32 %v10043_v62, %v12018_v56  ;;  %v2333_v37 = vadd.f32 %v2170_v33, %v1922_v52  ;;  %v19229_v49 = vrot.slane %v11894_v14, 2 }
 0x197   : > { %v1776_v0 = vadd.f32 %v1612_v10, %v11921_v31  ;;  %v12086_v61 = vpack.c.b16 %v18509_v58, %v18510_v48  ;;  %v1033_v10 = vmul.f32 %v10031_v57, %v12072_v40  ;;  %v12104_v58 = vmul.f32 %v10043_v62, %v12072_v40 }
 0x198   : > { %v2568_v31 = vsel %vm1537_vm1, %v19229_v49, %v2567_v3  ;;  %v1854_v7 = vmul.f32 %v10091_v18, %v12072_v40  ;;  %v1994_v54 = vmul.f32 %v10045_v63, %v12072_v40  ;;  %v12115_v33 = vmul.f32 %v10049_v2, %v12072_v40 }
 0x199   : > { %19228 = vst [vmem:[#allocation80_spill] sm:$0xff] %v12086_v61  ;;  %v18518_v48 = vrot.slane %v12086_v61, 1  ;;  %v2735_v52 = vadd.f32 %v2568_v31, %v11927_v30  ;;  %v1208_v14 = vrot.slane %v1033_v10, 1  ;;  %v2813_v49 = vmul.f32 %v19090_v42, %v12072_v40 }
 0x19a   : > { %v19230_v30 = vrot.slane %v11707_v11, 1  ;;  %v893_v28 = vmul.f32 %v10062_v8, %v12072_v40  ;;  %v1921_v10 = vadd.f32 %v1854_v7, %v1776_v0  ;;  %v2165_v35 = vrot.slane %v1994_v54, 1 }
 0x19b   : > { %v19232_v3 = vrot.slane %v11809_v16, 1  ;;  %v1211_v32 = vsel %vm1130_vm0, %v1208_v14, %v1210_v12  ;;  %v19233_v56 = vrot.slane %v12104_v58, 2  ;;  %v19234_v19 = vrot.slane %v11888_v59, 2 }
 0x19c   : > { %v12124_v31 = vsel %vm1130_vm0, %v19230_v30, %v18518_v48  ;;  %v2571_v48 = vrot.slane %v12115_v33, 2  ;;  %v1372_v0 = vadd.f32 %v1211_v32, %v893_v28  ;;  %v19235_v7 = vrot.slane %v11820_v34, 1  ;;  %v19238_v28 = vld [vmem:[#allocation39_spill] sm:$0xff] }
 0x19d   : > { %19231 = vst [vmem:[#allocation81_spill] sm:$0xff] %v12124_v31  ;;  %9397 = vmatmul.msk.bf16.gmra.mxu2 %vm4345_vm3, %v12124_v31  ;;  %v1209_v50 = vsel %vm1130_vm0, %v19232_v3, %v1208_v14  ;;  %v1616_v30 = vsel %vm1537_vm1, %v19234_v19, %v19233_v56  ;;  %v2168_v16 = vsel %vm1130_vm0, %v2165_v35, %v2167_v38  ;;  %v19236_v12 = vrot.slane %v11947_v20, 2  ;;  %v19240_v38 = vld [vmem:[#allocation36_spill] sm:$0xff] }
 0x19e   : > { %v1371_v40 = vadd.f32 %v1209_v50, %v892_v23  ;;  %v2166_v54 = vsel %vm1130_vm0, %v19235_v7, %v2165_v35  ;;  %v2332_v3 = vadd.f32 %v2168_v16, %v1921_v10  ;;  %v12147_v43 = vadd.f32 %v2813_v49, %v2735_v52  ;;  %v19246_v49 = vld [vmem:[#allocation15_spill] sm:$0xff]  ;;  %v19248_v7 = vld [vmem:[#allocation24_spill] sm:$0xff] }
 0x19f   : > { %v2331_v31 = vadd.f32 %v2166_v54, %v1920_v24  ;;  %v2572_v14 = vsel %vm1537_vm1, %v19236_v12, %v2571_v48  ;;  %v12151_v19 = vmul.f32 %v19091_v41, %v19222_v27  ;;  %v1617_v32 = vrot.slane %v12090_v51, 2  ;;  %v12169_v24 = vld [vmem:[%s18337_s1 + $0x8] ss:$0 sm:$0xff]  ;;  %v12193_v54 = vpop.permute.xlu1 %735 }
 0x1a0   : > { %19237 = vst [vmem:[#allocation82_spill] sm:$0xff] %v12147_v43  ;;  %v2573_v34 = vrot.slane %v12095_v55, 2  ;;  %v1778_v59 = vadd.f32 %v1616_v30, %v1371_v40  ;;  %v19239_v50 = vrot.slane %v19238_v28, 2  ;;  %v19241_v56 = vrot.slane %v19240_v38, 2  ;;  %v12175_v40 = vpop.permute.xlu2 %740  ;;  %v19260_v43 = vld [vmem:[#allocation42_spill] sm:$0xff] }
 0x1a1   : > { %v12164_v20 = vmul.f32 %v19090_v42, %v11426_v60  ;;  %v12173_v35 = vmul.f32 %v12169_v24, %v19222_v27  ;;  %19244 = vst [vmem:[#allocation83_spill] sm:$0xff] %v12175_v40  ;;  %v12177_v51 = vadd.f32 %v2572_v14, %v2331_v31  ;;  %v18525_v60 = vrot.slane %v12050_v25, 2 }
 0x1a2   : > { %v12160_v23 = vsel %vm1537_vm1, %v19241_v56, %v19239_v50  ;;  %v18524_v33 = vrot.slane %v12076_v39, 2  ;;  %v12185_v10 = vadd.f32 %v12004_v13, %v19246_v49  ;;  %v12191_v31 = vadd.f32 %v12031_v5, %v19248_v7  ;;  %19249 = vst [vmem:[#allocation24_spill] sm:$0xff] %v12193_v54  ;;  %v19250_v56 = vld [vmem:[#allocation46_spill] sm:$0xff]  ;;  %v19252_v7 = vld [vmem:[#allocation8_spill] sm:$0xff] }
 0x1a3   : > { %19242 = vst [vmem:[#allocation39_spill] sm:$0xff] %v12164_v20  ;;  %v12198_v12 = vmul.f32 %v10031_v57, %v12175_v40  ;;  %v1620_v13 = vsel %vm1537_vm1, %v1617_v32, %v18525_v60  ;;  %v12209_v5 = vmul.f32 %v10045_v63, %v12175_v40  ;;  %v19251_v49 = vrot.slane %v19250_v56, 2 }
 0x1a4   : > { %19243 = vst [vmem:[#allocation36_spill] sm:$0xff] %v12173_v35  ;;  %v2576_v14 = vsel %vm1537_vm1, %v2573_v34, %v18524_v33  ;;  %v1780_v50 = vadd.f32 %v1620_v13, %v1373_v22  ;;  %v19253_v52 = vrot.slane %v19252_v7, 2  ;;  %v12220_v27 = vmul.f32 %v19090_v42, %v11602_v9 }
 0x1a5   : > { %19245 = vst [vmem:[#allocation84_spill] sm:$0xff] %v12177_v51  ;;  %v2739_v38 = vadd.f32 %v2576_v14, %v2333_v37  ;;  %v1037_v28 = vmul.f32 %v10031_v57, %v12193_v54  ;;  %v1858_v16 = vmul.f32 %v10091_v18, %v12193_v54  ;;  %v12228_v22 = vmul.f32 %v19091_v41, %v11602_v9  ;;  %v12246_v51 = vpop.permute.xlu0 %730 }
 0x1a6   : > { %19247 = vst [vmem:[#allocation15_spill] sm:$0xff] %v12185_v10  ;;  %v12216_v55 = vsel %vm1537_vm1, %v19253_v52, %v19251_v49  ;;  %v12232_v37 = vmul.f32 %v12169_v24, %v11602_v9  ;;  %v1998_v52 = vmul.f32 %v10045_v63, %v12193_v54  ;;  %v2817_v13 = vmul.f32 %v19090_v42, %v12193_v54 }
 0x1a7   : > { %19254 = vst [vmem:[#allocation46_spill] sm:$0xff] %v12216_v55  ;;  %v1856_v14 = vmul.f32 %v10091_v18, %v11983_v36  ;;  %v18530_v56 = vrot.slane %v12198_v12, 1  ;;  %v1216_v49 = vrot.slane %v1037_v28, 1  ;;  %v1925_v7 = vadd.f32 %v1858_v16, %v1780_v50 }
 0x1a8   : > { %19255 = vst [vmem:[#allocation8_spill] sm:$0xff] %v12220_v27  ;;  %v897_v33 = vmul.f32 %v10062_v8, %v12193_v54  ;;  %v2173_v9 = vrot.slane %v1998_v52, 1  ;;  %v12244_v60 = vadd.f32 %v2817_v13, %v2739_v38  ;;  %v2799_v27 = vmul.f32 %v19090_v42, %v19260_v43 }
 0x1a9   : > { %19256 = vst [vmem:[#allocation85_spill] sm:$0xff] %v12228_v22  ;;  %v1219_v20 = vsel %vm1130_vm0, %v1216_v49, %v18530_v56  ;;  %v19261_v28 = vrot.slane %v12104_v58, 2  ;;  %v1923_v50 = vadd.f32 %v1856_v14, %v1778_v59  ;;  %v19262_v52 = vrot.slane %v12209_v5, 1 }
 0x1aa   : > { %19257 = vst [vmem:[#allocation86_spill] sm:$0xff] %v12232_v37  ;;  %v12256_v30 = vadd.f32 %v1219_v20, %v897_v33  ;;  %v12264_v4 = vmul.f32 %v19091_v41, %v19260_v43  ;;  %v1036_v58 = vmul.f32 %v10031_v57, %v12246_v51  ;;  %v1857_v59 = vmul.f32 %v10091_v18, %v12246_v51 }
 0x1ab   : > { %19258 = vst [vmem:[#allocation87_spill] sm:$0xff] %v12244_v60  ;;  %v1618_v16 = vsel %vm1537_vm1, %v19261_v28, %v1617_v32  ;;  %v2176_v38 = vsel %vm1130_vm0, %v2173_v9, %v19262_v52  ;;  %v2574_v60 = vsel %vm1537_vm1, %v2571_v48, %v2573_v34  ;;  %v12272_v32 = vmul.f32 %v10043_v62, %v12246_v51 }
 0x1ac   : > { %19259 = vst [vmem:[#allocation88_spill] sm:$0xff] %v12246_v51  ;;  %v1779_v13 = vadd.f32 %v1618_v16, %v1372_v0  ;;  %v12266_v26 = vadd.f32 %v2176_v38, %v1925_v7  ;;  %v2738_v56 = vadd.f32 %v2574_v60, %v2332_v3  ;;  %v1997_v48 = vmul.f32 %v10045_v63, %v12246_v51 }
 0x1ad   : > { %19263 = vst [vmem:[#allocation42_spill] sm:$0xff] %v12264_v4  ;;  %v12280_v0 = vmul.f32 %v10049_v2, %v12246_v51  ;;  %v895_v3 = vmul.f32 %v10062_v8, %v11983_v36  ;;  %v896_v34 = vmul.f32 %v10062_v8, %v12246_v51  ;;  %v1214_v20 = vrot.slane %v1036_v58, 1 }
 0x1ae   : > { %v2816_v60 = vmul.f32 %v19090_v42, %v12246_v51  ;;  %v18534_v33 = vrot.slane %v12272_v32, 2  ;;  %v1924_v14 = vadd.f32 %v1857_v59, %v1779_v13  ;;  %v2171_v7 = vrot.slane %v1997_v48, 1 }
 0x1af   : > { %v12292_v16 = vmul.f32 %v10043_v62, %v12175_v40  ;;  %v19264_v52 = vrot.slane %v12022_v1, 1  ;;  %v1217_v10 = vsel %vm1130_vm0, %v1214_v20, %v1216_v49  ;;  %v19266_v13 = vrot.slane %v12050_v25, 2 }
 0x1b0   : > { %v12298_v58 = vadd.f32 %v2816_v60, %v2738_v56  ;;  %v12300_v51 = vadd.f32 %v1217_v10, %v896_v34  ;;  %v19267_v48 = vrot.slane %v12037_v15, 1  ;;  %v12312_v1 = vmul.f32 %v10043_v62, %v12193_v54 }
 0x1b1   : > { %v1215_v38 = vsel %vm1130_vm0, %v19264_v52, %v1214_v20  ;;  %v1622_v59 = vsel %vm1537_vm1, %v19266_v13, %v18534_v33  ;;  %v2174_v56 = vsel %vm1130_vm0, %v2171_v7, %v2173_v9  ;;  %v19268_v10 = vrot.slane %v12280_v0, 2 }
 0x1b2   : > { %19265 = vst [vmem:[#allocation89_spill] sm:$0xff] %v12298_v58  ;;  %v1374_v55 = vadd.f32 %v1215_v38, %v895_v3  ;;  %v2172_v28 = vsel %vm1130_vm0, %v19267_v48, %v2171_v7  ;;  %v19269_v3 = vrot.slane %v12076_v39, 2  ;;  %v12322_v20 = vadd.f32 %v2174_v56, %v1924_v14  ;;  %v19291_v58 = vld [vmem:[#allocation75_spill] sm:$0xff] }
 0x1b3   : > { %v2334_v49 = vadd.f32 %v2172_v28, %v1923_v50  ;;  %v4131_v15 = vshrl.u32 %v11707_v11, 16  ;;  %v4135_v60 = vshll.u32 %v12086_v61, 16  ;;  %v12328_v52 = vmul.f32 %v10049_v2, %v12193_v54 }
 0x1b4   : > { %v2578_v34 = vsel %vm1537_vm1, %v19269_v3, %v19268_v10  ;;  %v12320_v25 = vadd.f32 %v1622_v59, %v1374_v55  ;;  %v19271_v50 = vrot.slane %v11805_v45, 1  ;;  %v19272_v39 = vrot.slane %v11827_v44, 1  ;;  %v19273_v55 = vld [vmem:[#allocation35_spill] sm:$0xff] }
 0x1b5   : > { %v12330_v9 = vadd.f32 %v2578_v34, %v2334_v49  ;;  %v19274_v28 = vrot.slane %v19273_v55, 1  ;;  %v4133_v13 = vor.u32 %v4131_v15, %v11958_v21  ;;  %v12343_v59 = vrot.slane %v4135_v60, 1  ;;  %v19278_v34 = vld [vmem:[#allocation50_spill] sm:$0xff]  ;;  %v12363_v60 = vpop.permute.xlu2 %755 }
 0x1b6   : > { %v3082_v7 = vsel %vm1130_vm0, %v19272_v39, %v19271_v50  ;;  %v19275_v14 = vmov %v19271_v50  ;;  %v12349_v49 = vmul.f32 %v10049_v2, %v12175_v40  ;;  %v1623_v44 = vrot.slane %v12312_v1, 2  ;;  %19281 = vst [vmem:[#allocation35_spill] sm:$0xff] %v12363_v60 }
 0x1b7   : > { %19270 = vst [vmem:[#allocation90_spill] sm:$0xff] %v12330_v9  ;;  %v3084_v38 = vsel %vm1130_vm0, %v19275_v14, %v19274_v28  ;;  %v3270_v48 = vadd.f32 %v3082_v7, %v11971_v46  ;;  %v19276_v10 = vrot.slane %v11816_v47, 2  ;;  %v19277_v45 = vrot.slane %v11831_v29, 2  ;;  %v19284_v14 = vld [vmem:[#allocation22_spill] sm:$0xff] }
 0x1b8   : > { %v3271_v56 = vadd.f32 %v3084_v38, %v11836_v53  ;;  %v19279_v21 = vrot.slane %v19278_v34, 2  ;;  %v12367_v50 = vsel %vm4094_vm2, %v4133_v13, %v12343_v59  ;;  %v12372_v7 = vmul.f32 %v12169_v24, %v19260_v43  ;;  %v19288_v43 = vld [vmem:[#allocation45_spill] sm:$0xff] }
 0x1b9   : > { %v3488_v3 = vsel %vm1537_vm1, %v19277_v45, %v19276_v10  ;;  %v19280_v15 = vmov %v19276_v10  ;;  %19282 = vst [vmem:[#allocation91_spill] sm:$0xff] %v12367_v50  ;;  %v18533_v47 = vrot.slane %v12292_v16, 2  ;;  %v2579_v28 = vrot.slane %v12328_v52, 2  ;;  %9327 = vmatmul.msk.bf16.gmra.mxu0 %vm4345_vm3, %v12367_v50  ;;  %v12384_v45 = vpop.permute.xlu1 %750 }
 0x1ba   : > { %v3490_v46 = vsel %vm1537_vm1, %v19280_v15, %v19279_v21  ;;  %v3676_v1 = vadd.f32 %v3488_v3, %v3270_v48  ;;  %19283 = vst [vmem:[#allocation92_spill] sm:$0xff] %v12372_v7  ;;  %v12379_v38 = vadd.f32 %v2799_v27, %v19284_v14  ;;  %v19286_v48 = vld [vmem:[#allocation25_spill] sm:$0xff]  ;;  %v12388_v3 = vmul.f32 %v19090_v42, %v19288_v43 }
 0x1bb   : > { %v3677_v39 = vadd.f32 %v3490_v46, %v3271_v56  ;;  %19287 = vst [vmem:[#allocation93_spill] sm:$0xff] %v12384_v45  ;;  %v18535_v52 = vrot.slane %v12349_v49, 2  ;;  %v12393_v21 = vmul.f32 %v10031_v57, %v12363_v60  ;;  %v1626_v27 = vsel %vm1537_vm1, %v1623_v44, %v18533_v47 }
 0x1bc   : > { %19285 = vst [vmem:[#allocation22_spill] sm:$0xff] %v12379_v38  ;;  %v3747_v56 = vadd.f32 %v19286_v48, %v3676_v1  ;;  %v12400_v15 = vmul.f32 %v19091_v41, %v19288_v43  ;;  %v12405_v14 = vmul.f32 %v12169_v24, %v19288_v43  ;;  %v12409_v29 = vmul.f32 %v10045_v63, %v12363_v60 }
 0x1bd   : > { %v3748_v10 = vadd.f32 %v19286_v48, %v3677_v39  ;;  %v1783_v39 = vadd.f32 %v1626_v27, %v12256_v30  ;;  %v2582_v53 = vsel %vm1537_vm1, %v2579_v28, %v18535_v52  ;;  %v1040_v13 = vmul.f32 %v10031_v57, %v12384_v45 }
 0x1be   : > { %v3814_v46 = vmax.f32 %v3747_v56, 0.0  ;;  %v1859_v56 = vmul.f32 %v10091_v18, %v12175_v40  ;;  %v2742_v43 = vadd.f32 %v2582_v53, %v12266_v26  ;;  %v18545_v27 = vrot.slane %v12393_v21, 1  ;;  %v12452_v26 = vpop.permute.xlu0 %745 }
 0x1bf   : > { %v3815_v1 = vmax.f32 %v3748_v10, 0.0  ;;  %v1222_v47 = vrot.slane %v1040_v13, 1  ;;  %v1861_v33 = vmul.f32 %v10091_v18, %v12384_v45  ;;  %v2001_v52 = vmul.f32 %v10045_v63, %v12384_v45  ;;  %19295 = vst [vmem:[#allocation97_spill] sm:$0xff] %v12452_v26 }
 0x1c0   : > { %v12418_v10 = vpack.c.bf16 %v3814_v46, %v3814_v46  ;;  %v900_v46 = vmul.f32 %v10062_v8, %v12384_v45  ;;  %v12440_v54 = vmul.f32 %v19091_v41, %v19291_v58 }
 0x1c1   : > { %v12420_v30 = vpack.c.bf16 %v3815_v1, %v3815_v1  ;;  %v2820_v1 = vmul.f32 %v19090_v42, %v12384_v45  ;;  %v1225_v53 = vsel %vm1130_vm0, %v1222_v47, %v18545_v27  ;;  %v1928_v13 = vadd.f32 %v1861_v33, %v1783_v39 }
 0x1c2   : > { %19289 = vst [vmem:[#allocation45_spill] sm:$0xff] %v12418_v10  ;;  %v18548_v50 = vunpack.c.l.b16 %v12418_v10  ;;  %v2179_v9 = vrot.slane %v2001_v52, 1  ;;  %v12448_v22 = vadd.f32 %v1225_v53, %v900_v46  ;;  %v898_v33 = vmul.f32 %v10062_v8, %v12175_v40 }
 0x1c3   : > { %19290 = vst [vmem:[#allocation94_spill] sm:$0xff] %v12420_v30  ;;  %v18547_v11 = vunpack.c.l.b16 %v12420_v30  ;;  %v12450_v38 = vadd.f32 %v2820_v1, %v2742_v43  ;;  %v19296_v52 = vrot.slane %v12409_v29, 1  ;;  %v19297_v27 = vrot.slane %v12272_v32, 2 }
 0x1c4   : > { %19292 = vst [vmem:[#allocation75_spill] sm:$0xff] %v12440_v54  ;;  %v12465_v46 = vmul.f32 %v10043_v62, %v12363_v60  ;;  %v12475_v32 = vmul.f32 %v10043_v62, %v12384_v45 }
 0x1c5   : > { %v12446_v37 = vpack.c.b16 %v18547_v11, %v18548_v50  ;;  %19294 = vst [vmem:[#allocation96_spill] sm:$0xff] %v12450_v38  ;;  %v2182_v39 = vsel %vm1130_vm0, %v2179_v9, %v19296_v52  ;;  %v1624_v10 = vsel %vm1537_vm1, %v19297_v27, %v1623_v44  ;;  %v1926_v11 = vadd.f32 %v1859_v56, %v12320_v25 }
 0x1c6   : > { %v2339_v1 = vadd.f32 %v2182_v39, %v1928_v13  ;;  %v1782_v53 = vadd.f32 %v1624_v10, %v12300_v51  ;;  %v12471_v50 = vmul.f32 %v10049_v2, %v12363_v60  ;;  %v19298_v44 = vrot.slane %v12280_v0, 2 }
 0x1c7   : > { %19293 = vst [vmem:[#allocation95_spill] sm:$0xff] %v12446_v37  ;;  %v18549_v43 = vrot.slane %v12446_v37, 1  ;;  %v1039_v56 = vmul.f32 %v10031_v57, %v12452_v26  ;;  %v19299_v27 = vrot.slane %v12086_v61, 1  ;;  %v12492_v13 = vmul.f32 %v10043_v62, %v12452_v26 }
 0x1c8   : > { %v2580_v25 = vsel %vm1537_vm1, %v19298_v44, %v2579_v28  ;;  %v1860_v0 = vmul.f32 %v10091_v18, %v12452_v26  ;;  %v2000_v52 = vmul.f32 %v10045_v63, %v12452_v26  ;;  %v12502_v39 = vmul.f32 %v10049_v2, %v12452_v26 }
 0x1c9   : > { %v12487_v51 = vsel %vm1130_vm0, %v19299_v27, %v18549_v43  ;;  %v2741_v10 = vadd.f32 %v2580_v25, %v12322_v20  ;;  %v1220_v28 = vrot.slane %v1039_v56, 1  ;;  %v2819_v20 = vmul.f32 %v19090_v42, %v12452_v26 }
 0x1ca   : > { %19300 = vst [vmem:[#allocation98_spill] sm:$0xff] %v12487_v51  ;;  %9398 = vmatmul.msk.bf16.gmra.mxu2 %vm4345_vm3, %v12487_v51  ;;  %v12508_v44 = vmul.f32 %v10049_v2, %v12384_v45  ;;  %v899_v25 = vmul.f32 %v10062_v8, %v12452_v26  ;;  %v1627_v27 = vrot.slane %v12492_v13, 2  ;;  %v1927_v56 = vadd.f32 %v1860_v0, %v1782_v53 }
 0x1cb   : > { %v19301_v43 = vrot.slane %v12198_v12, 1  ;;  %v1223_v30 = vsel %vm1130_vm0, %v1220_v28, %v1222_v47  ;;  %v2177_v38 = vrot.slane %v2000_v52, 1  ;;  %v2583_v40 = vrot.slane %v12502_v39, 2  ;;  %v19315_v39 = vld [vmem:[#allocation13_spill] sm:$0xff] }
 0x1cc   : > { %v1378_v48 = vadd.f32 %v1223_v30, %v899_v25  ;;  %v19302_v45 = vrot.slane %v12292_v16, 2  ;;  %v12521_v35 = vadd.f32 %v2819_v20, %v2741_v10  ;;  %v1629_v13 = vrot.slane %v12475_v32, 2  ;;  %v19306_v10 = vld [vmem:[#allocation32_spill] sm:$0xff] }
 0x1cd   : > { %v1221_v51 = vsel %vm1130_vm0, %v19301_v43, %v1220_v28  ;;  %v19304_v53 = vrot.slane %v12209_v5, 1  ;;  %v2180_v43 = vsel %vm1130_vm0, %v2177_v38, %v2179_v9  ;;  %v19305_v47 = vrot.slane %v12349_v49, 2  ;;  %v12542_v49 = vpop.permute.xlu2 %770 }
 0x1ce   : > { %v1377_v4 = vadd.f32 %v1221_v51, %v898_v33  ;;  %v1628_v34 = vsel %vm1537_vm1, %v19302_v45, %v1627_v27  ;;  %19303 = vst [vmem:[#allocation99_spill] sm:$0xff] %v12521_v35  ;;  %v2585_v30 = vrot.slane %v12508_v44, 2  ;;  %v2338_v51 = vadd.f32 %v2180_v43, %v1927_v56 }
 0x1cf   : > { %v2178_v12 = vsel %vm1130_vm0, %v19304_v53, %v2177_v38  ;;  %v2584_v0 = vsel %vm1537_vm1, %v19305_v47, %v2583_v40  ;;  %v12535_v32 = vadd.f32 %v12388_v3, %v19306_v10  ;;  %v12540_v9 = vmul.f32 %v12169_v24, %v19291_v58  ;;  %19309 = vst [vmem:[#allocation101_spill] sm:$0xff] %v12542_v49  ;;  %v19310_v38 = vld [vmem:[#allocation27_spill] sm:$0xff]  ;;  %v19313_v3 = vld [vmem:[#allocation33_spill] sm:$0xff] }
 0x1d0   : > { %v1784_v33 = vadd.f32 %v1628_v34, %v1377_v4  ;;  %v2337_v16 = vadd.f32 %v2178_v12, %v1926_v11  ;;  %v12546_v28 = vmul.f32 %v19091_v41, %v19310_v38  ;;  %v18562_v11 = vrot.slane %v12465_v46, 2  ;;  %v12568_v12 = vpop.permute.xlu1 %765 }
 0x1d1   : > { %19307 = vst [vmem:[#allocation32_spill] sm:$0xff] %v12535_v32  ;;  %v18561_v4 = vrot.slane %v12471_v50, 2  ;;  %v19314_v52 = vrot.slane %v19313_v3, 2  ;;  %v19316_v20 = vrot.slane %v19315_v39, 2  ;;  %v12562_v56 = vmul.f32 %v19090_v42, %v19291_v58  ;;  %v19321_v39 = vld [vmem:[#allocation53_spill] sm:$0xff] }
 0x1d2   : > { %19308 = vst [vmem:[#allocation100_spill] sm:$0xff] %v12540_v9  ;;  %v12550_v34 = vadd.f32 %v2584_v0, %v2337_v16  ;;  %v12566_v53 = vmul.f32 %v12169_v24, %v19310_v38  ;;  %v12573_v47 = vmul.f32 %v10031_v57, %v12542_v49  ;;  %v1632_v0 = vsel %vm1537_vm1, %v1629_v13, %v18562_v11 }
 0x1d3   : > { %19311 = vst [vmem:[#allocation27_spill] sm:$0xff] %v12546_v28  ;;  %v12557_v44 = vsel %vm1537_vm1, %v19316_v20, %v19314_v52  ;;  %v2588_v58 = vsel %vm1537_vm1, %v2585_v30, %v18561_v4  ;;  %v12584_v10 = vmul.f32 %v10045_v63, %v12542_v49  ;;  %v1786_v38 = vadd.f32 %v1632_v0, %v12448_v22 }
 0x1d4   : > { %19312 = vst [vmem:[#allocation102_spill] sm:$0xff] %v12550_v34  ;;  %v2745_v3 = vadd.f32 %v2588_v58, %v2339_v1  ;;  %v12590_v20 = vmul.f32 %v19091_v41, %v19321_v39  ;;  %v1043_v43 = vmul.f32 %v10031_v57, %v12568_v12  ;;  %v1864_v45 = vmul.f32 %v10091_v18, %v12568_v12  ;;  %v12613_v34 = vpop.permute.xlu0 %760 }
 0x1d5   : > { %19317 = vst [vmem:[#allocation33_spill] sm:$0xff] %v12557_v44  ;;  %v12599_v25 = vmul.f32 %v12169_v24, %v19321_v39  ;;  %v2004_v22 = vmul.f32 %v10045_v63, %v12568_v12  ;;  %v2823_v1 = vmul.f32 %v19090_v42, %v12568_v12  ;;  %v1862_v0 = vmul.f32 %v10091_v18, %v12363_v60 }
 0x1d6   : > { %19318 = vst [vmem:[#allocation13_spill] sm:$0xff] %v12562_v56  ;;  %v18565_v58 = vrot.slane %v12573_v47, 1  ;;  %v1228_v52 = vrot.slane %v1043_v43, 1  ;;  %v1931_v5 = vadd.f32 %v1864_v45, %v1786_v38  ;;  %v18566_v4 = vrot.slane %v12584_v10, 1 }
 0x1d7   : > { %19319 = vst [vmem:[#allocation103_spill] sm:$0xff] %v12566_v53  ;;  %v903_v16 = vmul.f32 %v10062_v8, %v12568_v12  ;;  %v2185_v39 = vrot.slane %v2004_v22, 1  ;;  %v12611_v11 = vadd.f32 %v2823_v1, %v2745_v3  ;;  %v1630_v26 = vsel %vm1537_vm1, %v1627_v27, %v1629_v13 }
 0x1d8   : > { %19320 = vst [vmem:[#allocation104_spill] sm:$0xff] %v12568_v12  ;;  %v1231_v56 = vsel %vm1130_vm0, %v1228_v52, %v18565_v58  ;;  %v1929_v43 = vadd.f32 %v1862_v0, %v1784_v33  ;;  %v1785_v22 = vadd.f32 %v1630_v26, %v1378_v48  ;;  %v2586_v3 = vsel %vm1537_vm1, %v2583_v40, %v2585_v30  ;;  %v12648_v30 = vpop.permute.xlu2 %790 }
 0x1d9   : > { %19322 = vst [vmem:[#allocation53_spill] sm:$0xff] %v12590_v20  ;;  %v12620_v45 = vadd.f32 %v1231_v56, %v903_v16  ;;  %v2188_v38 = vsel %vm1130_vm0, %v2185_v39, %v18566_v4  ;;  %v901_v1 = vmul.f32 %v10062_v8, %v12363_v60  ;;  %v1042_v58 = vmul.f32 %v10031_v57, %v12613_v34 }
 0x1da   : > { %19323 = vst [vmem:[#allocation105_spill] sm:$0xff] %v12599_v25  ;;  %v12628_v35 = vadd.f32 %v2188_v38, %v1931_v5  ;;  %v12634_v27 = vmul.f32 %v10043_v62, %v12613_v34  ;;  %v1863_v13 = vmul.f32 %v10091_v18, %v12613_v34  ;;  %v2003_v48 = vmul.f32 %v10045_v63, %v12613_v34 }
 0x1db   : > { %19324 = vst [vmem:[#allocation106_spill] sm:$0xff] %v12611_v11  ;;  %v2744_v11 = vadd.f32 %v2586_v3, %v2338_v51  ;;  %v12642_v40 = vmul.f32 %v10049_v2, %v12613_v34  ;;  %v12646_v26 = vmul.f32 %v10043_v62, %v12542_v49  ;;  %v902_v33 = vmul.f32 %v10062_v8, %v12613_v34 }
 0x1dc   : > { %19325 = vst [vmem:[#allocation107_spill] sm:$0xff] %v12613_v34  ;;  %v1226_v51 = vrot.slane %v1042_v58, 1  ;;  %v2822_v5 = vmul.f32 %v19090_v42, %v12613_v34  ;;  %v18575_v56 = vrot.slane %v12634_v27, 2  ;;  %v1930_v16 = vadd.f32 %v1863_v13, %v1785_v22 }
 0x1dd   : > { %19326 = vst [vmem:[#allocation108_spill] sm:$0xff] %v12648_v30  ;;  %v2183_v0 = vrot.slane %v2003_v48, 1  ;;  %v12658_v3 = vmul.f32 %v10043_v62, %v12568_v12  ;;  %v19327_v4 = vrot.slane %v12393_v21, 1  ;;  %v19329_v22 = vrot.slane %v12465_v46, 2 }
 0x1de   : > { %v1229_v54 = vsel %vm1130_vm0, %v1226_v51, %v1228_v52  ;;  %v12664_v58 = vadd.f32 %v2822_v5, %v2744_v11  ;;  %v19330_v48 = vrot.slane %v12409_v29, 1  ;;  %v12678_v21 = vmul.f32 %v10049_v2, %v12568_v12 }
 0x1df   : > { %v1227_v9 = vsel %vm1130_vm0, %v19327_v4, %v1226_v51  ;;  %v12666_v34 = vadd.f32 %v1229_v54, %v902_v33  ;;  %v1634_v13 = vsel %vm1537_vm1, %v19329_v22, %v18575_v56  ;;  %v2186_v11 = vsel %vm1130_vm0, %v2183_v0, %v2185_v39  ;;  %v19355_v56 = vld [vmem:[#allocation43_spill] sm:$0xff] }
 0x1e0   : > { %19328 = vst [vmem:[#allocation109_spill] sm:$0xff] %v12664_v58  ;;  %v1380_v60 = vadd.f32 %v1227_v9, %v901_v1  ;;  %v2184_v38 = vsel %vm1130_vm0, %v19330_v48, %v2183_v0  ;;  %v19331_v54 = vrot.slane %v12642_v40, 2  ;;  %v19332_v9 = vrot.slane %v12471_v50, 2 }
 0x1e1   : > { %v2340_v4 = vadd.f32 %v2184_v38, %v1929_v43  ;;  %v12688_v1 = vadd.f32 %v2186_v11, %v1930_v16  ;;  %v4139_v29 = vshrl.u32 %v12086_v61, 16  ;;  %v4143_v33 = vshll.u32 %v12446_v37, 16  ;;  %v19334_v43 = vld [vmem:[#allocation49_spill] sm:$0xff] }
 0x1e2   : > { %v2590_v52 = vsel %vm1537_vm1, %v19332_v9, %v19331_v54  ;;  %v12686_v46 = vadd.f32 %v1634_v13, %v1380_v60  ;;  %v12694_v51 = vmul.f32 %v10049_v2, %v12542_v49  ;;  %v2716_v5 = vadd.f32 %v12160_v23, %v19334_v43  ;;  %v19340_v54 = vld [vmem:[#allocation40_spill] sm:$0xff] }
 0x1e3   : > { %v12696_v39 = vadd.f32 %v2590_v52, %v2340_v4  ;;  %v19335_v50 = vrot.slane %v12009_v6, 1  ;;  %v19336_v60 = vrot.slane %v12151_v19, 1  ;;  %v4141_v0 = vor.u32 %v4139_v29, %v12343_v59  ;;  %v19342_v52 = vld [vmem:[#allocation36_spill] sm:$0xff] }
 0x1e4   : > { %v12706_v38 = vrot.slane %v4143_v33, 1  ;;  %v19338_v13 = vrot.slane %v19273_v55, 1  ;;  %v12717_v4 = vmul.f32 %v19091_v41, %v11983_v36  ;;  %v2861_v9 = vadd.f32 %v19340_v54, %v2716_v5  ;;  %v19346_v5 = vld [vmem:[#allocation59_spill] sm:$0xff] }
 0x1e5   : > { %19333 = vst [vmem:[#allocation110_spill] sm:$0xff] %v12696_v39  ;;  %v3088_v16 = vsel %vm1130_vm0, %v19336_v60, %v19335_v50  ;;  %v19337_v22 = vmov %v19336_v60  ;;  %v19341_v59 = vrot.slane %v12013_v17, 2  ;;  %v19343_v29 = vrot.slane %v19342_v52, 2 }
 0x1e6   : > { %v3086_v48 = vsel %vm1130_vm0, %v19338_v13, %v19337_v22  ;;  %v3273_v11 = vadd.f32 %v3088_v16, %v12191_v31  ;;  %19339 = vst [vmem:[#allocation49_spill] sm:$0xff] %v12717_v4  ;;  %v1635_v55 = vrot.slane %v12658_v3, 2  ;;  %v2591_v33 = vrot.slane %v12678_v21, 2  ;;  %v12743_v3 = vpop.permute.xlu2 %805  ;;  %v12764_v22 = vpop.permute.xlu1 %780 }
 0x1e7   : > { %v3494_v19 = vsel %vm1537_vm1, %v19343_v29, %v19341_v59  ;;  %v12729_v31 = vsel %vm4094_vm2, %v4141_v0, %v12706_v38  ;;  %v12733_v50 = vmul.f32 %v19090_v42, %v11983_v36  ;;  %v12737_v60 = vmul.f32 %v19091_v41, %v19346_v5  ;;  %19349 = vst [vmem:[#allocation112_spill] sm:$0xff] %v12743_v3 }
 0x1e8   : > { %19344 = vst [vmem:[#allocation40_spill] sm:$0xff] %v12729_v31  ;;  %v3679_v43 = vadd.f32 %v3494_v19, %v3273_v11  ;;  %v12741_v16 = vmul.f32 %v12169_v24, %v19346_v5  ;;  %9328 = vmatmul.msk.bf16.gmra.mxu0 %vm4345_vm3, %v12729_v31  ;;  %v3272_v21 = vadd.f32 %v3086_v48, %v2861_v9  ;;  %v18577_v0 = vrot.slane %v12646_v26, 2  ;;  %v19351_v11 = vld [vmem:[#allocation50_spill] sm:$0xff]  ;;  %v19360_v31 = vld [vmem:[#allocation65_spill] sm:$0xff] }
 0x1e9   : > { %19345 = vst [vmem:[#allocation36_spill] sm:$0xff] %v12733_v50  ;;  %v19350_v13 = vmov %v19343_v29  ;;  %v19352_v54 = vrot.slane %v19351_v11, 2  ;;  %v19353_v29 = vld [vmem:[#allocation25_spill] sm:$0xff]  ;;  %v12758_v23 = vmul.f32 %v12169_v24, %v11983_v36  ;;  %v12762_v48 = vmul.f32 %v19091_v41, %v19355_v56 }
 0x1ea   : > { %19347 = vst [vmem:[#allocation59_spill] sm:$0xff] %v12737_v60  ;;  %v3750_v19 = vadd.f32 %v19353_v29, %v3679_v43  ;;  %v12768_v52 = vmul.f32 %v12169_v24, %v19355_v56  ;;  %v1638_v43 = vsel %vm1537_vm1, %v1635_v55, %v18577_v0  ;;  %v19359_v11 = vrot.slane %v12694_v51, 2 }
 0x1eb   : > { %19348 = vst [vmem:[#allocation111_spill] sm:$0xff] %v12741_v16  ;;  %v3492_v59 = vsel %vm1537_vm1, %v19352_v54, %v19350_v13  ;;  %v12789_v0 = vmul.f32 %v10031_v57, %v12764_v22  ;;  %v19367_v4 = vrot.slane %v12634_v27, 2  ;;  %v19371_v56 = vrot.slane %v12573_v47, 1 }
 0x1ec   : > { %19354 = vst [vmem:[#allocation50_spill] sm:$0xff] %v12758_v23  ;;  %v3678_v9 = vadd.f32 %v3492_v59, %v3272_v21  ;;  %v3817_v13 = vmax.f32 %v3750_v19, 0.0  ;;  %v2594_v36 = vsel %vm1537_vm1, %v2591_v33, %v19359_v11  ;;  %v1789_v21 = vadd.f32 %v1638_v43, %v12620_v45  ;;  %v12818_v11 = vpop.permute.xlu0 %775 }
 0x1ed   : > { %19356 = vst [vmem:[#allocation25_spill] sm:$0xff] %v12762_v48  ;;  %v2748_v59 = vadd.f32 %v2594_v36, %v12628_v35  ;;  %v12783_v19 = vmul.f32 %v19091_v41, %v19360_v31  ;;  %v12794_v45 = vmul.f32 %v10043_v62, %v12764_v22  ;;  %v1867_v35 = vmul.f32 %v10091_v18, %v12764_v22 }
 0x1ee   : > { %19357 = vst [vmem:[#allocation43_spill] sm:$0xff] %v12764_v22  ;;  %v3749_v5 = vadd.f32 %v19353_v29, %v3678_v9  ;;  %v12785_v39 = vpack.c.bf16 %v3817_v13, %v3817_v13  ;;  %v12801_v9 = vmul.f32 %v10045_v63, %v12764_v22  ;;  %v12805_v13 = vmul.f32 %v10049_v2, %v12764_v22  ;;  %v13028_v53 = vpop.permute.xlu1 %800 }
 0x1ef   : > { %19358 = vst [vmem:[#allocation113_spill] sm:$0xff] %v12768_v52  ;;  %v12811_v43 = vmul.f32 %v12169_v24, %v19360_v31  ;;  %v12816_v29 = vadd.f32 %v1867_v35, %v1789_v21  ;;  %v1636_v12 = vsel %vm1537_vm1, %v19367_v4, %v1635_v55  ;;  %v12827_v31 = vpop.permute.xlu2 %815  ;;  %v19368_v35 = vrot.slane %v12642_v40, 2 }
 0x1f0   : > { %19361 = vst [vmem:[#allocation65_spill] sm:$0xff] %v12783_v19  ;;  %v3816_v54 = vmax.f32 %v3749_v5, 0.0  ;;  %v2826_v5 = vmul.f32 %v19090_v42, %v12764_v22  ;;  %v1788_v21 = vadd.f32 %v1636_v12, %v12666_v34  ;;  %v1045_v4 = vmul.f32 %v10031_v57, %v12818_v11 }
 0x1f1   : > { %19362 = vst [vmem:[#allocation114_spill] sm:$0xff] %v12785_v39  ;;  %v2592_v61 = vsel %vm1537_vm1, %v19368_v35, %v2591_v33  ;;  %v19369_v55 = vunpack.c.l.b16 %v12785_v39  ;;  %v12848_v34 = vmul.f32 %v10043_v62, %v12818_v11  ;;  %v1866_v12 = vmul.f32 %v10091_v18, %v12818_v11 }
 0x1f2   : > { %19363 = vst [vmem:[#allocation115_spill] sm:$0xff] %v12811_v43  ;;  %v12813_v36 = vpack.c.bf16 %v3816_v54, %v3816_v54  ;;  %v12822_v50 = vadd.f32 %v2826_v5, %v2748_v59  ;;  %v2747_v27 = vadd.f32 %v2592_v61, %v12688_v1  ;;  %v2006_v40 = vmul.f32 %v10045_v63, %v12818_v11 }
 0x1f3   : > { %19365 = vst [vmem:[#allocation117_spill] sm:$0xff] %v12818_v11  ;;  %v905_v61 = vmul.f32 %v10062_v8, %v12818_v11  ;;  %v1232_v1 = vrot.slane %v1045_v4, 1  ;;  %v12858_v33 = vmul.f32 %v10049_v2, %v12818_v11  ;;  %v2825_v35 = vmul.f32 %v19090_v42, %v12818_v11 }
 0x1f4   : > { %19364 = vst [vmem:[#allocation116_spill] sm:$0xff] %v12813_v36  ;;  %v18584_v54 = vunpack.c.l.b16 %v12813_v36  ;;  %v1933_v59 = vadd.f32 %v1866_v12, %v1788_v21  ;;  %v2189_v58 = vrot.slane %v2006_v40, 1  ;;  %v19372_v4 = vrot.slane %v12789_v0, 1 }
 0x1f5   : > { %19366 = vst [vmem:[#allocation118_spill] sm:$0xff] %v12822_v50  ;;  %v12867_v39 = vsel %vm1130_vm0, %v19371_v56, %v1232_v1  ;;  %v18594_v50 = vrot.slane %v12858_v33, 2  ;;  %v12873_v19 = vadd.f32 %v2825_v35, %v2747_v27  ;;  %v19374_v11 = vrot.slane %v12446_v37, 1  ;;  %v19378_v27 = vld [vmem:[#allocation71_spill] sm:$0xff] }
 0x1f6   : > { %v12844_v5 = vpack.c.b16 %v19369_v55, %v18584_v54  ;;  %v18592_v54 = vrot.slane %v12848_v34, 2  ;;  %v1235_v36 = vsel %vm1130_vm0, %v1232_v1, %v19372_v4  ;;  %v19376_v47 = vrot.slane %v12794_v45, 2  ;;  %19400 = vst [vmem:[#allocation140_spill] sm:$0xff] %v13028_v53 }
 0x1f7   : > { %19373 = vst [vmem:[#allocation120_spill] sm:$0xff] %v12873_v19  ;;  %v1384_v12 = vadd.f32 %v1235_v36, %v905_v61  ;;  %v19377_v40 = vrot.slane %v12584_v10, 1  ;;  %v12894_v35 = vmul.f32 %v19091_v41, %v19378_v27  ;;  %v19380_v36 = vrot.slane %v12801_v9, 1 }
 0x1f8   : > { %19370 = vst [vmem:[#allocation119_spill] sm:$0xff] %v12844_v5  ;;  %v18591_v55 = vrot.slane %v12844_v5, 1  ;;  %v1642_v56 = vsel %vm1537_vm1, %v18592_v54, %v19376_v47  ;;  %v19381_v10 = vrot.slane %v12805_v13, 2  ;;  %v12912_v47 = vmul.f32 %v10043_v62, %v12648_v30 }
 0x1f9   : > { %v12890_v1 = vsel %vm1130_vm0, %v19377_v40, %v2189_v58  ;;  %19379 = vst [vmem:[#allocation71_spill] sm:$0xff] %v12894_v35  ;;  %v2192_v61 = vsel %vm1130_vm0, %v2189_v58, %v19380_v36  ;;  %v1869_v40 = vmul.f32 %v10091_v18, %v12648_v30  ;;  %v12922_v58 = vmul.f32 %v10049_v2, %v12648_v30 }
 0x1fa   : > { %v12880_v21 = vsel %vm1130_vm0, %v19374_v11, %v18591_v55  ;;  %v12898_v11 = vmul.f32 %v10031_v57, %v12648_v30  ;;  %v2598_v4 = vsel %vm1537_vm1, %v18594_v50, %v19381_v10  ;;  %19382 = vst [vmem:[#allocation122_spill] sm:$0xff] %v12912_v47  ;;  %v1791_v55 = vadd.f32 %v1642_v56, %v1384_v12  ;;  %v12940_v56 = vpop.permute.xlu2 %830 }
 0x1fb   : > { %19375 = vst [vmem:[#allocation121_spill] sm:$0xff] %v12880_v21  ;;  %9399 = vmatmul.msk.bf16.gmra.mxu2 %vm4345_vm3, %v12880_v21  ;;  %v2344_v54 = vadd.f32 %v2192_v61, %v1933_v59  ;;  %v12918_v21 = vmul.f32 %v10045_v63, %v12648_v30  ;;  %v12926_v36 = vmul.f32 %v10031_v57, %v12743_v3  ;;  %v19410_v32 = vrot.slane %v12922_v58, 2 }
 0x1fc   : > { %v12930_v10 = vmul.f32 %v10043_v62, %v12743_v3  ;;  %v12934_v12 = vmul.f32 %v10045_v63, %v12743_v3  ;;  %v12938_v59 = vmul.f32 %v10049_v2, %v12743_v3  ;;  %19384 = vst [vmem:[#allocation124_spill] sm:$0xff] %v12940_v56  ;;  %v1936_v61 = vadd.f32 %v1869_v40, %v1791_v55 }
 0x1fd   : > { %v12942_v50 = vadd.f32 %v2598_v4, %v2344_v54  ;;  %v12948_v16 = vmul.f32 %v12169_v24, %v19378_v27  ;;  %v12952_v60 = vmul.f32 %v10062_v8, %v12542_v49  ;;  %v12956_v52 = vmul.f32 %v10091_v18, %v12542_v49 }
 0x1fe   : > { %19383 = vst [vmem:[#allocation123_spill] sm:$0xff] %v12938_v59  ;;  %v12960_v54 = vmul.f32 %v10062_v8, %v12648_v30  ;;  %v12968_v19 = vmul.f32 %v10062_v8, %v12743_v3  ;;  %v12972_v23 = vmul.f32 %v10091_v18, %v12743_v3  ;;  %v12980_v40 = vmul.f32 %v10031_v57, %v12827_v31  ;;  %v12994_v30 = vpop.permute.xlu0 %795 }
 0x1ff   : > { %19385 = vst [vmem:[#allocation125_spill] sm:$0xff] %v12942_v50  ;;  %v12984_v27 = vmul.f32 %v10043_v62, %v12827_v31  ;;  %v12988_v3 = vmul.f32 %v10045_v63, %v12827_v31  ;;  %v12992_v50 = vmul.f32 %v10049_v2, %v12827_v31  ;;  %v12998_v4 = vmul.f32 %v10062_v8, %v12827_v31 }
 0x200   : > { %19386 = vst [vmem:[#allocation126_spill] sm:$0xff] %v12948_v16  ;;  %v13002_v55 = vmul.f32 %v10091_v18, %v12827_v31  ;;  %v13006_v49 = vmul.f32 %v19091_v41, %v12827_v31  ;;  %v13010_v43 = vmul.f32 %v12169_v24, %v12827_v31  ;;  %v13014_v35 = vmul.f32 %v19090_v42, %v12827_v31 }
 0x201   : > { %19387 = vst [vmem:[#allocation127_spill] sm:$0xff] %v12968_v19  ;;  %v13018_v16 = vmul.f32 %v10031_v57, %v12940_v56  ;;  %v13022_v48 = vmul.f32 %v10045_v63, %v12940_v56  ;;  %v13026_v25 = vmul.f32 %v10049_v2, %v12940_v56  ;;  %v13032_v28 = vmul.f32 %v19091_v41, %v12940_v56 }
 0x202   : > { %19388 = vst [vmem:[#allocation128_spill] sm:$0xff] %v12972_v23  ;;  %v13036_v31 = vmul.f32 %v12169_v24, %v12940_v56  ;;  %v13044_v20 = vmul.f32 %v10049_v2, %v12994_v30  ;;  %v13054_v47 = vmul.f32 %v10091_v18, %v12940_v56  ;;  %v13056_v59 = vpop.permute.xlu2 %845  ;;  %v13063_v7 = vmul.f32 %v19090_v42, %v12940_v56 }
 0x203   : > { %19389 = vst [vmem:[#allocation129_spill] sm:$0xff] %v12984_v27  ;;  %v13080_v56 = vmul.f32 %v19091_v41, %v13056_v59  ;;  %v19419_v27 = vld [vmem:[#allocation15_spill] sm:$0xff] }
 0x204   : > { %19390 = vst [vmem:[#allocation130_spill] sm:$0xff] %v12992_v50  ;;  %v19409_v19 = vrot.slane %v13044_v20, 2 }
 0x205   : > { %19391 = vst [vmem:[#allocation131_spill] sm:$0xff] %v12994_v30 }
 0x206   : > { %19392 = vst [vmem:[#allocation132_spill] sm:$0xff] %v12998_v4  ;;  %v13076_v4 = vmul.f32 %v10031_v57, %v13056_v59 }
 0x207   : > { %19393 = vst [vmem:[#allocation133_spill] sm:$0xff] %v13002_v55 }
 0x208   : > { %19394 = vst [vmem:[#allocation134_spill] sm:$0xff] %v13006_v49  ;;  %v19407_v49 = vrot.slane %v12918_v21, 1 }
 0x209   : > { %19395 = vst [vmem:[#allocation135_spill] sm:$0xff] %v13010_v43  ;;  %v2604_v43 = vsel %vm1537_vm1, %v19410_v32, %v19409_v19  ;;  %v19417_v32 = vrot.slane %v12400_v15, 1 }
 0x20a   : > { %19396 = vst [vmem:[#allocation136_spill] sm:$0xff] %v13014_v35  ;;  %v13040_v35 = vmul.f32 %v10045_v63, %v12994_v30 }
 0x20b   : > { %19397 = vst [vmem:[#allocation137_spill] sm:$0xff] %v13018_v16 }
 0x20c   : > { %19398 = vst [vmem:[#allocation138_spill] sm:$0xff] %v13022_v48  ;;  %v18636_v55 = vrot.slane %v13040_v35, 1  ;;  %v19415_v48 = vrot.slane %v12009_v6, 1  ;;  %v19420_v6 = vld [vmem:[#allocation38_spill] sm:$0xff] }
 0x20d   : > { %19399 = vst [vmem:[#allocation139_spill] sm:$0xff] %v13026_v25 }
 0x20e   : > { %19401 = vst [vmem:[#allocation141_spill] sm:$0xff] %v13032_v28  ;;  %v2198_v44 = vsel %vm1130_vm0, %v19407_v49, %v18636_v55  ;;  %v19411_v49 = vld [vmem:[#allocation37_spill] sm:$0xff]  ;;  %v19412_v55 = vld [vmem:[#allocation46_spill] sm:$0xff] }
 0x20f   : > { %19402 = vst [vmem:[#allocation142_spill] sm:$0xff] %v13036_v31  ;;  %v2347_v23 = vadd.f32 %v2198_v44, %v1936_v61  ;;  %v4151_v31 = vshll.u32 %v12844_v5, 16  ;;  %v2719_v28 = vadd.f32 %v19412_v55, %v19411_v49  ;;  %v13098_v44 = vmul.f32 %v10031_v57, %v13028_v53 }
 0x210   : > { %19403 = vst [vmem:[#allocation143_spill] sm:$0xff] %v13044_v20  ;;  %v19423_v20 = vrot.slane %v12013_v17, 2  ;;  %v910_v17 = vmul.f32 %v10062_v8, %v13028_v53 }
 0x211   : > { %19404 = vst [vmem:[#allocation144_spill] sm:$0xff] %v13054_v47  ;;  %v19413_v47 = vld [vmem:[#allocation57_spill] sm:$0xff]  ;;  %v13100_v61 = vadd.f32 %v2604_v43, %v2347_v23  ;;  %v13109_v41 = vrot.slane %v4151_v31, 1  ;;  %v906_v43 = vmul.f32 %v10062_v8, %v12764_v22  ;;  %v13139_v31 = vmul.f32 %v10043_v62, %v13028_v53 }
 0x212   : > { %19405 = vst [vmem:[#allocation145_spill] sm:$0xff] %v13056_v59  ;;  %v19414_v25 = vrot.slane %v19413_v47, 1  ;;  %v19437_v22 = vrot.slane %v12694_v51, 2 }
 0x213   : > { %19406 = vst [vmem:[#allocation146_spill] sm:$0xff] %v13063_v7  ;;  %v4147_v7 = vshrl.u32 %v12446_v37, 16 }
 0x214   : > { %19408 = vst [vmem:[#allocation147_spill] sm:$0xff] %v13080_v56  ;;  %v3090_v50 = vsel %vm1130_vm0, %v19415_v48, %v19414_v25  ;;  %v19418_v19 = vmov %v19414_v25  ;;  %v2864_v25 = vadd.f32 %v19420_v6, %v2719_v28  ;;  %v19421_v48 = vld [vmem:[#allocation58_spill] sm:$0xff]  ;;  %v13128_v28 = vmul.f32 %v12169_v24, %v13056_v59 }
 0x215   : > { %19416 = vst [vmem:[#allocation37_spill] sm:$0xff] %v13100_v61  ;;  %v3092_v37 = vsel %vm1130_vm0, %v19418_v19, %v19417_v32  ;;  %v3274_v55 = vadd.f32 %v3090_v50, %v19419_v27  ;;  %v4149_v49 = vor.u32 %v4147_v7, %v12706_v38  ;;  %v19422_v16 = vrot.slane %v19421_v48, 2  ;;  %v13124_v38 = vpop.permute.xlu1 %785 }
 0x216   : > { %v13122_v50 = vmul.f32 %v19090_v42, %v13056_v59  ;;  %19425 = vst [vmem:[#allocation57_spill] sm:$0xff] %v13124_v38  ;;  %v19428_v24 = vrot.slane %v12405_v14, 2  ;;  %v19429_v32 = vrot.slane %v19421_v48, 2  ;;  %v13157_v6 = vmul.f32 %v10091_v18, %v13028_v53 }
 0x217   : > { %v3496_v23 = vsel %vm1537_vm1, %v19423_v20, %v19422_v16  ;;  %19426 = vst [vmem:[#allocation15_spill] sm:$0xff] %v13128_v28  ;;  %v13134_v20 = vsel %vm4094_vm2, %v4149_v49, %v13109_v41  ;;  %v3275_v16 = vadd.f32 %v3092_v37, %v2864_v25  ;;  %v1242_v49 = vrot.slane %v13098_v44, 1 }
 0x218   : > { %19424 = vst [vmem:[#allocation46_spill] sm:$0xff] %v13122_v50  ;;  %v3680_v7 = vadd.f32 %v3496_v23, %v3274_v55  ;;  %9329 = vmatmul.msk.bf16.gmra.mxu0 %vm4345_vm3, %v13134_v20  ;;  %v3498_v19 = vsel %vm1537_vm1, %v19429_v32, %v19428_v24  ;;  %v13151_v55 = vld [vmem:[%s18338_s2] ss:$0 sm:$0xff]  ;;  %v13161_v23 = vmul.f32 %v10031_v57, %v13124_v38  ;;  %v19431_v44 = vrot.slane %v12646_v26, 2 }
 0x219   : > { %19427 = vst [vmem:[#allocation38_spill] sm:$0xff] %v13134_v20  ;;  %v3681_v25 = vadd.f32 %v3498_v19, %v3275_v16  ;;  %v1049_v48 = vmul.f32 %v10031_v57, %v12994_v30  ;;  %v1383_v32 = vadd.f32 %v12867_v39, %v12952_v60  ;;  %v13174_v16 = vmul.f32 %v10045_v63, %v13028_v53 }
 0x21a   : > { %v3751_v37 = vadd.f32 %v13151_v55, %v3680_v7  ;;  %v19430_v7 = vrot.slane %v12848_v34, 2  ;;  %v1868_v47 = vmul.f32 %v10091_v18, %v13124_v38  ;;  %v1236_v39 = vrot.slane %v13161_v23, 1 }
 0x21b   : > { %v3752_v19 = vadd.f32 %v13151_v55, %v3681_v25  ;;  %v2008_v26 = vmul.f32 %v10045_v63, %v13124_v38  ;;  %v1649_v34 = vrot.slane %v13139_v31, 2  ;;  %v19433_v61 = vrot.slane %v12926_v36, 1 }
 0x21c   : > { %v3818_v24 = vmax.f32 %v3751_v37, 0.0  ;;  %v1640_v27 = vsel %vm1537_vm1, %v19431_v44, %v19430_v7  ;;  %v1932_v37 = vadd.f32 %v12956_v52, %v12686_v46  ;;  %v13189_v7 = vmul.f32 %v10049_v2, %v13028_v53 }
 0x21d   : > { %v1790_v60 = vadd.f32 %v1640_v27, %v1383_v32  ;;  %v3819_v25 = vmax.f32 %v3752_v19, 0.0  ;;  %v1245_v46 = vsel %vm1130_vm0, %v1242_v49, %v19433_v61  ;;  %v909_v52 = vmul.f32 %v10062_v8, %v12994_v30 }
 0x21e   : > { %v13181_v20 = vpack.c.bf16 %v3818_v24, %v3818_v24  ;;  %v2343_v44 = vadd.f32 %v12890_v1, %v1932_v37  ;;  %v1240_v27 = vrot.slane %v1049_v48, 1  ;;  %v13199_v23 = vmul.f32 %v10043_v62, %v13124_v38 }
 0x21f   : > { %v1456_v31 = vmul.f32 %v10043_v62, %v12994_v30  ;;  %v13203_v24 = vpack.c.bf16 %v3819_v25, %v3819_v25  ;;  %v1935_v32 = vadd.f32 %v1868_v47, %v1790_v60  ;;  %v2193_v19 = vrot.slane %v2008_v26, 1 }
 0x220   : > { %19432 = vst [vmem:[#allocation58_spill] sm:$0xff] %v13181_v20  ;;  %v19435_v37 = vrot.slane %v12789_v0, 1  ;;  %v2414_v48 = vmul.f32 %v10049_v2, %v13124_v38  ;;  %v19436_v53 = vrot.slane %v12858_v33, 2  ;;  %v19438_v47 = vrot.slane %v12801_v9, 1 }
 0x221   : > { %19434 = vst [vmem:[#allocation148_spill] sm:$0xff] %v13203_v24  ;;  %v18662_v25 = vunpack.c.l.b16 %v13203_v24  ;;  %v19439_v26 = vrot.slane %v12918_v21, 1  ;;  %v1643_v1 = vrot.slane %v13199_v23, 2  ;;  %v1243_v51 = vsel %vm1130_vm0, %v1240_v27, %v1242_v49 }
 0x222   : > { %v1237_v61 = vsel %vm1130_vm0, %v19435_v37, %v1236_v39  ;;  %v2596_v50 = vsel %vm1537_vm1, %v19437_v22, %v19436_v53  ;;  %v2194_v60 = vsel %vm1130_vm0, %v19438_v47, %v2193_v19  ;;  %v2599_v59 = vrot.slane %v2414_v48, 2 }
 0x223   : > { %v2196_v0 = vsel %vm1130_vm0, %v2193_v19, %v19439_v26  ;;  %v2749_v37 = vadd.f32 %v2596_v50, %v2343_v44  ;;  %v2345_v56 = vadd.f32 %v2194_v60, %v12816_v29  ;;  %v19440_v53 = vunpack.c.l.b16 %v13181_v20 }
 0x224   : > { %v2346_v33 = vadd.f32 %v2196_v0, %v1935_v32  ;;  %v1385_v9 = vadd.f32 %v1237_v61, %v906_v43  ;;  %v2827_v21 = vmul.f32 %v19090_v42, %v13124_v38  ;;  %v1389_v19 = vadd.f32 %v1245_v46, %v910_v17  ;;  %v13240_v32 = vpop.permute.xlu0 %810 }
 0x225   : > { %v13230_v22 = vpack.c.b16 %v18662_v25, %v19440_v53  ;;  %v1647_v50 = vrot.slane %v1456_v31, 2  ;;  %v19442_v44 = vrot.slane %v12805_v13, 2  ;;  %v19443_v23 = vrot.slane %v12922_v58, 2 }
 0x226   : > { %v13247_v61 = vadd.f32 %v2827_v21, %v2749_v37  ;;  %v2199_v17 = vrot.slane %v13174_v16, 1  ;;  %v19447_v13 = vrot.slane %v12898_v11, 1  ;;  %v1388_v31 = vadd.f32 %v1243_v51, %v909_v52  ;;  %v13266_v16 = vpop.permute.xlu2 %1809 }
 0x227   : > { %19441 = vst [vmem:[#allocation149_spill] sm:$0xff] %v13230_v22  ;;  %v2600_v29 = vsel %vm1537_vm1, %v19442_v44, %v2599_v59  ;;  %v2602_v49 = vsel %vm1537_vm1, %v2599_v59, %v19443_v23  ;;  %v18663_v48 = vrot.slane %v13230_v22, 1  ;;  %v19448_v58 = vrot.slane %v12794_v45, 2 }
 0x228   : > { %v13243_v47 = vadd.f32 %v2600_v29, %v2345_v56  ;;  %v13245_v43 = vadd.f32 %v2602_v49, %v2346_v33  ;;  %19446 = vst [vmem:[#allocation152_spill] sm:$0xff] %v13247_v61  ;;  %v1241_v46 = vsel %vm1130_vm0, %v19447_v13, %v1240_v27  ;;  %v19449_v60 = vrot.slane %v12930_v10, 2 }
 0x229   : > { %v1644_v59 = vsel %vm1537_vm1, %v19448_v58, %v1643_v1  ;;  %v19450_v26 = vrot.slane %v12844_v5, 1  ;;  %19452 = vst [vmem:[#allocation154_spill] sm:$0xff] %v13266_v16  ;;  %v1052_v52 = vmul.f32 %v10031_v57, %v13240_v32  ;;  %v2605_v27 = vrot.slane %v13189_v7, 2  ;;  %v826_v58 = vpop.permute.xlu1 %825 }
 0x22a   : > { %19444 = vst [vmem:[#allocation150_spill] sm:$0xff] %v13243_v47  ;;  %v1652_v56 = vsel %vm1537_vm1, %v1649_v34, %v19449_v60  ;;  %v1792_v37 = vadd.f32 %v1644_v59, %v1385_v9  ;;  %v19453_v33 = vmov %v19447_v13  ;;  %v13278_v53 = vmul.f32 %v10045_v63, %v13240_v32  ;;  %v19455_v59 = vld [vmem:[#allocation133_spill] sm:$0xff] }
 0x22b   : > { %19445 = vst [vmem:[#allocation151_spill] sm:$0xff] %v13245_v43  ;;  %v13264_v0 = vsel %vm1130_vm0, %v19450_v26, %v18663_v48  ;;  %v1796_v45 = vadd.f32 %v1652_v56, %v1389_v19  ;;  %v1239_v51 = vsel %vm1130_vm0, %v1236_v39, %v19453_v33  ;;  %v1387_v21 = vadd.f32 %v1241_v46, %v12960_v54  ;;  %v19458_v33 = vld [vmem:[#allocation122_spill] sm:$0xff]  ;;  %v19468_v48 = vld [vmem:[#allocation137_spill] sm:$0xff] }
 0x22c   : > { %19451 = vst [vmem:[#allocation153_spill] sm:$0xff] %v13264_v0  ;;  %9400 = vmatmul.msk.bf16.gmra.mxu2 %vm4345_vm3, %v13264_v0  ;;  %v1870_v9 = vmul.f32 %v10091_v18, %v12994_v30  ;;  %v907_v19 = vmul.f32 %v10062_v8, %v13124_v38  ;;  %v1650_v7 = vsel %vm1537_vm1, %v1647_v50, %v1649_v34  ;;  %v19454_v11 = vrot.slane %v12934_v12, 1  ;;  %v19456_v34 = vld [vmem:[#allocation123_spill] sm:$0xff]  ;;  %v19494_v38 = vld [vmem:[#allocation22_spill] sm:$0xff] }
 0x22d   : > { %v1795_v29 = vadd.f32 %v1650_v7, %v1388_v31  ;;  %v1873_v23 = vmul.f32 %v10091_v18, %v13240_v32  ;;  %v1246_v13 = vrot.slane %v1052_v52, 1  ;;  %v2203_v46 = vrot.slane %v13278_v53, 1 }
 0x22e   : > { %v2202_v39 = vsel %vm1130_vm0, %v2199_v17, %v19454_v11  ;;  %v1386_v49 = vadd.f32 %v1239_v51, %v907_v19  ;;  %v1937_v54 = vadd.f32 %v1870_v9, %v1792_v37  ;;  %v13294_v60 = vadd.f32 %v19455_v59, %v1796_v45 }
 0x22f   : > { %v19457_v56 = vrot.slane %v19456_v34, 2  ;;  %v19459_v11 = vrot.slane %v19458_v33, 2  ;;  %v13306_v51 = vmul.f32 %v10045_v63, %v13266_v16  ;;  %v13310_v52 = vmul.f32 %v10049_v2, %v13266_v16 }
 0x230   : > { %v1459_v45 = vmul.f32 %v10043_v62, %v13240_v32  ;;  %v13316_v53 = vmul.f32 %v10049_v2, %v13240_v32  ;;  %v19460_v9 = vrot.slane %v13040_v35, 1  ;;  %v13325_v59 = vmul.f32 %v10031_v57, %v826_v58 }
 0x231   : > { %v13299_v26 = vsel %vm1537_vm1, %v2605_v27, %v19457_v56  ;;  %v1648_v31 = vsel %vm1537_vm1, %v19459_v11, %v1647_v50  ;;  %v19461_v19 = vmov %v19459_v11  ;;  %v19463_v44 = vrot.slane %v12988_v3, 1 }
 0x232   : > { %v1794_v37 = vadd.f32 %v1648_v31, %v1387_v21  ;;  %v2200_v50 = vsel %vm1130_vm0, %v19460_v9, %v2199_v17  ;;  %v1646_v7 = vsel %vm1537_vm1, %v1643_v1, %v19461_v19  ;;  %v1940_v21 = vadd.f32 %v1873_v23, %v1795_v29  ;;  %v13343_v9 = vpop.permute.xlu2 %2771 }
 0x233   : > { %v1793_v56 = vadd.f32 %v1646_v7, %v1386_v49  ;;  %v2348_v11 = vadd.f32 %v2200_v50, %v1937_v54  ;;  %v19462_v31 = vrot.slane %v12980_v40, 1  ;;  %v2206_v35 = vsel %vm1130_vm0, %v2203_v46, %v19463_v44  ;;  %19465 = vst [vmem:[#allocation123_spill] sm:$0xff] %v13343_v9  ;;  %v19466_v50 = vld [vmem:[#allocation143_spill] sm:$0xff] }
 0x234   : > { %v13335_v17 = vmul.f32 %v10091_v18, %v13266_v16  ;;  %v912_v29 = vmul.f32 %v10062_v8, %v13240_v32  ;;  %v18669_v23 = vrot.slane %v13325_v59, 1  ;;  %v1653_v54 = vrot.slane %v1459_v45, 2 }
 0x235   : > { %v1249_v25 = vsel %vm1130_vm0, %v1246_v13, %v19462_v31  ;;  %v2609_v33 = vrot.slane %v13316_v53, 2  ;;  %v915_v44 = vmul.f32 %v10062_v8, %v826_v58  ;;  %v19467_v19 = vrot.slane %v19466_v50, 2  ;;  %v19470_v53 = vld [vmem:[#allocation11_spill] sm:$0xff] }
 0x236   : > { %19464 = vst [vmem:[#allocation133_spill] sm:$0xff] %v13335_v17  ;;  %v1391_v31 = vadd.f32 %v1249_v25, %v912_v29  ;;  %v2351_v1 = vadd.f32 %v2206_v35, %v1940_v21  ;;  %v19469_v0 = vrot.slane %v19468_v48, 1  ;;  %v1938_v45 = vadd.f32 %v13157_v6, %v1793_v56  ;;  %v19477_v35 = vld [vmem:[#allocation130_spill] sm:$0xff] }
 0x237   : > { %v2606_v7 = vsel %vm1537_vm1, %v19467_v19, %v2605_v27  ;;  %v13357_v24 = vmul.f32 %v19470_v53, %v13240_v32  ;;  %v19472_v50 = vrot.slane %v12926_v36, 1  ;;  %v13367_v27 = vld [vmem:[%s18337_s1 + $0x8] ss:$0 sm:$0xff]  ;;  %v13375_v6 = vmul.f32 %v19470_v53, %v13343_v9  ;;  %v13394_v9 = vpop.permute.xlu0 %820 }
 0x238   : > { %v1255_v16 = vsel %vm1130_vm0, %v18669_v23, %v19469_v0  ;;  %v2754_v49 = vadd.f32 %v2606_v7, %v2348_v11  ;;  %v13371_v0 = vmul.f32 %v13367_v27, %v13240_v32  ;;  %v13381_v36 = vmul.f32 %v10043_v62, %v826_v58 }
 0x239   : > { %v13359_v20 = vadd.f32 %v1255_v16, %v915_v44  ;;  %v1247_v25 = vsel %vm1130_vm0, %v19472_v50, %v1246_v13  ;;  %19473 = vst [vmem:[#allocation143_spill] sm:$0xff] %v13375_v6  ;;  %v13378_v16 = vmul.f32 %v10045_v63, %v826_v58  ;;  %v19475_v13 = vld [vmem:[#allocation129_spill] sm:$0xff]  ;;  %v1876_v11 = vmul.f32 %v10091_v18, %v826_v58 }
 0x23a   : > { %19474 = vst [vmem:[#allocation11_spill] sm:$0xff] %v13381_v36  ;;  %v19476_v21 = vrot.slane %v19475_v13, 2  ;;  %v19478_v29 = vrot.slane %v19477_v35, 2  ;;  %v13391_v7 = vmul.f32 %v10049_v2, %v826_v58  ;;  %v2835_v23 = vmul.f32 %v19090_v42, %v826_v58 }
 0x23b   : > { %19471 = vst [vmem:[#allocation122_spill] sm:$0xff] %v13359_v20  ;;  %v13396_v48 = vadd.f32 %v2202_v39, %v1938_v45  ;;  %v13402_v43 = vmul.f32 %v19470_v53, %v826_v58  ;;  %v1054_v47 = vmul.f32 %v10031_v57, %v13394_v9 }
 0x23c   : > { %v1656_v56 = vsel %vm1537_vm1, %v1653_v54, %v19476_v21  ;;  %v2612_v44 = vsel %vm1537_vm1, %v2609_v33, %v19478_v29  ;;  %v2832_v21 = vmul.f32 %v19090_v42, %v13240_v32  ;;  %v13409_v29 = vmul.f32 %v13367_v27, %v826_v58  ;;  %v19484_v32 = vld [vmem:[#allocation138_spill] sm:$0xff] }
 0x23d   : > { %v1798_v19 = vadd.f32 %v1656_v56, %v1391_v31  ;;  %v2757_v50 = vadd.f32 %v2612_v44, %v2351_v1  ;;  %v19479_v31 = vrot.slane %v12934_v12, 1  ;;  %v2209_v1 = vrot.slane %v13378_v16, 1  ;;  %v19481_v44 = vld [vmem:[#allocation127_spill] sm:$0xff] }
 0x23e   : > { %19480 = vst [vmem:[#allocation129_spill] sm:$0xff] %v13409_v29  ;;  %v1390_v39 = vadd.f32 %v1247_v25, %v19481_v44  ;;  %v13412_v45 = vadd.f32 %v2832_v21, %v2754_v49  ;;  %v19482_v25 = vrot.slane %v12930_v10, 2  ;;  %v19483_v21 = vld [vmem:[#allocation128_spill] sm:$0xff]  ;;  %v2015_v44 = vmul.f32 %v10045_v63, %v13394_v9 }
 0x23f   : > { %v2204_v56 = vsel %vm1130_vm0, %v19479_v31, %v2203_v46  ;;  %v1943_v61 = vadd.f32 %v1876_v11, %v1798_v19  ;;  %v13420_v16 = vadd.f32 %v2835_v23, %v2757_v50  ;;  %v1939_v31 = vadd.f32 %v19483_v21, %v1794_v37  ;;  %v19487_v21 = vld [vmem:[#allocation42_spill] sm:$0xff]  ;;  %v19493_v46 = vld [vmem:[#allocation32_spill] sm:$0xff] }
 0x240   : > { %v1654_v49 = vsel %vm1537_vm1, %v19482_v25, %v1653_v54  ;;  %v19485_v20 = vrot.slane %v19484_v32, 1  ;;  %v19486_v23 = vrot.slane %v19456_v34, 2  ;;  %v1250_v10 = vrot.slane %v1054_v47, 1 }
 0x241   : > { %v1797_v19 = vadd.f32 %v1654_v49, %v1390_v39  ;;  %v2350_v58 = vadd.f32 %v2204_v56, %v1939_v31  ;;  %v13438_v54 = vmul.f32 %v10043_v62, %v13394_v9  ;;  %v1875_v37 = vmul.f32 %v10091_v18, %v13394_v9 }
 0x242   : > { %v2212_v12 = vsel %vm1130_vm0, %v2209_v1, %v19485_v20  ;;  %v2610_v50 = vsel %vm1537_vm1, %v19486_v23, %v2609_v33  ;;  %v4155_v25 = vshrl.u32 %v12844_v5, 16  ;;  %v4159_v20 = vshll.u32 %v13230_v22, 16  ;;  %v19490_v33 = vld [vmem:[#allocation63_spill] sm:$0xff] }
 0x243   : > { %v19488_v11 = vrot.slane %v19487_v21, 1  ;;  %v19489_v39 = vrot.slane %v12400_v15, 1  ;;  %v19491_v56 = vrot.slane %v19490_v33, 1  ;;  %v2207_v31 = vrot.slane %v2015_v44, 1 }
 0x244   : > { %v13456_v23 = vmul.f32 %v10049_v2, %v13394_v9  ;;  %v4157_v28 = vor.u32 %v4155_v25, %v13109_v41  ;;  %v13461_v15 = vrot.slane %v4159_v20, 1  ;;  %v19497_v32 = vrot.slane %v12405_v14, 2 }
 0x245   : > { %v3094_v34 = vsel %vm1130_vm0, %v19489_v39, %v19488_v11  ;;  %v19492_v47 = vmov %v19488_v11  ;;  %v19495_v11 = vld [vmem:[#allocation92_spill] sm:$0xff]  ;;  %v2354_v29 = vadd.f32 %v2212_v12, %v1943_v61  ;;  %v914_v25 = vmul.f32 %v10062_v8, %v13394_v9 }
 0x246   : > { %v3096_v49 = vsel %vm1130_vm0, %v19492_v47, %v19491_v56  ;;  %v3276_v5 = vadd.f32 %v3094_v34, %v19493_v46  ;;  %v19496_v39 = vrot.slane %v19495_v11, 2  ;;  %v19498_v56 = vld [vmem:[#allocation64_spill] sm:$0xff]  ;;  %v19501_v14 = vrot.slane %v12980_v40, 1 }
 0x247   : > { %v3277_v30 = vadd.f32 %v3096_v49, %v19494_v38  ;;  %v19499_v44 = vrot.slane %v19498_v56, 2  ;;  %v13475_v38 = vmul.f32 %v19470_v53, %v13394_v9  ;;  %v1657_v20 = vrot.slane %v13438_v54, 2 }
 0x248   : > { %v3500_v21 = vsel %vm1537_vm1, %v19497_v32, %v19496_v39  ;;  %v19500_v47 = vmov %v19496_v39  ;;  %v1251_v32 = vsel %vm1130_vm0, %v19501_v14, %v1250_v10  ;;  %v13485_v34 = vsel %vm4094_vm2, %v4157_v28, %v13461_v15  ;;  %v19506_v39 = vld [vmem:[#allocation132_spill] sm:$0xff] }
 0x249   : > { %v3502_v17 = vsel %vm1537_vm1, %v19500_v47, %v19499_v44  ;;  %v3682_v41 = vadd.f32 %v3500_v21, %v3276_v5  ;;  %19502 = vst [vmem:[#allocation130_spill] sm:$0xff] %v13485_v34  ;;  %v19503_v61 = vrot.slane %v12988_v3, 1  ;;  %9330 = vmatmul.msk.bf16.gmra.mxu0 %vm4345_vm3, %v13485_v34  ;;  %v2756_v54 = vadd.f32 %v2610_v50, %v2350_v58  ;;  %v13560_v34 = vpop.permute.xlu0 %835 }
 0x24a   : > { %v3683_v46 = vadd.f32 %v3502_v17, %v3277_v30  ;;  %v2834_v30 = vmul.f32 %v19090_v42, %v13394_v9  ;;  %v13496_v17 = vpop.permute.xlu1 %840  ;;  %v19505_v28 = vrot.slane %v13325_v59, 1  ;;  %v1942_v3 = vadd.f32 %v1875_v37, %v1797_v19 }
 0x24b   : > { %v2208_v12 = vsel %vm1130_vm0, %v19503_v61, %v2207_v31  ;;  %v3753_v5 = vadd.f32 %v13151_v55, %v3682_v41  ;;  %19504 = vst [vmem:[#allocation127_spill] sm:$0xff] %v13496_v17  ;;  %v2613_v11 = vrot.slane %v13456_v23, 2  ;;  %v1392_v21 = vadd.f32 %v1251_v32, %v19506_v39 }
 0x24c   : > { %v3754_v40 = vadd.f32 %v13151_v55, %v3683_v46  ;;  %v1253_v49 = vsel %vm1130_vm0, %v1250_v10, %v19505_v28  ;;  %v19507_v41 = vrot.slane %v19475_v13, 2  ;;  %v2210_v61 = vsel %vm1130_vm0, %v2207_v31, %v2209_v1  ;;  %v19510_v10 = vld [vmem:[#allocation139_spill] sm:$0xff] }
 0x24d   : > { %v3820_v47 = vmax.f32 %v3753_v5, 0.0  ;;  %v2352_v58 = vadd.f32 %v2208_v12, %v13294_v60  ;;  %v13511_v59 = vmul.f32 %v13367_v27, %v13394_v9  ;;  %v19511_v37 = vrot.slane %v19510_v10, 2 }
 0x24e   : > { %v3821_v14 = vmax.f32 %v3754_v40, 0.0  ;;  %v1658_v46 = vsel %vm1537_vm1, %v19507_v41, %v1657_v20  ;;  %v19512_v23 = vrot.slane %v13391_v7, 2  ;;  %v13524_v32 = vmul.f32 %v10031_v57, %v13496_v17 }
 0x24f   : > { %v13513_v19 = vpack.c.bf16 %v3820_v47, %v3820_v47  ;;  %v13528_v60 = vmul.f32 %v10045_v63, %v13496_v17  ;;  %v13532_v9 = vmul.f32 %v10049_v2, %v13496_v17  ;;  %v2838_v31 = vmul.f32 %v19090_v42, %v13496_v17 }
 0x250   : > { %v13515_v50 = vpack.c.bf16 %v3821_v14, %v3821_v14  ;;  %v2618_v13 = vsel %vm1537_vm1, %v19512_v23, %v19511_v37  ;;  %v13540_v40 = vmul.f32 %v19470_v53, %v13496_v17  ;;  %v13544_v28 = vmul.f32 %v13367_v27, %v13496_v17 }
 0x251   : > { %19508 = vst [vmem:[#allocation128_spill] sm:$0xff] %v13513_v19  ;;  %v2760_v1 = vadd.f32 %v2618_v13, %v2354_v29  ;;  %v18684_v12 = vunpack.c.l.b16 %v13513_v19  ;;  %v1393_v39 = vadd.f32 %v1253_v49, %v914_v25  ;;  %v1799_v47 = vadd.f32 %v1658_v46, %v1392_v21  ;;  %v19529_v21 = vld [vmem:[#allocation53_spill] sm:$0xff] }
 0x252   : > { %19509 = vst [vmem:[#allocation42_spill] sm:$0xff] %v13515_v50  ;;  %v18683_v5 = vunpack.c.l.b16 %v13515_v50  ;;  %v19516_v14 = vrot.slane %v19477_v35, 2  ;;  %v13549_v41 = vadd.f32 %v2834_v30, %v2756_v54  ;;  %v2353_v37 = vadd.f32 %v2210_v61, %v1942_v3 }
 0x253   : > { %19513 = vst [vmem:[#allocation63_spill] sm:$0xff] %v13528_v60  ;;  %v13565_v54 = vadd.f32 %v2838_v31, %v2760_v1  ;;  %v19519_v46 = vrot.slane %v13381_v36, 2  ;;  %v917_v31 = vmul.f32 %v10062_v8, %v13560_v34  ;;  %v19523_v30 = vrot.slane %v13230_v22, 1  ;;  %v19533_v36 = vld [vmem:[#allocation27_spill] sm:$0xff] }
 0x254   : > { %19514 = vst [vmem:[#allocation32_spill] sm:$0xff] %v13532_v9  ;;  %v2614_v29 = vsel %vm1537_vm1, %v19516_v14, %v2613_v11  ;;  %v13558_v44 = vpack.c.b16 %v18683_v5, %v18684_v12  ;;  %v19522_v12 = vrot.slane %v13391_v7, 2  ;;  %v4163_v7 = vshrl.u32 %v13230_v22, 16  ;;  %v19537_v22 = vld [vmem:[#allocation54_spill] sm:$0xff]  ;;  %v19538_v9 = vld [vmem:[#allocation103_spill] sm:$0xff] }
 0x255   : > { %19515 = vst [vmem:[#allocation22_spill] sm:$0xff] %v13544_v28  ;;  %v13551_v23 = vadd.f32 %v2614_v29, %v2352_v58  ;;  %v1660_v61 = vsel %vm1537_vm1, %v1657_v20, %v19519_v46  ;;  %v13573_v58 = vpop.permute.xlu1 %990  ;;  %v19521_v29 = vld [vmem:[#allocation144_spill] sm:$0xff]  ;;  %v19530_v3 = vrot.slane %v19529_v21, 1  ;;  %v19531_v13 = vrot.slane %v19490_v33, 1 }
 0x256   : > { %19517 = vst [vmem:[#allocation92_spill] sm:$0xff] %v13558_v44  ;;  %v18685_v49 = vrot.slane %v13558_v44, 1  ;;  %v1800_v14 = vadd.f32 %v1660_v61, %v1393_v39  ;;  %v13576_v5 = vadd.f32 %v19521_v29, %v1799_v47  ;;  %v2616_v1 = vsel %vm1537_vm1, %v2613_v11, %v19522_v12 }
 0x257   : > { %19518 = vst [vmem:[#allocation64_spill] sm:$0xff] %v13565_v54  ;;  %v13590_v20 = vadd.f32 %v2616_v1, %v2353_v37  ;;  %v13594_v39 = vmul.f32 %v10031_v57, %v13560_v34  ;;  %v13601_v11 = vmul.f32 %v10043_v62, %v13560_v34  ;;  %v1878_v12 = vmul.f32 %v10091_v18, %v13560_v34  ;;  %v19527_v37 = vld [vmem:[#allocation17_spill] sm:$0xff] }
 0x258   : > { %19520 = vst [vmem:[#allocation132_spill] sm:$0xff] %v13573_v58  ;;  %v13588_v35 = vsel %vm1130_vm0, %v19523_v30, %v18685_v49  ;;  %v4167_v47 = vshll.u32 %v13558_v44, 16  ;;  %v19528_v30 = vld [vmem:[#allocation33_spill] sm:$0xff]  ;;  %v13610_v61 = vmul.f32 %v10045_v63, %v13560_v34  ;;  %v13614_v29 = vmul.f32 %v10045_v63, %v13573_v58 }
 0x259   : > { %19524 = vst [vmem:[#allocation144_spill] sm:$0xff] %v13588_v35  ;;  %9401 = vmatmul.msk.bf16.gmra.mxu2 %vm4345_vm3, %v13588_v35  ;;  %v2722_v46 = vadd.f32 %v19528_v30, %v19527_v37  ;;  %v4165_v1 = vor.u32 %v4163_v7, %v13461_v15  ;;  %v3098_v49 = vsel %vm1130_vm0, %v19531_v13, %v19530_v3  ;;  %v19532_v30 = vld [vmem:[#allocation62_spill] sm:$0xff]  ;;  %v19534_v50 = vrot.slane %v19533_v36, 1  ;;  %v13634_v7 = vpop.f32.mrf.mxu0 }
 0x25a   : > { %19525 = vst [vmem:[#allocation155_spill] sm:$0xff] %v13594_v39  ;;  %v13624_v25 = vmul.f32 %v10049_v2, %v13560_v34  ;;  %v13626_v37 = vrot.slane %v4167_v47, 1  ;;  %v19535_v19 = vmov %v19530_v3  ;;  %v19539_v13 = vrot.slane %v19538_v9, 2  ;;  %v19540_v3 = vld [vmem:[#allocation105_spill] sm:$0xff] }
 0x25b   : > { %19526 = vst [vmem:[#allocation156_spill] sm:$0xff] %v13601_v11  ;;  %v2867_v35 = vadd.f32 %v19532_v30, %v2722_v46  ;;  %v3100_v15 = vsel %vm1130_vm0, %v19535_v19, %v19534_v50  ;;  %v19541_v60 = vrot.slane %v19540_v3, 2  ;;  %v918_v47 = vmul.f32 %v10062_v8, %v13496_v17 }
 0x25c   : > { %19536 = vst [vmem:[#allocation17_spill] sm:$0xff] %v13634_v7  ;;  %v3279_v33 = vadd.f32 %v3100_v15, %v19537_v22  ;;  %v19542_v46 = vrot.slane %v13076_v4, 1  ;;  %v19543_v30 = vrot.slane %v13524_v32, 1  ;;  %v13651_v19 = vsel %vm4094_vm2, %v4165_v1, %v13626_v37  ;;  %v19545_v15 = vld [vmem:[#allocation145_spill] sm:$0xff] }
 0x25d   : > { %v3506_v54 = vsel %vm1537_vm1, %v19541_v60, %v19539_v13  ;;  %19544 = vst [vmem:[#allocation33_spill] sm:$0xff] %v13651_v19  ;;  %v3278_v22 = vadd.f32 %v3098_v49, %v2867_v35  ;;  %v1465_v50 = vmul.f32 %v10043_v62, %v13496_v17  ;;  %v13657_v60 = vmul.f32 %v10043_v62, %v19545_v15  ;;  %v13659_v13 = vpop.permute.xlu0 %850 }
 0x25e   : > { %v1261_v21 = vsel %vm1130_vm0, %v19543_v30, %v19542_v46  ;;  %9331 = vmatmul.msk.bf16.gmra.mxu0 %vm4345_vm3, %v13651_v19  ;;  %v19546_v7 = vrot.slane %v19540_v3, 2  ;;  %v19547_v46 = vrot.slane %v19498_v56, 2  ;;  %v3685_v30 = vadd.f32 %v3506_v54, %v3279_v33  ;;  %v13679_v33 = vpop.permute.xlu1 %1954 }
 0x25f   : > { %v1397_v35 = vadd.f32 %v1261_v21, %v918_v47  ;;  %v2221_v49 = vrot.slane %v13614_v29, 1  ;;  %v1665_v9 = vrot.slane %v1465_v50, 2  ;;  %v18700_v10 = vrot.slane %v13657_v60, 2  ;;  %19549 = vst [vmem:[#allocation53_spill] sm:$0xff] %v13679_v33 }
 0x260   : > { %v3504_v1 = vsel %vm1537_vm1, %v19547_v46, %v19546_v7  ;;  %v2428_v36 = vmul.f32 %v10049_v2, %v13573_v58  ;;  %v3756_v19 = vadd.f32 %v13151_v55, %v3685_v30  ;;  %v1882_v56 = vmul.f32 %v10091_v18, %v13573_v58 }
 0x261   : > { %v3684_v17 = vadd.f32 %v3504_v1, %v3278_v22  ;;  %v19548_v7 = vrot.slane %v13306_v51, 1  ;;  %v1668_v47 = vsel %vm1537_vm1, %v1665_v9, %v18700_v10  ;;  %v13686_v22 = vadd.f32 %v1878_v12, %v1800_v14 }
 0x262   : > { %v2627_v21 = vrot.slane %v2428_v36, 2  ;;  %v2837_v50 = vmul.f32 %v19090_v42, %v13560_v34  ;;  %v3823_v46 = vmax.f32 %v3756_v19, 0.0  ;;  %v1804_v1 = vadd.f32 %v1668_v47, %v1397_v35 }
 0x263   : > { %v2224_v54 = vsel %vm1130_vm0, %v2221_v49, %v19548_v7  ;;  %v3755_v3 = vadd.f32 %v13151_v55, %v3684_v17  ;;  %19550 = vst [vmem:[#allocation62_spill] sm:$0xff] %v13686_v22  ;;  %v19551_v28 = vrot.slane %v13310_v52, 2  ;;  %v13696_v17 = vmul.f32 %v19470_v53, %v13679_v33  ;;  %v13713_v22 = vpop.f32.mrf.mxu0 }
 0x264   : > { %v13698_v10 = vpack.c.bf16 %v3823_v46, %v3823_v46  ;;  %v1949_v36 = vadd.f32 %v1882_v56, %v1804_v1  ;;  %v2844_v14 = vmul.f32 %v19090_v42, %v13679_v33  ;;  %v19554_v12 = vrot.slane %v13524_v32, 1  ;;  %19558 = vst [vmem:[#allocation158_spill] sm:$0xff] %v13713_v22 }
 0x265   : > { %v3822_v7 = vmax.f32 %v3755_v3, 0.0  ;;  %v2630_v29 = vsel %vm1537_vm1, %v2627_v21, %v19551_v28  ;;  %19552 = vst [vmem:[#allocation54_spill] sm:$0xff] %v13696_v17  ;;  %v19555_v19 = vrot.slane %v13594_v39, 1  ;;  %v19557_v30 = vrot.slane %v13601_v11, 2  ;;  %v13736_v28 = vpop.permute.xlu0 %1814 }
 0x266   : > { %19553 = vst [vmem:[#allocation105_spill] sm:$0xff] %v13698_v10  ;;  %v18701_v56 = vunpack.c.l.b16 %v13698_v10  ;;  %v2360_v1 = vadd.f32 %v2224_v54, %v1949_v36  ;;  %v1881_v32 = vmul.f32 %v10091_v18, %v13659_v13 }
 0x267   : > { %v1259_v35 = vsel %vm1130_vm0, %v19555_v19, %v19554_v12  ;;  %v13707_v3 = vpack.c.bf16 %v3822_v7, %v3822_v7  ;;  %v1666_v46 = vsel %vm1537_vm1, %v19557_v30, %v1665_v9  ;;  %v13720_v12 = vmul.f32 %v10045_v63, %v13659_v13  ;;  %19561 = vst [vmem:[#allocation161_spill] sm:$0xff] %v13736_v28 }
 0x268   : > { %v1396_v47 = vadd.f32 %v1259_v35, %v917_v31  ;;  %v13725_v31 = vmul.f32 %v19470_v53, %v13560_v34  ;;  %v13729_v19 = vadd.f32 %v2837_v50, %v13590_v20  ;;  %v2766_v54 = vadd.f32 %v2630_v29, %v2360_v1 }
 0x269   : > { %19556 = vst [vmem:[#allocation157_spill] sm:$0xff] %v13707_v3  ;;  %v18702_v9 = vunpack.c.l.b16 %v13707_v3  ;;  %v13734_v35 = vmul.f32 %v10049_v2, %v13659_v13  ;;  %v19563_v20 = vrot.slane %v13375_v6, 1  ;;  %v19564_v29 = vrot.slane %v13696_v17, 1  ;;  %v2917_v17 = vpop.permute.xlu1 %2916 }
 0x26a   : > { %19559 = vst [vmem:[#allocation159_spill] sm:$0xff] %v13720_v12  ;;  %v1803_v30 = vadd.f32 %v1666_v46, %v1396_v47  ;;  %v13746_v47 = vmul.f32 %v10045_v63, %v13679_v33  ;;  %v13755_v1 = vmul.f32 %v13367_v27, %v13560_v34  ;;  %v2911_v36 = vadd.f32 %v2844_v14, %v2766_v54 }
 0x26b   : > { %19560 = vst [vmem:[#allocation160_spill] sm:$0xff] %v13734_v35  ;;  %v13742_v7 = vpack.c.b16 %v18701_v56, %v18702_v9  ;;  %v3186_v50 = vsel %vm1130_vm0, %v19564_v29, %v19563_v20  ;;  %v19565_v22 = vrot.slane %v13720_v12, 1  ;;  %v18706_v9 = vrot.slane %v13734_v35, 2 }
 0x26c   : > { %v1948_v46 = vadd.f32 %v1881_v32, %v1803_v30  ;;  %v2843_v20 = vmul.f32 %v19090_v42, %v13736_v28  ;;  %v13767_v32 = vmul.f32 %v10049_v2, %v13679_v33  ;;  %v13769_v34 = vadd.f32 %v3186_v50, %v2911_v36 }
 0x26d   : > { %19562 = vst [vmem:[#allocation162_spill] sm:$0xff] %v13742_v7  ;;  %v2222_v56 = vsel %vm1130_vm0, %v19565_v22, %v2221_v49  ;;  %v18707_v6 = vrot.slane %v13742_v7, 1  ;;  %v2628_v49 = vsel %vm1537_vm1, %v18706_v9, %v2627_v21  ;;  %v2755_v22 = vadd.f32 %v13299_v26, %v13396_v48  ;;  %v19569_v21 = vld [vmem:[#allocation136_spill] sm:$0xff]  ;;  %v19570_v48 = vld [vmem:[#allocation134_spill] sm:$0xff] }
 0x26e   : > { %v2359_v39 = vadd.f32 %v2222_v56, %v1948_v46  ;;  %19566 = vst [vmem:[#allocation163_spill] sm:$0xff] %v13769_v34  ;;  %v19567_v14 = vrot.slane %v13558_v44, 1  ;;  %v13786_v36 = vmul.f32 %v10045_v63, %v13736_v28  ;;  %v19571_v26 = vrot.slane %v19570_v48, 1 }
 0x26f   : > { %v2900_v29 = vadd.f32 %v19569_v21, %v2755_v22  ;;  %v19572_v50 = vrot.slane %v13357_v24, 1  ;;  %v19574_v9 = vrot.slane %v13475_v38, 1 }
 0x270   : > { %v13781_v56 = vsel %vm1130_vm0, %v19567_v14, %v18707_v6  ;;  %v2765_v54 = vadd.f32 %v2628_v49, %v2359_v39  ;;  %v19573_v14 = vrot.slane %v13402_v43, 1  ;;  %v19575_v49 = vld [vmem:[#allocation141_spill] sm:$0xff]  ;;  %v19580_v21 = vmov %v19571_v26  ;;  %v13818_v43 = vpop.f32.mrf.mxu0 }
 0x271   : > { %19568 = vst [vmem:[#allocation164_spill] sm:$0xff] %v13781_v56  ;;  %9402 = vmatmul.msk.bf16.gmra.mxu2 %vm4345_vm3, %v13781_v56  ;;  %v3162_v46 = vsel %vm1130_vm0, %v19572_v50, %v19571_v26  ;;  %v19576_v6 = vrot.slane %v19575_v49, 1  ;;  %v19579_v22 = vmov %v19574_v9 }
 0x272   : > { %v3166_v39 = vsel %vm1130_vm0, %v19574_v9, %v19573_v14  ;;  %v19577_v11 = vmov %v19573_v14  ;;  %v13806_v56 = vadd.f32 %v2843_v20, %v2765_v54  ;;  %v3164_v26 = vsel %vm1130_vm0, %v19580_v21, %v19579_v22  ;;  %v13816_v14 = vpop.f32.mrf.mxu2  ;;  %19582 = vst [vmem:[#allocation141_spill] sm:$0xff] %v13818_v43  ;;  %v19583_v20 = vld [vmem:[#allocation135_spill] sm:$0xff] }
 0x273   : > { %v3168_v30 = vsel %vm1130_vm0, %v19577_v11, %v19576_v6  ;;  %v3310_v50 = vadd.f32 %v3162_v46, %v13412_v45  ;;  %v3312_v34 = vadd.f32 %v3166_v39, %v13549_v41  ;;  %19581 = vst [vmem:[#allocation134_spill] sm:$0xff] %v13816_v14  ;;  %v3311_v6 = vadd.f32 %v3164_v26, %v2900_v29  ;;  %v19588_v39 = vld [vmem:[#allocation129_spill] sm:$0xff]  ;;  %v19591_v26 = vld [vmem:[#allocation142_spill] sm:$0xff] }
 0x274   : > { %19578 = vst [vmem:[#allocation136_spill] sm:$0xff] %v13806_v56  ;;  %v3313_v11 = vadd.f32 %v3168_v30, %v13420_v16  ;;  %v19584_v38 = vrot.slane %v19583_v20, 2  ;;  %v19585_v54 = vrot.slane %v13371_v0, 2  ;;  %v19586_v45 = vrot.slane %v13511_v59, 2 }
 0x275   : > { %v19589_v22 = vrot.slane %v19588_v39, 2  ;;  %v19592_v16 = vrot.slane %v19591_v26, 2  ;;  %v13842_v20 = vmul.f32 %v19470_v53, %v2917_v17  ;;  %v13847_v59 = vmul.f32 %v13367_v27, %v2917_v17 }
 0x276   : > { %v3568_v48 = vsel %vm1537_vm1, %v19585_v54, %v19584_v38  ;;  %v19587_v41 = vmov %v19584_v38  ;;  %v19590_v21 = vmov %v19586_v45  ;;  %v1061_v17 = vmul.f32 %v10031_v57, %v13573_v58 }
 0x277   : > { %v3570_v46 = vsel %vm1537_vm1, %v19587_v41, %v19586_v45  ;;  %v3572_v29 = vsel %vm1537_vm1, %v19590_v21, %v19589_v22  ;;  %v19593_v30 = vmov %v19589_v22  ;;  %v3716_v56 = vadd.f32 %v3568_v48, %v3310_v50 }
 0x278   : > { %v3574_v9 = vsel %vm1537_vm1, %v19593_v30, %v19592_v16  ;;  %v3717_v38 = vadd.f32 %v3570_v46, %v3311_v6  ;;  %v3718_v54 = vadd.f32 %v3572_v29, %v3312_v34  ;;  %v2225_v45 = vrot.slane %v13786_v36, 1 }
 0x279   : > { %v3719_v35 = vadd.f32 %v3574_v9, %v3313_v11  ;;  %v3787_v41 = vadd.f32 %v13151_v55, %v3716_v56  ;;  %v919_v22 = vmul.f32 %v10062_v8, %v19545_v15  ;;  %v920_v9 = vmul.f32 %v10062_v8, %v13659_v13  ;;  %v19770_v15 = vld [vmem:[#allocation75_spill] sm:$0xff] }
 0x27a   : > { %v3788_v39 = vadd.f32 %v13151_v55, %v3717_v38  ;;  %v3789_v50 = vadd.f32 %v13151_v55, %v3718_v54  ;;  %v1060_v56 = vmul.f32 %v10031_v57, %v13659_v13  ;;  %v1467_v21 = vmul.f32 %v10043_v62, %v13659_v13  ;;  %v13881_v33 = vpop.f32.mrf.mxu2 }
 0x27b   : > { %v3790_v34 = vadd.f32 %v13151_v55, %v3719_v35  ;;  %v3854_v6 = vmax.f32 %v3787_v41, 0.0  ;;  %v1264_v16 = vrot.slane %v1061_v17, 1  ;;  %v1468_v30 = vmul.f32 %v10043_v62, %v13573_v58  ;;  %19599 = vst [vmem:[#allocation166_spill] sm:$0xff] %v13881_v33  ;;  %v19772_v62 = vld [vmem:[#allocation76_spill] sm:$0xff] }
 0x27c   : > { %v3855_v11 = vmax.f32 %v3788_v39, 0.0  ;;  %v3856_v48 = vmax.f32 %v3789_v50, 0.0  ;;  %v1262_v35 = vrot.slane %v1060_v56, 1  ;;  %v1669_v57 = vrot.slane %v1467_v21, 2 }
 0x27d   : > { %v3857_v46 = vmax.f32 %v3790_v34, 0.0  ;;  %v13863_v29 = vpack.c.bf16 %v3854_v6, %v3854_v6  ;;  %v19598_v50 = vrot.slane %v13076_v4, 1  ;;  %v1671_v56 = vrot.slane %v1468_v30, 2 }
 0x27e   : > { %v13867_v38 = vpack.c.bf16 %v3855_v11, %v3855_v11  ;;  %v13869_v54 = vpack.c.bf16 %v3856_v48, %v3856_v48  ;;  %v1265_v6 = vsel %vm1130_vm0, %v1262_v35, %v1264_v16  ;;  %v19601_v39 = vrot.slane %v13657_v60, 2  ;;  %v2777_v16 = vpop.permute.xlu0 %2776 }
 0x27f   : > { %19594 = vst [vmem:[#allocation135_spill] sm:$0xff] %v13863_v29  ;;  %v13871_v41 = vpack.c.bf16 %v3857_v46, %v3857_v46  ;;  %v1263_v34 = vsel %vm1130_vm0, %v19598_v50, %v1262_v35  ;;  %v13883_v46 = vpop.f32.mrf.mxu0  ;;  %v1399_v21 = vadd.f32 %v1265_v6, %v920_v9  ;;  %v1672_v50 = vsel %vm1537_vm1, %v1669_v57, %v1671_v56 }
 0x280   : > { %19595 = vst [vmem:[#allocation129_spill] sm:$0xff] %v13867_v38  ;;  %v18715_v17 = vunpack.c.l.b16 %v13867_v38  ;;  %v18714_v36 = vunpack.c.l.b16 %v13869_v54  ;;  %v1398_v48 = vadd.f32 %v1263_v34, %v919_v22  ;;  %v1670_v4 = vsel %vm1537_vm1, %v19601_v39, %v1669_v57 }
 0x281   : > { %19596 = vst [vmem:[#allocation142_spill] sm:$0xff] %v13869_v54  ;;  %v18713_v11 = vunpack.c.l.b16 %v13871_v41  ;;  %v1884_v35 = vmul.f32 %v10091_v18, %v13736_v28  ;;  %v19602_v30 = vunpack.c.l.b16 %v13863_v29  ;;  %v19605_v39 = vrot.slane %v13306_v51, 1 }
 0x282   : > { %19597 = vst [vmem:[#allocation165_spill] sm:$0xff] %v13871_v41  ;;  %v1805_v60 = vadd.f32 %v1670_v4, %v1398_v48  ;;  %v3595_v34 = vrot.slane %v13847_v59, 2  ;;  %v1806_v6 = vadd.f32 %v1672_v50, %v1399_v21  ;;  %v19606_v56 = vrot.slane %v13746_v47, 1  ;;  %v19607_v4 = vld [vmem:[#allocation133_spill] sm:$0xff] }
 0x283   : > { %19600 = vst [vmem:[#allocation167_spill] sm:$0xff] %v13883_v46  ;;  %v13895_v22 = vpack.c.b16 %v18715_v17, %v19602_v30  ;;  %v13901_v9 = vpack.c.b16 %v18713_v11, %v18714_v36  ;;  %v2226_v57 = vsel %vm1130_vm0, %v19605_v39, %v2225_v45  ;;  %v2430_v30 = vmul.f32 %v10049_v2, %v13736_v28  ;;  %v9809_v11 = vld [vmem:[%s18339_s3] sm:$0xff]  ;;  %v19773_v46 = vld [vmem:[#allocation47_spill] sm:$0xff] }
 0x284   : > { %v2228_v38 = vsel %vm1130_vm0, %v2225_v45, %v19606_v56  ;;  %v1950_v39 = vadd.f32 %v19607_v4, %v1805_v60  ;;  %v2846_v59 = vmul.f32 %v19090_v42, %v2777_v16  ;;  %v1951_v21 = vadd.f32 %v1884_v35, %v1806_v6  ;;  %4668 = vmatpush.bf16.msrb.mxu1 %v9809_v11 }
 0x285   : > { %19603 = vst [vmem:[#allocation168_spill] sm:$0xff] %v13895_v22  ;;  %v4303_v48 = vshll.u32 %v13895_v22, 16  ;;  %v4311_v51 = vshll.u32 %v13901_v9, 16  ;;  %v2631_v50 = vrot.slane %v2430_v30, 2  ;;  %v13920_v47 = vmul.f32 %v19470_v53, %v2777_v16 }
 0x286   : > { %19604 = vst [vmem:[#allocation169_spill] sm:$0xff] %v13901_v9  ;;  %v13923_v45 = vmul.f32 %v13367_v27, %v2777_v16  ;;  %v4307_v36 = vshrl.u32 %v13895_v22, 16  ;;  %v2361_v41 = vadd.f32 %v2226_v57, %v1950_v39  ;;  %v2362_v54 = vadd.f32 %v2228_v38, %v1951_v21  ;;  %v13942_v57 = vpop.f32.mrf.mxu2  ;;  %v19617_v39 = vld [vmem:[#allocation138_spill] sm:$0xff] }
 0x287   : > { %19608 = vst [vmem:[#allocation133_spill] sm:$0xff] %v13920_v47  ;;  %v13925_v56 = vrot.slane %v4303_v48, 1  ;;  %v13928_v17 = vrot.slane %v4311_v51, 1  ;;  %v19611_v60 = vrot.slane %v13310_v52, 2  ;;  %v19612_v6 = vrot.slane %v13767_v32, 2  ;;  %v13944_v38 = vpop.f32.mrf.mxu0 }
 0x288   : > { %19609 = vst [vmem:[#allocation170_spill] sm:$0xff] %v13923_v45  ;;  %v18719_v16 = vrot.slane %v13920_v47, 1  ;;  %v4171_v51 = vshrl.u32 %v13558_v44, 16  ;;  %v19616_v52 = vrot.slane %v13610_v61, 1  ;;  %v19618_v32 = vrot.slane %v19617_v39, 1 }
 0x289   : > { %19610 = vst [vmem:[#allocation171_spill] sm:$0xff] %v13925_v56  ;;  %v2632_v35 = vsel %vm1537_vm1, %v19611_v60, %v2631_v50  ;;  %v2634_v30 = vsel %vm1537_vm1, %v2631_v50, %v19612_v6  ;;  %v4309_v11 = vor.u32 %v4307_v36, %v13925_v56  ;;  %v13953_v50 = vmul.f32 %v19470_v53, %v13573_v58 }
 0x28a   : > { %v13938_v48 = vadd.f32 %v2632_v35, %v2361_v41  ;;  %19614 = vst [vmem:[#allocation173_spill] sm:$0xff] %v13942_v57  ;;  %v2214_v21 = vsel %vm1130_vm0, %v19618_v32, %v19616_v52  ;;  %v2768_v36 = vadd.f32 %v2634_v30, %v2362_v54  ;;  %v4175_v41 = vshll.u32 %v13742_v7, 16 }
 0x28b   : > { %19615 = vst [vmem:[#allocation174_spill] sm:$0xff] %v13944_v38  ;;  %v3575_v60 = vrot.slane %v13755_v1, 2  ;;  %v13959_v35 = vsel %vm4094_vm2, %v4309_v11, %v13928_v17  ;;  %v19621_v6 = vrot.slane %v13842_v20, 1  ;;  %v4173_v52 = vor.u32 %v4171_v51, %v13626_v37  ;;  %v19622_v1 = vld [vmem:[#allocation146_spill] sm:$0xff] }
 0x28c   : > { %19613 = vst [vmem:[#allocation172_spill] sm:$0xff] %v13938_v48  ;;  %9349 = vmatmul.msk.bf16.vlgmr.msra.gmra.mxu1 %vm4345_vm3, %v13959_v35  ;;  %v2913_v54 = vadd.f32 %v2846_v59, %v2768_v36  ;;  %v13969_v30 = vrot.slane %v4175_v41, 1  ;;  %v2903_v32 = vadd.f32 %v19622_v1, %v13551_v23  ;;  %v19623_v11 = vrot.slane %v13725_v31, 1  ;;  %v19630_v1 = vld [vmem:[#allocation22_spill] sm:$0xff] }
 0x28d   : > { %19619 = vst [vmem:[#allocation138_spill] sm:$0xff] %v13953_v50  ;;  %v3190_v39 = vsel %vm1130_vm0, %v18719_v16, %v19621_v6  ;;  %v19624_v4 = vrot.slane %v19575_v49, 1  ;;  %v2355_v29 = vadd.f32 %v2214_v21, %v13576_v5  ;;  %v13981_v37 = vmul.f32 %v19470_v53, %v13659_v13  ;;  %v9865_v49 = vld [vmem:[%s18339_s3 + $0x10] sm:$0xff] }
 0x28e   : > { %19620 = vst [vmem:[#allocation175_spill] sm:$0xff] %v13959_v35  ;;  %v19625_v51 = vrot.slane %v13923_v45, 2  ;;  %v19626_v36 = vrot.slane %v13540_v40, 1  ;;  %v19627_v23 = vmov %v19623_v11  ;;  %4988 = vmatpush.bf16.msra.mxu1 %v9865_v49  ;;  %v3324_v5 = vadd.f32 %v3190_v39, %v2913_v54  ;;  %v19633_v39 = vld [vmem:[#allocation56_spill] sm:$0xff]  ;;  %v19636_v49 = vld [vmem:[#allocation27_spill] sm:$0xff] }
 0x28f   : > { %v3170_v20 = vsel %vm1130_vm0, %v19624_v4, %v19623_v11  ;;  %v13996_v4 = vsel %vm4094_vm2, %v4173_v52, %v13969_v30  ;;  %v19629_v31 = vrot.slane %v19591_v26, 2  ;;  %v19631_v11 = vrot.slane %v19630_v1, 2  ;;  %v19639_v26 = vld [vmem:[#allocation25_spill] sm:$0xff] }
 0x290   : > { %v3596_v59 = vsel %vm1537_vm1, %v19625_v51, %v3595_v34  ;;  %v3172_v41 = vsel %vm1130_vm0, %v19627_v23, %v19626_v36  ;;  %19628 = vst [vmem:[#allocation146_spill] sm:$0xff] %v13996_v4  ;;  %v3314_v21 = vadd.f32 %v3170_v20, %v2903_v32  ;;  %9332 = vmatmul.msk.bf16.gmra.mxu0 %vm4345_vm3, %v13996_v4  ;;  %v19632_v36 = vld [vmem:[#allocation55_spill] sm:$0xff]  ;;  %v19634_v23 = vld [vmem:[#allocation66_spill] sm:$0xff]  ;;  %v19637_v32 = vrot.slane %v19636_v49, 1 }
 0x291   : > { %v3315_v6 = vadd.f32 %v3172_v41, %v13729_v19  ;;  %v3576_v34 = vsel %vm1537_vm1, %v19629_v31, %v3575_v60  ;;  %v3578_v51 = vsel %vm1537_vm1, %v3575_v60, %v19631_v11  ;;  %v2725_v54 = vadd.f32 %v19633_v39, %v19632_v36  ;;  %v19643_v11 = vld [vmem:[#allocation139_spill] sm:$0xff] }
 0x292   : > { %v19635_v52 = vrot.slane %v19634_v23, 1  ;;  %v14014_v20 = vadd.f32 %v3596_v59, %v3324_v5  ;;  %v3720_v41 = vadd.f32 %v3576_v34, %v3314_v21  ;;  %v19640_v35 = vrot.slane %v19639_v26, 1  ;;  %v19645_v59 = vld [vmem:[#allocation44_spill] sm:$0xff]  ;;  %v19646_v21 = vld [vmem:[#allocation51_spill] sm:$0xff]  ;;  %v14032_v34 = vpop.f32.mrf.mxu2 }
 0x293   : > { %v3721_v16 = vadd.f32 %v3578_v51, %v3315_v6  ;;  %v19642_v60 = vrot.slane %v13624_v25, 2  ;;  %v19644_v36 = vrot.slane %v19643_v11, 2  ;;  %v14028_v49 = vmul.f32 %v13367_v27, %v13659_v13  ;;  %19647 = vst [vmem:[#allocation55_spill] sm:$0xff] %v14032_v34  ;;  %v14034_v51 = vpop.f32.mrf.mxu0 }
 0x294   : > { %v3102_v19 = vsel %vm1130_vm0, %v19637_v32, %v19635_v52  ;;  %19638 = vst [vmem:[#allocation22_spill] sm:$0xff] %v14014_v20  ;;  %v19641_v31 = vmov %v19635_v52  ;;  %v2870_v5 = vadd.f32 %v19645_v59, %v2725_v54  ;;  %v19649_v32 = vld [vmem:[#allocation67_spill] sm:$0xff]  ;;  %v19653_v59 = vld [vmem:[#allocation113_spill] sm:$0xff]  ;;  %v4315_v22 = vshrl.u32 %v13901_v9, 16 }
 0x295   : > { %v3104_v4 = vsel %vm1130_vm0, %v19641_v31, %v19640_v35  ;;  %v2620_v39 = vsel %vm1537_vm1, %v19644_v36, %v19642_v60  ;;  %v3280_v6 = vadd.f32 %v3102_v19, %v19646_v21  ;;  %19648 = vst [vmem:[#allocation56_spill] sm:$0xff] %v14034_v51  ;;  %v3791_v35 = vadd.f32 %v13151_v55, %v3720_v41  ;;  %v19651_v60 = vld [vmem:[#allocation103_spill] sm:$0xff]  ;;  %v19749_v51 = vld [vmem:[#allocation86_spill] sm:$0xff] }
 0x296   : > { %v2761_v23 = vadd.f32 %v2620_v39, %v2355_v29  ;;  %v3792_v52 = vadd.f32 %v13151_v55, %v3721_v16  ;;  %v19650_v31 = vrot.slane %v19649_v32, 2  ;;  %v19652_v11 = vrot.slane %v19651_v60, 2 }
 0x297   : > { %v3281_v54 = vadd.f32 %v3104_v4, %v2870_v5  ;;  %v19654_v19 = vrot.slane %v19653_v59, 2  ;;  %v3858_v39 = vmax.f32 %v3791_v35, 0.0  ;;  %v18728_v60 = vrot.slane %v14028_v49, 2 }
 0x298   : > { %v3508_v36 = vsel %vm1537_vm1, %v19652_v11, %v19650_v31  ;;  %v19655_v21 = vmov %v19650_v31  ;;  %v3859_v16 = vmax.f32 %v3792_v52, 0.0  ;;  %v19656_v11 = vld [vmem:[#allocation147_spill] sm:$0xff]  ;;  %v19658_v5 = vrot.slane %v13540_v40, 1  ;;  %v19661_v52 = vld [vmem:[#allocation46_spill] sm:$0xff]  ;;  %v19664_v40 = vld [vmem:[#allocation64_spill] sm:$0xff] }
 0x299   : > { %v3510_v56 = vsel %vm1537_vm1, %v19655_v21, %v19654_v19  ;;  %v3686_v29 = vadd.f32 %v3508_v36, %v3280_v6  ;;  %v19657_v4 = vrot.slane %v19656_v11, 1  ;;  %v14058_v20 = vpack.c.bf16 %v3858_v39, %v3858_v39 }
 0x29a   : > { %v3687_v45 = vadd.f32 %v3510_v56, %v3281_v54  ;;  %v14060_v6 = vpack.c.bf16 %v3859_v16, %v3859_v16  ;;  %v4317_v35 = vor.u32 %v4315_v22, %v13928_v17  ;;  %v2906_v36 = vadd.f32 %v19661_v52, %v2761_v23 }
 0x29b   : > { %v3757_v31 = vadd.f32 %v13151_v55, %v3686_v29  ;;  %v3174_v32 = vsel %vm1130_vm0, %v19658_v5, %v19657_v4  ;;  %19659 = vst [vmem:[#allocation66_spill] sm:$0xff] %v14058_v20  ;;  %v19662_v56 = vrot.slane %v13981_v37, 1  ;;  %v19663_v54 = vmov %v19657_v4  ;;  %v19665_v5 = vld [vmem:[#allocation15_spill] sm:$0xff] }
 0x29c   : > { %19660 = vst [vmem:[#allocation27_spill] sm:$0xff] %v14060_v6  ;;  %v3758_v19 = vadd.f32 %v13151_v55, %v3687_v45  ;;  %v3316_v41 = vadd.f32 %v3174_v32, %v19664_v40  ;;  %v18727_v39 = vunpack.c.l.b16 %v14058_v20  ;;  %v18726_v16 = vunpack.c.l.b16 %v14060_v6  ;;  %v19675_v40 = vld [vmem:[#allocation6_spill] sm:$0xff]  ;;  %v19685_v6 = vld [vmem:[#allocation48_spill] sm:$0xff] }
 0x29d   : > { %v3824_v21 = vmax.f32 %v3757_v31, 0.0  ;;  %v3176_v29 = vsel %vm1130_vm0, %v19663_v54, %v19662_v56  ;;  %v19666_v17 = vrot.slane %v19665_v5, 2  ;;  %v19667_v22 = vrot.slane %v19630_v1, 2  ;;  %v14085_v56 = vpop.f32.mrf.mxu0  ;;  %v19672_v54 = vld [vmem:[#allocation59_spill] sm:$0xff] }
 0x29e   : > { %v3317_v4 = vadd.f32 %v3176_v29, %v2906_v36  ;;  %v3825_v23 = vmax.f32 %v3758_v19, 0.0  ;;  %19670 = vst [vmem:[#allocation139_spill] sm:$0xff] %v14085_v56  ;;  %v14091_v36 = vpack.c.b16 %v18726_v16, %v18727_v39  ;;  %v19673_v19 = vrot.slane %v19672_v54, 1  ;;  %v19678_v16 = vld [vmem:[#allocation30_spill] sm:$0xff]  ;;  %v19731_v56 = vld [vmem:[#allocation35_spill] sm:$0xff] }
 0x29f   : > { %v3580_v45 = vsel %vm1537_vm1, %v19667_v22, %v19666_v17  ;;  %v14078_v31 = vpack.c.bf16 %v3824_v21, %v3824_v21  ;;  %v19669_v11 = vmov %v19666_v17  ;;  %v19674_v21 = vrot.slane %v19639_v26, 1 }
 0x2a0   : > { %v3582_v32 = vsel %vm1537_vm1, %v19669_v11, %v18728_v60  ;;  %v3722_v52 = vadd.f32 %v3580_v45, %v3316_v41  ;;  %19671 = vst [vmem:[#allocation44_spill] sm:$0xff] %v14091_v36  ;;  %v19676_v5 = vrot.slane %v19675_v40, 1  ;;  %v19677_v17 = vmov %v19673_v19  ;;  %v19682_v60 = vld [vmem:[#allocation111_spill] sm:$0xff] }
 0x2a1   : > { %19668 = vst [vmem:[#allocation25_spill] sm:$0xff] %v14078_v31  ;;  %v3723_v1 = vadd.f32 %v3582_v32, %v3317_v4  ;;  %v3106_v29 = vsel %vm1130_vm0, %v19674_v21, %v19673_v19  ;;  %v14103_v22 = vpack.c.bf16 %v3825_v23, %v3825_v23  ;;  %v4179_v45 = vshrl.u32 %v13742_v7, 16  ;;  %v14108_v32 = vpop.f32.mrf.mxu2  ;;  %v19680_v21 = vld [vmem:[#allocation16_spill] sm:$0xff] }
 0x2a2   : > { %v3108_v41 = vsel %vm1130_vm0, %v19677_v17, %v19676_v5  ;;  %v3793_v11 = vadd.f32 %v13151_v55, %v3722_v52  ;;  %v3282_v4 = vadd.f32 %v3106_v29, %v19678_v16  ;;  %19679 = vst [vmem:[#allocation51_spill] sm:$0xff] %v14108_v32  ;;  %v4319_v26 = vshll.u32 %v14091_v36, 16  ;;  %9357 = vmatmul.msk.bf16.vlgmr.msrb.gmra.mxu1 %vm4345_vm3, %v19680_v21  ;;  %v19681_v5 = vld [vmem:[#allocation41_spill] sm:$0xff] }
 0x2a3   : > { %v3794_v54 = vadd.f32 %v13151_v55, %v3723_v1  ;;  %v3283_v23 = vadd.f32 %v3108_v41, %v19681_v5  ;;  %v18733_v17 = vunpack.c.l.b16 %v14103_v22  ;;  %v19683_v52 = vrot.slane %v19682_v60, 2  ;;  %v19692_v60 = vld [vmem:[#allocation63_spill] sm:$0xff]  ;;  %v19717_v32 = vld [vmem:[#allocation65_spill] sm:$0xff] }
 0x2a4   : > { %v3860_v39 = vmax.f32 %v3793_v11, 0.0  ;;  %v19684_v16 = vrot.slane %v19653_v59, 2  ;;  %v19686_v20 = vrot.slane %v19685_v6, 2  ;;  %v14127_v21 = vrot.slane %v4319_v26, 1 }
 0x2a5   : > { %v19687_v19 = vmov %v19683_v52  ;;  %v3861_v55 = vmax.f32 %v3794_v54, 0.0  ;;  %v14131_v11 = vmul.f32 %v13367_v27, %v13573_v58  ;;  %v19689_v5 = vunpack.c.l.b16 %v14078_v31  ;;  %v14156_v54 = vld [vmem:[%s18338_s2] ss:$0 sm:$0xff]  ;;  %v19733_v58 = vld [vmem:[#allocation20_spill] sm:$0xff] }
 0x2a6   : > { %v3512_v29 = vsel %vm1537_vm1, %v19684_v16, %v19683_v52  ;;  %v3514_v9 = vsel %vm1537_vm1, %v19687_v19, %v19686_v20  ;;  %v14139_v52 = vpack.c.bf16 %v3860_v39, %v3860_v39  ;;  %v19693_v16 = vrot.slane %v19692_v60, 1 }
 0x2a7   : > { %v3688_v1 = vadd.f32 %v3512_v29, %v3282_v4  ;;  %v3689_v41 = vadd.f32 %v3514_v9, %v3283_v23  ;;  %19688 = vst [vmem:[#allocation67_spill] sm:$0xff] %v14131_v11  ;;  %v14137_v59 = vpack.c.b16 %v18733_v17, %v19689_v5  ;;  %v19694_v20 = vrot.slane %v13610_v61, 1  ;;  %v19697_v29 = vld [vmem:[#allocation32_spill] sm:$0xff]  ;;  %v14169_v5 = vpop.f32.mrf.mxu0  ;;  %v19701_v17 = vld [vmem:[#allocation62_spill] sm:$0xff] }
 0x2a8   : > { %19691 = vst [vmem:[#allocation113_spill] sm:$0xff] %v14139_v52  ;;  %v14148_v9 = vsel %vm4094_vm2, %v4317_v35, %v14127_v21  ;;  %v4181_v4 = vor.u32 %v4179_v45, %v13969_v30  ;;  %v14151_v19 = vpack.c.bf16 %v3861_v55, %v3861_v55  ;;  %v19698_v30 = vrot.slane %v19697_v29, 2 }
 0x2a9   : > { %19690 = vst [vmem:[#allocation103_spill] sm:$0xff] %v14137_v59  ;;  %v2216_v26 = vsel %vm1130_vm0, %v19694_v20, %v19693_v16  ;;  %v3759_v39 = vadd.f32 %v14156_v54, %v3688_v1  ;;  %9350 = vmatmul.msk.bf16.vlgmr.msra.gmra.mxu3 %vm4345_vm3, %v14148_v9  ;;  %v18736_v61 = vrot.slane %v14137_v59, 1  ;;  %v4183_v23 = vshll.u32 %v14137_v59, 16 }
 0x2aa   : > { %19695 = vst [vmem:[#allocation147_spill] sm:$0xff] %v14148_v9  ;;  %v3760_v35 = vadd.f32 %v14156_v54, %v3689_v41  ;;  %v19699_v45 = vrot.slane %v13624_v25, 2  ;;  %v18738_v16 = vunpack.c.l.b16 %v14139_v52  ;;  %v18737_v1 = vunpack.c.l.b16 %v14151_v19 }
 0x2ab   : > { %19696 = vst [vmem:[#allocation46_spill] sm:$0xff] %v14151_v19  ;;  %v3826_v20 = vmax.f32 %v3759_v39, 0.0  ;;  %v2356_v9 = vadd.f32 %v2216_v26, %v19701_v17  ;;  %v19702_v48 = vrot.slane %v13742_v7, 1  ;;  %v4185_v47 = vrot.slane %v4183_v23, 1  ;;  %v9812_v39 = vld [vmem:[%s18339_s3 + $0x18] sm:$0xff] }
 0x2ac   : > { %v2622_v55 = vsel %vm1537_vm1, %v19699_v45, %v19698_v30  ;;  %19700 = vst [vmem:[#allocation64_spill] sm:$0xff] %v14169_v5  ;;  %v3827_v25 = vmax.f32 %v3760_v35, 0.0  ;;  %v2840_v30 = vmul.f32 %v19090_v42, %v13659_v13  ;;  %v19704_v45 = vld [vmem:[#allocation126_spill] sm:$0xff]  ;;  %v14190_v17 = vpack.c.b16 %v18737_v1, %v18738_v16  ;;  %v19711_v16 = vld [vmem:[#allocation28_spill] sm:$0xff]  ;;  %5340 = vmatpush.bf16.msrb.mxu3 %v9812_v39  ;;  %v19713_v19 = vld [vmem:[#allocation61_spill] sm:$0xff] }
 0x2ad   : > { %v14179_v41 = vsel %vm1130_vm0, %v19702_v48, %v18736_v61  ;;  %v3515_v5 = vrot.slane %v19704_v45, 2  ;;  %v14192_v26 = vpack.c.bf16 %v3826_v20, %v3826_v20  ;;  %v2762_v48 = vadd.f32 %v2622_v55, %v2356_v9  ;;  %v14208_v20 = vpop.f32.mrf.mxu2  ;;  %v19710_v9 = vld [vmem:[#allocation50_spill] sm:$0xff] }
 0x2ae   : > { %19703 = vst [vmem:[#allocation15_spill] sm:$0xff] %v14179_v41  ;;  %9403 = vmatmul.msk.bf16.gmra.mxu2 %vm4345_vm3, %v14179_v41  ;;  %v14199_v23 = vsel %vm4094_vm2, %v4181_v4, %v4185_v47  ;;  %v14201_v35 = vpack.c.bf16 %v3827_v25, %v3827_v25  ;;  %v19707_v45 = vrot.slane %v13953_v50, 1  ;;  %v19708_v61 = vrot.slane %v13981_v37, 1  ;;  %v19712_v37 = vld [vmem:[#allocation60_spill] sm:$0xff]  ;;  %v19720_v39 = vld [vmem:[#allocation74_spill] sm:$0xff] }
 0x2af   : > { %19705 = vst [vmem:[#allocation59_spill] sm:$0xff] %v14190_v17  ;;  %v14213_v41 = vmul.f32 %v19470_v53, %v19711_v16  ;;  %9333 = vmatmul.msk.bf16.gmra.mxu0 %vm4345_vm3, %v14199_v23  ;;  %v2907_v25 = vadd.f32 %v2840_v30, %v2762_v48  ;;  %v19716_v55 = vrot.slane %v19675_v40, 1  ;;  %v19718_v50 = vrot.slane %v19717_v32, 1 }
 0x2b0   : > { %19706 = vst [vmem:[#allocation6_spill] sm:$0xff] %v14199_v23  ;;  %v3178_v1 = vsel %vm1130_vm0, %v19708_v61, %v19707_v45  ;;  %v2728_v61 = vadd.f32 %v19713_v19, %v19712_v37  ;;  %v19714_v45 = vld [vmem:[#allocation71_spill] sm:$0xff]  ;;  %v4327_v30 = vshll.u32 %v14190_v17, 16  ;;  %v19721_v4 = vrot.slane %v19685_v6, 2 }
 0x2b1   : > { %19709 = vst [vmem:[#allocation30_spill] sm:$0xff] %v14208_v20  ;;  %v19715_v52 = vrot.slane %v19714_v45, 1  ;;  %v3318_v48 = vadd.f32 %v3178_v1, %v2907_v25  ;;  %v19722_v37 = vunpack.c.l.b16 %v14192_v26  ;;  %v19723_v40 = vunpack.c.l.b16 %v14201_v35  ;;  %v19728_v25 = vld [vmem:[#allocation115_spill] sm:$0xff] }
 0x2b2   : > { %v3516_v19 = vsel %vm1537_vm1, %v19721_v4, %v3515_v5  ;;  %v19726_v45 = vrot.slane %v14028_v49, 2  ;;  %v14261_v49 = vmul.f32 %v19470_v53, %v19731_v56  ;;  %9358 = vmatmul.msk.bf16.gmra.mxu1 %vm4345_vm3, %v19733_v58  ;;  %v19734_v58 = vld [vmem:[#allocation31_spill] sm:$0xff]  ;;  %v19745_v60 = vrot.slane %v14213_v41, 1 }
 0x2b3   : > { %v3110_v20 = vsel %vm1130_vm0, %v19716_v55, %v19715_v52  ;;  %v19719_v12 = vmov %v19715_v52  ;;  %v14240_v52 = vpack.c.b16 %v19723_v40, %v19722_v37  ;;  %v19725_v55 = vrot.slane %v14131_v11, 2 }
 0x2b4   : > { %v3112_v23 = vsel %vm1130_vm0, %v19719_v12, %v19718_v50  ;;  %v19727_v50 = vld [vmem:[#allocation39_spill] sm:$0xff]  ;;  %v19792_v10 = vunpack.c.l.b16 %v14201_v35 }
 0x2b5   : > { %v3285_v13 = vadd.f32 %v3112_v23, %v19720_v39  ;;  %19724 = vst [vmem:[#allocation41_spill] sm:$0xff] %v14240_v52  ;;  %v3584_v12 = vsel %vm1537_vm1, %v19726_v45, %v19725_v55  ;;  %v2873_v1 = vadd.f32 %v19727_v50, %v2728_v61  ;;  %v19729_v23 = vrot.slane %v19728_v25, 2  ;;  %v19730_v39 = vld [vmem:[#allocation83_spill] sm:$0xff]  ;;  %v14268_v45 = vpop.f32.mrf.mxu0  ;;  %v14291_v34 = vpop.f32.mrf.mxu2 }
 0x2b6   : > { %v14253_v4 = vmul.f32 %v19470_v53, %v19730_v39  ;;  %v14257_v37 = vmul.f32 %v13367_v27, %v19730_v39  ;;  %v3724_v40 = vadd.f32 %v3584_v12, %v3318_v48  ;;  %v14265_v61 = vmul.f32 %v13367_v27, %v19711_v16  ;;  %19732 = vst [vmem:[#allocation111_spill] sm:$0xff] %v14268_v45  ;;  %v19742_v12 = vld [vmem:[#allocation85_spill] sm:$0xff]  ;;  %v19797_v35 = vld [vmem:[#allocation107_spill] sm:$0xff] }
 0x2b7   : > { %v3518_v6 = vsel %vm1537_vm1, %v3515_v5, %v19729_v23  ;;  %v4323_v5 = vshrl.u32 %v14091_v36, 16  ;;  %v3284_v55 = vadd.f32 %v3110_v20, %v2873_v1  ;;  %v14270_v50 = vrot.slane %v4327_v30, 1  ;;  %19735 = vst [vmem:[#allocation48_spill] sm:$0xff] %v14291_v34 }
 0x2b8   : > { %v3691_v11 = vadd.f32 %v3518_v6, %v3285_v13  ;;  %v3795_v13 = vadd.f32 %v14156_v54, %v3724_v40  ;;  %v14279_v16 = vmul.f32 %v13367_v27, %v19731_v56  ;;  %v4187_v20 = vshrl.u32 %v14137_v59, 16 }
 0x2b9   : > { %v3690_v1 = vadd.f32 %v3516_v19, %v3284_v55  ;;  %v4325_v30 = vor.u32 %v4323_v5, %v14127_v21  ;;  %v4191_v6 = vshll.u32 %v14240_v52, 16  ;;  %v14287_v40 = vmul.f32 %v19470_v53, %v19734_v58 }
 0x2ba   : > { %v3762_v48 = vadd.f32 %v14156_v54, %v3691_v11  ;;  %v3862_v23 = vmax.f32 %v3795_v13, 0.0  ;;  %v4189_v45 = vor.u32 %v4187_v20, %v4185_v47  ;;  %v19737_v21 = vrot.slane %v14240_v52, 1  ;;  %v19740_v20 = vld [vmem:[#allocation21_spill] sm:$0xff] }
 0x2bb   : > { %v3761_v28 = vadd.f32 %v14156_v54, %v3690_v1  ;;  %v14295_v19 = vsel %vm4094_vm2, %v4325_v30, %v14270_v50  ;;  %v19738_v5 = vrot.slane %v14137_v59, 1  ;;  %v19741_v1 = vld [vmem:[#allocation8_spill] sm:$0xff]  ;;  %v19743_v30 = vrot.slane %v19742_v12, 1 }
 0x2bc   : > { %v3829_v36 = vmax.f32 %v3762_v48, 0.0  ;;  %19736 = vst [vmem:[#allocation62_spill] sm:$0xff] %v14295_v19  ;;  %v3929_v13 = vpack.c.bf16 %v3862_v23, %v3862_v23  ;;  %9351 = vmatmul.msk.bf16.gmra.mxu3 %vm4345_vm3, %v14295_v19  ;;  %v2876_v11 = vadd.f32 %v19741_v1, %v19740_v20  ;;  %v19744_v34 = vrot.slane %v19717_v32, 1 }
 0x2bd   : > { %v14302_v55 = vsel %vm1130_vm0, %v19738_v5, %v19737_v21  ;;  %v3828_v47 = vmax.f32 %v3761_v28, 0.0  ;;  %v19746_v21 = vmov %v19743_v30  ;;  %v14320_v23 = vrot.slane %v4191_v6, 1  ;;  %v19748_v28 = vld [vmem:[#allocation70_spill] sm:$0xff] }
 0x2be   : > { %19739 = vst [vmem:[#allocation126_spill] sm:$0xff] %v14302_v55  ;;  %v14304_v48 = vpack.c.bf16 %v3829_v36, %v3829_v36  ;;  %v3114_v29 = vsel %vm1130_vm0, %v19744_v34, %v19743_v30  ;;  %v3116_v36 = vsel %vm1130_vm0, %v19746_v21, %v19745_v60  ;;  %v14322_v5 = vunpack.c.l.b16 %v3929_v13  ;;  %9404 = vmatmul.msk.bf16.gmra.mxu2 %vm4345_vm3, %v14302_v55  ;;  %v14404_v13 = vpop.f32.mrf.mxu2 }
 0x2bf   : > { %v3286_v19 = vadd.f32 %v3114_v29, %v19748_v28  ;;  %v19750_v20 = vrot.slane %v19749_v51, 2  ;;  %v19751_v1 = vrot.slane %v19728_v25, 2  ;;  %v14330_v8 = vpack.c.bf16 %v3828_v47, %v3828_v47  ;;  %v19760_v25 = vld [vmem:[#allocation79_spill] sm:$0xff]  ;;  %19761 = vst [vmem:[#allocation65_spill] sm:$0xff] %v14404_v13 }
 0x2c0   : > { %19747 = vst [vmem:[#allocation50_spill] sm:$0xff] %v14322_v5  ;;  %v18753_v34 = vunpack.c.l.b16 %v14304_v48  ;;  %v3287_v30 = vadd.f32 %v3116_v36, %v2876_v11  ;;  %v19752_v12 = vrot.slane %v14265_v61, 2  ;;  %v14340_v29 = vmul.f32 %v19090_v42, %v19730_v39  ;;  %v14355_v39 = vpop.f32.mrf.mxu0 }
 0x2c1   : > { %v3520_v32 = vsel %vm1537_vm1, %v19751_v1, %v19750_v20  ;;  %v19753_v60 = vmov %v19750_v20  ;;  %v14348_v11 = vmul.f32 %v13367_v27, %v19734_v58  ;;  %v14352_v51 = vsel %vm4094_vm2, %v4189_v45, %v14320_v23  ;;  %19755 = vst [vmem:[#allocation60_spill] sm:$0xff] %v14355_v39  ;;  %v14394_v20 = vld [vmem:[%s18337_s1 + $0x8] ss:$0 sm:$0xff] }
 0x2c2   : > { %v3522_v6 = vsel %vm1537_vm1, %v19753_v60, %v19752_v12  ;;  %v3692_v47 = vadd.f32 %v3520_v32, %v3286_v19  ;;  %19754 = vst [vmem:[#allocation28_spill] sm:$0xff] %v14352_v51  ;;  %v18754_v21 = vunpack.c.l.b16 %v14330_v8  ;;  %v14359_v28 = vmul.f32 %v19090_v42, %v19731_v56  ;;  %9334 = vmatmul.msk.bf16.gmra.mxu0 %vm4345_vm3, %v14352_v51  ;;  %v19762_v51 = vld [vmem:[#allocation108_spill] sm:$0xff] }
 0x2c3   : > { %v3693_v36 = vadd.f32 %v3522_v6, %v3287_v30  ;;  %v14366_v58 = vpack.c.b16 %v14322_v5, %v14322_v5  ;;  %v3117_v1 = vrot.slane %v14287_v40, 1  ;;  %v19758_v30 = vld [vmem:[#allocation101_spill] sm:$0xff]  ;;  %v19759_v6 = vld [vmem:[#allocation14_spill] sm:$0xff]  ;;  %v3523_v19 = vrot.slane %v14348_v11, 2 }
 0x2c4   : > { %v3763_v45 = vadd.f32 %v14156_v54, %v3692_v47  ;;  %v14375_v56 = vpack.c.b16 %v18753_v34, %v18754_v21  ;;  %v14380_v12 = vmul.f32 %v19470_v53, %v19758_v30  ;;  %v14384_v60 = vmul.f32 %v13367_v27, %v19758_v30 }
 0x2c5   : > { %19756 = vst [vmem:[#allocation61_spill] sm:$0xff] %v14366_v58  ;;  %v3764_v32 = vadd.f32 %v14156_v54, %v3693_v36  ;;  %v14388_v47 = vmul.f32 %v19470_v53, %v19759_v6  ;;  %v14398_v36 = vmul.f32 %v14394_v20, %v19759_v6  ;;  %v14402_v27 = vmul.f32 %v19470_v53, %v19760_v25 }
 0x2c6   : > { %19757 = vst [vmem:[#allocation71_spill] sm:$0xff] %v14375_v56  ;;  %v3830_v40 = vmax.f32 %v3763_v45, 0.0  ;;  %v14408_v45 = vmul.f32 %v14394_v20, %v19760_v25  ;;  %v4331_v11 = vshrl.u32 %v14190_v17, 16  ;;  %v4335_v21 = vshll.u32 %v14366_v58, 16  ;;  %v19767_v17 = vld [vmem:[#allocation24_spill] sm:$0xff] }
 0x2c7   : > { %v3831_v34 = vmax.f32 %v3764_v32, 0.0  ;;  %v14416_v6 = vmul.f32 %v19090_v42, %v19758_v30  ;;  %v14420_v5 = vmul.f32 %v19470_v53, %v19762_v51  ;;  %v14424_v32 = vmul.f32 %v14394_v20, %v19762_v51  ;;  %v19764_v30 = vld [vmem:[#allocation23_spill] sm:$0xff] }
 0x2c8   : > { %v14412_v55 = vpack.c.bf16 %v3830_v40, %v3830_v40  ;;  %v14432_v13 = vor.u32 %v4331_v11, %v14270_v50  ;;  %9359 = vmatmul.msk.bf16.gmra.mxu1 %vm4345_vm3, %v19764_v30  ;;  %v4199_v2 = vshll.u32 %v14375_v56, 16  ;;  %v14444_v40 = vmul.f32 %v19090_v42, %v19762_v51  ;;  %v14453_v18 = vpop.f32.mrf.mxu0 }
 0x2c9   : > { %v14426_v25 = vpack.c.bf16 %v3831_v34, %v3831_v34  ;;  %v4337_v50 = vrot.slane %v4335_v21, 1  ;;  %19766 = vst [vmem:[#allocation115_spill] sm:$0xff] %v14453_v18  ;;  %v14457_v58 = vmul.f32 %v19470_v53, %v19767_v17  ;;  %v14461_v51 = vmul.f32 %v14394_v20, %v19767_v17  ;;  %v19768_v21 = vld [vmem:[#allocation88_spill] sm:$0xff] }
 0x2ca   : > { %19763 = vst [vmem:[#allocation74_spill] sm:$0xff] %v14432_v13  ;;  %v4030_v57 = vunpack.c.l.b16 %v14412_v55  ;;  %v14465_v11 = vmul.f32 %v19470_v53, %v19768_v21  ;;  %v14471_v39 = vrot.slane %v4199_v2, 1  ;;  %v19769_v18 = vrot.slane %v14213_v41, 1 }
 0x2cb   : > { %v18765_v34 = vunpack.c.l.b16 %v14426_v25  ;;  %v4338_v30 = vsel %vm4094_vm2, %v14432_v13, %v4337_v50  ;;  %v19771_v17 = vrot.slane %v19770_v15, 1  ;;  %v19774_v50 = vrot.slane %v14265_v61, 2  ;;  %v19775_v13 = vld [vmem:[#allocation100_spill] sm:$0xff] }
 0x2cc   : > { %9352 = vmatmul.msk.bf16.gmra.mxu3 %vm4345_vm3, %v4338_v30  ;;  %v3118_v63 = vsel %vm1130_vm0, %v19769_v18, %v3117_v1  ;;  %v19776_v31 = vrot.slane %v19775_v13, 2  ;;  %v14489_v41 = vmul.f32 %v14394_v20, %v19768_v21  ;;  %v19777_v18 = vrot.slane %v14375_v56, 1 }
 0x2cd   : > { %v14451_v55 = vpack.c.b16 %v18765_v34, %v4030_v57  ;;  %v4195_v34 = vshrl.u32 %v14240_v52, 16  ;;  %v3120_v38 = vsel %vm1130_vm0, %v3117_v1, %v19771_v17  ;;  %v3288_v33 = vadd.f32 %v3118_v63, %v19772_v62 }
 0x2ce   : > { %v3289_v14 = vadd.f32 %v3120_v38, %v19773_v46  ;;  %v3524_v30 = vsel %vm1537_vm1, %v19774_v50, %v3523_v19  ;;  %v3526_v2 = vsel %vm1537_vm1, %v3523_v19, %v19776_v31  ;;  %v19778_v1 = vrot.slane %v14240_v52, 1  ;;  %v14499_v46 = vpop.f32.mrf.mxu2  ;;  %v19784_v19 = vld [vmem:[#allocation93_spill] sm:$0xff] }
 0x2cf   : > { %19765 = vst [vmem:[#allocation39_spill] sm:$0xff] %v14451_v55  ;;  %v4197_v63 = vor.u32 %v4195_v34, %v14320_v23  ;;  %v19781_v38 = vunpack.c.l.b16 %v14103_v22  ;;  %v19782_v61 = vunpack.c.l.b16 %v14192_v26  ;;  %v14509_v21 = vmul.f32 %v19470_v53, %v19784_v19  ;;  %v19785_v26 = vld [vmem:[#allocation97_spill] sm:$0xff]  ;;  %v19788_v22 = vld [vmem:[#allocation104_spill] sm:$0xff] }
 0x2d0   : > { %v14496_v62 = vsel %vm1130_vm0, %v19778_v1, %v19777_v18  ;;  %19780 = vst [vmem:[#allocation35_spill] sm:$0xff] %v14499_v46  ;;  %v14513_v17 = vmul.f32 %v14394_v20, %v19784_v19  ;;  %v3694_v23 = vadd.f32 %v3524_v30, %v3288_v33  ;;  %v3695_v34 = vadd.f32 %v3526_v2, %v3289_v14  ;;  %v19787_v2 = vld [vmem:[#allocation112_spill] sm:$0xff]  ;;  %v19791_v46 = vld [vmem:[#allocation13_spill] sm:$0xff] }
 0x2d1   : > { %19779 = vst [vmem:[#allocation83_spill] sm:$0xff] %v14496_v62  ;;  %v14505_v31 = vpack.c.b16 %v19782_v61, %v19781_v38  ;;  %9405 = vmatmul.msk.bf16.gmra.mxu2 %vm4345_vm3, %v14496_v62  ;;  %v14521_v18 = vmul.f32 %v19470_v53, %v19785_v26  ;;  %v14525_v1 = vsel %vm4094_vm2, %v4197_v63, %v14471_v39  ;;  %v14552_v62 = vpop.f32.mrf.mxu0  ;;  %v19793_v43 = vunpack.c.l.b16 %v14330_v8 }
 0x2d2   : > { %19786 = vst [vmem:[#allocation21_spill] sm:$0xff] %v14525_v1  ;;  %v14530_v61 = vmul.f32 %v14394_v20, %v19785_v26  ;;  %9335 = vmatmul.msk.bf16.gmra.mxu0 %vm4345_vm3, %v14525_v1  ;;  %v3765_v33 = vadd.f32 %v14156_v54, %v3694_v23  ;;  %v3766_v14 = vadd.f32 %v14156_v54, %v3695_v34  ;;  %v19790_v1 = vld [vmem:[#allocation2_spill] sm:$0xff]  ;;  %v19795_v3 = vunpack.c.l.b16 %v14304_v48 }
 0x2d3   : > { %19783 = vst [vmem:[#allocation31_spill] sm:$0xff] %v14505_v31  ;;  %v14539_v19 = vmul.f32 %v19470_v53, %v19787_v2  ;;  %v14543_v63 = vmul.f32 %v14394_v20, %v19787_v2  ;;  %v14547_v26 = vmul.f32 %v19470_v53, %v19788_v22  ;;  %v2879_v31 = vadd.f32 %v19791_v46, %v19790_v1 }
 0x2d4   : > { %v3832_v38 = vmax.f32 %v3765_v33, 0.0  ;;  %v3833_v34 = vmax.f32 %v3766_v14, 0.0  ;;  %19789 = vst [vmem:[#allocation8_spill] sm:$0xff] %v14552_v62  ;;  %v14560_v52 = vpack.c.b16 %v19793_v43, %v19792_v10  ;;  %v14564_v50 = vpack.c.b16 %v4030_v57, %v19795_v3  ;;  %v19798_v43 = vld [vmem:[#allocation52_spill] sm:$0xff] }
 0x2d5   : > { %v14569_v14 = vmul.f32 %v14394_v20, %v19788_v22  ;;  %v14576_v8 = vmul.f32 %v19470_v53, %v19797_v35  ;;  %v14580_v10 = vmul.f32 %v14394_v20, %v19797_v35  ;;  %v4207_v3 = vshll.u32 %v14451_v55, 16 }
 0x2d6   : > { %19794 = vst [vmem:[#allocation85_spill] sm:$0xff] %v14560_v52  ;;  %v3899_v23 = vpack.c.bf16 %v3832_v38, %v3832_v38  ;;  %v14571_v30 = vpack.c.bf16 %v3833_v34, %v3833_v34  ;;  %v19799_v22 = vrot.slane %v14402_v27, 1  ;;  %v19800_v1 = vrot.slane %v19770_v15, 1  ;;  %v14596_v33 = vpop.f32.mrf.mxu2  ;;  %v19809_v27 = vld [vmem:[#allocation9_spill] sm:$0xff] }
 0x2d7   : > { %19796 = vst [vmem:[#allocation70_spill] sm:$0xff] %v14564_v50  ;;  %v19801_v34 = vrot.slane %v14388_v47, 1  ;;  %v19804_v50 = vld [vmem:[#allocation82_spill] sm:$0xff]  ;;  %v19806_v48 = vrot.slane %v19775_v13, 2  ;;  %v19807_v15 = vrot.slane %v14398_v36, 2  ;;  %v19810_v59 = vunpack.c.l.b16 %v19809_v27 }
 0x2d8   : > { %9360 = vmatmul.msk.bf16.gmra.mxu1 %vm4345_vm3, %v19798_v43  ;;  %v4032_v57 = vunpack.c.l.b16 %v3899_v23  ;;  %v3122_v38 = vsel %vm1130_vm0, %v19800_v1, %v19799_v22  ;;  %v19802_v46 = vmov %v19799_v22  ;;  %19803 = vst [vmem:[#allocation86_spill] sm:$0xff] %v14596_v33  ;;  %v19805_v23 = vrot.slane %v14408_v45, 2 }
 0x2d9   : > { %v3124_v35 = vsel %vm1130_vm0, %v19802_v46, %v19801_v34  ;;  %v3290_v62 = vadd.f32 %v3122_v38, %v2879_v31  ;;  %v19811_v46 = vld [vmem:[#allocation18_spill] sm:$0xff]  ;;  %v19814_v31 = vunpack.c.l.b16 %v14571_v30  ;;  %v19816_v38 = vld [vmem:[#allocation49_spill] sm:$0xff]  ;;  %v19819_v45 = vrot.slane %v19710_v9, 2 }
 0x2da   : > { %v3291_v43 = vadd.f32 %v3124_v35, %v19804_v50  ;;  %v3528_v52 = vsel %vm1537_vm1, %v19806_v48, %v19805_v23  ;;  %v19808_v22 = vmov %v19805_v23  ;;  %v19812_v34 = vunpack.c.l.b16 %v19811_v46  ;;  %v19821_v46 = vld [vmem:[#allocation78_spill] sm:$0xff] }
 0x2db   : > { %v3530_v1 = vsel %vm1537_vm1, %v19808_v22, %v19807_v15  ;;  %v14617_v50 = vpack.c.b16 %v19814_v31, %v4032_v57  ;;  %v19817_v13 = vrot.slane %v19816_v38, 1  ;;  %v19818_v48 = vrot.slane %v14388_v47, 1 }
 0x2dc   : > { %v14613_v33 = vpack.c.b16 %v19812_v34, %v19810_v59  ;;  %v19820_v23 = vmov %v19807_v15  ;;  %v18786_v22 = vrot.slane %v14451_v55, 1  ;;  %v3696_v59 = vadd.f32 %v3528_v52, %v3290_v62 }
 0x2dd   : > { %19815 = vst [vmem:[#allocation14_spill] sm:$0xff] %v14617_v50  ;;  %v3126_v35 = vsel %vm1130_vm0, %v19818_v48, %v19817_v13  ;;  %v3532_v15 = vsel %vm1537_vm1, %v19820_v23, %v19819_v45  ;;  %v3697_v27 = vadd.f32 %v3530_v1, %v3291_v43  ;;  %v4203_v47 = vshrl.u32 %v14375_v56, 16  ;;  %v19822_v48 = vld [vmem:[#allocation84_spill] sm:$0xff]  ;;  %v19824_v1 = vld [vmem:[#allocation43_spill] sm:$0xff] }
 0x2de   : > { %19813 = vst [vmem:[#allocation101_spill] sm:$0xff] %v14613_v33  ;;  %v3292_v34 = vadd.f32 %v3126_v35, %v19821_v46  ;;  %v4209_v44 = vrot.slane %v4207_v3, 1  ;;  %9429 = vmatmul.msk.bf16.vlgmr.msrb.gmra.mxu3 %vm4345_vm3, %v14613_v33  ;;  %v3767_v36 = vadd.f32 %v14156_v54, %v3696_v59  ;;  %v19823_v45 = vld [vmem:[#allocation36_spill] sm:$0xff]  ;;  %v14643_v35 = vmul.f32 %v19470_v53, %v19824_v1 }
 0x2df   : > { %v3768_v13 = vadd.f32 %v14156_v54, %v3697_v27  ;;  %v2882_v52 = vadd.f32 %v19823_v45, %v19822_v48  ;;  %v4205_v23 = vor.u32 %v4203_v47, %v14471_v39  ;;  %v19825_v3 = vunpack.c.l.b16 %v14426_v25 }
 0x2e0   : > { %v3698_v62 = vadd.f32 %v3532_v15, %v3292_v34  ;;  %v19827_v59 = vrot.slane %v14375_v56, 1  ;;  %v14657_v15 = vpop.f32.mrf.mxu0  ;;  %v3834_v34 = vmax.f32 %v3767_v36, 0.0  ;;  %v14662_v39 = vmul.f32 %v14394_v20, %v19824_v1 }
 0x2e1   : > { %v14648_v46 = vpack.c.b16 %v4032_v57, %v19825_v3  ;;  %19829 = vst [vmem:[#allocation23_spill] sm:$0xff] %v14657_v15  ;;  %v3835_v48 = vmax.f32 %v3768_v13, 0.0  ;;  %v19830_v25 = vrot.slane %v14465_v11, 1  ;;  %v19831_v57 = vrot.slane %v19816_v38, 1  ;;  %v19839_v11 = vld [vmem:[#allocation89_spill] sm:$0xff] }
 0x2e2   : > { %v14655_v27 = vsel %vm1130_vm0, %v19827_v59, %v18786_v22  ;;  %v3769_v45 = vadd.f32 %v14156_v54, %v3698_v62  ;;  %v19832_v3 = vrot.slane %v14489_v41, 2  ;;  %v19833_v36 = vrot.slane %v19710_v9, 2 }
 0x2e3   : > { %19826 = vst [vmem:[#allocation79_spill] sm:$0xff] %v14648_v46  ;;  %9406 = vmatmul.msk.bf16.gmra.mxu2 %vm4345_vm3, %v14655_v27  ;;  %v3128_v47 = vsel %vm1130_vm0, %v19831_v57, %v19830_v25  ;;  %v19834_v62 = vrot.slane %v14457_v58, 1  ;;  %v19835_v1 = vmov %v19830_v25  ;;  %v14682_v31 = vsel %vm4094_vm2, %v4205_v23, %v4209_v44  ;;  %v19907_v46 = vld [vmem:[#allocation110_spill] sm:$0xff] }
 0x2e4   : > { %19828 = vst [vmem:[#allocation108_spill] sm:$0xff] %v14655_v27  ;;  %v3534_v13 = vsel %vm1537_vm1, %v19833_v36, %v19832_v3  ;;  %v3901_v43 = vpack.c.bf16 %v3834_v34, %v3834_v34  ;;  %v14684_v7 = vpack.c.bf16 %v3835_v48, %v3835_v48  ;;  %v3293_v38 = vadd.f32 %v3128_v47, %v2882_v52  ;;  %v14699_v48 = vpop.f32.mrf.mxu2  ;;  %v19844_v27 = vld [vmem:[#allocation117_spill] sm:$0xff] }
 0x2e5   : > { %v3130_v59 = vsel %vm1130_vm0, %v19835_v1, %v19834_v62  ;;  %19836 = vst [vmem:[#allocation24_spill] sm:$0xff] %v14682_v31  ;;  %9336 = vmatmul.msk.bf16.gmra.mxu0 %vm4345_vm3, %v14682_v31  ;;  %v3836_v25 = vmax.f32 %v3769_v45, 0.0  ;;  %v19837_v9 = vrot.slane %v14253_v4, 1  ;;  %v19838_v57 = vmov %v19834_v62  ;;  %v19843_v1 = vld [vmem:[#allocation87_spill] sm:$0xff]  ;;  %v19857_v31 = vld [vmem:[#allocation72_spill] sm:$0xff] }
 0x2e6   : > { %v3294_v36 = vadd.f32 %v3130_v59, %v19839_v11  ;;  %v19840_v62 = vrot.slane %v14461_v51, 2  ;;  %v19841_v23 = vrot.slane %v14489_v41, 2  ;;  %19842 = vst [vmem:[#allocation88_spill] sm:$0xff] %v14699_v48  ;;  %v4034_v52 = vunpack.c.l.b16 %v3901_v43 }
 0x2e7   : > { %v3132_v3 = vsel %vm1130_vm0, %v19838_v57, %v19837_v9  ;;  %v4035_v47 = vunpack.c.l.b16 %v14684_v7  ;;  %v3699_v45 = vadd.f32 %v3534_v13, %v3293_v38  ;;  %v14705_v58 = vmul.f32 %v19470_v53, %v19844_v27  ;;  %v19848_v38 = vld [vmem:[#allocation90_spill] sm:$0xff] }
 0x2e8   : > { %v3536_v34 = vsel %vm1537_vm1, %v19841_v23, %v19840_v62  ;;  %v3295_v22 = vadd.f32 %v3132_v3, %v19843_v1  ;;  %v14709_v59 = vmul.f32 %v14394_v20, %v19844_v27  ;;  %v19845_v41 = vrot.slane %v14257_v37, 2  ;;  %v19852_v1 = vld [vmem:[#allocation19_spill] sm:$0xff]  ;;  %9361 = vmatmul.msk.bf16.gmra.mxu1 %vm4345_vm3, %v19857_v31 }
 0x2e9   : > { %v19846_v9 = vmov %v19840_v62  ;;  %v3700_v43 = vadd.f32 %v3536_v34, %v3294_v36  ;;  %v14716_v11 = vpack.c.b16 %v4035_v47, %v4034_v52  ;;  %v3770_v7 = vadd.f32 %v14156_v54, %v3699_v45  ;;  %v19849_v62 = vld [vmem:[#allocation140_spill] sm:$0xff] }
 0x2ea   : > { %v3538_v57 = vsel %vm1537_vm1, %v19846_v9, %v19845_v41  ;;  %v2885_v3 = vadd.f32 %v14340_v29, %v19848_v38  ;;  %v14723_v23 = vmul.f32 %v19470_v53, %v19849_v62  ;;  %v14727_v27 = vmul.f32 %v14394_v20, %v19849_v62 }
 0x2eb   : > { %19847 = vst [vmem:[#allocation75_spill] sm:$0xff] %v14716_v11  ;;  %v3701_v13 = vadd.f32 %v3538_v57, %v3295_v22  ;;  %v3771_v51 = vadd.f32 %v14156_v54, %v3700_v43  ;;  %v19850_v36 = vunpack.c.l.b16 %v14571_v30  ;;  %v19853_v45 = vunpack.c.l.b16 %v19852_v1  ;;  %v19854_v22 = vld [vmem:[#allocation12_spill] sm:$0xff] }
 0x2ec   : > { %v19855_v41 = vunpack.c.l.b16 %v19854_v22  ;;  %v4211_v29 = vshrl.u32 %v14451_v55, 16  ;;  %v3837_v57 = vmax.f32 %v3770_v7, 0.0  ;;  %v3903_v38 = vpack.c.bf16 %v3836_v25, %v3836_v25 }
 0x2ed   : > { %v14732_v34 = vpack.c.b16 %v4034_v52, %v19850_v36  ;;  %v3772_v48 = vadd.f32 %v14156_v54, %v3701_v13  ;;  %v3838_v43 = vmax.f32 %v3771_v51, 0.0  ;;  %v19858_v30 = vrot.slane %v14521_v18, 1 }
 0x2ee   : > { %v14738_v9 = vpack.c.b16 %v19855_v41, %v19853_v45  ;;  %v19859_v52 = vrot.slane %v14253_v4, 1  ;;  %v19860_v1 = vrot.slane %v14509_v21, 1  ;;  %v18791_v25 = vrot.slane %v14617_v50, 1  ;;  %v14755_v41 = vpop.f32.mrf.mxu0  ;;  %v19863_v4 = vld [vmem:[#allocation99_spill] sm:$0xff] }
 0x2ef   : > { %19851 = vst [vmem:[#allocation76_spill] sm:$0xff] %v14732_v34  ;;  %v19861_v45 = vmov %v19858_v30  ;;  %v4213_v7 = vor.u32 %v4211_v29, %v4209_v44  ;;  %v14757_v31 = vpack.c.bf16 %v3837_v57, %v3837_v57  ;;  %v3839_v51 = vmax.f32 %v3772_v48, 0.0 }
 0x2f0   : > { %19856 = vst [vmem:[#allocation47_spill] sm:$0xff] %v14738_v9  ;;  %v3134_v36 = vsel %vm1130_vm0, %v19859_v52, %v19858_v30  ;;  %v3136_v22 = vsel %vm1130_vm0, %v19861_v45, %v19860_v1  ;;  %v14759_v34 = vpack.c.bf16 %v3838_v43, %v3838_v43  ;;  %v19864_v30 = vrot.slane %v14530_v61, 2  ;;  %9430 = vmatmul.msk.bf16.gmra.mxu3 %vm4345_vm3, %v14738_v9 }
 0x2f1   : > { %19862 = vst [vmem:[#allocation100_spill] sm:$0xff] %v14755_v41  ;;  %v3296_v13 = vadd.f32 %v3134_v36, %v2885_v3  ;;  %v3297_v15 = vadd.f32 %v3136_v22, %v19863_v4  ;;  %v19865_v52 = vrot.slane %v14257_v37, 2  ;;  %v4215_v1 = vshll.u32 %v14617_v50, 16  ;;  %v14779_v37 = vpop.f32.mrf.mxu2  ;;  %v19870_v4 = vld [vmem:[#allocation102_spill] sm:$0xff] }
 0x2f2   : > { %v4036_v45 = vunpack.c.l.b16 %v3903_v38  ;;  %v18790_v44 = vunpack.c.l.b16 %v14757_v31  ;;  %v19866_v29 = vrot.slane %v14513_v17, 2  ;;  %v19867_v3 = vmov %v19864_v30  ;;  %19868 = vst [vmem:[#allocation93_spill] sm:$0xff] %v14779_v37 }
 0x2f3   : > { %v3540_v18 = vsel %vm1537_vm1, %v19865_v52, %v19864_v30  ;;  %v14774_v57 = vpack.c.bf16 %v3839_v51, %v3839_v51  ;;  %v2888_v61 = vadd.f32 %v14359_v28, %v19870_v4  ;;  %v19871_v30 = vrot.slane %v14261_v49, 1  ;;  %v19876_v4 = vld [vmem:[#allocation131_spill] sm:$0xff] }
 0x2f4   : > { %v3542_v48 = vsel %vm1537_vm1, %v19867_v3, %v19866_v29  ;;  %v3702_v36 = vadd.f32 %v3540_v18, %v3296_v13  ;;  %v14783_v38 = vpack.c.b16 %v18790_v44, %v4036_v45  ;;  %v19872_v51 = vrot.slane %v14509_v21, 1  ;;  %v19875_v44 = vld [vmem:[#allocation96_spill] sm:$0xff] }
 0x2f5   : > { %v3703_v22 = vadd.f32 %v3542_v48, %v3297_v15  ;;  %v19873_v15 = vrot.slane %v14279_v16, 2  ;;  %v19874_v13 = vmov %v19866_v29  ;;  %v18793_v29 = vunpack.c.l.b16 %v14774_v57 }
 0x2f6   : > { %19869 = vst [vmem:[#allocation97_spill] sm:$0xff] %v14783_v38  ;;  %v3138_v52 = vsel %vm1130_vm0, %v19872_v51, %v19871_v30  ;;  %v3773_v3 = vadd.f32 %v14156_v54, %v3702_v36  ;;  %v14803_v43 = vmul.f32 %v19470_v53, %v19876_v4  ;;  %v19877_v21 = vrot.slane %v14451_v55, 1 }
 0x2f7   : > { %v3544_v18 = vsel %vm1537_vm1, %v19874_v13, %v19873_v15  ;;  %v3774_v48 = vadd.f32 %v14156_v54, %v3703_v22  ;;  %v3298_v28 = vadd.f32 %v3138_v52, %v19875_v44  ;;  %v4217_v30 = vrot.slane %v4215_v1, 1 }
 0x2f8   : > { %v14810_v17 = vsel %vm1130_vm0, %v19877_v21, %v18791_v25  ;;  %v14812_v51 = vpack.c.b16 %v4036_v45, %v4035_v47  ;;  %v19880_v36 = vunpack.c.l.b16 %v14759_v34  ;;  %v3840_v22 = vmax.f32 %v3773_v3, 0.0 }
 0x2f9   : > { %19878 = vst [vmem:[#allocation112_spill] sm:$0xff] %v14810_v17  ;;  %9407 = vmatmul.msk.bf16.gmra.mxu2 %vm4345_vm3, %v14810_v17  ;;  %v3841_v52 = vmax.f32 %v3774_v48, 0.0  ;;  %v19882_v15 = vrot.slane %v14576_v8, 1  ;;  %v19883_v13 = vrot.slane %v14261_v49, 1  ;;  %v14829_v1 = vsel %vm4094_vm2, %v4213_v7, %v4217_v30 }
 0x2fa   : > { %19879 = vst [vmem:[#allocation104_spill] sm:$0xff] %v14812_v51  ;;  %v14820_v44 = vpack.c.b16 %v18793_v29, %v19880_v36  ;;  %v19885_v25 = vrot.slane %v14580_v10, 2  ;;  %v19886_v17 = vrot.slane %v14279_v16, 2  ;;  %v14839_v48 = vmul.f32 %v14394_v20, %v19876_v4  ;;  %9337 = vmatmul.msk.bf16.gmra.mxu0 %vm4345_vm3, %v14829_v1 }
 0x2fb   : > { %v3140_v21 = vsel %vm1130_vm0, %v19883_v13, %v19882_v15  ;;  %19884 = vst [vmem:[#allocation13_spill] sm:$0xff] %v14829_v1  ;;  %v14843_v49 = vpack.c.bf16 %v3840_v22, %v3840_v22  ;;  %v14845_v7 = vpack.c.bf16 %v3841_v52, %v3841_v52  ;;  %v3551_v15 = vrot.slane %v14709_v59, 2  ;;  %v19898_v13 = vld [vmem:[#allocation57_spill] sm:$0xff] }
 0x2fc   : > { %19881 = vst [vmem:[#allocation2_spill] sm:$0xff] %v14820_v44  ;;  %v3299_v45 = vadd.f32 %v3140_v21, %v2888_v61  ;;  %v3546_v36 = vsel %vm1537_vm1, %v19886_v17, %v19885_v25  ;;  %v3145_v61 = vrot.slane %v14705_v58, 1  ;;  %v14850_v25 = vpop.f32.mrf.mxu0  ;;  %v3704_v17 = vadd.f32 %v3544_v18, %v3298_v28 }
 0x2fd   : > { %19887 = vst [vmem:[#allocation107_spill] sm:$0xff] %v14850_v25  ;;  %v3153_v21 = vrot.slane %v14803_v43, 1  ;;  %v18797_v29 = vunpack.c.l.b16 %v14843_v49  ;;  %v18796_v22 = vunpack.c.l.b16 %v14845_v7  ;;  %v19888_v58 = vrot.slane %v14547_v26, 1  ;;  %v19895_v26 = vld [vmem:[#allocation106_spill] sm:$0xff]  ;;  %v19904_v25 = vld [vmem:[#allocation69_spill] sm:$0xff] }
 0x2fe   : > { %v3705_v3 = vadd.f32 %v3546_v36, %v3299_v45  ;;  %v3775_v52 = vadd.f32 %v14156_v54, %v3704_v17  ;;  %v19889_v59 = vrot.slane %v14576_v8, 1  ;;  %v19890_v47 = vrot.slane %v14380_v12, 1  ;;  %v19893_v36 = vld [vmem:[#allocation109_spill] sm:$0xff]  ;;  %v14876_v17 = vpop.f32.mrf.mxu2 }
 0x2ff   : > { %v19891_v18 = vmov %v19888_v58  ;;  %v3559_v43 = vrot.slane %v14839_v48, 2  ;;  %v14873_v45 = vpack.c.b16 %v18796_v22, %v18797_v29  ;;  %19894 = vst [vmem:[#allocation9_spill] sm:$0xff] %v14876_v17  ;;  %v19897_v48 = vrot.slane %v14580_v10, 2  ;;  %v19899_v22 = vld [vmem:[#allocation80_spill] sm:$0xff]  ;;  %v19902_v29 = vld [vmem:[#allocation34_spill] sm:$0xff] }
 0x300   : > { %v3142_v16 = vsel %vm1130_vm0, %v19889_v59, %v19888_v58  ;;  %v3144_v28 = vsel %vm1130_vm0, %v19891_v18, %v19890_v47  ;;  %v3776_v58 = vadd.f32 %v14156_v54, %v3705_v3  ;;  %v3842_v59 = vmax.f32 %v3775_v52, 0.0  ;;  %9362 = vmatmul.msk.bf16.gmra.mxu1 %vm4345_vm3, %v19899_v22 }
 0x301   : > { %19892 = vst [vmem:[#allocation82_spill] sm:$0xff] %v14873_v45  ;;  %v3300_v8 = vadd.f32 %v3142_v16, %v19893_v36  ;;  %v3301_v1 = vadd.f32 %v3144_v28, %v19895_v26  ;;  %v19896_v47 = vrot.slane %v14569_v14, 2  ;;  %v14887_v51 = vmul.f32 %v19470_v53, %v19898_v13 }
 0x302   : > { %v4219_v16 = vshrl.u32 %v14617_v50, 16  ;;  %v4223_v3 = vshll.u32 %v14716_v11, 16  ;;  %v19900_v52 = vrot.slane %v14384_v60, 2  ;;  %v3843_v10 = vmax.f32 %v3776_v58, 0.0 }
 0x303   : > { %v3548_v18 = vsel %vm1537_vm1, %v19897_v48, %v19896_v47  ;;  %v19901_v28 = vmov %v19896_v47  ;;  %v14898_v26 = vpack.c.bf16 %v3842_v59, %v3842_v59  ;;  %v19903_v17 = vunpack.c.l.b16 %v19902_v29 }
 0x304   : > { %v3550_v36 = vsel %vm1537_vm1, %v19901_v28, %v19900_v52  ;;  %v3706_v47 = vadd.f32 %v3548_v18, %v3300_v8  ;;  %v19905_v37 = vunpack.c.l.b16 %v19904_v25  ;;  %v4221_v41 = vor.u32 %v4219_v16, %v4217_v30  ;;  %v14930_v8 = vpop.f32.mrf.mxu0  ;;  %v19913_v52 = vld [vmem:[#allocation120_spill] sm:$0xff] }
 0x305   : > { %v3707_v48 = vadd.f32 %v3550_v36, %v3301_v1  ;;  %v2891_v9 = vadd.f32 %v14416_v6, %v19907_v46  ;;  %v19908_v33 = vrot.slane %v14380_v12, 1  ;;  %v19909_v58 = vrot.slane %v14716_v11, 1 }
 0x306   : > { %v14904_v22 = vpack.c.b16 %v19905_v37, %v19903_v17  ;;  %v19910_v59 = vrot.slane %v14617_v50, 1  ;;  %v14918_v29 = vpack.c.bf16 %v3843_v10, %v3843_v10  ;;  %v3777_v37 = vadd.f32 %v14156_v54, %v3706_v47 }
 0x307   : > { %v3146_v14 = vsel %vm1130_vm0, %v19908_v33, %v3145_v61  ;;  %v3778_v30 = vadd.f32 %v14156_v54, %v3707_v48  ;;  %v14922_v25 = vrot.slane %v4223_v3, 1  ;;  %v18807_v6 = vunpack.c.l.b16 %v14898_v26 }
 0x308   : > { %19906 = vst [vmem:[#allocation18_spill] sm:$0xff] %v14904_v22  ;;  %v14916_v1 = vsel %vm1130_vm0, %v19910_v59, %v19909_v58  ;;  %v19912_v12 = vrot.slane %v14643_v35, 1  ;;  %v3302_v46 = vadd.f32 %v3146_v14, %v2891_v9  ;;  %9431 = vmatmul.msk.bf16.gmra.mxu3 %vm4345_vm3, %v14904_v22  ;;  %v18805_v17 = vunpack.c.l.b16 %v14918_v29  ;;  %v19916_v9 = vld [vmem:[#allocation125_spill] sm:$0xff] }
 0x309   : > { %19911 = vst [vmem:[#allocation49_spill] sm:$0xff] %v14916_v1  ;;  %v3844_v18 = vmax.f32 %v3777_v37, 0.0  ;;  %v3845_v16 = vmax.f32 %v3778_v30, 0.0  ;;  %v19914_v3 = vrot.slane %v14384_v60, 2  ;;  %v19915_v10 = vrot.slane %v14662_v39, 2  ;;  %9408 = vmatmul.msk.bf16.gmra.mxu2 %vm4345_vm3, %v14916_v1 }
 0x30a   : > { %v3148_v33 = vsel %vm1130_vm0, %v3145_v61, %v19912_v12  ;;  %v2895_v47 = vadd.f32 %v14444_v40, %v19916_v9  ;;  %v19917_v48 = vunpack.c.l.b16 %v14757_v31  ;;  %v19918_v14 = vunpack.c.l.b16 %v14759_v34 }
 0x30b   : > { %v3303_v28 = vadd.f32 %v3148_v33, %v19913_v52  ;;  %v3552_v36 = vsel %vm1537_vm1, %v19914_v3, %v3551_v15  ;;  %v3554_v61 = vsel %vm1537_vm1, %v3551_v15, %v19915_v10  ;;  %v14952_v60 = vpack.c.b16 %v18805_v17, %v18807_v6  ;;  %v14974_v52 = vpop.f32.mrf.mxu2 }
 0x30c   : > { %v14946_v58 = vpack.c.b16 %v19918_v14, %v19917_v48  ;;  %v14954_v59 = vpack.c.bf16 %v3844_v18, %v3844_v18  ;;  %v14956_v37 = vpack.c.bf16 %v3845_v16, %v3845_v16  ;;  %v3708_v15 = vadd.f32 %v3552_v36, %v3302_v46 }
 0x30d   : > { %19919 = vst [vmem:[#allocation78_spill] sm:$0xff] %v14952_v60  ;;  %v3709_v40 = vadd.f32 %v3554_v61, %v3303_v28  ;;  %v19920_v31 = vrot.slane %v14420_v5, 1  ;;  %v19921_v30 = vrot.slane %v14723_v23, 1  ;;  %v19922_v33 = vrot.slane %v14424_v32, 2 }
 0x30e   : > { %v3157_v16 = vrot.slane %v14539_v19, 1  ;;  %v14972_v46 = vsel %vm4094_vm2, %v4221_v41, %v14922_v25  ;;  %v18804_v28 = vunpack.c.l.b16 %v14954_v59  ;;  %v18803_v3 = vunpack.c.l.b16 %v14956_v37 }
 0x30f   : > { %v3154_v34 = vsel %vm1130_vm0, %v19920_v31, %v3153_v21  ;;  %v3156_v12 = vsel %vm1130_vm0, %v3153_v21, %v19921_v30  ;;  %v3560_v18 = vsel %vm1537_vm1, %v19922_v33, %v3559_v43  ;;  %19923 = vst [vmem:[#allocation84_spill] sm:$0xff] %v14972_v46  ;;  %v3373_v36 = vmul.f32 %v14394_v20, %v19898_v13  ;;  %v15002_v33 = vpop.f32.mrf.mxu0 }
 0x310   : > { %9338 = vmatmul.msk.bf16.gmra.mxu0 %vm4345_vm3, %v14972_v46  ;;  %v3779_v21 = vadd.f32 %v14156_v54, %v3708_v15  ;;  %v3780_v19 = vadd.f32 %v14156_v54, %v3709_v40  ;;  %v3306_v10 = vadd.f32 %v3154_v34, %v2895_v47  ;;  %v3149_v41 = vrot.slane %v14887_v51, 1 }
 0x311   : > { %v14989_v61 = vpack.c.b16 %v18803_v3, %v18804_v28  ;;  %v19925_v9 = vrot.slane %v14727_v27, 2  ;;  %v19926_v15 = vmov %v19921_v30  ;;  %v2831_v51 = vmul.f32 %v19090_v42, %v19787_v2  ;;  %v19939_v28 = vld [vmem:[#allocation26_spill] sm:$0xff] }
 0x312   : > { %v3846_v13 = vmax.f32 %v3779_v21, 0.0  ;;  %v3847_v48 = vmax.f32 %v3780_v19, 0.0  ;;  %v3712_v14 = vadd.f32 %v3560_v18, %v3306_v10  ;;  %v3158_v40 = vsel %vm1130_vm0, %v19926_v15, %v3157_v16  ;;  %v19927_v21 = vld [vmem:[#allocation37_spill] sm:$0xff]  ;;  %v19929_v10 = vld [vmem:[#allocation95_spill] sm:$0xff] }
 0x313   : > { %19924 = vst [vmem:[#allocation36_spill] sm:$0xff] %v14989_v61  ;;  %v3562_v20 = vsel %vm1537_vm1, %v3559_v43, %v19925_v9  ;;  %v3563_v47 = vrot.slane %v14543_v63, 2  ;;  %v3555_v31 = vrot.slane %v3373_v36, 2  ;;  %v4231_v43 = vshll.u32 %v14783_v38, 16  ;;  %9363 = vmatmul.msk.bf16.gmra.mxu1 %vm4345_vm3, %v19929_v10 }
 0x314   : > { %v3913_v34 = vpack.c.bf16 %v3846_v13, %v3846_v13  ;;  %v15000_v30 = vpack.c.bf16 %v3847_v48, %v3847_v48  ;;  %v2898_v19 = vadd.f32 %v2831_v51, %v19927_v21  ;;  %v19928_v18 = vmov %v19925_v9  ;;  %v19932_v51 = vld [vmem:[#allocation118_spill] sm:$0xff] }
 0x315   : > { %v3564_v23 = vsel %vm1537_vm1, %v19928_v18, %v3563_v47  ;;  %v19930_v36 = vrot.slane %v14643_v35, 1  ;;  %v19931_v13 = vrot.slane %v14420_v5, 1  ;;  %v2830_v15 = vmul.f32 %v19090_v42, %v19849_v62  ;;  %v19933_v18 = vld [vmem:[#allocation152_spill] sm:$0xff] }
 0x316   : > { %v4046_v2 = vunpack.c.l.b16 %v3913_v34  ;;  %v18806_v63 = vunpack.c.l.b16 %v15000_v30  ;;  %v2829_v27 = vmul.f32 %v19090_v42, %v19876_v4  ;;  %v4857_v3 = vrot.slane %v14783_v38, 1 }
 0x317   : > { %v3150_v9 = vsel %vm1130_vm0, %v19930_v36, %v3149_v41  ;;  %v3152_v48 = vsel %vm1130_vm0, %v3149_v41, %v19931_v13  ;;  %v19935_v5 = vrot.slane %v14662_v39, 2  ;;  %v19936_v36 = vrot.slane %v14424_v32, 2  ;;  %v19937_v13 = vld [vmem:[#allocation68_spill] sm:$0xff] }
 0x318   : > { %v3304_v21 = vadd.f32 %v3150_v9, %v19932_v51  ;;  %v3305_v34 = vadd.f32 %v3152_v48, %v19933_v18  ;;  %v15027_v35 = vpack.c.b16 %v18806_v63, %v4046_v2  ;;  %v19938_v4 = vunpack.c.l.b16 %v19937_v13  ;;  %v15041_v48 = vpop.f32.mrf.mxu2 }
 0x319   : > { %v3556_v41 = vsel %vm1537_vm1, %v19935_v5, %v3555_v31  ;;  %v3558_v62 = vsel %vm1537_vm1, %v3555_v31, %v19936_v36  ;;  %v19940_v9 = vunpack.c.l.b16 %v19939_v28  ;;  %v19942_v63 = vrot.slane %v13357_v24, 1  ;;  %v19943_v36 = vld [vmem:[#allocation150_spill] sm:$0xff] }
 0x31a   : > { %19934 = vst [vmem:[#allocation43_spill] sm:$0xff] %v15027_v35  ;;  %v3710_v18 = vadd.f32 %v3556_v41, %v3304_v21  ;;  %v3711_v17 = vadd.f32 %v3558_v62, %v3305_v34  ;;  %v4227_v5 = vshrl.u32 %v14716_v11, 16  ;;  %v4233_v6 = vrot.slane %v4231_v43, 1  ;;  %v19944_v21 = vld [vmem:[#allocation151_spill] sm:$0xff] }
 0x31b   : > { %v15039_v51 = vpack.c.b16 %v19940_v9, %v19938_v4  ;;  %v3160_v39 = vsel %vm1130_vm0, %v3157_v16, %v19942_v63  ;;  %v3783_v32 = vadd.f32 %v14156_v54, %v3712_v14  ;;  %v2896_v13 = vadd.f32 %v2829_v27, %v19943_v36 }
 0x31c   : > { %v3781_v28 = vadd.f32 %v14156_v54, %v3710_v18  ;;  %v3782_v31 = vadd.f32 %v14156_v54, %v3711_v17  ;;  %v2897_v34 = vadd.f32 %v2830_v15, %v19944_v21  ;;  %v19945_v24 = vrot.slane %v14716_v11, 1 }
 0x31d   : > { %19941 = vst [vmem:[#allocation89_spill] sm:$0xff] %v15039_v51  ;;  %9432 = vmatmul.msk.bf16.gmra.mxu3 %vm4345_vm3, %v15039_v51  ;;  %v4229_v14 = vor.u32 %v4227_v5, %v14922_v25  ;;  %v3309_v43 = vadd.f32 %v3160_v39, %v2898_v19  ;;  %v19947_v63 = vrot.slane %v13371_v0, 2  ;;  %v3307_v4 = vadd.f32 %v3156_v12, %v2896_v13  ;;  %v15076_v0 = vpop.f32.mrf.mxu0 }
 0x31e   : > { %v15059_v16 = vsel %vm1130_vm0, %v19945_v24, %v4857_v3  ;;  %v3848_v62 = vmax.f32 %v3781_v28, 0.0  ;;  %v3849_v17 = vmax.f32 %v3782_v31, 0.0  ;;  %v3308_v27 = vadd.f32 %v3158_v40, %v2897_v34 }
 0x31f   : > { %19946 = vst [vmem:[#allocation87_spill] sm:$0xff] %v15059_v16  ;;  %v3566_v41 = vsel %vm1537_vm1, %v3563_v47, %v19947_v63  ;;  %9409 = vmatmul.msk.bf16.gmra.mxu2 %vm4345_vm3, %v15059_v16  ;;  %v15068_v15 = vsel %vm4094_vm2, %v4229_v14, %v4233_v6  ;;  %v3850_v9 = vmax.f32 %v3783_v32, 0.0  ;;  %v19949_v36 = vunpack.c.l.b16 %v14774_v57 }
 0x320   : > { %19948 = vst [vmem:[#allocation117_spill] sm:$0xff] %v15068_v15  ;;  %v3715_v18 = vadd.f32 %v3566_v41, %v3309_v43  ;;  %v19950_v25 = vunpack.c.l.b16 %v14843_v49  ;;  %v3915_v47 = vpack.c.bf16 %v3848_v62, %v3848_v62  ;;  %v3916_v39 = vpack.c.bf16 %v3849_v17, %v3849_v17  ;;  %9339 = vmatmul.msk.bf16.gmra.mxu0 %vm4345_vm3, %v15068_v15  ;;  %v15101_v43 = vpop.f32.mrf.mxu1 }
 0x321   : > { %v3713_v12 = vadd.f32 %v3562_v20, %v3307_v4  ;;  %v3714_v40 = vadd.f32 %v3564_v23, %v3308_v27  ;;  %v19952_v32 = vunpack.c.l.b16 %v14845_v7  ;;  %v19953_v28 = vunpack.c.l.b16 %v14898_v26  ;;  %v15099_v26 = vpop.f32.mrf.mxu2  ;;  %19960 = vst [vmem:[#allocation99_spill] sm:$0xff] %v15101_v43 }
 0x322   : > { %v15074_v19 = vpack.c.b16 %v19950_v25, %v19949_v36  ;;  %v3786_v5 = vadd.f32 %v14156_v54, %v3715_v18  ;;  %v19955_v49 = vunpack.c.l.b16 %v14918_v29  ;;  %v19956_v31 = vunpack.c.l.b16 %v14954_v59  ;;  %v19966_v36 = vld [vmem:[#allocation45_spill] sm:$0xff] }
 0x323   : > { %v15085_v57 = vpack.c.b16 %v19953_v28, %v19952_v32  ;;  %v19958_v20 = vunpack.c.l.b16 %v14956_v37  ;;  %v4048_v21 = vunpack.c.l.b16 %v3915_v47  ;;  %v4049_v34 = vunpack.c.l.b16 %v3916_v39 }
 0x324   : > { %19951 = vst [vmem:[#allocation90_spill] sm:$0xff] %v15074_v19  ;;  %v15091_v13 = vpack.c.b16 %v19956_v31, %v19955_v49  ;;  %v3784_v24 = vadd.f32 %v14156_v54, %v3713_v12  ;;  %v3785_v7 = vadd.f32 %v14156_v54, %v3714_v40  ;;  %v3853_v14 = vmax.f32 %v3786_v5, 0.0  ;;  %v19964_v54 = vld [vmem:[#allocation77_spill] sm:$0xff] }
 0x325   : > { %19954 = vst [vmem:[#allocation140_spill] sm:$0xff] %v15085_v57  ;;  %v15095_v23 = vpack.c.b16 %v4046_v2, %v19958_v20  ;;  %v15103_v29 = vpack.c.b16 %v4049_v34, %v4048_v21  ;;  %v3917_v63 = vpack.c.bf16 %v3850_v9, %v3850_v9  ;;  %v19963_v2 = vld [vmem:[#allocation119_spill] sm:$0xff]  ;;  %v19965_v18 = vunpack.c.l.b16 %v19964_v54  ;;  %v15117_v40 = vpop.f32.mrf.mxu0 }
 0x326   : > { %19957 = vst [vmem:[#allocation19_spill] sm:$0xff] %v15091_v13  ;;  %v3851_v59 = vmax.f32 %v3784_v24, 0.0  ;;  %v3852_v41 = vmax.f32 %v3785_v7, 0.0  ;;  %v15105_v62 = vpack.c.bf16 %v3853_v14, %v3853_v14  ;;  %9364 = vmatmul.msk.bf16.gmra.mxu1 %vm4345_vm3, %v19963_v2  ;;  %v19967_v25 = vunpack.c.l.b16 %v19966_v36  ;;  %v20060_v13 = vld [vmem:[#allocation10_spill] sm:$0xff] }
 0x327   : > { %19959 = vst [vmem:[#allocation12_spill] sm:$0xff] %v15095_v23  ;;  %v4050_v4 = vunpack.c.l.b16 %v3917_v63  ;;  %v4859_v9 = vrot.slane %v14820_v44, 1  ;;  %v4235_v5 = vshrl.u32 %v14783_v38, 16  ;;  %v4239_v32 = vshll.u32 %v14820_v44, 16 }
 0x328   : > { %19961 = vst [vmem:[#allocation102_spill] sm:$0xff] %v15103_v29  ;;  %v3918_v37 = vpack.c.bf16 %v3851_v59, %v3851_v59  ;;  %v3919_v17 = vpack.c.bf16 %v3852_v41, %v3852_v41  ;;  %v15113_v47 = vpack.c.b16 %v19967_v25, %v19965_v18  ;;  %v18808_v12 = vunpack.c.l.b16 %v15105_v62  ;;  %v15135_v14 = vpop.f32.mrf.mxu1  ;;  %v19982_v18 = vld [vmem:[#allocation116_spill] sm:$0xff] }
 0x329   : > { %19962 = vst [vmem:[#allocation96_spill] sm:$0xff] %v15105_v62  ;;  %v19971_v31 = vunpack.c.l.b16 %v15000_v30  ;;  %v15131_v24 = vpack.c.b16 %v4050_v4, %v4049_v34  ;;  %v4237_v7 = vor.u32 %v4235_v5, %v4233_v6  ;;  %v15140_v59 = vsel %vm1130_vm0, %v4857_v3, %v4859_v9  ;;  %v15142_v63 = vpop.f32.mrf.mxu2  ;;  %v19979_v3 = vld [vmem:[#allocation149_spill] sm:$0xff] }
 0x32a   : > { %v4051_v27 = vunpack.c.l.b16 %v3918_v37  ;;  %19968 = vst [vmem:[#allocation131_spill] sm:$0xff] %v15113_v47  ;;  %v4052_v39 = vunpack.c.l.b16 %v3919_v17  ;;  %v4241_v41 = vrot.slane %v4239_v32, 1  ;;  %v4247_v17 = vshll.u32 %v14873_v45, 16 }
 0x32b   : > { %v15129_v20 = vpack.c.b16 %v4048_v21, %v19971_v31  ;;  %19973 = vst [vmem:[#allocation34_spill] sm:$0xff] %v15131_v24  ;;  %v19983_v36 = vunpack.c.l.b16 %v19982_v18  ;;  %v4251_v15 = vshrl.u32 %v14873_v45, 16  ;;  %v4259_v62 = vshrl.u32 %v14952_v60, 16 }
 0x32c   : > { %v15121_v28 = vpack.c.b16 %v4051_v27, %v4050_v4  ;;  %v15125_v49 = vpack.c.b16 %v18808_v12, %v4052_v39  ;;  %19974 = vst [vmem:[#allocation69_spill] sm:$0xff] %v15135_v14  ;;  %v15147_v30 = vsel %vm4094_vm2, %v4237_v7, %v4241_v41  ;;  %v15151_v6 = vpack.c.b16 %v4052_v39, %v4051_v27  ;;  %v19980_v4 = vld [vmem:[#allocation94_spill] sm:$0xff]  ;;  %v15179_v12 = vpop.f32.mrf.mxu3 }
 0x32d   : > { %19972 = vst [vmem:[#allocation57_spill] sm:$0xff] %v15129_v20  ;;  %9433 = vmatmul.msk.bf16.gmra.mxu3 %vm4345_vm3, %v15113_v47  ;;  %v15153_v21 = vpop.f32.mrf.mxu0  ;;  %v19981_v54 = vunpack.c.l.b16 %v19980_v4  ;;  %v4861_v27 = vrot.slane %v14873_v45, 1  ;;  %v4243_v39 = vshrl.u32 %v14820_v44, 16  ;;  %v4249_v5 = vrot.slane %v4247_v17, 1 }
 0x32e   : > { %19969 = vst [vmem:[#allocation109_spill] sm:$0xff] %v15121_v28  ;;  %v4867_v10 = vrot.slane %v15027_v35, 1 }
 0x32f   : > { %19970 = vst [vmem:[#allocation106_spill] sm:$0xff] %v15125_v49  ;;  %9410 = vmatmul.msk.bf16.gmra.mxu2 %vm4345_vm3, %v15140_v59  ;;  %v15166_v25 = vpack.c.b16 %v19983_v36, %v19981_v54  ;;  %v15175_v31 = vsel %vm1130_vm0, %v4859_v9, %v4861_v27  ;;  %v4245_v4 = vor.u32 %v4243_v39, %v4241_v41  ;;  %v19992_v41 = vld [vmem:[#allocation92_spill] sm:$0xff]  ;;  %v4255_v39 = vshll.u32 %v14952_v60, 16 }
 0x330   : > { %19975 = vst [vmem:[#allocation110_spill] sm:$0xff] %v15140_v59  ;;  %9340 = vmatmul.msk.bf16.gmra.mxu0 %vm4345_vm3, %v15147_v30  ;;  %v15155_v34 = vpop.f32.mrf.mxu1 }
 0x331   : > { %19976 = vst [vmem:[#allocation120_spill] sm:$0xff] %v15147_v30  ;;  %v15159_v37 = vpop.f32.mrf.mxu2  ;;  %v15184_v54 = vsel %vm4094_vm2, %v4245_v4, %v4249_v5  ;;  %v19995_v4 = vld [vmem:[#allocation58_spill] sm:$0xff]  ;;  %v4863_v30 = vrot.slane %v14952_v60, 1  ;;  %v4257_v46 = vrot.slane %v4255_v39, 1 }
 0x332   : > { %19977 = vst [vmem:[#allocation125_spill] sm:$0xff] %v15151_v6  ;;  %v19996_v16 = vunpack.c.l.b16 %v19995_v4  ;;  %v4253_v4 = vor.u32 %v4251_v15, %v4249_v5  ;;  %v20006_v15 = vld [vmem:[#allocation162_spill] sm:$0xff]  ;;  %v20007_v5 = vld [vmem:[#allocation148_spill] sm:$0xff] }
 0x333   : > { %19978 = vst [vmem:[#allocation37_spill] sm:$0xff] %v15155_v34 }
 0x334   : > { %19984 = vst [vmem:[#allocation118_spill] sm:$0xff] %v15166_v25  ;;  %v15194_v36 = vpop.f32.mrf.mxu3 }
 0x335   : > { %19986 = vst [vmem:[#allocation68_spill] sm:$0xff] %v15175_v31  ;;  %v15177_v7 = vpop.f32.mrf.mxu0 }
 0x336   : > { %9365 = vmatmul.msk.bf16.gmra.mxu1 %vm4345_vm3, %v19979_v3  ;;  %19987 = vst [vmem:[#allocation26_spill] sm:$0xff] %v15179_v12 }
 0x337   : > { %19988 = vst [vmem:[#allocation150_spill] sm:$0xff] %v15184_v54 }
 0x338   : > { %v15172_v32 = vpop.f32.mrf.mxu1  ;;  %19991 = vst [vmem:[#allocation45_spill] sm:$0xff] %v15194_v36 }
 0x339   : > { %19985 = vst [vmem:[#allocation152_spill] sm:$0xff] %v15172_v32  ;;  %v15188_v17 = vpop.f32.mrf.mxu2  ;;  %v15214_v32 = vsel %vm1130_vm0, %v4861_v27, %v4863_v30 }
 0x33a   : > { %19989 = vst [vmem:[#allocation151_spill] sm:$0xff] %v15188_v17 }
 0x33d   : > { %9434 = vmatmul.msk.bf16.gmra.mxu3 %vm4345_vm3, %v15166_v25  ;;  %v15192_v9 = vpop.f32.mrf.mxu0 }
 0x33e   : > { %19990 = vst [vmem:[#allocation77_spill] sm:$0xff] %v15192_v9 }
 0x33f   : > { %9411 = vmatmul.msk.bf16.gmra.mxu2 %vm4345_vm3, %v15175_v31  ;;  %v19993_v31 = vld [vmem:[#allocation114_spill] sm:$0xff] }
 0x340   : > { %9341 = vmatmul.msk.bf16.gmra.mxu0 %vm4345_vm3, %v15184_v54  ;;  %v15190_v18 = vpop.f32.mrf.mxu1  ;;  %v19994_v59 = vunpack.c.l.b16 %v19993_v31  ;;  %19999 = vst [vmem:[#allocation114_spill] sm:$0xff] %v15214_v32 }
 0x341   : > { %v15205_v54 = vpop.f32.mrf.mxu2 }
 0x342   : > { %v15203_v1 = vpack.c.b16 %v19996_v16, %v19994_v59  ;;  %19998 = vst [vmem:[#allocation116_spill] sm:$0xff] %v15205_v54  ;;  %v15218_v16 = vpop.f32.mrf.mxu3  ;;  %v15223_v59 = vsel %vm4094_vm2, %v4253_v4, %v4257_v46 }
 0x343   : > { %20001 = vst [vmem:[#allocation176_spill] sm:$0xff] %v15218_v16  ;;  %v20008_v16 = vunpack.c.l.b16 %v20007_v5 }
 0x344   : > { %19997 = vst [vmem:[#allocation94_spill] sm:$0xff] %v15203_v1 }
 0x345   : > { %v15216_v31 = vpop.f32.mrf.mxu0  ;;  %20002 = vst [vmem:[#allocation177_spill] sm:$0xff] %v15223_v59 }
 0x346   : > { %9366 = vmatmul.msk.bf16.gmra.mxu1 %vm4345_vm3, %v19992_v41  ;;  %20000 = vst [vmem:[#allocation58_spill] sm:$0xff] %v15216_v31  ;;  %v4263_v41 = vshll.u32 %v14989_v61, 16 }
 0x348   : > { %v15211_v36 = vpop.f32.mrf.mxu1 }
 0x349   : > { %v15227_v39 = vpop.f32.mrf.mxu2 }
 0x34a   : > { %20003 = vst [vmem:[#allocation178_spill] sm:$0xff] %v15227_v39  ;;  %v15233_v34 = vpop.f32.mrf.mxu3 }
 0x34b   : > { %20005 = vst [vmem:[#allocation180_spill] sm:$0xff] %v15233_v34  ;;  %v4261_v34 = vor.u32 %v4259_v62, %v4257_v46 }
 0x34d   : > { %9435 = vmatmul.msk.bf16.gmra.mxu3 %vm4345_vm3, %v15203_v1  ;;  %v15231_v27 = vpop.f32.mrf.mxu0  ;;  %v20104_v1 = vld [vmem:[#allocation67_spill] sm:$0xff] }
 0x34e   : > { %20004 = vst [vmem:[#allocation179_spill] sm:$0xff] %v15231_v27  ;;  %v20042_v27 = vld [vmem:[#allocation134_spill] sm:$0xff] }
 0x34f   : > { %9412 = vmatmul.msk.bf16.gmra.mxu2 %vm4345_vm3, %v15214_v32  ;;  %v20009_v32 = vld [vmem:[#allocation128_spill] sm:$0xff] }
 0x350   : > { %9342 = vmatmul.msk.bf16.gmra.mxu0 %vm4345_vm3, %v15223_v59  ;;  %v15229_v12 = vpop.f32.mrf.mxu1  ;;  %v20010_v14 = vunpack.c.l.b16 %v20009_v32  ;;  %v4865_v59 = vrot.slane %v14989_v61, 1 }
 0x351   : > { %v15243_v43 = vpop.f32.mrf.mxu2 }
 0x352   : > { %v15241_v4 = vpack.c.b16 %v20010_v14, %v20008_v16  ;;  %20012 = vst [vmem:[#allocation128_spill] sm:$0xff] %v15243_v43  ;;  %v15253_v5 = vsel %vm1130_vm0, %v4863_v30, %v4865_v59  ;;  %v4265_v14 = vrot.slane %v4263_v41, 1  ;;  %v15257_v16 = vpop.f32.mrf.mxu3  ;;  %v20020_v41 = vld [vmem:[#allocation103_spill] sm:$0xff] }
 0x353   : > { %20013 = vst [vmem:[#allocation181_spill] sm:$0xff] %v15253_v5 }
 0x354   : > { %20011 = vst [vmem:[#allocation148_spill] sm:$0xff] %v15241_v4 }
 0x355   : > { %v15255_v32 = vpop.f32.mrf.mxu0  ;;  %20015 = vst [vmem:[#allocation183_spill] sm:$0xff] %v15257_v16  ;;  %v4271_v16 = vshll.u32 %v15027_v35, 16 }
 0x356   : > { %9367 = vmatmul.msk.bf16.gmra.mxu1 %vm4345_vm3, %v20006_v15  ;;  %20014 = vst [vmem:[#allocation182_spill] sm:$0xff] %v15255_v32  ;;  %v15262_v15 = vsel %vm4094_vm2, %v4261_v34, %v4265_v14  ;;  %v20023_v34 = vld [vmem:[#allocation157_spill] sm:$0xff] }
 0x357   : > { %20016 = vst [vmem:[#allocation184_spill] sm:$0xff] %v15262_v15  ;;  %v20024_v2 = vunpack.c.l.b16 %v20023_v34  ;;  %v20038_v32 = vld [vmem:[#allocation25_spill] sm:$0xff] }
 0x358   : > { %v15250_v6 = vpop.f32.mrf.mxu1 }
 0x359   : > { %v15266_v46 = vpop.f32.mrf.mxu2 }
 0x35a   : > { %20017 = vst [vmem:[#allocation185_spill] sm:$0xff] %v15266_v46  ;;  %v15272_v3 = vpop.f32.mrf.mxu3 }
 0x35b   : > { %20019 = vst [vmem:[#allocation187_spill] sm:$0xff] %v15272_v3  ;;  %v4267_v3 = vshrl.u32 %v14989_v61, 16 }
 0x35d   : > { %9436 = vmatmul.msk.bf16.gmra.mxu3 %vm4345_vm3, %v15241_v4  ;;  %v15270_v30 = vpop.f32.mrf.mxu0  ;;  %v4269_v34 = vor.u32 %v4267_v3, %v4265_v14  ;;  %v20034_v3 = vld [vmem:[#allocation41_spill] sm:$0xff]  ;;  %v4279_v14 = vshll.u32 %v15103_v29, 16  ;;  %v20064_v4 = vrot.slane %v15121_v28, 1 }
 0x35e   : > { %20018 = vst [vmem:[#allocation186_spill] sm:$0xff] %v15270_v30  ;;  %v4273_v30 = vrot.slane %v4271_v16, 1 }
 0x35f   : > { %9413 = vmatmul.msk.bf16.gmra.mxu2 %vm4345_vm3, %v15253_v5  ;;  %v20021_v5 = vld [vmem:[#allocation42_spill] sm:$0xff] }
 0x360   : > { %9343 = vmatmul.msk.bf16.gmra.mxu0 %vm4345_vm3, %v15262_v15  ;;  %v15268_v62 = vpop.f32.mrf.mxu1  ;;  %v20022_v24 = vunpack.c.l.b16 %v20021_v5 }
 0x361   : > { %v15283_v15 = vpop.f32.mrf.mxu2 }
 0x362   : > { %v15281_v20 = vpack.c.b16 %v20024_v2, %v20022_v24  ;;  %20026 = vst [vmem:[#allocation157_spill] sm:$0xff] %v15283_v15  ;;  %v15296_v2 = vpop.f32.mrf.mxu3  ;;  %v15301_v24 = vsel %vm4094_vm2, %v4269_v34, %v4273_v30 }
 0x363   : > { %20029 = vst [vmem:[#allocation190_spill] sm:$0xff] %v15296_v2  ;;  %v20036_v2 = vld [vmem:[#allocation105_spill] sm:$0xff] }
 0x364   : > { %20025 = vst [vmem:[#allocation42_spill] sm:$0xff] %v15281_v20 }
 0x365   : > { %v15294_v5 = vpop.f32.mrf.mxu0  ;;  %20030 = vst [vmem:[#allocation191_spill] sm:$0xff] %v15301_v24 }
 0x366   : > { %9368 = vmatmul.msk.bf16.gmra.mxu1 %vm4345_vm3, %v20020_v41  ;;  %v15292_v41 = vsel %vm1130_vm0, %v4865_v59, %v4867_v10  ;;  %20028 = vst [vmem:[#allocation189_spill] sm:$0xff] %v15294_v5  ;;  %v20037_v5 = vunpack.c.l.b16 %v20036_v2 }
 0x367   : > { %20027 = vst [vmem:[#allocation188_spill] sm:$0xff] %v15292_v41 }
 0x368   : > { %v15289_v46 = vpop.f32.mrf.mxu1 }
 0x369   : > { %v15305_v16 = vpop.f32.mrf.mxu2 }
 0x36a   : > { %20031 = vst [vmem:[#allocation192_spill] sm:$0xff] %v15305_v16  ;;  %v15311_v23 = vpop.f32.mrf.mxu3 }
 0x36b   : > { %20033 = vst [vmem:[#allocation194_spill] sm:$0xff] %v15311_v23  ;;  %v4275_v23 = vshrl.u32 %v15027_v35, 16  ;;  %v20067_v35 = vld [vmem:[#allocation122_spill] sm:$0xff] }
 0x36d   : > { %9437 = vmatmul.msk.bf16.gmra.mxu3 %vm4345_vm3, %v15281_v20  ;;  %v15309_v59 = vpop.f32.mrf.mxu0 }
 0x36e   : > { %20032 = vst [vmem:[#allocation193_spill] sm:$0xff] %v15309_v59  ;;  %v4869_v59 = vrot.slane %v15103_v29, 1 }
 0x36f   : > { %9414 = vmatmul.msk.bf16.gmra.mxu2 %vm4345_vm3, %v15292_v41  ;;  %v20035_v41 = vld [vmem:[#allocation141_spill] sm:$0xff] }
 0x370   : > { %9344 = vmatmul.msk.bf16.gmra.mxu0 %vm4345_vm3, %v15301_v24  ;;  %v15307_v15 = vpop.f32.mrf.mxu1  ;;  %v4676_v34 = vadd.f32 %v15190_v18, %v20035_v41  ;;  %v20039_v24 = vunpack.c.l.b16 %v20038_v32  ;;  %v15334_v41 = vsel %vm1130_vm0, %v4867_v10, %v4869_v59 }
 0x371   : > { %v15324_v16 = vpop.f32.mrf.mxu2  ;;  %20043 = vst [vmem:[#allocation25_spill] sm:$0xff] %v15334_v41 }
 0x372   : > { %v15322_v20 = vpack.c.b16 %v20039_v24, %v20037_v5  ;;  %20041 = vst [vmem:[#allocation105_spill] sm:$0xff] %v15324_v16  ;;  %v5142_v18 = vadd.f32 %v20042_v27, %v4676_v34  ;;  %v4277_v5 = vor.u32 %v4275_v23, %v4273_v30  ;;  %v20049_v23 = vld [vmem:[#allocation166_spill] sm:$0xff] }
 0x373   : > { %v5347_v2 = vpop.f32.mrf.mxu3 }
 0x374   : > { %20040 = vst [vmem:[#allocation141_spill] sm:$0xff] %v15322_v20  ;;  %v15340_v24 = vadd.f32 %v5347_v2, %v5142_v18  ;;  %v20052_v18 = vld [vmem:[#allocation3_spill] sm:$0xff] }
 0x376   : > { %9369 = vmatmul.msk.bf16.gmra.mxu1 %vm4345_vm3, %v20034_v3  ;;  %v4281_v3 = vrot.slane %v4279_v14, 1  ;;  %20045 = vst [vmem:[#allocation195_spill] sm:$0xff] %v15340_v24  ;;  %v20047_v14 = vld [vmem:[#allocation167_spill] sm:$0xff] }
 0x377   : > { %v15336_v32 = vpop.f32.mrf.mxu0  ;;  %v4678_v27 = vadd.f32 %v15211_v36, %v20047_v14  ;;  %v20054_v36 = vld [vmem:[#allocation174_spill] sm:$0xff] }
 0x378   : > { %v15330_v43 = vpop.f32.mrf.mxu1  ;;  %20044 = vst [vmem:[#allocation134_spill] sm:$0xff] %v15336_v32  ;;  %v15343_v16 = vsel %vm4094_vm2, %v4277_v5, %v4281_v3  ;;  %v4681_v14 = vadd.f32 %v15229_v12, %v20054_v36  ;;  %v20061_v12 = vld [vmem:[#allocation11_spill] sm:$0xff] }
 0x379   : > { %20046 = vst [vmem:[#allocation196_spill] sm:$0xff] %v15343_v16  ;;  %v5143_v30 = vadd.f32 %v20049_v23, %v4678_v27  ;;  %v20062_v36 = vrot.slane %v20061_v12, 2  ;;  %v20063_v27 = vld [vmem:[#allocation173_spill] sm:$0xff] }
 0x37b   : > { %v5349_v24 = vpop.f32.mrf.mxu3 }
 0x37c   : > { %v15349_v10 = vpop.f32.mrf.mxu2  ;;  %v15360_v5 = vadd.f32 %v5349_v24, %v5143_v30  ;;  %v20057_v24 = vld [vmem:[#allocation145_spill] sm:$0xff]  ;;  %v20058_v30 = vld [vmem:[#allocation4_spill] sm:$0xff] }
 0x37d   : > { %9438 = vmatmul.msk.bf16.gmra.mxu3 %vm4345_vm3, %v15322_v20  ;;  %20048 = vst [vmem:[#allocation167_spill] sm:$0xff] %v15349_v10 }
 0x37f   : > { %9415 = vmatmul.msk.bf16.gmra.mxu2 %vm4345_vm3, %v15334_v41  ;;  %v15354_v32 = vpop.f32.mrf.mxu0  ;;  %v20051_v41 = vld [vmem:[#allocation124_spill] sm:$0xff] }
 0x380   : > { %9345 = vmatmul.msk.bf16.gmra.mxu0 %vm4345_vm3, %v15343_v16  ;;  %v15351_v34 = vpop.f32.mrf.mxu1  ;;  %20050 = vst [vmem:[#allocation166_spill] sm:$0xff] %v15354_v32  ;;  %v1463_v2 = vmul.f32 %v20052_v18, %v20051_v41  ;;  %v4287_v16 = vshll.u32 %v15121_v28, 16  ;;  %v20056_v32 = vld [vmem:[#allocation31_spill] sm:$0xff]  ;;  %v4283_v18 = vshrl.u32 %v15103_v29, 16 }
 0x381   : > { %20053 = vst [vmem:[#allocation124_spill] sm:$0xff] %v15360_v5  ;;  %v20059_v5 = vld [vmem:[#allocation127_spill] sm:$0xff] }
 0x382   : > { %v1661_v23 = vrot.slane %v1463_v2, 2  ;;  %v4289_v20 = vrot.slane %v4287_v16, 1  ;;  %v1879_v31 = vmul.f32 %v20060_v13, %v20059_v5  ;;  %v5144_v2 = vadd.f32 %v20063_v27, %v4681_v14 }
 0x383   : > { %v4285_v29 = vor.u32 %v4283_v18, %v4281_v3  ;;  %v20072_v3 = vld [vmem:[#allocation56_spill] sm:$0xff] }
 0x384   : > { %v15365_v10 = vpop.f32.mrf.mxu2 }
 0x385   : > { %20055 = vst [vmem:[#allocation3_spill] sm:$0xff] %v15365_v10  ;;  %v1662_v10 = vsel %vm1537_vm1, %v20062_v36, %v1661_v23  ;;  %v15396_v14 = vsel %vm4094_vm2, %v4285_v29, %v4289_v20  ;;  %v20074_v36 = vld [vmem:[#allocation155_spill] sm:$0xff] }
 0x386   : > { %9370 = vmatmul.msk.bf16.gmra.mxu1 %vm4345_vm3, %v14375_v56  ;;  %v2020_v56 = vmul.f32 %v20058_v30, %v20057_v24  ;;  %v1801_v54 = vadd.f32 %v1662_v10, %v20067_v35  ;;  %v20068_v30 = vld [vmem:[#allocation5_spill] sm:$0xff]  ;;  %20070 = vst [vmem:[#allocation127_spill] sm:$0xff] %v15396_v14  ;;  %v4683_v10 = vadd.f32 %v15250_v6, %v20072_v3  ;;  %v9868_v3 = vld [vmem:[%s18337_s1 + $0x8] ss:$0 sm:$0xff] }
 0x387   : > { %v2426_v9 = vmul.f32 %v20068_v30, %v20057_v24  ;;  %v20075_v30 = vrot.slane %v20074_v36, 1 }
 0x388   : > { %v15371_v39 = vpop.f32.mrf.mxu1  ;;  %v2217_v27 = vrot.slane %v2020_v56, 1 }
 0x38b   : > { %v5352_v5 = vpop.f32.mrf.mxu3 }
 0x38c   : > { %v15393_v12 = vadd.f32 %v5352_v5, %v5144_v2  ;;  %v15404_v18 = vpop.f32.mrf.mxu2  ;;  %v20076_v2 = vld [vmem:[#allocation137_spill] sm:$0xff] }
 0x38d   : > { %9439 = vmatmul.msk.bf16.gmra.mxu3 %vm4345_vm3, %v20056_v32  ;;  %v15384_v32 = vsel %vm1130_vm0, %v4869_v59, %v20064_v4  ;;  %v15386_v16 = vpop.f32.mrf.mxu0  ;;  %v1946_v4 = vadd.f32 %v1879_v31, %v1801_v54  ;;  %v20071_v59 = vld [vmem:[#allocation7_spill] sm:$0xff]  ;;  %20073 = vst [vmem:[#allocation10_spill] sm:$0xff] %v15404_v18  ;;  %v20077_v5 = vrot.slane %v20076_v2, 1 }
 0x38e   : > { %20065 = vst [vmem:[#allocation174_spill] sm:$0xff] %v15384_v32  ;;  %v916_v35 = vmul.f32 %v20071_v59, %v20051_v41  ;;  %v20080_v59 = vld [vmem:[#allocation154_spill] sm:$0xff] }
 0x38f   : > { %20066 = vst [vmem:[#allocation145_spill] sm:$0xff] %v15386_v16  ;;  %9416 = vmatmul.msk.bf16.gmra.mxu2 %vm4345_vm3, %v15384_v32  ;;  %v1257_v29 = vsel %vm1130_vm0, %v20077_v5, %v20075_v30  ;;  %v20078_v32 = vld [vmem:[#allocation63_spill] sm:$0xff]  ;;  %v15418_v6 = vmul.f32 %v19470_v53, %v20080_v59  ;;  %v15424_v36 = vmul.f32 %v9868_v3, %v20080_v59  ;;  %v20081_v30 = vld [vmem:[#allocation156_spill] sm:$0xff]  ;;  %v20087_v16 = vld [vmem:[#allocation161_spill] sm:$0xff] }
 0x390   : > { %20069 = vst [vmem:[#allocation4_spill] sm:$0xff] %v15393_v12  ;;  %9346 = vmatmul.msk.bf16.gmra.mxu0 %vm4345_vm3, %v15396_v14  ;;  %v20079_v56 = vrot.slane %v20078_v32, 1  ;;  %v2623_v14 = vrot.slane %v2426_v9, 2  ;;  %v15414_v54 = vpop.f32.mrf.mxu1  ;;  %v1395_v31 = vadd.f32 %v1257_v29, %v916_v35  ;;  %v20082_v32 = vrot.slane %v20081_v30, 2  ;;  %v20083_v9 = vld [vmem:[#allocation32_spill] sm:$0xff] }
 0x391   : > { %v20084_v5 = vrot.slane %v20083_v9, 2  ;;  %v2983_v17 = vmul.f32 %v19470_v53, %v20087_v16  ;;  %v20088_v30 = vld [vmem:[#allocation132_spill] sm:$0xff]  ;;  %v20090_v53 = vld [vmem:[#allocation139_spill] sm:$0xff] }
 0x392   : > { %v2218_v12 = vsel %vm1130_vm0, %v20079_v56, %v2217_v27  ;;  %v1664_v2 = vsel %vm1537_vm1, %v1661_v23, %v20082_v32  ;;  %v2841_v23 = vmul.f32 %v19090_v42, %v20088_v30  ;;  %v1880_v32 = vmul.f32 %v20060_v13, %v20057_v24  ;;  %v20092_v13 = vld [vmem:[#allocation123_spill] sm:$0xff] }
 0x393   : > { %v2357_v41 = vadd.f32 %v2218_v12, %v1946_v4  ;;  %v2624_v35 = vsel %vm1537_vm1, %v20084_v5, %v2623_v14  ;;  %v20085_v12 = vld [vmem:[#allocation55_spill] sm:$0xff]  ;;  %v1802_v56 = vadd.f32 %v1664_v2, %v1395_v31  ;;  %v5354_v57 = vpop.f32.mrf.mxu3  ;;  %v3585_v31 = vrot.slane %v15424_v36, 2 }
 0x394   : > { %v5145_v4 = vadd.f32 %v20085_v12, %v4683_v10  ;;  %v3179_v10 = vrot.slane %v15418_v6, 1  ;;  %v4686_v5 = vadd.f32 %v15268_v62, %v20090_v53  ;;  %v4291_v12 = vshrl.u32 %v15121_v28, 16  ;;  %v20098_v53 = vld [vmem:[#allocation85_spill] sm:$0xff] }
 0x395   : > { %v15433_v29 = vpop.f32.mrf.mxu0  ;;  %v2763_v18 = vadd.f32 %v2624_v35, %v2357_v41  ;;  %v15450_v35 = vpop.f32.mrf.mxu2  ;;  %v4295_v30 = vshll.u32 %v15125_v49, 16  ;;  %v3181_v24 = vrot.slane %v2983_v17, 1  ;;  %v3389_v17 = vmul.f32 %v9868_v3, %v20087_v16 }
 0x396   : > { %20086 = vst [vmem:[#allocation11_spill] sm:$0xff] %v15433_v29  ;;  %9371 = vmatmul.msk.bf16.gmra.mxu1 %vm4345_vm3, %v14451_v55  ;;  %v15443_v9 = vadd.f32 %v5354_v57, %v5145_v4  ;;  %v1947_v55 = vadd.f32 %v1880_v32, %v1802_v56  ;;  %v3391_v57 = vmul.f32 %v9868_v3, %v20092_v13  ;;  %v20093_v4 = vld [vmem:[#allocation159_spill] sm:$0xff] }
 0x397   : > { %v2908_v2 = vadd.f32 %v2841_v23, %v2763_v18  ;;  %20091 = vst [vmem:[#allocation122_spill] sm:$0xff] %v15450_v35  ;;  %v20094_v6 = vrot.slane %v20093_v4, 1  ;;  %v20097_v23 = vld [vmem:[#allocation53_spill] sm:$0xff]  ;;  %v4293_v35 = vor.u32 %v4291_v12, %v4289_v20  ;;  %v20099_v4 = vrot.slane %v15125_v49, 1  ;;  %v20106_v12 = vld [vmem:[#allocation51_spill] sm:$0xff] }
 0x398   : > { %20089 = vst [vmem:[#allocation173_spill] sm:$0xff] %v15443_v9  ;;  %v20095_v9 = vld [vmem:[#allocation138_spill] sm:$0xff]  ;;  %v3390_v62 = vmul.f32 %v9868_v3, %v20097_v23  ;;  %v15464_v29 = vpop.f32.mrf.mxu1  ;;  %v4297_v16 = vrot.slane %v4295_v30, 1  ;;  %v20111_v30 = vld [vmem:[#allocation143_spill] sm:$0xff] }
 0x399   : > { %v2220_v36 = vsel %vm1130_vm0, %v2217_v27, %v20094_v6  ;;  %v20096_v41 = vrot.slane %v20095_v9, 1  ;;  %v20100_v27 = vrot.slane %v15121_v28, 1 }
 0x39a   : > { %v2358_v56 = vadd.f32 %v2220_v36, %v1947_v55  ;;  %v5146_v55 = vadd.f32 %v20106_v12, %v4686_v5  ;;  %v3589_v5 = vrot.slane %v3390_v62, 2 }
 0x39b   : > { %v3180_v18 = vsel %vm1130_vm0, %v20096_v41, %v3179_v10  ;;  %v15472_v9 = vsel %vm1130_vm0, %v20100_v27, %v20099_v4  ;;  %v20102_v41 = vld [vmem:[#allocation160_spill] sm:$0xff]  ;;  %v2845_v4 = vmul.f32 %v19090_v42, %v20092_v13  ;;  %v20107_v27 = vld [vmem:[#allocation54_spill] sm:$0xff]  ;;  %v3587_v13 = vrot.slane %v3389_v17, 2 }
 0x39c   : > { %v3319_v32 = vadd.f32 %v3180_v18, %v2908_v2  ;;  %20101 = vst [vmem:[#allocation5_spill] sm:$0xff] %v15472_v9  ;;  %v20103_v6 = vrot.slane %v20102_v41, 2  ;;  %v2842_v18 = vmul.f32 %v19090_v42, %v20080_v59  ;;  %v20108_v41 = vrot.slane %v20107_v27, 1  ;;  %v9813_v42 = vld [vmem:[%s18339_s3 + $0x20] sm:$0xff]  ;;  %v20116_v27 = vld [vmem:[#allocation64_spill] sm:$0xff] }
 0x39d   : > { %9440 = vmatmul.msk.bf16.gmra.mxu3 %vm4345_vm3, %v20098_v53  ;;  %v20105_v53 = vrot.slane %v20104_v1, 2  ;;  %v15481_v2 = vpop.f32.mrf.mxu0  ;;  %v15500_v59 = vsel %vm4094_vm2, %v4293_v35, %v4297_v16  ;;  %v4688_v62 = vadd.f32 %v15289_v46, %v20116_v27  ;;  %5875 = vmatpush.bf16.msrb.mxu0 %v9813_v42 }
 0x39e   : > { %v2626_v23 = vsel %vm1537_vm1, %v2623_v14, %v20103_v6  ;;  %v3184_v14 = vsel %vm1130_vm0, %v3181_v24, %v20108_v41  ;;  %20114 = vst [vmem:[#allocation56_spill] sm:$0xff] %v15500_v59  ;;  %v3591_v41 = vrot.slane %v3391_v57, 2  ;;  %v3590_v57 = vsel %vm1537_vm1, %v3587_v13, %v3589_v5 }
 0x39f   : > { %v3586_v20 = vsel %vm1537_vm1, %v20105_v53, %v3585_v31  ;;  %v2764_v3 = vadd.f32 %v2626_v23, %v2358_v56  ;;  %9417 = vmatmul.msk.bf16.gmra.mxu2 %vm4345_vm3, %v15472_v9  ;;  %v20109_v53 = vld [vmem:[#allocation133_spill] sm:$0xff]  ;;  %v20112_v56 = vrot.slane %v20111_v30, 1 }
 0x3a0   : > { %v3725_v36 = vadd.f32 %v3586_v20, %v3319_v32  ;;  %v5357_v1 = vpop.f32.mrf.mxu3  ;;  %v20110_v6 = vrot.slane %v20109_v53, 1  ;;  %v20115_v20 = vld [vmem:[#allocation172_spill] sm:$0xff]  ;;  %9347 = vmatmul.msk.bf16.gmra.mxu0 %vm4345_vm3, %v15500_v59  ;;  %v3592_v46 = vsel %vm1537_vm1, %v3589_v5, %v3591_v41 }
 0x3a1   : > { %v15497_v23 = vadd.f32 %v5357_v1, %v5146_v55  ;;  %v2912_v12 = vadd.f32 %v2845_v4, %v20115_v20  ;;  %v20117_v53 = vld [vmem:[#allocation136_spill] sm:$0xff]  ;;  %v2909_v35 = vadd.f32 %v2842_v18, %v2764_v3  ;;  %v3182_v4 = vsel %vm1130_vm0, %v3179_v10, %v3181_v24  ;;  %v20120_v3 = vld [vmem:[#allocation30_spill] sm:$0xff]  ;;  %v20121_v24 = vld [vmem:[#allocation163_spill] sm:$0xff] }
 0x3a2   : > { %v3188_v32 = vsel %vm1130_vm0, %v20112_v56, %v20110_v6  ;;  %v3321_v55 = vadd.f32 %v3184_v14, %v20117_v53  ;;  %v15511_v1 = vpop.f32.mrf.mxu2  ;;  %v9869_v6 = vld [vmem:[%s18338_s2] ss:$0 sm:$0xff]  ;;  %v5147_v18 = vadd.f32 %v20120_v3, %v4688_v62  ;;  %v3588_v53 = vsel %vm1537_vm1, %v3585_v31, %v3587_v13  ;;  %v20123_v31 = vld [vmem:[#allocation168_spill] sm:$0xff] }
 0x3a3   : > { %20113 = vst [vmem:[#allocation7_spill] sm:$0xff] %v15497_v23  ;;  %v3796_v17 = vadd.f32 %v9869_v6, %v3725_v36  ;;  %v3323_v30 = vadd.f32 %v3188_v32, %v2912_v12  ;;  %v15518_v56 = vpop.f32.mrf.mxu1  ;;  %v3320_v20 = vadd.f32 %v3182_v4, %v2909_v35  ;;  %v20118_v14 = vld [vmem:[#allocation170_spill] sm:$0xff]  ;;  %v3728_v12 = vadd.f32 %v3592_v46, %v20121_v24  ;;  %v20122_v4 = vld [vmem:[#allocation111_spill] sm:$0xff] }
 0x3a4   : > { %v20119_v27 = vrot.slane %v20118_v14, 2  ;;  %v3727_v10 = vadd.f32 %v3590_v57, %v3321_v55  ;;  %v4691_v62 = vadd.f32 %v15307_v15, %v20122_v4  ;;  %v4875_v13 = vrot.slane %v20123_v31, 1  ;;  %v20126_v15 = vld [vmem:[#allocation48_spill] sm:$0xff] }
 0x3a5   : > { %v15526_v9 = vpop.f32.mrf.mxu0  ;;  %v3726_v36 = vadd.f32 %v3588_v53, %v3320_v20  ;;  %v3863_v32 = vmax.f32 %v3796_v17, 0.0  ;;  %v4299_v57 = vshrl.u32 %v15125_v49, 16  ;;  %v20127_v53 = vrot.slane %v15125_v49, 1 }
 0x3a6   : > { %v3594_v42 = vsel %vm1537_vm1, %v3591_v41, %v20119_v27  ;;  %9372 = vmatmul.msk.bf16.gmra.mxu1 %vm4345_vm3, %v14617_v50  ;;  %v3798_v41 = vadd.f32 %v9869_v6, %v3727_v10  ;;  %v20125_v27 = vld [vmem:[#allocation70_spill] sm:$0xff] }
 0x3a7   : > { %v3729_v59 = vadd.f32 %v3594_v42, %v3323_v30  ;;  %v3797_v35 = vadd.f32 %v9869_v6, %v3726_v36  ;;  %v15538_v55 = vpack.c.bf16 %v3863_v32, %v3863_v32  ;;  %v3799_v30 = vadd.f32 %v9869_v6, %v3728_v12 }
 0x3a8   : > { %v5359_v23 = vpop.f32.mrf.mxu3  ;;  %v3865_v46 = vmax.f32 %v3798_v41, 0.0  ;;  %v15549_v36 = vsel %vm1130_vm0, %v20127_v53, %v4875_v13  ;;  %v4301_v32 = vor.u32 %v4299_v57, %v4297_v16 }
 0x3a9   : > { %v15531_v5 = vadd.f32 %v5359_v23, %v5147_v18  ;;  %v3864_v17 = vmax.f32 %v3797_v35, 0.0  ;;  %20124 = vst [vmem:[#allocation155_spill] sm:$0xff] %v15538_v55  ;;  %v3800_v20 = vadd.f32 %v9869_v6, %v3729_v59  ;;  %v5148_v18 = vadd.f32 %v20126_v15, %v4691_v62  ;;  %v20130_v62 = vld [vmem:[#allocation171_spill] sm:$0xff] }
 0x3aa   : > { %v15536_v14 = vpop.f32.mrf.mxu2  ;;  %v3932_v3 = vpack.c.bf16 %v3865_v46, %v3865_v46  ;;  %20128 = vst [vmem:[#allocation137_spill] sm:$0xff] %v15549_v36  ;;  %v18850_v59 = vunpack.c.l.b16 %v15538_v55  ;;  %v3866_v12 = vmax.f32 %v3799_v30, 0.0  ;;  %v20134_v30 = vld [vmem:[#allocation60_spill] sm:$0xff]  ;;  %v20140_v55 = vld [vmem:[#allocation79_spill] sm:$0xff] }
 0x3ab   : > { %v15543_v23 = vpop.f32.mrf.mxu1  ;;  %v3931_v42 = vpack.c.bf16 %v3864_v17, %v3864_v17  ;;  %v3867_v35 = vmax.f32 %v3800_v20, 0.0  ;;  %v15562_v17 = vsel %vm4094_vm2, %v4301_v32, %v20130_v62  ;;  %v4693_v20 = vadd.f32 %v15330_v43, %v20134_v30  ;;  %v20137_v43 = vld [vmem:[#allocation47_spill] sm:$0xff] }
 0x3ac   : > { %v15554_v24 = vunpack.c.l.b16 %v3932_v3  ;;  %20131 = vst [vmem:[#allocation154_spill] sm:$0xff] %v15562_v17  ;;  %v5564_v30 = vshll.u32 %v20137_v43, 16 }
 0x3ad   : > { %9441 = vmatmul.msk.bf16.gmra.mxu3 %vm4345_vm3, %v20125_v27  ;;  %v15551_v10 = vpop.f32.mrf.mxu0  ;;  %v5206_v6 = vunpack.c.l.b16 %v3931_v42  ;;  %v3933_v42 = vpack.c.bf16 %v3866_v12, %v3866_v12  ;;  %v3934_v15 = vpack.c.bf16 %v3867_v35, %v3867_v35 }
 0x3ae   : > { %20129 = vst [vmem:[#allocation63_spill] sm:$0xff] %v15554_v24 }
 0x3af   : > { %9418 = vmatmul.msk.bf16.gmra.mxu2 %vm4345_vm3, %v15549_v36  ;;  %v15566_v16 = vpack.c.b16 %v5206_v6, %v18850_v59  ;;  %v15569_v46 = vpack.c.b16 %v15554_v24, %v5206_v6  ;;  %v6471_v6 = vunpack.c.l.b16 %v3933_v42  ;;  %v6472_v59 = vunpack.c.l.b16 %v3934_v15  ;;  %v20141_v42 = vld [vmem:[#allocation169_spill] sm:$0xff] }
 0x3b0   : > { %v5362_v41 = vpop.f32.mrf.mxu3  ;;  %9348 = vmatmul.msk.bf16.gmra.mxu0 %vm4345_vm3, %v15562_v17  ;;  %v4877_v15 = vrot.slane %v20141_v42, 1 }
 0x3b1   : > { %v15558_v4 = vadd.f32 %v5362_v41, %v5148_v18  ;;  %20132 = vst [vmem:[#allocation156_spill] sm:$0xff] %v15566_v16  ;;  %v20135_v18 = vld [vmem:[#allocation65_spill] sm:$0xff]  ;;  %v15588_v12 = vpack.c.b16 %v6472_v59, %v6471_v6 }
 0x3b2   : > { %20133 = vst [vmem:[#allocation32_spill] sm:$0xff] %v15569_v46  ;;  %v15575_v57 = vpop.f32.mrf.mxu2  ;;  %v5149_v53 = vadd.f32 %v20135_v18, %v4693_v20  ;;  %v20136_v41 = vld [vmem:[#allocation101_spill] sm:$0xff]  ;;  %v20139_v46 = vld [vmem:[#allocation115_spill] sm:$0xff]  ;;  %v15602_v59 = vsel %vm1130_vm0, %v4875_v13, %v4877_v15 }
 0x3b3   : > { %v15577_v3 = vpop.f32.mrf.mxu1  ;;  %v5560_v62 = vshll.u32 %v20136_v41, 16  ;;  %20138 = vst [vmem:[#allocation55_spill] sm:$0xff] %v15588_v12  ;;  %v4696_v35 = vadd.f32 %v15351_v34, %v20139_v46  ;;  %v5558_v24 = vshrl.u32 %v20136_v41, 16 }
 0x3b4   : > { %20143 = vst [vmem:[#allocation161_spill] sm:$0xff] %v15602_v59 }
 0x3b5   : > { %v15580_v32 = vpop.f32.mrf.mxu0  ;;  %v5562_v18 = vrot.slane %v5560_v62, 1 }
 0x3b6   : > { %9373 = vmatmul.msk.bf16.gmra.mxu1 %vm4345_vm3, %v14716_v11  ;;  %v5566_v11 = vrot.slane %v5564_v30, 1  ;;  %v20145_v30 = vld [vmem:[#allocation8_spill] sm:$0xff] }
 0x3b7   : > { %v5563_v34 = vor.u32 %v5562_v18, %v5558_v24  ;;  %v4698_v16 = vadd.f32 %v15371_v39, %v20145_v30  ;;  %v20152_v30 = vld [vmem:[#allocation44_spill] sm:$0xff] }
 0x3b8   : > { %v5364_v36 = vpop.f32.mrf.mxu3 }
 0x3b9   : > { %v15585_v17 = vadd.f32 %v5364_v36, %v5149_v53  ;;  %v20142_v53 = vld [vmem:[#allocation35_spill] sm:$0xff]  ;;  %v5567_v12 = vsel %vm4094_vm2, %v5563_v34, %v5566_v11  ;;  %v5571_v34 = vshll.u32 %v14904_v22, 16 }
 0x3ba   : > { %v15592_v20 = vpop.f32.mrf.mxu2  ;;  %v5150_v50 = vadd.f32 %v20142_v53, %v4696_v35  ;;  %v20147_v53 = vld [vmem:[#allocation86_spill] sm:$0xff] }
 0x3bb   : > { %v15598_v36 = vpop.f32.mrf.mxu1  ;;  %v5151_v41 = vadd.f32 %v20147_v53, %v4698_v16  ;;  %v5568_v16 = vshrl.u32 %v20137_v43, 16  ;;  %v5573_v53 = vrot.slane %v5571_v34, 1  ;;  %v20158_v34 = vld [vmem:[#allocation100_spill] sm:$0xff] }
 0x3bc   : > { %v4703_v43 = vadd.f32 %v15464_v29, %v20158_v34  ;;  %v20164_v29 = vld [vmem:[#allocation59_spill] sm:$0xff] }
 0x3bd   : > { %9442 = vmatmul.msk.bf16.gmra.mxu3 %vm4345_vm3, %v20140_v55  ;;  %v15604_v6 = vpop.f32.mrf.mxu0  ;;  %v15666_v34 = vrot.slane %v20164_v29, 1 }
 0x3bf   : > { %9419 = vmatmul.msk.bf16.gmra.mxu2 %vm4345_vm3, %v15602_v59  ;;  %v4879_v59 = vrot.slane %v20152_v30, 1  ;;  %20165 = vst [vmem:[#allocation143_spill] sm:$0xff] %v15666_v34 }
 0x3c0   : > { %v5367_v46 = vpop.f32.mrf.mxu3  ;;  %9465 = vmatmul.msk.bf16.vlgmr.msrb.gmra.mxu0 %vm4345_vm3, %v5567_v12  ;;  %v20150_v12 = vld [vmem:[#allocation23_spill] sm:$0xff] }
 0x3c1   : > { %v15608_v62 = vadd.f32 %v5367_v46, %v5150_v50  ;;  %v4701_v46 = vadd.f32 %v15414_v54, %v20150_v12  ;;  %v5570_v54 = vor.u32 %v5568_v16, %v5566_v11 }
 0x3c2   : > { %v15614_v35 = vpop.f32.mrf.mxu2 }
 0x3c3   : > { %20144 = vst [vmem:[#allocation132_spill] sm:$0xff] %v15608_v62  ;;  %v15616_v13 = vpop.f32.mrf.mxu1  ;;  %v20153_v62 = vld [vmem:[#allocation76_spill] sm:$0xff] }
 0x3c4   : > { %20146 = vst [vmem:[#allocation139_spill] sm:$0xff] %v15614_v35  ;;  %v5574_v35 = vsel %vm4094_vm2, %v5570_v54, %v5573_v53  ;;  %v20162_v54 = vld [vmem:[#allocation107_spill] sm:$0xff] }
 0x3c5   : > { %v15619_v24 = vpop.f32.mrf.mxu0 }
 0x3c6   : > { %20148 = vst [vmem:[#allocation123_spill] sm:$0xff] %v15619_v24  ;;  %9374 = vmatmul.msk.bf16.gmra.mxu1 %vm4345_vm3, %v14783_v38  ;;  %v20154_v38 = vld [vmem:[#allocation88_spill] sm:$0xff] }
 0x3c8   : > { %v5369_v18 = vpop.f32.mrf.mxu3 }
 0x3c9   : > { %v15623_v50 = vadd.f32 %v5369_v18, %v5151_v41  ;;  %v5152_v41 = vadd.f32 %v20154_v38, %v4701_v46  ;;  %v15638_v18 = vsel %vm1130_vm0, %v4877_v15, %v4879_v59  ;;  %v20159_v46 = vld [vmem:[#allocation93_spill] sm:$0xff] }
 0x3ca   : > { %v15628_v39 = vpop.f32.mrf.mxu2  ;;  %20155 = vst [vmem:[#allocation53_spill] sm:$0xff] %v15638_v18 }
 0x3cb   : > { %20149 = vst [vmem:[#allocation159_spill] sm:$0xff] %v15623_v50  ;;  %v15634_v24 = vpop.f32.mrf.mxu1 }
 0x3cc   : > { %20151 = vst [vmem:[#allocation138_spill] sm:$0xff] %v15628_v39 }
 0x3cd   : > { %9443 = vmatmul.msk.bf16.gmra.mxu3 %vm4345_vm3, %v20153_v62  ;;  %v15640_v50 = vpop.f32.mrf.mxu0 }
 0x3ce   : > { %20156 = vst [vmem:[#allocation160_spill] sm:$0xff] %v15640_v50  ;;  %v5153_v50 = vadd.f32 %v20159_v46, %v4703_v43  ;;  %v5578_v43 = vshll.u32 %v15039_v51, 16  ;;  %v20166_v46 = vld [vmem:[#allocation104_spill] sm:$0xff] }
 0x3cf   : > { %9420 = vmatmul.msk.bf16.gmra.mxu2 %vm4345_vm3, %v15638_v18  ;;  %v5575_v18 = vshrl.u32 %v14904_v22, 16 }
 0x3d0   : > { %v5372_v12 = vpop.f32.mrf.mxu3  ;;  %9466 = vmatmul.msk.bf16.gmra.mxu0 %vm4345_vm3, %v5574_v35  ;;  %v4706_v35 = vadd.f32 %v15518_v56, %v20162_v54  ;;  %v15677_v56 = vsel %vm1130_vm0, %v4879_v59, %v15666_v34  ;;  %v4708_v59 = vadd.f32 %v15543_v23, %v14930_v8  ;;  %v4711_v8 = vadd.f32 %v15577_v3, %v15002_v33 }
 0x3d1   : > { %v15644_v39 = vadd.f32 %v5372_v12, %v5152_v41  ;;  %20168 = vst [vmem:[#allocation172_spill] sm:$0xff] %v15677_v56 }
 0x3d2   : > { %v15650_v38 = vpop.f32.mrf.mxu2 }
 0x3d3   : > { %20157 = vst [vmem:[#allocation67_spill] sm:$0xff] %v15644_v39  ;;  %v15652_v15 = vpop.f32.mrf.mxu1 }
 0x3d5   : > { %v15655_v11 = vpop.f32.mrf.mxu0 }
 0x3d6   : > { %20160 = vst [vmem:[#allocation51_spill] sm:$0xff] %v15655_v11  ;;  %9375 = vmatmul.msk.bf16.gmra.mxu1 %vm4345_vm3, %v14820_v44  ;;  %v5577_v11 = vor.u32 %v5575_v18, %v5573_v53  ;;  %v5580_v44 = vrot.slane %v5578_v43, 1  ;;  %v9815_v53 = vld [vmem:[%s18339_s3 + $0x30] sm:$0xff]  ;;  %v5155_v43 = vadd.f32 %v14974_v52, %v4708_v59  ;;  %v5582_v52 = vshrl.u32 %v15039_v51, 16 }
 0x3d7   : > { %6498 = vmatpush.bf16.msrb.mxu2 %v9815_v53 }
 0x3d8   : > { %v5374_v16 = vpop.f32.mrf.mxu3  ;;  %v5584_v33 = vor.u32 %v5582_v52, %v5580_v44 }
 0x3d9   : > { %v15659_v41 = vadd.f32 %v5374_v16, %v5153_v50  ;;  %v20167_v50 = vld [vmem:[#allocation9_spill] sm:$0xff] }
 0x3da   : > { %v15663_v12 = vpop.f32.mrf.mxu2  ;;  %v5154_v16 = vadd.f32 %v20167_v50, %v4706_v35 }
 0x3db   : > { %20161 = vst [vmem:[#allocation54_spill] sm:$0xff] %v15659_v41  ;;  %v15672_v39 = vpop.f32.mrf.mxu1 }
 0x3dc   : > { %20163 = vst [vmem:[#allocation133_spill] sm:$0xff] %v15663_v12  ;;  %v5581_v12 = vsel %vm4094_vm2, %v5577_v11, %v5580_v44 }
 0x3dd   : > { %9444 = vmatmul.msk.bf16.gmra.mxu3 %vm4345_vm3, %v20166_v46  ;;  %v15679_v54 = vpop.f32.mrf.mxu0 }
 0x3df   : > { %9421 = vmatmul.msk.bf16.gmra.mxu2 %vm4345_vm3, %v15677_v56 }
 0x3e0   : > { %v5377_v41 = vpop.f32.mrf.mxu3  ;;  %9467 = vmatmul.msk.bf16.gmra.mxu0 %vm4345_vm3, %v5581_v12  ;;  %v5585_v12 = vshll.u32 %v15113_v47, 16 }
 0x3e1   : > { %v15683_v22 = vadd.f32 %v5377_v41, %v5154_v16  ;;  %v20170_v16 = vld [vmem:[#allocation61_spill] sm:$0xff] }
 0x3e2   : > { %v15692_v18 = vpop.f32.mrf.mxu2  ;;  %v4883_v53 = vrot.slane %v20170_v16, 1  ;;  %v5587_v59 = vrot.slane %v5585_v12, 1  ;;  %v4713_v12 = vadd.f32 %v15598_v36, %v15076_v0 }
 0x3e3   : > { %v15694_v35 = vpop.f32.mrf.mxu1 }
 0x3e5   : > { %v15697_v41 = vpop.f32.mrf.mxu0 }
 0x3e6   : > { %9376 = vmatmul.msk.bf16.gmra.mxu1 %vm4345_vm3, %v14873_v45 }
 0x3e8   : > { %v5379_v50 = vpop.f32.mrf.mxu3 }
 0x3e9   : > { %v15701_v11 = vadd.f32 %v5379_v50, %v5155_v43  ;;  %v5156_v43 = vadd.f32 %v15041_v48, %v4711_v8  ;;  %v4884_v50 = vsel %vm1130_vm0, %v15666_v34, %v4883_v53  ;;  %v5157_v8 = vadd.f32 %v15099_v26, %v4713_v12 }
 0x3ea   : > { %v15706_v23 = vpop.f32.mrf.mxu2  ;;  %v5589_v26 = vshrl.u32 %v15113_v47, 16 }
 0x3eb   : > { %20169 = vst [vmem:[#allocation64_spill] sm:$0xff] %v15701_v11  ;;  %v15712_v56 = vpop.f32.mrf.mxu1  ;;  %v5588_v11 = vsel %vm4094_vm2, %v5584_v33, %v5587_v59 }
 0x3ec   : > { %v5591_v12 = vor.u32 %v5589_v26, %v5587_v59 }
 0x3ed   : > { %9445 = vmatmul.msk.bf16.gmra.mxu3 %vm4345_vm3, %v14946_v58  ;;  %v15717_v45 = vpop.f32.mrf.mxu0 }
 0x3ef   : > { %9422 = vmatmul.msk.bf16.gmra.mxu2 %vm4345_vm3, %v4884_v50 }
 0x3f0   : > { %v5382_v3 = vpop.f32.mrf.mxu3  ;;  %9468 = vmatmul.msk.bf16.gmra.mxu0 %vm4345_vm3, %v5588_v11  ;;  %v4716_v11 = vadd.f32 %v15616_v13, %v15117_v40 }
 0x3f1   : > { %v15720_v16 = vadd.f32 %v5382_v3, %v5156_v43  ;;  %v5592_v43 = vshll.u32 %v15166_v25, 16 }
 0x3f2   : > { %v15726_v51 = vpop.f32.mrf.mxu2  ;;  %v5158_v33 = vadd.f32 %v15142_v63, %v4716_v11 }
 0x3f3   : > { %v15728_v48 = vpop.f32.mrf.mxu1  ;;  %v5594_v36 = vrot.slane %v5592_v43, 1  ;;  %v4718_v43 = vadd.f32 %v15634_v24, %v15153_v21  ;;  %v5596_v21 = vshrl.u32 %v15166_v25, 16  ;;  %v20175_v24 = vld [vmem:[#allocation94_spill] sm:$0xff]  ;;  %v20181_v25 = vld [vmem:[#allocation77_spill] sm:$0xff] }
 0x3f5   : > { %v15731_v53 = vpop.f32.mrf.mxu0  ;;  %v5595_v13 = vsel %vm4094_vm2, %v5591_v12, %v5594_v36  ;;  %v5159_v63 = vadd.f32 %v15159_v37, %v4718_v43  ;;  %v5598_v37 = vor.u32 %v5596_v21, %v5594_v36  ;;  %v20177_v43 = vld [vmem:[#allocation151_spill] sm:$0xff]  ;;  %v4723_v36 = vadd.f32 %v15672_v39, %v20181_v25 }
 0x3f6   : > { %9377 = vmatmul.msk.bf16.gmra.mxu1 %vm4345_vm3, %v14952_v60  ;;  %v20190_v39 = vld [vmem:[#allocation19_spill] sm:$0xff] }
 0x3f8   : > { %v5384_v44 = vpop.f32.mrf.mxu3 }
 0x3f9   : > { %v15735_v52 = vadd.f32 %v5384_v44, %v5157_v8  ;;  %v20171_v44 = vld [vmem:[#allocation52_spill] sm:$0xff] }
 0x3fa   : > { %v15740_v0 = vpop.f32.mrf.mxu2 }
 0x3fb   : > { %v15745_v50 = vpop.f32.mrf.mxu1 }
 0x3fd   : > { %9446 = vmatmul.msk.bf16.gmra.mxu3 %vm4345_vm3, %v15074_v19  ;;  %v15748_v3 = vpop.f32.mrf.mxu0 }
 0x3ff   : > { %9537 = vmatmul.msk.bf16.vlgmr.msrb.gmra.mxu2 %vm4345_vm3, %v20171_v44  ;;  %v20176_v44 = vld [vmem:[#allocation140_spill] sm:$0xff] }
 0x400   : > { %v5387_v8 = vpop.f32.mrf.mxu3  ;;  %9469 = vmatmul.msk.bf16.gmra.mxu0 %vm4345_vm3, %v5595_v13 }
 0x401   : > { %v15752_v40 = vadd.f32 %v5387_v8, %v5158_v33  ;;  %v4721_v33 = vadd.f32 %v15652_v15, %v15177_v7  ;;  %v5599_v8 = vshll.u32 %v20175_v24, 16 }
 0x402   : > { %v15758_v34 = vpop.f32.mrf.mxu2 }
 0x403   : > { %v15760_v60 = vpop.f32.mrf.mxu1  ;;  %v5160_v47 = vadd.f32 %v20177_v43, %v4721_v33  ;;  %v20183_v33 = vld [vmem:[#allocation116_spill] sm:$0xff] }
 0x404   : > { %v5161_v43 = vadd.f32 %v20183_v33, %v4723_v36  ;;  %v5603_v36 = vshrl.u32 %v20175_v24, 16 }
 0x405   : > { %v15763_v59 = vpop.f32.mrf.mxu0 }
 0x406   : > { %20172 = vst [vmem:[#allocation136_spill] sm:$0xff] %v15763_v59  ;;  %9378 = vmatmul.msk.bf16.gmra.mxu1 %vm4345_vm3, %v14989_v61  ;;  %v20185_v59 = vld [vmem:[#allocation43_spill] sm:$0xff] }
 0x408   : > { %v5389_v11 = vpop.f32.mrf.mxu3 }
 0x409   : > { %v15767_v26 = vadd.f32 %v5389_v11, %v5159_v63  ;;  %v5601_v63 = vrot.slane %v5599_v8, 1 }
 0x40a   : > { %v15771_v12 = vpop.f32.mrf.mxu2 }
 0x40b   : > { %20173 = vst [vmem:[#allocation170_spill] sm:$0xff] %v15767_v26  ;;  %v15777_v13 = vpop.f32.mrf.mxu1  ;;  %v20179_v26 = vld [vmem:[#allocation72_spill] sm:$0xff]  ;;  %v5602_v15 = vsel %vm4094_vm2, %v5598_v37, %v5601_v63 }
 0x40c   : > { %20174 = vst [vmem:[#allocation30_spill] sm:$0xff] %v15771_v12 }
 0x40d   : > { %9447 = vmatmul.msk.bf16.gmra.mxu3 %vm4345_vm3, %v20176_v44  ;;  %v15780_v61 = vpop.f32.mrf.mxu0 }
 0x40e   : > { %20178 = vst [vmem:[#allocation163_spill] sm:$0xff] %v15780_v61 }
 0x40f   : > { %9538 = vmatmul.msk.bf16.gmra.mxu2 %vm4345_vm3, %v20179_v26  ;;  %v20187_v26 = vld [vmem:[#allocation148_spill] sm:$0xff] }
 0x410   : > { %v5392_v11 = vpop.f32.mrf.mxu3  ;;  %9470 = vmatmul.msk.bf16.gmra.mxu0 %vm4345_vm3, %v5602_v15  ;;  %v5606_v37 = vshll.u32 %v20187_v26, 16 }
 0x411   : > { %v15784_v7 = vadd.f32 %v5392_v11, %v5160_v47  ;;  %v20188_v11 = vld [vmem:[#allocation58_spill] sm:$0xff] }
 0x412   : > { %v15790_v21 = vpop.f32.mrf.mxu2  ;;  %v4726_v15 = vadd.f32 %v15694_v35, %v20188_v11  ;;  %v5608_v33 = vrot.slane %v5606_v37, 1 }
 0x413   : > { %20180 = vst [vmem:[#allocation111_spill] sm:$0xff] %v15784_v7  ;;  %v15792_v12 = vpop.f32.mrf.mxu1  ;;  %v20191_v7 = vld [vmem:[#allocation178_spill] sm:$0xff] }
 0x414   : > { %20182 = vst [vmem:[#allocation70_spill] sm:$0xff] %v15790_v21  ;;  %v5162_v21 = vadd.f32 %v20191_v7, %v4726_v15  ;;  %v20197_v7 = vld [vmem:[#allocation128_spill] sm:$0xff] }
 0x415   : > { %v15795_v8 = vpop.f32.mrf.mxu0 }
 0x416   : > { %20184 = vst [vmem:[#allocation48_spill] sm:$0xff] %v15795_v8  ;;  %9379 = vmatmul.msk.bf16.gmra.mxu1 %vm4345_vm3, %v20185_v59 }
 0x418   : > { %v5394_v61 = vpop.f32.mrf.mxu3 }
 0x419   : > { %v15799_v47 = vadd.f32 %v5394_v61, %v5161_v43  ;;  %v5605_v61 = vor.u32 %v5603_v36, %v5601_v63 }
 0x41a   : > { %v15804_v25 = vpop.f32.mrf.mxu2 }
 0x41b   : > { %20186 = vst [vmem:[#allocation171_spill] sm:$0xff] %v15799_v47  ;;  %v15809_v8 = vpop.f32.mrf.mxu1  ;;  %v20193_v47 = vld [vmem:[#allocation80_spill] sm:$0xff]  ;;  %v5609_v11 = vsel %vm4094_vm2, %v5605_v61, %v5608_v33 }
 0x41c   : > { %20189 = vst [vmem:[#allocation60_spill] sm:$0xff] %v15804_v25  ;;  %v20195_v25 = vld [vmem:[#allocation179_spill] sm:$0xff] }
 0x41d   : > { %9448 = vmatmul.msk.bf16.gmra.mxu3 %vm4345_vm3, %v20190_v39  ;;  %v15812_v59 = vpop.f32.mrf.mxu0  ;;  %v4728_v37 = vadd.f32 %v15712_v56, %v20195_v25  ;;  %v20204_v25 = vld [vmem:[#allocation12_spill] sm:$0xff] }
 0x41e   : > { %20192 = vst [vmem:[#allocation65_spill] sm:$0xff] %v15812_v59  ;;  %v20199_v59 = vld [vmem:[#allocation102_spill] sm:$0xff] }
 0x41f   : > { %9539 = vmatmul.msk.bf16.gmra.mxu2 %vm4345_vm3, %v20193_v47  ;;  %v5163_v15 = vadd.f32 %v20197_v7, %v4728_v37  ;;  %v20201_v47 = vld [vmem:[#allocation42_spill] sm:$0xff]  ;;  %v5610_v37 = vshrl.u32 %v20187_v26, 16 }
 0x420   : > { %v5397_v43 = vpop.f32.mrf.mxu3  ;;  %9471 = vmatmul.msk.bf16.gmra.mxu0 %vm4345_vm3, %v5609_v11  ;;  %v5613_v61 = vshll.u32 %v20201_v47, 16 }
 0x421   : > { %v15816_v35 = vadd.f32 %v5397_v43, %v5162_v21  ;;  %v20202_v43 = vld [vmem:[#allocation182_spill] sm:$0xff] }
 0x422   : > { %v15822_v24 = vpop.f32.mrf.mxu2  ;;  %v4731_v11 = vadd.f32 %v15728_v48, %v20202_v43  ;;  %v5615_v7 = vrot.slane %v5613_v61, 1 }
 0x423   : > { %20194 = vst [vmem:[#allocation115_spill] sm:$0xff] %v15816_v35  ;;  %v15824_v39 = vpop.f32.mrf.mxu1  ;;  %v20205_v35 = vld [vmem:[#allocation185_spill] sm:$0xff] }
 0x424   : > { %20196 = vst [vmem:[#allocation35_spill] sm:$0xff] %v15822_v24  ;;  %v5164_v24 = vadd.f32 %v20205_v35, %v4731_v11  ;;  %v20211_v35 = vld [vmem:[#allocation157_spill] sm:$0xff] }
 0x425   : > { %v15827_v63 = vpop.f32.mrf.mxu0 }
 0x426   : > { %20198 = vst [vmem:[#allocation8_spill] sm:$0xff] %v15827_v63  ;;  %9380 = vmatmul.msk.bf16.gmra.mxu1 %vm4345_vm3, %v20199_v59 }
 0x428   : > { %v5399_v36 = vpop.f32.mrf.mxu3 }
 0x429   : > { %v15831_v21 = vadd.f32 %v5399_v36, %v5163_v15  ;;  %v5612_v15 = vor.u32 %v5610_v37, %v5608_v33 }
 0x42a   : > { %v15836_v56 = vpop.f32.mrf.mxu2 }
 0x42b   : > { %20200 = vst [vmem:[#allocation86_spill] sm:$0xff] %v15831_v21  ;;  %v15841_v63 = vpop.f32.mrf.mxu1  ;;  %v20207_v21 = vld [vmem:[#allocation95_spill] sm:$0xff]  ;;  %v5616_v43 = vsel %vm4094_vm2, %v5612_v15, %v5615_v7 }
 0x42c   : > { %20203 = vst [vmem:[#allocation23_spill] sm:$0xff] %v15836_v56  ;;  %v20209_v56 = vld [vmem:[#allocation186_spill] sm:$0xff] }
 0x42d   : > { %9449 = vmatmul.msk.bf16.gmra.mxu3 %vm4345_vm3, %v20204_v25  ;;  %v15844_v59 = vpop.f32.mrf.mxu0  ;;  %v4733_v61 = vadd.f32 %v15745_v50, %v20209_v56  ;;  %v5617_v50 = vshrl.u32 %v20201_v47, 16  ;;  %v20216_v56 = vld [vmem:[#allocation141_spill] sm:$0xff] }
 0x42e   : > { %20206 = vst [vmem:[#allocation88_spill] sm:$0xff] %v15844_v59  ;;  %v20222_v47 = vld [vmem:[#allocation193_spill] sm:$0xff]  ;;  %v20233_v59 = vld [vmem:[#allocation195_spill] sm:$0xff] }
 0x42f   : > { %9540 = vmatmul.msk.bf16.gmra.mxu2 %vm4345_vm3, %v20207_v21  ;;  %v5165_v11 = vadd.f32 %v20211_v35, %v4733_v61  ;;  %v20214_v21 = vld [vmem:[#allocation189_spill] sm:$0xff]  ;;  %v5619_v61 = vor.u32 %v5617_v50, %v5615_v7  ;;  %v4738_v7 = vadd.f32 %v15777_v13, %v20222_v47  ;;  %v20230_v47 = vld [vmem:[#allocation34_spill] sm:$0xff] }
 0x430   : > { %v5402_v36 = vpop.f32.mrf.mxu3  ;;  %9472 = vmatmul.msk.bf16.gmra.mxu0 %vm4345_vm3, %v5616_v43  ;;  %v4736_v15 = vadd.f32 %v15760_v60, %v20214_v21  ;;  %v5620_v43 = vshll.u32 %v20216_v56, 16 }
 0x431   : > { %v15848_v48 = vadd.f32 %v5402_v36, %v5164_v24 }
 0x432   : > { %v15854_v26 = vpop.f32.mrf.mxu2 }
 0x433   : > { %20208 = vst [vmem:[#allocation100_spill] sm:$0xff] %v15848_v48  ;;  %v15856_v25 = vpop.f32.mrf.mxu1  ;;  %v20217_v48 = vld [vmem:[#allocation57_spill] sm:$0xff] }
 0x434   : > { %20210 = vst [vmem:[#allocation93_spill] sm:$0xff] %v15854_v26 }
 0x435   : > { %v15859_v33 = vpop.f32.mrf.mxu0 }
 0x436   : > { %20212 = vst [vmem:[#allocation107_spill] sm:$0xff] %v15859_v33  ;;  %9381 = vmatmul.msk.bf16.gmra.mxu1 %vm4345_vm3, %v15121_v28  ;;  %v20218_v33 = vld [vmem:[#allocation192_spill] sm:$0xff] }
 0x437   : > { %v5166_v26 = vadd.f32 %v20218_v33, %v4736_v15  ;;  %v20224_v33 = vld [vmem:[#allocation105_spill] sm:$0xff] }
 0x438   : > { %v5404_v37 = vpop.f32.mrf.mxu3  ;;  %v5167_v15 = vadd.f32 %v20224_v33, %v4738_v7  ;;  %v5624_v7 = vshrl.u32 %v20216_v56, 16 }
 0x439   : > { %v15863_v24 = vadd.f32 %v5404_v37, %v5165_v11  ;;  %v5622_v11 = vrot.slane %v5620_v43, 1 }
 0x43a   : > { %v15867_v36 = vpop.f32.mrf.mxu2 }
 0x43b   : > { %20213 = vst [vmem:[#allocation9_spill] sm:$0xff] %v15863_v24  ;;  %v15873_v35 = vpop.f32.mrf.mxu1  ;;  %v20220_v24 = vld [vmem:[#allocation119_spill] sm:$0xff]  ;;  %v5623_v21 = vsel %vm4094_vm2, %v5619_v61, %v5622_v11 }
 0x43c   : > { %20215 = vst [vmem:[#allocation61_spill] sm:$0xff] %v15867_v36 }
 0x43d   : > { %9450 = vmatmul.msk.bf16.gmra.mxu3 %vm4345_vm3, %v20217_v48  ;;  %v15876_v28 = vpop.f32.mrf.mxu0  ;;  %v20239_v48 = vld [vmem:[#allocation124_spill] sm:$0xff] }
 0x43e   : > { %20219 = vst [vmem:[#allocation52_spill] sm:$0xff] %v15876_v28 }
 0x43f   : > { %9541 = vmatmul.msk.bf16.gmra.mxu2 %vm4345_vm3, %v20220_v24  ;;  %v20227_v24 = vld [vmem:[#allocation31_spill] sm:$0xff] }
 0x440   : > { %v5407_v37 = vpop.f32.mrf.mxu3  ;;  %9473 = vmatmul.msk.bf16.gmra.mxu0 %vm4345_vm3, %v5623_v21  ;;  %v5627_v61 = vshll.u32 %v20227_v24, 16 }
 0x441   : > { %v15880_v60 = vadd.f32 %v5407_v37, %v5166_v26  ;;  %v20228_v37 = vld [vmem:[#allocation134_spill] sm:$0xff] }
 0x442   : > { %v15886_v50 = vpop.f32.mrf.mxu2  ;;  %v4741_v21 = vadd.f32 %v15792_v12, %v20228_v37  ;;  %v5629_v33 = vrot.slane %v5627_v61, 1  ;;  %v20236_v61 = vld [vmem:[#allocation166_spill] sm:$0xff] }
 0x443   : > { %20221 = vst [vmem:[#allocation151_spill] sm:$0xff] %v15880_v60  ;;  %v15888_v36 = vpop.f32.mrf.mxu1  ;;  %v20231_v60 = vld [vmem:[#allocation167_spill] sm:$0xff]  ;;  %v4743_v56 = vadd.f32 %v15809_v8, %v20236_v61  ;;  %v20245_v61 = vld [vmem:[#allocation125_spill] sm:$0xff] }
 0x444   : > { %20223 = vst [vmem:[#allocation72_spill] sm:$0xff] %v15886_v50  ;;  %v5168_v50 = vadd.f32 %v20231_v60, %v4741_v21 }
 0x445   : > { %v15891_v43 = vpop.f32.mrf.mxu0 }
 0x446   : > { %20225 = vst [vmem:[#allocation77_spill] sm:$0xff] %v15891_v43  ;;  %9382 = vmatmul.msk.bf16.gmra.mxu1 %vm4345_vm3, %v15125_v49 }
 0x448   : > { %v5409_v28 = vpop.f32.mrf.mxu3 }
 0x449   : > { %v15895_v26 = vadd.f32 %v5409_v28, %v5167_v15  ;;  %v5626_v28 = vor.u32 %v5624_v7, %v5622_v11  ;;  %v20238_v11 = vld [vmem:[#allocation3_spill] sm:$0xff] }
 0x44a   : > { %v15900_v13 = vpop.f32.mrf.mxu2  ;;  %v5169_v21 = vadd.f32 %v20238_v11, %v4743_v56  ;;  %v5631_v56 = vshrl.u32 %v20227_v24, 16 }
 0x44b   : > { %20226 = vst [vmem:[#allocation116_spill] sm:$0xff] %v15895_v26  ;;  %v15905_v43 = vpop.f32.mrf.mxu1  ;;  %v20232_v26 = vld [vmem:[#allocation149_spill] sm:$0xff] }
 0x44c   : > { %20229 = vst [vmem:[#allocation58_spill] sm:$0xff] %v15900_v13  ;;  %v5630_v13 = vsel %vm4094_vm2, %v5626_v28, %v5629_v33  ;;  %v20243_v28 = vld [vmem:[#allocation145_spill] sm:$0xff] }
 0x44d   : > { %9451 = vmatmul.msk.bf16.gmra.mxu3 %vm4345_vm3, %v20230_v47  ;;  %v5882_v49 = vpop.f32.mrf.mxu0  ;;  %v4746_v8 = vadd.f32 %v15824_v39, %v20243_v28 }
 0x44e   : > { %v15911_v12 = vadd.f32 %v5882_v49, %v20233_v59 }
 0x44f   : > { %9542 = vmatmul.msk.bf16.gmra.mxu2 %vm4345_vm3, %v20232_v26 }
 0x450   : > { %v5412_v15 = vpop.f32.mrf.mxu3  ;;  %20234 = vst [vmem:[#allocation178_spill] sm:$0xff] %v15911_v12  ;;  %9474 = vmatmul.msk.bf16.gmra.mxu0 %vm4345_vm3, %v5630_v13  ;;  %v20247_v12 = vld [vmem:[#allocation92_spill] sm:$0xff] }
 0x451   : > { %v15913_v37 = vadd.f32 %v5412_v15, %v5168_v50  ;;  %v20242_v50 = vld [vmem:[#allocation85_spill] sm:$0xff] }
 0x452   : > { %v15919_v47 = vpop.f32.mrf.mxu2  ;;  %v5634_v13 = vshll.u32 %v20242_v50, 16 }
 0x453   : > { %20235 = vst [vmem:[#allocation80_spill] sm:$0xff] %v15913_v37  ;;  %v15921_v60 = vpop.f32.mrf.mxu1 }
 0x454   : > { %20237 = vst [vmem:[#allocation179_spill] sm:$0xff] %v15919_v47  ;;  %v5636_v11 = vrot.slane %v5634_v13, 1  ;;  %v20249_v13 = vld [vmem:[#allocation11_spill] sm:$0xff]  ;;  %v20251_v47 = vld [vmem:[#allocation173_spill] sm:$0xff] }
 0x455   : > { %v5884_v7 = vpop.f32.mrf.mxu0  ;;  %v4748_v24 = vadd.f32 %v15841_v63, %v20249_v13  ;;  %v20253_v63 = vld [vmem:[#allocation96_spill] sm:$0xff] }
 0x456   : > { %v15925_v49 = vadd.f32 %v5884_v7, %v20239_v48  ;;  %9383 = vmatmul.msk.bf16.gmra.mxu1 %vm4345_vm3, %v20123_v31  ;;  %v20246_v7 = vld [vmem:[#allocation10_spill] sm:$0xff] }
 0x458   : > { %v5414_v26 = vpop.f32.mrf.mxu3  ;;  %20240 = vst [vmem:[#allocation128_spill] sm:$0xff] %v15925_v49  ;;  %v5170_v49 = vadd.f32 %v20246_v7, %v4746_v8 }
 0x459   : > { %v15929_v59 = vadd.f32 %v5414_v26, %v5169_v21  ;;  %v5633_v21 = vor.u32 %v5631_v56, %v5629_v33  ;;  %v20250_v33 = vld [vmem:[#allocation122_spill] sm:$0xff] }
 0x45a   : > { %v15934_v15 = vpop.f32.mrf.mxu2  ;;  %v5171_v56 = vadd.f32 %v20250_v33, %v4748_v24  ;;  %v5638_v33 = vshrl.u32 %v20242_v50, 16 }
 0x45b   : > { %20241 = vst [vmem:[#allocation182_spill] sm:$0xff] %v15929_v59  ;;  %v15939_v48 = vpop.f32.mrf.mxu1  ;;  %v20248_v59 = vld [vmem:[#allocation4_spill] sm:$0xff] }
 0x45c   : > { %20244 = vst [vmem:[#allocation185_spill] sm:$0xff] %v15934_v15  ;;  %v5637_v15 = vsel %vm4094_vm2, %v5633_v21, %v5636_v11  ;;  %v20255_v21 = vld [vmem:[#allocation135_spill] sm:$0xff] }
 0x45d   : > { %9452 = vmatmul.msk.bf16.gmra.mxu3 %vm4345_vm3, %v20245_v61  ;;  %v5887_v31 = vpop.f32.mrf.mxu0 }
 0x45e   : > { %v15945_v39 = vadd.f32 %v5887_v31, %v20248_v59  ;;  %v4751_v59 = vadd.f32 %v15856_v25, %v15481_v2 }
 0x45f   : > { %9543 = vmatmul.msk.bf16.gmra.mxu2 %vm4345_vm3, %v20247_v12 }
 0x460   : > { %v5417_v26 = vpop.f32.mrf.mxu3  ;;  %9475 = vmatmul.msk.bf16.gmra.mxu0 %vm4345_vm3, %v5637_v15  ;;  %v20254_v15 = vunpack.c.l.b16 %v20253_v63  ;;  %v5172_v2 = vadd.f32 %v15511_v1, %v4751_v59 }
 0x461   : > { %v15947_v28 = vadd.f32 %v5417_v26, %v5170_v49  ;;  %v20256_v26 = vunpack.c.l.b16 %v20255_v21  ;;  %v20257_v21 = vld [vmem:[#allocation162_spill] sm:$0xff] }
 0x462   : > { %v15953_v37 = vpop.f32.mrf.mxu2 }
 0x463   : > { %v15955_v8 = vpop.f32.mrf.mxu1  ;;  %v15971_v13 = vpack.c.b16 %v20256_v26, %v20254_v15  ;;  %v20258_v15 = vld [vmem:[#allocation7_spill] sm:$0xff] }
 0x465   : > { %v5889_v7 = vpop.f32.mrf.mxu0 }
 0x466   : > { %v15959_v31 = vadd.f32 %v5889_v7, %v20251_v47  ;;  %9384 = vmatmul.msk.bf16.gmra.mxu1 %vm4345_vm3, %v20141_v42  ;;  %v5641_v47 = vshll.u32 %v20125_v27, 16 }
 0x468   : > { %v5419_v12 = vpop.f32.mrf.mxu3  ;;  %20252 = vst [vmem:[#allocation95_spill] sm:$0xff] %v15959_v31 }
 0x469   : > { %v15963_v49 = vadd.f32 %v5419_v12, %v5171_v56  ;;  %v5640_v56 = vor.u32 %v5638_v33, %v5636_v11  ;;  %v5643_v12 = vrot.slane %v5641_v47, 1  ;;  %v4753_v11 = vadd.f32 %v15873_v35, %v15526_v9  ;;  %v20260_v35 = vld [vmem:[#allocation129_spill] sm:$0xff] }
 0x46a   : > { %v15973_v24 = vpop.f32.mrf.mxu2  ;;  %v4756_v9 = vadd.f32 %v15888_v36, %v15551_v10 }
 0x46b   : > { %v15979_v7 = vpop.f32.mrf.mxu1  ;;  %v5644_v31 = vsel %vm4094_vm2, %v5640_v56, %v5643_v12  ;;  %v5173_v59 = vadd.f32 %v15536_v14, %v4753_v11 }
 0x46d   : > { %9453 = vmatmul.msk.bf16.gmra.mxu3 %vm4345_vm3, %v15971_v13  ;;  %v5892_v25 = vpop.f32.mrf.mxu0 }
 0x46e   : > { %v15985_v26 = vadd.f32 %v5892_v25, %v20258_v15 }
 0x46f   : > { %9544 = vmatmul.msk.bf16.gmra.mxu2 %vm4345_vm3, %v20257_v21 }
 0x470   : > { %v5422_v63 = vpop.f32.mrf.mxu3  ;;  %9476 = vmatmul.msk.bf16.gmra.mxu0 %vm4345_vm3, %v5644_v31  ;;  %v5648_v31 = vshll.u32 %v20140_v55, 16 }
 0x471   : > { %v15987_v42 = vadd.f32 %v5422_v63, %v5172_v2  ;;  %v20261_v2 = vunpack.c.l.b16 %v20260_v35  ;;  %v20262_v63 = vld [vmem:[#allocation142_spill] sm:$0xff]  ;;  %v20264_v35 = vld [vmem:[#allocation103_spill] sm:$0xff] }
 0x472   : > { %v15993_v33 = vpop.f32.mrf.mxu2  ;;  %v20263_v15 = vunpack.c.l.b16 %v20262_v63 }
 0x473   : > { %v15995_v1 = vpop.f32.mrf.mxu1 }
 0x474   : > { %v16012_v14 = vpack.c.b16 %v20263_v15, %v20261_v2 }
 0x475   : > { %v5894_v47 = vpop.f32.mrf.mxu0 }
 0x476   : > { %v15999_v25 = vadd.f32 %v5894_v47, %v15531_v5  ;;  %9385 = vmatmul.msk.bf16.gmra.mxu1 %vm4345_vm3, %v20152_v30  ;;  %v5645_v5 = vshrl.u32 %v20125_v27, 16 }
 0x478   : > { %v5424_v21 = vpop.f32.mrf.mxu3  ;;  %20259 = vst [vmem:[#allocation186_spill] sm:$0xff] %v15999_v25  ;;  %v5647_v10 = vor.u32 %v5645_v5, %v5643_v12 }
 0x479   : > { %v16003_v56 = vadd.f32 %v5424_v21, %v5173_v59  ;;  %v5650_v59 = vrot.slane %v5648_v31, 1  ;;  %v5174_v21 = vadd.f32 %v15575_v57, %v4756_v9  ;;  %v4758_v31 = vadd.f32 %v15905_v43, %v15580_v32  ;;  %v20268_v43 = vld [vmem:[#allocation165_spill] sm:$0xff] }
 0x47a   : > { %v16014_v11 = vpop.f32.mrf.mxu2  ;;  %v4761_v32 = vadd.f32 %v15921_v60, %v15604_v6 }
 0x47b   : > { %v16019_v47 = vpop.f32.mrf.mxu1  ;;  %v5651_v15 = vsel %vm4094_vm2, %v5647_v10, %v5650_v59  ;;  %v5175_v12 = vadd.f32 %v15592_v20, %v4758_v31  ;;  %v20269_v10 = vunpack.c.l.b16 %v20268_v43  ;;  %v20273_v43 = vld [vmem:[#allocation41_spill] sm:$0xff] }
 0x47d   : > { %9454 = vmatmul.msk.bf16.gmra.mxu3 %vm4345_vm3, %v16012_v14  ;;  %v5897_v30 = vpop.f32.mrf.mxu0 }
 0x47e   : > { %v16025_v2 = vadd.f32 %v5897_v30, %v15558_v4 }
 0x47f   : > { %9545 = vmatmul.msk.bf16.gmra.mxu2 %vm4345_vm3, %v20264_v35 }
 0x480   : > { %v5427_v36 = vpop.f32.mrf.mxu3  ;;  %20265 = vst [vmem:[#allocation157_spill] sm:$0xff] %v16025_v2  ;;  %9477 = vmatmul.msk.bf16.gmra.mxu0 %vm4345_vm3, %v5651_v15 }
 0x481   : > { %v16027_v63 = vadd.f32 %v5427_v36, %v5174_v21  ;;  %v5655_v21 = vshll.u32 %v20153_v62, 16  ;;  %v20270_v36 = vld [vmem:[#allocation66_spill] sm:$0xff] }
 0x482   : > { %v16033_v25 = vpop.f32.mrf.mxu2  ;;  %v20271_v35 = vunpack.c.l.b16 %v20270_v36 }
 0x483   : > { %v16035_v57 = vpop.f32.mrf.mxu1  ;;  %v5657_v31 = vrot.slane %v5655_v21, 1  ;;  %v20277_v21 = vld [vmem:[#allocation123_spill] sm:$0xff] }
 0x484   : > { %v16052_v20 = vpack.c.b16 %v20271_v35, %v20269_v10  ;;  %v20274_v10 = vld [vmem:[#allocation132_spill] sm:$0xff]  ;;  %v4763_v2 = vadd.f32 %v15939_v48, %v20277_v21 }
 0x485   : > { %v5899_v9 = vpop.f32.mrf.mxu0  ;;  %v20285_v21 = vld [vmem:[#allocation160_spill] sm:$0xff] }
 0x486   : > { %v16039_v4 = vadd.f32 %v5899_v9, %v15585_v17  ;;  %9386 = vmatmul.msk.bf16.gmra.mxu1 %vm4345_vm3, %v20164_v29  ;;  %v5652_v17 = vshrl.u32 %v20140_v55, 16  ;;  %v20272_v9 = vld [vmem:[#allocation139_spill] sm:$0xff] }
 0x488   : > { %v5429_v5 = vpop.f32.mrf.mxu3  ;;  %20266 = vst [vmem:[#allocation189_spill] sm:$0xff] %v16039_v4  ;;  %v5654_v6 = vor.u32 %v5652_v17, %v5650_v59  ;;  %v20278_v59 = vld [vmem:[#allocation16_spill] sm:$0xff] }
 0x489   : > { %v16043_v30 = vadd.f32 %v5429_v5, %v5175_v12  ;;  %v5176_v5 = vadd.f32 %v20272_v9, %v4761_v32  ;;  %v4824_v17 = vrot.slane %v20278_v59, 1  ;;  %v20279_v9 = vld [vmem:[#allocation138_spill] sm:$0xff]  ;;  %v20286_v59 = vld [vmem:[#allocation27_spill] sm:$0xff] }
 0x48a   : > { %v16054_v15 = vpop.f32.mrf.mxu2  ;;  %v5658_v4 = vsel %vm4094_vm2, %v5654_v6, %v5657_v31  ;;  %v20282_v6 = vld [vmem:[#allocation159_spill] sm:$0xff] }
 0x48b   : > { %20267 = vst [vmem:[#allocation192_spill] sm:$0xff] %v16043_v30  ;;  %v16059_v12 = vpop.f32.mrf.mxu1 }
 0x48d   : > { %9455 = vmatmul.msk.bf16.gmra.mxu3 %vm4345_vm3, %v16052_v20  ;;  %v5902_v29 = vpop.f32.mrf.mxu0 }
 0x48e   : > { %v16065_v36 = vadd.f32 %v5902_v29, %v20274_v10  ;;  %v20280_v29 = vld [vmem:[#allocation20_spill] sm:$0xff] }
 0x48f   : > { %9546 = vmatmul.msk.bf16.gmra.mxu2 %vm4345_vm3, %v20273_v43  ;;  %v5177_v43 = vadd.f32 %v20279_v9, %v4763_v2  ;;  %v20281_v10 = vrot.slane %v20280_v29, 1  ;;  %v4766_v2 = vadd.f32 %v15955_v8, %v20285_v21  ;;  %v20287_v9 = vunpack.c.l.b16 %v20286_v59  ;;  %v20288_v29 = vld [vmem:[#allocation113_spill] sm:$0xff] }
 0x490   : > { %v5432_v60 = vpop.f32.mrf.mxu3  ;;  %20275 = vst [vmem:[#allocation119_spill] sm:$0xff] %v16065_v36  ;;  %9478 = vmatmul.msk.bf16.gmra.mxu0 %vm4345_vm3, %v5658_v4  ;;  %v9814_v4 = vld [vmem:[%s18339_s3 + $0x28] sm:$0xff] }
 0x491   : > { %v16067_v35 = vadd.f32 %v5432_v60, %v5176_v5  ;;  %v4826_v5 = vsel %vm1130_vm0, %v4824_v17, %v20281_v10  ;;  %6254 = vmatpush.bf16.msrb.mxu1 %v9814_v4  ;;  %v5178_v8 = vadd.f32 %v15650_v38, %v4766_v2  ;;  %v20296_v38 = vld [vmem:[#allocation47_spill] sm:$0xff] }
 0x492   : > { %v16073_v55 = vpop.f32.mrf.mxu2  ;;  %v6091_v2 = vrot.slane %v20296_v38, 1  ;;  %v20303_v38 = vld [vmem:[#allocation50_spill] sm:$0xff] }
 0x493   : > { %20276 = vst [vmem:[#allocation193_spill] sm:$0xff] %v16067_v35  ;;  %v16075_v32 = vpop.f32.mrf.mxu1  ;;  %v20289_v35 = vunpack.c.l.b16 %v20288_v29 }
 0x495   : > { %v5904_v30 = vpop.f32.mrf.mxu0  ;;  %v16097_v17 = vpack.c.b16 %v20289_v35, %v20287_v9  ;;  %v20292_v35 = vld [vmem:[#allocation71_spill] sm:$0xff] }
 0x496   : > { %v16083_v36 = vadd.f32 %v5904_v30, %v20282_v6  ;;  %9393 = vmatmul.msk.bf16.vlgmr.msra.gmra.mxu1 %vm4345_vm3, %v4826_v5  ;;  %v5659_v30 = vshrl.u32 %v20153_v62, 16  ;;  %v20293_v9 = vld [vmem:[#allocation67_spill] sm:$0xff] }
 0x497   : > { %20290 = vst [vmem:[#allocation167_spill] sm:$0xff] %v16097_v17 }
 0x498   : > { %v5434_v60 = vpop.f32.mrf.mxu3  ;;  %20283 = vst [vmem:[#allocation105_spill] sm:$0xff] %v16083_v36  ;;  %v5661_v5 = vor.u32 %v5659_v30, %v5657_v31  ;;  %v20295_v31 = vld [vmem:[#allocation51_spill] sm:$0xff] }
 0x499   : > { %v16086_v48 = vadd.f32 %v5434_v60, %v5177_v43  ;;  %v5662_v43 = vshll.u32 %v20166_v46, 16  ;;  %v4768_v30 = vadd.f32 %v15979_v7, %v20295_v31  ;;  %v9816_v31 = vld [vmem:[%s18339_s3 + $0x38] sm:$0xff] }
 0x49a   : > { %v16099_v10 = vpop.f32.mrf.mxu2  ;;  %6767 = vmatpush.bf16.msra.mxu3 %v9816_v31 }
 0x49b   : > { %20284 = vst [vmem:[#allocation134_spill] sm:$0xff] %v16086_v48  ;;  %v16105_v60 = vpop.f32.mrf.mxu1  ;;  %v5664_v21 = vrot.slane %v5662_v43, 1  ;;  %v20297_v48 = vld [vmem:[#allocation101_spill] sm:$0xff] }
 0x49c   : > { %20291 = vst [vmem:[#allocation149_spill] sm:$0xff] %v16099_v10  ;;  %v20298_v10 = vld [vmem:[#allocation133_spill] sm:$0xff] }
 0x49d   : > { %9456 = vmatmul.msk.bf16.gmra.mxu3 %vm4345_vm3, %v16097_v17  ;;  %v5907_v6 = vpop.f32.mrf.mxu0  ;;  %v5665_v4 = vsel %vm4094_vm2, %v5661_v5, %v5664_v21  ;;  %v20299_v5 = vld [vmem:[#allocation54_spill] sm:$0xff] }
 0x49e   : > { %v16111_v29 = vadd.f32 %v5907_v6, %v20293_v9  ;;  %v5179_v6 = vadd.f32 %v20298_v10, %v4768_v30  ;;  %v20301_v10 = vld [vmem:[#allocation46_spill] sm:$0xff] }
 0x49f   : > { %9547 = vmatmul.msk.bf16.gmra.mxu2 %vm4345_vm3, %v20292_v35  ;;  %v6090_v35 = vrot.slane %v20297_v48, 1  ;;  %v4771_v48 = vadd.f32 %v15995_v1, %v15679_v54  ;;  %v20302_v30 = vunpack.c.l.b16 %v20301_v10  ;;  %v20304_v10 = vld [vmem:[#allocation39_spill] sm:$0xff] }
 0x4a0   : > { %v5437_v59 = vpop.f32.mrf.mxu3  ;;  %20294 = vst [vmem:[#allocation195_spill] sm:$0xff] %v16111_v29  ;;  %9479 = vmatmul.msk.bf16.gmra.mxu0 %vm4345_vm3, %v5665_v4  ;;  %v5669_v4 = vshll.u32 %v14946_v58, 16 }
 0x4a1   : > { %v16113_v36 = vadd.f32 %v5437_v59, %v5178_v8  ;;  %v6092_v8 = vsel %vm1130_vm0, %v6090_v35, %v6091_v2  ;;  %v16142_v35 = vpack.c.b16 %v20303_v38, %v20302_v30 }
 0x4a2   : > { %v16119_v62 = vpop.f32.mrf.mxu2 }
 0x4a3   : > { %v16122_v43 = vpop.f32.mrf.mxu1 }
 0x4a5   : > { %v5909_v9 = vpop.f32.mrf.mxu0 }
 0x4a6   : > { %v16128_v29 = vadd.f32 %v5909_v9, %v20299_v5  ;;  %9501 = vmatmul.msk.bf16.vlgmr.msrb.gmra.mxu1 %vm4345_vm3, %v6092_v8  ;;  %v5671_v8 = vrot.slane %v5669_v4, 1  ;;  %v5180_v5 = vadd.f32 %v15692_v18, %v4771_v48  ;;  %v4773_v4 = vadd.f32 %v16019_v47, %v15697_v41  ;;  %v20306_v18 = vld [vmem:[#allocation18_spill] sm:$0xff] }
 0x4a7   : > { %v5676_v41 = vshll.u32 %v15074_v19, 16  ;;  %v4776_v47 = vadd.f32 %v16035_v57, %v15717_v45 }
 0x4a8   : > { %v5439_v59 = vpop.f32.mrf.mxu3  ;;  %20300 = vst [vmem:[#allocation166_spill] sm:$0xff] %v16128_v29 }
 0x4a9   : > { %v16131_v7 = vadd.f32 %v5439_v59, %v5179_v6  ;;  %v5666_v6 = vshrl.u32 %v20166_v46, 16 }
 0x4aa   : > { %v16144_v9 = vpop.f32.mrf.mxu2 }
 0x4ab   : > { %v16149_v59 = vpop.f32.mrf.mxu1  ;;  %v5668_v54 = vor.u32 %v5666_v6, %v5664_v21  ;;  %v6093_v21 = vrot.slane %v20306_v18, 1  ;;  %v5181_v6 = vadd.f32 %v15706_v23, %v4773_v4  ;;  %v20309_v18 = vld [vmem:[#allocation156_spill] sm:$0xff]  ;;  %v5673_v23 = vshrl.u32 %v14946_v58, 16 }
 0x4ad   : > { %9457 = vmatmul.msk.bf16.gmra.mxu3 %vm4345_vm3, %v16142_v35  ;;  %v5912_v29 = vpop.f32.mrf.mxu0  ;;  %v5672_v38 = vsel %vm4094_vm2, %v5668_v54, %v5671_v8 }
 0x4ae   : > { %v16155_v30 = vadd.f32 %v5912_v29, %v15683_v22  ;;  %v6094_v22 = vsel %vm1130_vm0, %v6091_v2, %v6093_v21  ;;  %v5678_v2 = vrot.slane %v5676_v41, 1  ;;  %v4778_v41 = vadd.f32 %v16059_v12, %v15731_v53 }
 0x4af   : > { %9548 = vmatmul.msk.bf16.gmra.mxu2 %vm4345_vm3, %v20304_v10  ;;  %v4781_v53 = vadd.f32 %v16075_v32, %v15748_v3  ;;  %v5680_v12 = vshrl.u32 %v15074_v19, 16  ;;  %v20328_v19 = vld [vmem:[#allocation70_spill] sm:$0xff] }
 0x4b0   : > { %v5442_v1 = vpop.f32.mrf.mxu3  ;;  %20305 = vst [vmem:[#allocation3_spill] sm:$0xff] %v16155_v30  ;;  %9480 = vmatmul.msk.bf16.gmra.mxu0 %vm4345_vm3, %v5672_v38 }
 0x4b1   : > { %v16157_v31 = vadd.f32 %v5442_v1, %v5180_v5  ;;  %v20307_v5 = vld [vmem:[#allocation64_spill] sm:$0xff] }
 0x4b2   : > { %v16163_v46 = vpop.f32.mrf.mxu2 }
 0x4b3   : > { %v16166_v48 = vpop.f32.mrf.mxu1 }
 0x4b5   : > { %v5914_v10 = vpop.f32.mrf.mxu0 }
 0x4b6   : > { %v16171_v1 = vadd.f32 %v5914_v10, %v20307_v5  ;;  %9502 = vmatmul.msk.bf16.gmra.mxu1 %vm4345_vm3, %v6094_v22  ;;  %v5182_v10 = vadd.f32 %v15726_v51, %v4776_v47  ;;  %v20310_v5 = vld [vmem:[#allocation14_spill] sm:$0xff]  ;;  %v20312_v51 = vld [vmem:[#allocation89_spill] sm:$0xff] }
 0x4b8   : > { %v5444_v29 = vpop.f32.mrf.mxu3  ;;  %20308 = vst [vmem:[#allocation124_spill] sm:$0xff] %v16171_v1 }
 0x4b9   : > { %v16174_v38 = vadd.f32 %v5444_v29, %v5181_v6  ;;  %v5675_v6 = vor.u32 %v5673_v23, %v5671_v8  ;;  %v6095_v8 = vrot.slane %v20312_v51, 1  ;;  %v5183_v23 = vadd.f32 %v15740_v0, %v4778_v41  ;;  %v20314_v0 = vld [vmem:[#allocation29_spill] sm:$0xff] }
 0x4ba   : > { %v16179_v54 = vpop.f32.mrf.mxu2 }
 0x4bb   : > { %v16184_v4 = vpop.f32.mrf.mxu1  ;;  %v5679_v1 = vsel %vm4094_vm2, %v5675_v6, %v5678_v2  ;;  %v5683_v6 = vshll.u32 %v20176_v44, 16 }
 0x4bd   : > { %9458 = vmatmul.msk.bf16.gmra.mxu3 %vm4345_vm3, %v20309_v18  ;;  %v5917_v22 = vpop.f32.mrf.mxu0 }
 0x4be   : > { %v16190_v45 = vadd.f32 %v5917_v22, %v15720_v16  ;;  %v6096_v16 = vsel %vm1130_vm0, %v6093_v21, %v6095_v8  ;;  %v5682_v21 = vor.u32 %v5680_v12, %v5678_v2  ;;  %v20318_v2 = vld [vmem:[#allocation136_spill] sm:$0xff] }
 0x4bf   : > { %9549 = vmatmul.msk.bf16.gmra.mxu2 %vm4345_vm3, %v20310_v5  ;;  %v4783_v12 = vadd.f32 %v16105_v60, %v20318_v2  ;;  %v20325_v60 = vld [vmem:[#allocation19_spill] sm:$0xff] }
 0x4c0   : > { %v5447_v29 = vpop.f32.mrf.mxu3  ;;  %20311 = vst [vmem:[#allocation85_spill] sm:$0xff] %v16190_v45  ;;  %9481 = vmatmul.msk.bf16.gmra.mxu0 %vm4345_vm3, %v5679_v1  ;;  %v20326_v2 = vld [vmem:[#allocation163_spill] sm:$0xff] }
 0x4c1   : > { %v16192_v57 = vadd.f32 %v5447_v29, %v5182_v10 }
 0x4c2   : > { %v16198_v30 = vpop.f32.mrf.mxu2 }
 0x4c3   : > { %v16201_v47 = vpop.f32.mrf.mxu1 }
 0x4c5   : > { %v5919_v5 = vpop.f32.mrf.mxu0 }
 0x4c6   : > { %v16206_v22 = vadd.f32 %v5919_v5, %v15735_v52  ;;  %9503 = vmatmul.msk.bf16.gmra.mxu1 %vm4345_vm3, %v6096_v16  ;;  %v5184_v52 = vadd.f32 %v15758_v34, %v4781_v53  ;;  %v20315_v16 = vld [vmem:[#allocation75_spill] sm:$0xff] }
 0x4c8   : > { %v5449_v10 = vpop.f32.mrf.mxu3  ;;  %20313 = vst [vmem:[#allocation145_spill] sm:$0xff] %v16206_v22  ;;  %v20321_v22 = vld [vmem:[#allocation30_spill] sm:$0xff] }
 0x4c9   : > { %v16209_v1 = vadd.f32 %v5449_v10, %v5183_v23  ;;  %v5685_v23 = vrot.slane %v5683_v6, 1 }
 0x4ca   : > { %v16215_v29 = vpop.f32.mrf.mxu2 }
 0x4cb   : > { %v16219_v41 = vpop.f32.mrf.mxu1  ;;  %v5686_v10 = vsel %vm4094_vm2, %v5682_v21, %v5685_v23 }
 0x4cd   : > { %9573 = vmatmul.msk.bf16.vlgmr.msra.gmra.mxu3 %vm4345_vm3, %v20314_v0  ;;  %v5922_v51 = vpop.f32.mrf.mxu0  ;;  %v20319_v0 = vld [vmem:[#allocation131_spill] sm:$0xff] }
 0x4ce   : > { %v16225_v3 = vadd.f32 %v5922_v51, %v15752_v40  ;;  %v6097_v34 = vrot.slane %v20319_v0, 1  ;;  %v20322_v51 = vld [vmem:[#allocation170_spill] sm:$0xff]  ;;  %v4786_v0 = vadd.f32 %v16122_v43, %v20326_v2 }
 0x4cf   : > { %9550 = vmatmul.msk.bf16.gmra.mxu2 %vm4345_vm3, %v20315_v16  ;;  %v5185_v16 = vadd.f32 %v20321_v22, %v4783_v12  ;;  %v5687_v22 = vshrl.u32 %v20176_v44, 16  ;;  %v20336_v44 = vld [vmem:[#allocation60_spill] sm:$0xff] }
 0x4d0   : > { %v5452_v5 = vpop.f32.mrf.mxu3  ;;  %20316 = vst [vmem:[#allocation125_spill] sm:$0xff] %v16225_v3  ;;  %9482 = vmatmul.msk.bf16.gmra.mxu0 %vm4345_vm3, %v5686_v10  ;;  %v6098_v40 = vsel %vm1130_vm0, %v6095_v8, %v6097_v34  ;;  %v5690_v10 = vshll.u32 %v20325_v60, 16  ;;  %v20327_v3 = vld [vmem:[#allocation91_spill] sm:$0xff] }
 0x4d1   : > { %v16227_v32 = vadd.f32 %v5452_v5, %v5184_v52 }
 0x4d2   : > { %v16236_v6 = vpop.f32.mrf.mxu2  ;;  %v5692_v12 = vrot.slane %v5690_v10, 1  ;;  %v20334_v10 = vld [vmem:[#allocation48_spill] sm:$0xff] }
 0x4d3   : > { %20317 = vst [vmem:[#allocation10_spill] sm:$0xff] %v16227_v32  ;;  %v16234_v53 = vpop.f32.mrf.mxu1 }
 0x4d4   : > { %20320 = vst [vmem:[#allocation92_spill] sm:$0xff] %v16236_v6 }
 0x4d5   : > { %v5924_v45 = vpop.f32.mrf.mxu0 }
 0x4d6   : > { %v16241_v5 = vadd.f32 %v5924_v45, %v20322_v51  ;;  %9504 = vmatmul.msk.bf16.gmra.mxu1 %vm4345_vm3, %v6098_v40  ;;  %v5186_v45 = vadd.f32 %v20328_v19, %v4786_v0  ;;  %v4788_v19 = vadd.f32 %v16149_v59, %v20334_v10  ;;  %v20335_v0 = vld [vmem:[#allocation118_spill] sm:$0xff]  ;;  %v20342_v10 = vld [vmem:[#allocation65_spill] sm:$0xff] }
 0x4d8   : > { %v5454_v52 = vpop.f32.mrf.mxu3  ;;  %20323 = vst [vmem:[#allocation4_spill] sm:$0xff] %v16241_v5  ;;  %v5689_v5 = vor.u32 %v5687_v22, %v5685_v23  ;;  %v6099_v23 = vrot.slane %v20335_v0, 1  ;;  %v4791_v0 = vadd.f32 %v16166_v48, %v20342_v10 }
 0x4d9   : > { %v16244_v21 = vadd.f32 %v5454_v52, %v5185_v16  ;;  %v20330_v52 = vld [vmem:[#allocation97_spill] sm:$0xff] }
 0x4da   : > { %v16255_v40 = vpop.f32.mrf.mxu2 }
 0x4db   : > { %20324 = vst [vmem:[#allocation11_spill] sm:$0xff] %v16244_v21  ;;  %v16252_v8 = vpop.f32.mrf.mxu1  ;;  %v20331_v21 = vld [vmem:[#allocation111_spill] sm:$0xff] }
 0x4dc   : > { %20329 = vst [vmem:[#allocation122_spill] sm:$0xff] %v16255_v40  ;;  %v5187_v40 = vadd.f32 %v20336_v44, %v4788_v19  ;;  %v5694_v44 = vshrl.u32 %v20325_v60, 16  ;;  %v20350_v60 = vld [vmem:[#allocation94_spill] sm:$0xff] }
 0x4dd   : > { %9574 = vmatmul.msk.bf16.gmra.mxu3 %vm4345_vm3, %v20327_v3  ;;  %v5927_v51 = vpop.f32.mrf.mxu0  ;;  %v5693_v3 = vsel %vm4094_vm2, %v5689_v5, %v5692_v12 }
 0x4de   : > { %v16260_v43 = vadd.f32 %v5927_v51, %v20331_v21  ;;  %v20337_v51 = vld [vmem:[#allocation171_spill] sm:$0xff] }
 0x4df   : > { %9551 = vmatmul.msk.bf16.gmra.mxu2 %vm4345_vm3, %v20330_v52  ;;  %v6100_v52 = vsel %vm1130_vm0, %v6097_v34, %v6099_v23 }
 0x4e0   : > { %v5457_v16 = vpop.f32.mrf.mxu3  ;;  %20332 = vst [vmem:[#allocation173_spill] sm:$0xff] %v16260_v43  ;;  %9483 = vmatmul.msk.bf16.gmra.mxu0 %vm4345_vm3, %v5693_v3  ;;  %v20343_v43 = vld [vmem:[#allocation40_spill] sm:$0xff] }
 0x4e1   : > { %v16262_v2 = vadd.f32 %v5457_v16, %v5186_v45  ;;  %v20340_v16 = vld [vmem:[#allocation12_spill] sm:$0xff] }
 0x4e2   : > { %v5697_v3 = vshll.u32 %v20340_v16, 16  ;;  %v16280_v59 = vpop.f32.mrf.mxu2 }
 0x4e3   : > { %20333 = vst [vmem:[#allocation96_spill] sm:$0xff] %v16262_v2  ;;  %v16269_v22 = vpop.f32.mrf.mxu1 }
 0x4e4   : > { %20341 = vst [vmem:[#allocation7_spill] sm:$0xff] %v16280_v59  ;;  %v5699_v34 = vrot.slane %v5697_v3, 1  ;;  %v20349_v3 = vld [vmem:[#allocation8_spill] sm:$0xff] }
 0x4e5   : > { %v5929_v32 = vpop.f32.mrf.mxu0  ;;  %v4793_v10 = vadd.f32 %v16184_v4, %v20349_v3  ;;  %v20356_v4 = vld [vmem:[#allocation57_spill] sm:$0xff] }
 0x4e6   : > { %v16274_v45 = vadd.f32 %v5929_v32, %v20337_v51  ;;  %9505 = vmatmul.msk.bf16.gmra.mxu1 %vm4345_vm3, %v6100_v52  ;;  %v20344_v32 = vld [vmem:[#allocation35_spill] sm:$0xff] }
 0x4e7   : > { %v5188_v51 = vadd.f32 %v20344_v32, %v4791_v0  ;;  %v6101_v0 = vrot.slane %v20350_v60, 1  ;;  %v20357_v60 = vld [vmem:[#allocation88_spill] sm:$0xff] }
 0x4e8   : > { %v5459_v21 = vpop.f32.mrf.mxu3  ;;  %20338 = vst [vmem:[#allocation135_spill] sm:$0xff] %v16274_v45  ;;  %v20345_v45 = vld [vmem:[#allocation2_spill] sm:$0xff]  ;;  %v4796_v3 = vadd.f32 %v16201_v47, %v20357_v60 }
 0x4e9   : > { %v16277_v5 = vadd.f32 %v5459_v21, %v5187_v40  ;;  %v5696_v40 = vor.u32 %v5694_v44, %v5692_v12  ;;  %v20352_v44 = vld [vmem:[#allocation23_spill] sm:$0xff] }
 0x4ea   : > { %v16302_v32 = vpop.f32.mrf.mxu2 }
 0x4eb   : > { %20339 = vst [vmem:[#allocation162_spill] sm:$0xff] %v16277_v5  ;;  %v16287_v19 = vpop.f32.mrf.mxu1  ;;  %v20346_v5 = vld [vmem:[#allocation115_spill] sm:$0xff] }
 0x4ec   : > { %20351 = vst [vmem:[#allocation103_spill] sm:$0xff] %v16302_v32 }
 0x4ed   : > { %9575 = vmatmul.msk.bf16.gmra.mxu3 %vm4345_vm3, %v20343_v43  ;;  %v5932_v52 = vpop.f32.mrf.mxu0  ;;  %v5700_v43 = vsel %vm4094_vm2, %v5696_v40, %v5699_v34 }
 0x4ee   : > { %v16293_v2 = vadd.f32 %v5932_v52, %v20346_v5  ;;  %v6102_v5 = vsel %vm1130_vm0, %v6099_v23, %v6101_v0  ;;  %v20353_v52 = vld [vmem:[#allocation86_spill] sm:$0xff] }
 0x4ef   : > { %9552 = vmatmul.msk.bf16.gmra.mxu2 %vm4345_vm3, %v20345_v45  ;;  %v5189_v45 = vadd.f32 %v20352_v44, %v4793_v10  ;;  %v5701_v10 = vshrl.u32 %v20340_v16, 16 }
 0x4f0   : > { %v5462_v21 = vpop.f32.mrf.mxu3  ;;  %20347 = vst [vmem:[#allocation129_spill] sm:$0xff] %v16293_v2  ;;  %9484 = vmatmul.msk.bf16.gmra.mxu0 %vm4345_vm3, %v5700_v43  ;;  %v5704_v43 = vshll.u32 %v20356_v4, 16  ;;  %v20358_v2 = vld [vmem:[#allocation38_spill] sm:$0xff] }
 0x4f1   : > { %v16295_v48 = vadd.f32 %v5462_v21, %v5188_v51 }
 0x4f2   : > { %v5706_v44 = vrot.slane %v5704_v43, 1  ;;  %v20365_v43 = vld [vmem:[#allocation107_spill] sm:$0xff] }
 0x4f3   : > { %20348 = vst [vmem:[#allocation142_spill] sm:$0xff] %v16295_v48  ;;  %v16304_v12 = vpop.f32.mrf.mxu1  ;;  %v16322_v48 = vpop.f32.mrf.mxu2  ;;  %v4798_v16 = vadd.f32 %v16219_v41, %v20365_v43  ;;  %v20372_v41 = vld [vmem:[#allocation99_spill] sm:$0xff]  ;;  %v20373_v43 = vld [vmem:[#allocation34_spill] sm:$0xff] }
 0x4f4   : > { %20359 = vst [vmem:[#allocation139_spill] sm:$0xff] %v16322_v48  ;;  %v20366_v48 = vld [vmem:[#allocation148_spill] sm:$0xff] }
 0x4f5   : > { %v5934_v59 = vpop.f32.mrf.mxu0 }
 0x4f6   : > { %v16309_v21 = vadd.f32 %v5934_v59, %v20353_v52  ;;  %9506 = vmatmul.msk.bf16.gmra.mxu1 %vm4345_vm3, %v6102_v5  ;;  %v20360_v59 = vld [vmem:[#allocation93_spill] sm:$0xff] }
 0x4f7   : > { %v5190_v52 = vadd.f32 %v20360_v59, %v4796_v3  ;;  %v6103_v3 = vrot.slane %v20366_v48, 1  ;;  %v4801_v48 = vadd.f32 %v16234_v53, %v20372_v41 }
 0x4f8   : > { %v5464_v51 = vpop.f32.mrf.mxu3  ;;  %20354 = vst [vmem:[#allocation165_spill] sm:$0xff] %v16309_v21  ;;  %v20361_v21 = vld [vmem:[#allocation82_spill] sm:$0xff] }
 0x4f9   : > { %v16312_v40 = vadd.f32 %v5464_v51, %v5189_v45  ;;  %v5703_v45 = vor.u32 %v5701_v10, %v5699_v34  ;;  %v20367_v34 = vld [vmem:[#allocation61_spill] sm:$0xff] }
 0x4fa   : > { %v5191_v10 = vadd.f32 %v20367_v34, %v4798_v16  ;;  %v5711_v16 = vshll.u32 %v20373_v43, 16  ;;  %v20374_v34 = vld [vmem:[#allocation130_spill] sm:$0xff] }
 0x4fb   : > { %20355 = vst [vmem:[#allocation66_spill] sm:$0xff] %v16312_v40  ;;  %v16320_v23 = vpop.f32.mrf.mxu1  ;;  %v20362_v40 = vld [vmem:[#allocation100_spill] sm:$0xff] }
 0x4fd   : > { %9576 = vmatmul.msk.bf16.gmra.mxu3 %vm4345_vm3, %v20358_v2  ;;  %v5937_v5 = vpop.f32.mrf.mxu0  ;;  %v5707_v2 = vsel %vm4094_vm2, %v5703_v45, %v5706_v44 }
 0x4fe   : > { %v16328_v47 = vadd.f32 %v5937_v5, %v20362_v40  ;;  %v16341_v40 = vpop.f32.mrf.mxu2  ;;  %v20369_v5 = vld [vmem:[#allocation9_spill] sm:$0xff] }
 0x4ff   : > { %9553 = vmatmul.msk.bf16.gmra.mxu2 %vm4345_vm3, %v20361_v21  ;;  %v6104_v21 = vsel %vm1130_vm0, %v6101_v0, %v6103_v3  ;;  %20368 = vst [vmem:[#allocation123_spill] sm:$0xff] %v16341_v40 }
 0x500   : > { %v5467_v51 = vpop.f32.mrf.mxu3  ;;  %20363 = vst [vmem:[#allocation41_spill] sm:$0xff] %v16328_v47  ;;  %9485 = vmatmul.msk.bf16.gmra.mxu0 %vm4345_vm3, %v5707_v2  ;;  %v5708_v2 = vshrl.u32 %v20356_v4, 16 }
 0x501   : > { %v16330_v60 = vadd.f32 %v5467_v51, %v5190_v52 }
 0x502   : > { %v5710_v0 = vor.u32 %v5708_v2, %v5706_v44  ;;  %v20381_v44 = vld [vmem:[#allocation69_spill] sm:$0xff] }
 0x503   : > { %20364 = vst [vmem:[#allocation132_spill] sm:$0xff] %v16330_v60  ;;  %v16337_v59 = vpop.f32.mrf.mxu1  ;;  %v20375_v60 = vld [vmem:[#allocation72_spill] sm:$0xff] }
 0x505   : > { %v5939_v32 = vpop.f32.mrf.mxu0 }
 0x506   : > { %v16344_v51 = vadd.f32 %v5939_v32, %v20369_v5  ;;  %9507 = vmatmul.msk.bf16.gmra.mxu1 %vm4345_vm3, %v6104_v21  ;;  %v5192_v32 = vadd.f32 %v20375_v60, %v4801_v48  ;;  %v4803_v60 = vadd.f32 %v16252_v8, %v20381_v44  ;;  %v20382_v48 = vld [vmem:[#allocation42_spill] sm:$0xff]  ;;  %v5718_v8 = vshll.u32 %v20245_v61, 16 }
 0x507   : > { %v6105_v2 = vrot.slane %v20382_v48, 1  ;;  %v20389_v44 = vld [vmem:[#allocation26_spill] sm:$0xff] }
 0x508   : > { %v5469_v52 = vpop.f32.mrf.mxu3  ;;  %20370 = vst [vmem:[#allocation16_spill] sm:$0xff] %v16344_v51  ;;  %v5713_v51 = vrot.slane %v5711_v16, 1  ;;  %v20383_v16 = vld [vmem:[#allocation17_spill] sm:$0xff]  ;;  %v4806_v48 = vadd.f32 %v16269_v22, %v20389_v44  ;;  %v20396_v22 = vld [vmem:[#allocation190_spill] sm:$0xff] }
 0x509   : > { %v16347_v45 = vadd.f32 %v5469_v52, %v5191_v10  ;;  %v20376_v10 = vld [vmem:[#allocation78_spill] sm:$0xff]  ;;  %v20377_v52 = vld [vmem:[#allocation151_spill] sm:$0xff] }
 0x50a   : > { %v5714_v4 = vsel %vm4094_vm2, %v5710_v0, %v5713_v51 }
 0x50b   : > { %20371 = vst [vmem:[#allocation138_spill] sm:$0xff] %v16347_v45  ;;  %v16355_v47 = vpop.f32.mrf.mxu1  ;;  %v16366_v45 = vpop.f32.mrf.mxu2 }
 0x50c   : > { %20380 = vst [vmem:[#allocation160_spill] sm:$0xff] %v16366_v45  ;;  %v20395_v45 = vld [vmem:[#allocation36_spill] sm:$0xff] }
 0x50d   : > { %9577 = vmatmul.msk.bf16.gmra.mxu3 %vm4345_vm3, %v20374_v34  ;;  %v5942_v5 = vpop.f32.mrf.mxu0  ;;  %v20384_v34 = vld [vmem:[#allocation37_spill] sm:$0xff] }
 0x50e   : > { %v16361_v53 = vadd.f32 %v5942_v5, %v20377_v52  ;;  %v4671_v40 = vadd.f32 %v20384_v34, %v20383_v16  ;;  %v20385_v5 = vld [vmem:[#allocation58_spill] sm:$0xff] }
 0x50f   : > { %9554 = vmatmul.msk.bf16.gmra.mxu2 %vm4345_vm3, %v20376_v10  ;;  %v5193_v52 = vadd.f32 %v20385_v5, %v4803_v60  ;;  %v20390_v16 = vld [vmem:[#allocation158_spill] sm:$0xff] }
 0x510   : > { %v5472_v21 = vpop.f32.mrf.mxu3  ;;  %20378 = vst [vmem:[#allocation20_spill] sm:$0xff] %v16361_v53  ;;  %9486 = vmatmul.msk.bf16.gmra.mxu0 %vm4345_vm3, %v5714_v4  ;;  %v20386_v53 = vld [vmem:[#allocation116_spill] sm:$0xff] }
 0x511   : > { %v16363_v41 = vadd.f32 %v5472_v21, %v5192_v32  ;;  %v6106_v21 = vsel %vm1130_vm0, %v6103_v3, %v6105_v2  ;;  %v5715_v3 = vshrl.u32 %v20373_v43, 16 }
 0x513   : > { %20379 = vst [vmem:[#allocation159_spill] sm:$0xff] %v16363_v41  ;;  %v4990_v10 = vpop.f32.mrf.mxu1  ;;  %v16387_v60 = vpop.f32.mrf.mxu2 }
 0x514   : > { %v5140_v6 = vadd.f32 %v4990_v10, %v4671_v40  ;;  %v20391_v40 = vld [vmem:[#allocation152_spill] sm:$0xff]  ;;  %20392 = vst [vmem:[#allocation71_spill] sm:$0xff] %v16387_v60  ;;  %v20393_v10 = vld [vmem:[#allocation33_spill] sm:$0xff] }
 0x515   : > { %v5944_v32 = vpop.f32.mrf.mxu0  ;;  %v4673_v34 = vadd.f32 %v20391_v40, %v20390_v16  ;;  %v20397_v16 = vld [vmem:[#allocation80_spill] sm:$0xff] }
 0x516   : > { %v16377_v41 = vadd.f32 %v5944_v32, %v20386_v53  ;;  %9508 = vmatmul.msk.bf16.gmra.mxu1 %vm4345_vm3, %v6106_v21  ;;  %v5720_v53 = vrot.slane %v5718_v8, 1  ;;  %v5492_v44 = vadd.f32 %v20396_v22, %v5140_v6  ;;  %v20399_v8 = vld [vmem:[#allocation45_spill] sm:$0xff] }
 0x518   : > { %v5474_v0 = vpop.f32.mrf.mxu3  ;;  %20387 = vst [vmem:[#allocation27_spill] sm:$0xff] %v16377_v41  ;;  %v5717_v41 = vor.u32 %v5715_v3, %v5713_v51  ;;  %v20401_v3 = vld [vmem:[#allocation52_spill] sm:$0xff] }
 0x519   : > { %v16380_v4 = vadd.f32 %v5474_v0, %v5193_v52  ;;  %v20394_v52 = vld [vmem:[#allocation179_spill] sm:$0xff] }
 0x51a   : > { %v5194_v21 = vadd.f32 %v20394_v52, %v4806_v48  ;;  %v4808_v48 = vadd.f32 %v16287_v19, %v20399_v8  ;;  %v20405_v8 = vld [vmem:[#allocation176_spill] sm:$0xff] }
 0x51b   : > { %20388 = vst [vmem:[#allocation113_spill] sm:$0xff] %v16380_v4  ;;  %v4992_v5 = vpop.f32.mrf.mxu1 }
 0x51c   : > { %v5141_v32 = vadd.f32 %v4992_v5, %v4673_v34  ;;  %v20400_v34 = vld [vmem:[#allocation141_spill] sm:$0xff]  ;;  %v6027_v5 = vadd.f32 %v20401_v3, %v5492_v44  ;;  %v5725_v44 = vshll.u32 %v15971_v13, 16 }
 0x51d   : > { %9578 = vmatmul.msk.bf16.gmra.mxu3 %vm4345_vm3, %v20393_v10  ;;  %v5947_v0 = vpop.f32.mrf.mxu0  ;;  %v5721_v10 = vsel %vm4094_vm2, %v5717_v41, %v5720_v53  ;;  %v6107_v51 = vrot.slane %v20400_v34, 1  ;;  %v4811_v34 = vadd.f32 %v16304_v12, %v20405_v8  ;;  %v20406_v3 = vld [vmem:[#allocation77_spill] sm:$0xff]  ;;  %v20409_v8 = vld [vmem:[#allocation180_spill] sm:$0xff] }
 0x51e   : > { %v16397_v40 = vadd.f32 %v5947_v0, %v20397_v16  ;;  %v20402_v0 = vld [vmem:[#allocation185_spill] sm:$0xff]  ;;  %v20403_v16 = vld [vmem:[#allocation194_spill] sm:$0xff] }
 0x51f   : > { %9555 = vmatmul.msk.bf16.gmra.mxu2 %vm4345_vm3, %v20395_v45  ;;  %v16407_v45 = vpop.f32.mrf.mxu2  ;;  %v5195_v22 = vadd.f32 %v20402_v0, %v4808_v48  ;;  %v5196_v0 = vadd.f32 %v15953_v37, %v4811_v34  ;;  %v4813_v37 = vadd.f32 %v16320_v23, %v20409_v8  ;;  %v20410_v34 = vld [vmem:[#allocation31_spill] sm:$0xff]  ;;  %v20413_v8 = vld [vmem:[#allocation6_spill] sm:$0xff] }
 0x520   : > { %v5477_v4 = vpop.f32.mrf.mxu3  ;;  %20398 = vst [vmem:[#allocation67_spill] sm:$0xff] %v16397_v40  ;;  %9487 = vmatmul.msk.bf16.gmra.mxu0 %vm4345_vm3, %v5721_v10  ;;  %v5493_v10 = vadd.f32 %v20403_v16, %v5141_v32  ;;  %v20404_v40 = vld [vmem:[#allocation182_spill] sm:$0xff]  ;;  %v5727_v32 = vrot.slane %v5725_v44, 1  ;;  %v20408_v16 = vld [vmem:[#allocation43_spill] sm:$0xff] }
 0x521   : > { %v16399_v60 = vadd.f32 %v5477_v4, %v5194_v21  ;;  %v6108_v21 = vsel %vm1130_vm0, %v6105_v2, %v6107_v51  ;;  %v5722_v2 = vshrl.u32 %v20245_v61, 16 }
 0x522   : > { %v6028_v48 = vadd.f32 %v20406_v3, %v5493_v10 }
 0x523   : > { %v6256_v52 = vpop.f32.mrf.mxu1 }
 0x524   : > { %v16409_v6 = vadd.f32 %v6256_v52, %v6027_v5  ;;  %v20407_v5 = vld [vmem:[#allocation146_spill] sm:$0xff] }
 0x525   : > { %v5949_v4 = vpop.f32.mrf.mxu0 }
 0x526   : > { %v16415_v43 = vadd.f32 %v5949_v4, %v20404_v40  ;;  %9509 = vmatmul.msk.bf16.gmra.mxu1 %vm4345_vm3, %v6108_v21  ;;  %v5724_v4 = vor.u32 %v5722_v2, %v5720_v53  ;;  %v6109_v53 = vrot.slane %v20410_v34, 1  ;;  %v5197_v2 = vadd.f32 %v15973_v24, %v4813_v37 }
 0x527   : > { %v16430_v21 = vpop.f32.mrf.mxu2  ;;  %v5732_v24 = vshll.u32 %v16012_v14, 16 }
 0x528   : > { %v5479_v41 = vpop.f32.mrf.mxu3  ;;  %v5728_v44 = vsel %vm4094_vm2, %v5724_v4, %v5727_v32 }
 0x529   : > { %v16418_v19 = vadd.f32 %v5479_v41, %v5195_v22 }
 0x52b   : > { %v6258_v52 = vpop.f32.mrf.mxu1 }
 0x52c   : > { %v16427_v40 = vadd.f32 %v6258_v52, %v6028_v48  ;;  %v20411_v48 = vld [vmem:[#allocation178_spill] sm:$0xff] }
 0x52d   : > { %9579 = vmatmul.msk.bf16.gmra.mxu3 %vm4345_vm3, %v20407_v5  ;;  %v5952_v22 = vpop.f32.mrf.mxu0 }
 0x52e   : > { %v16435_v12 = vadd.f32 %v5952_v22, %v15947_v28  ;;  %v6110_v28 = vsel %vm1130_vm0, %v6107_v51, %v6109_v53 }
 0x52f   : > { %9556 = vmatmul.msk.bf16.gmra.mxu2 %vm4345_vm3, %v20408_v16  ;;  %v16455_v23 = vpop.f32.mrf.mxu2 }
 0x530   : > { %v5482_v41 = vpop.f32.mrf.mxu3  ;;  %9488 = vmatmul.msk.bf16.gmra.mxu0 %vm4345_vm3, %v5728_v44  ;;  %v5729_v44 = vshrl.u32 %v15971_v13, 16 }
 0x531   : > { %v16437_v10 = vadd.f32 %v5482_v41, %v5196_v0  ;;  %v20412_v41 = vld [vmem:[#allocation183_spill] sm:$0xff] }
 0x532   : > { %v4816_v16 = vadd.f32 %v16337_v59, %v20412_v41  ;;  %v5731_v51 = vor.u32 %v5729_v44, %v5727_v32  ;;  %v9817_v32 = vld [vmem:[%s18339_s3 + $0x40] sm:$0xff]  ;;  %v6111_v44 = vrot.slane %v20242_v50, 1  ;;  %v5739_v50 = vshll.u32 %v16052_v20, 16 }
 0x533   : > { %v6261_v3 = vpop.f32.mrf.mxu1  ;;  %7015 = vmatpush.bf16.msra.mxu0 %v9817_v32 }
 0x534   : > { %v16445_v5 = vadd.f32 %v6261_v3, %v20411_v48  ;;  %v5198_v3 = vadd.f32 %v15993_v33, %v4816_v16  ;;  %v20416_v33 = vld [vmem:[#allocation187_spill] sm:$0xff] }
 0x535   : > { %v5954_v52 = vpop.f32.mrf.mxu0  ;;  %v4818_v16 = vadd.f32 %v16355_v47, %v20416_v33 }
 0x536   : > { %v16450_v22 = vadd.f32 %v5954_v52, %v15963_v49  ;;  %9510 = vmatmul.msk.bf16.gmra.mxu1 %vm4345_vm3, %v6110_v28  ;;  %v20414_v49 = vld [vmem:[#allocation128_spill] sm:$0xff]  ;;  %v20415_v28 = vld [vmem:[#allocation102_spill] sm:$0xff] }
 0x538   : > { %v5484_v0 = vpop.f32.mrf.mxu3 }
 0x539   : > { %v16453_v4 = vadd.f32 %v5484_v0, %v5197_v2  ;;  %v5734_v2 = vrot.slane %v5732_v24, 1  ;;  %v16482_v24 = vpop.f32.mrf.mxu2 }
 0x53b   : > { %v6263_v37 = vpop.f32.mrf.mxu1  ;;  %v5735_v41 = vsel %vm4094_vm2, %v5731_v51, %v5734_v2  ;;  %v5199_v51 = vadd.f32 %v16014_v11, %v4818_v16 }
 0x53c   : > { %v16464_v34 = vadd.f32 %v6263_v37, %v20414_v49  ;;  %v6112_v49 = vsel %vm1130_vm0, %v6109_v53, %v6111_v44  ;;  %v20418_v53 = vld [vmem:[#allocation95_spill] sm:$0xff] }
 0x53d   : > { %9580 = vmatmul.msk.bf16.gmra.mxu3 %vm4345_vm3, %v20413_v8  ;;  %v5957_v48 = vpop.f32.mrf.mxu0 }
 0x53e   : > { %v16470_v59 = vadd.f32 %v5957_v48, %v15987_v42 }
 0x53f   : > { %9557 = vmatmul.msk.bf16.gmra.mxu2 %vm4345_vm3, %v20415_v28  ;;  %v5741_v28 = vrot.slane %v5739_v50, 1  ;;  %v6113_v50 = vrot.slane %v20125_v27, 1  ;;  %v5743_v27 = vshrl.u32 %v16052_v20, 16 }
 0x540   : > { %v5487_v52 = vpop.f32.mrf.mxu3  ;;  %9489 = vmatmul.msk.bf16.gmra.mxu0 %vm4345_vm3, %v5735_v41 }
 0x541   : > { %v16472_v0 = vadd.f32 %v5487_v52, %v5198_v3  ;;  %v20417_v52 = vld [vmem:[#allocation28_spill] sm:$0xff]  ;;  %v16499_v41 = vpop.f32.mrf.mxu2 }
 0x543   : > { %v6266_v42 = vpop.f32.mrf.mxu1 }
 0x544   : > { %v16485_v8 = vadd.f32 %v6266_v42, %v15945_v39  ;;  %v5736_v39 = vshrl.u32 %v16012_v14, 16 }
 0x545   : > { %v5959_v37 = vpop.f32.mrf.mxu0 }
 0x546   : > { %v16490_v48 = vadd.f32 %v5959_v37, %v16003_v56  ;;  %9511 = vmatmul.msk.bf16.gmra.mxu1 %vm4345_vm3, %v6112_v49  ;;  %v6650_v56 = vadd.f32 %v16033_v25, %v16409_v6  ;;  %v5738_v16 = vor.u32 %v5736_v39, %v5734_v2  ;;  %v6651_v6 = vadd.f32 %v16054_v15, %v16427_v40 }
 0x547   : > { %v6114_v39 = vsel %vm1130_vm0, %v6111_v44, %v6113_v50  ;;  %v5745_v15 = vor.u32 %v5743_v27, %v5741_v28  ;;  %v20423_v44 = vld [vmem:[#allocation186_spill] sm:$0xff] }
 0x548   : > { %v5489_v3 = vpop.f32.mrf.mxu3 }
 0x549   : > { %v16493_v47 = vadd.f32 %v5489_v3, %v5199_v51  ;;  %v20419_v51 = vld [vmem:[#allocation109_spill] sm:$0xff]  ;;  %v5742_v3 = vsel %vm4094_vm2, %v5738_v16, %v5741_v28 }
 0x54a   : > { %v20422_v16 = vld [vmem:[#allocation21_spill] sm:$0xff] }
 0x54b   : > { %v6268_v11 = vpop.f32.mrf.mxu1 }
 0x54c   : > { %v16502_v32 = vadd.f32 %v6268_v11, %v20418_v53  ;;  %v20420_v53 = vld [vmem:[#allocation192_spill] sm:$0xff] }
 0x54d   : > { %9581 = vmatmul.msk.bf16.gmra.mxu3 %vm4345_vm3, %v20417_v52  ;;  %v5962_v33 = vpop.f32.mrf.mxu0 }
 0x54e   : > { %v16509_v37 = vadd.f32 %v5962_v33, %v16027_v63  ;;  %v16522_v63 = vpop.f32.mrf.mxu2 }
 0x54f   : > { %9558 = vmatmul.msk.bf16.gmra.mxu2 %vm4345_vm3, %v20419_v51  ;;  %v6652_v51 = vadd.f32 %v16073_v55, %v16445_v5  ;;  %v20428_v5 = vld [vmem:[#allocation157_spill] sm:$0xff] }
 0x550   : > { %v6769_v42 = vpop.f32.mrf.mxu3  ;;  %9490 = vmatmul.msk.bf16.gmra.mxu0 %vm4345_vm3, %v5742_v3 }
 0x551   : > { %v16511_v49 = vadd.f32 %v6769_v42, %v6650_v56 }
 0x553   : > { %v6271_v52 = vpop.f32.mrf.mxu1 }
 0x554   : > { %v16517_v25 = vadd.f32 %v6271_v52, %v15985_v26  ;;  %v5746_v26 = vshll.u32 %v16097_v17, 16 }
 0x555   : > { %v5964_v2 = vpop.f32.mrf.mxu0 }
 0x556   : > { %v16525_v56 = vadd.f32 %v5964_v2, %v20420_v53  ;;  %9512 = vmatmul.msk.bf16.gmra.mxu1 %vm4345_vm3, %v6114_v39  ;;  %v5748_v52 = vrot.slane %v5746_v26, 1  ;;  %v20425_v39 = vld [vmem:[#allocation193_spill] sm:$0xff]  ;;  %v16547_v27 = vpop.f32.mrf.mxu2 }
 0x558   : > { %v6771_v11 = vpop.f32.mrf.mxu3  ;;  %20421 = vst [vmem:[#allocation51_spill] sm:$0xff] %v16525_v56  ;;  %v5749_v28 = vsel %vm4094_vm2, %v5745_v15, %v5748_v52 }
 0x559   : > { %v16528_v33 = vadd.f32 %v6771_v11, %v6651_v6  ;;  %v20424_v6 = vld [vmem:[#allocation106_spill] sm:$0xff] }
 0x55b   : > { %v6273_v40 = vpop.f32.mrf.mxu1 }
 0x55c   : > { %v16535_v42 = vadd.f32 %v6273_v40, %v20423_v44  ;;  %v20429_v44 = vld [vmem:[#allocation149_spill] sm:$0xff] }
 0x55d   : > { %9582 = vmatmul.msk.bf16.gmra.mxu3 %vm4345_vm3, %v20422_v16  ;;  %v5967_v3 = vpop.f32.mrf.mxu0  ;;  %v20427_v16 = vld [vmem:[#allocation79_spill] sm:$0xff] }
 0x55e   : > { %v16542_v11 = vadd.f32 %v5967_v3, %v20425_v39  ;;  %v6115_v40 = vrot.slane %v20427_v16, 1  ;;  %v16564_v16 = vpop.f32.mrf.mxu2 }
 0x55f   : > { %9559 = vmatmul.msk.bf16.gmra.mxu2 %vm4345_vm3, %v20424_v6  ;;  %v6653_v6 = vadd.f32 %v20429_v44, %v16464_v34  ;;  %v5750_v34 = vshrl.u32 %v16097_v17, 16 }
 0x560   : > { %v6774_v2 = vpop.f32.mrf.mxu3  ;;  %20426 = vst [vmem:[#allocation47_spill] sm:$0xff] %v16542_v11  ;;  %9491 = vmatmul.msk.bf16.gmra.mxu0 %vm4345_vm3, %v5749_v28  ;;  %v6116_v3 = vsel %vm1130_vm0, %v6113_v50, %v6115_v40  ;;  %v5753_v28 = vshll.u32 %v16142_v35, 16  ;;  %v20434_v50 = vld [vmem:[#allocation189_spill] sm:$0xff] }
 0x561   : > { %v16544_v53 = vadd.f32 %v6774_v2, %v6652_v51  ;;  %v20430_v2 = vld [vmem:[#allocation134_spill] sm:$0xff] }
 0x563   : > { %v6276_v55 = vpop.f32.mrf.mxu1 }
 0x564   : > { %v16552_v26 = vadd.f32 %v6276_v55, %v20428_v5  ;;  %v20433_v55 = vld [vmem:[#allocation24_spill] sm:$0xff]  ;;  %v5755_v5 = vrot.slane %v5753_v28, 1 }
 0x565   : > { %v5969_v56 = vpop.f32.mrf.mxu0 }
 0x566   : > { %v16558_v39 = vadd.f32 %v5969_v56, %v20430_v2  ;;  %9513 = vmatmul.msk.bf16.gmra.mxu1 %vm4345_vm3, %v6116_v3  ;;  %v6654_v56 = vadd.f32 %v16119_v62, %v16485_v8  ;;  %v20435_v2 = vld [vmem:[#allocation168_spill] sm:$0xff]  ;;  %v20438_v62 = vld [vmem:[#allocation119_spill] sm:$0xff] }
 0x568   : > { %v6776_v51 = vpop.f32.mrf.mxu3  ;;  %20431 = vst [vmem:[#allocation101_spill] sm:$0xff] %v16558_v39 }
 0x569   : > { %v16561_v15 = vadd.f32 %v6776_v51, %v6653_v6  ;;  %v5752_v6 = vor.u32 %v5750_v34, %v5748_v52  ;;  %v6655_v52 = vadd.f32 %v16144_v9, %v16502_v32  ;;  %v20441_v32 = vld [vmem:[#allocation105_spill] sm:$0xff] }
 0x56b   : > { %20432 = vst [vmem:[#allocation133_spill] sm:$0xff] %v16561_v15  ;;  %v6278_v44 = vpop.f32.mrf.mxu1  ;;  %v5756_v28 = vsel %vm4094_vm2, %v5752_v6, %v5755_v5  ;;  %v16584_v15 = vpop.f32.mrf.mxu2 }
 0x56c   : > { %v16570_v11 = vadd.f32 %v6278_v44, %v20434_v50  ;;  %v20437_v44 = vld [vmem:[#allocation76_spill] sm:$0xff] }
 0x56d   : > { %9583 = vmatmul.msk.bf16.gmra.mxu3 %vm4345_vm3, %v20433_v55  ;;  %v5972_v3 = vpop.f32.mrf.mxu0  ;;  %v6117_v50 = vrot.slane %v20437_v44, 1 }
 0x56e   : > { %v16577_v39 = vadd.f32 %v5972_v3, %v16113_v36 }
 0x56f   : > { %9560 = vmatmul.msk.bf16.gmra.mxu2 %vm4345_vm3, %v20435_v2  ;;  %v6118_v36 = vsel %vm1130_vm0, %v6115_v40, %v6117_v50  ;;  %v20440_v2 = vld [vmem:[#allocation13_spill] sm:$0xff] }
 0x570   : > { %v6779_v51 = vpop.f32.mrf.mxu3  ;;  %20436 = vst [vmem:[#allocation54_spill] sm:$0xff] %v16577_v39  ;;  %9492 = vmatmul.msk.bf16.gmra.mxu0 %vm4345_vm3, %v5756_v28  ;;  %v20446_v39 = vld [vmem:[#allocation63_spill] sm:$0xff] }
 0x571   : > { %v16579_v55 = vadd.f32 %v6779_v51, %v6654_v56  ;;  %v5760_v51 = vshll.u32 %v20309_v18, 16 }
 0x573   : > { %v6281_v17 = vpop.f32.mrf.mxu1  ;;  %v5762_v28 = vrot.slane %v5760_v51, 1 }
 0x574   : > { %v16587_v8 = vadd.f32 %v6281_v17, %v20438_v62  ;;  %v5757_v17 = vshrl.u32 %v16142_v35, 16 }
 0x575   : > { %v5974_v34 = vpop.f32.mrf.mxu0 }
 0x576   : > { %v16593_v3 = vadd.f32 %v5974_v34, %v16131_v7  ;;  %9514 = vmatmul.msk.bf16.gmra.mxu1 %vm4345_vm3, %v6118_v36  ;;  %v6656_v7 = vadd.f32 %v16163_v46, %v16517_v25  ;;  %v5759_v62 = vor.u32 %v5757_v17, %v5755_v5  ;;  %v16607_v34 = vpop.f32.mrf.mxu2  ;;  %v20442_v36 = vld [vmem:[#allocation169_spill] sm:$0xff]  ;;  %v20445_v25 = vld [vmem:[#allocation195_spill] sm:$0xff]  ;;  %v6657_v17 = vadd.f32 %v16179_v54, %v16535_v42  ;;  %v20450_v42 = vld [vmem:[#allocation84_spill] sm:$0xff] }
 0x578   : > { %v6781_v56 = vpop.f32.mrf.mxu3  ;;  %20439 = vst [vmem:[#allocation46_spill] sm:$0xff] %v16593_v3  ;;  %v5763_v51 = vsel %vm4094_vm2, %v5759_v62, %v5762_v28 }
 0x579   : > { %v16596_v6 = vadd.f32 %v6781_v56, %v6655_v52 }
 0x57b   : > { %v6283_v9 = vpop.f32.mrf.mxu1 }
 0x57c   : > { %v16603_v44 = vadd.f32 %v6283_v9, %v20441_v32  ;;  %v20444_v9 = vld [vmem:[#allocation104_spill] sm:$0xff] }
 0x57d   : > { %9584 = vmatmul.msk.bf16.gmra.mxu3 %vm4345_vm3, %v20440_v2  ;;  %v5977_v40 = vpop.f32.mrf.mxu0  ;;  %v6119_v32 = vrot.slane %v20444_v9, 1  ;;  %v20451_v9 = vld [vmem:[#allocation166_spill] sm:$0xff] }
 0x57e   : > { %v16612_v56 = vadd.f32 %v5977_v40, %v16157_v31  ;;  %v16625_v31 = vpack.c.b16 %v20446_v39, %v20446_v39 }
 0x57f   : > { %9561 = vmatmul.msk.bf16.gmra.mxu2 %vm4345_vm3, %v20442_v36  ;;  %v6120_v36 = vsel %vm1130_vm0, %v6117_v50, %v6119_v32 }
 0x580   : > { %v6784_v52 = vpop.f32.mrf.mxu3  ;;  %20443 = vst [vmem:[#allocation39_spill] sm:$0xff] %v16612_v56  ;;  %9493 = vmatmul.msk.bf16.gmra.mxu0 %vm4345_vm3, %v5763_v51  ;;  %v5764_v51 = vshrl.u32 %v20309_v18, 16  ;;  %v5768_v54 = vshll.u32 %v16625_v31, 16 }
 0x581   : > { %v16614_v2 = vadd.f32 %v6784_v52, %v6656_v7  ;;  %20447 = vst [vmem:[#allocation18_spill] sm:$0xff] %v16625_v31  ;;  %v16633_v52 = vpop.f32.mrf.mxu2  ;;  %v20478_v31 = vld [vmem:[#allocation7_spill] sm:$0xff] }
 0x582   : > { %v5766_v50 = vor.u32 %v5764_v51, %v5762_v28  ;;  %v6121_v28 = vrot.slane %v14946_v58, 1  ;;  %v20458_v58 = vld [vmem:[#allocation117_spill] sm:$0xff] }
 0x583   : > { %v6286_v46 = vpop.f32.mrf.mxu1 }
 0x584   : > { %v6418_v5 = vadd.f32 %v6286_v46, %v20445_v25  ;;  %v5770_v25 = vrot.slane %v5768_v54, 1 }
 0x585   : > { %v5979_v3 = vpop.f32.mrf.mxu0 }
 0x586   : > { %v16628_v40 = vadd.f32 %v5979_v3, %v16174_v38  ;;  %9515 = vmatmul.msk.bf16.gmra.mxu1 %vm4345_vm3, %v6120_v36  ;;  %v6658_v38 = vadd.f32 %v16198_v30, %v16552_v26  ;;  %v20452_v36 = vld [vmem:[#allocation44_spill] sm:$0xff]  ;;  %v20455_v26 = vld [vmem:[#allocation3_spill] sm:$0xff] }
 0x588   : > { %v6786_v7 = vpop.f32.mrf.mxu3  ;;  %20448 = vst [vmem:[#allocation64_spill] sm:$0xff] %v16628_v40 }
 0x589   : > { %v16631_v62 = vadd.f32 %v6786_v7, %v6657_v17  ;;  %v16652_v51 = vpop.f32.mrf.mxu2 }
 0x58b   : > { %20449 = vst [vmem:[#allocation14_spill] sm:$0xff] %v16631_v62  ;;  %v6288_v39 = vpop.f32.mrf.mxu1 }
 0x58c   : > { %v6419_v46 = vadd.f32 %v6288_v39, %v20451_v9  ;;  %v6659_v39 = vadd.f32 %v16215_v29, %v16570_v11  ;;  %v20460_v29 = vld [vmem:[#allocation92_spill] sm:$0xff] }
 0x58d   : > { %9585 = vmatmul.msk.bf16.gmra.mxu3 %vm4345_vm3, %v20450_v42  ;;  %v5982_v3 = vpop.f32.mrf.mxu0  ;;  %v5771_v42 = vsel %vm4094_vm2, %v5766_v50, %v5770_v25  ;;  %v6660_v11 = vadd.f32 %v20460_v29, %v16587_v8  ;;  %v20468_v8 = vld [vmem:[#allocation122_spill] sm:$0xff] }
 0x58e   : > { %v16645_v7 = vadd.f32 %v5982_v3, %v16192_v57  ;;  %v6122_v57 = vsel %vm1130_vm0, %v6119_v32, %v6121_v28  ;;  %v6661_v29 = vadd.f32 %v20468_v8, %v16603_v44 }
 0x58f   : > { %9562 = vmatmul.msk.bf16.gmra.mxu2 %vm4345_vm3, %v20452_v36  ;;  %v20459_v36 = vld [vmem:[#allocation124_spill] sm:$0xff] }
 0x590   : > { %v6789_v17 = vpop.f32.mrf.mxu3  ;;  %20453 = vst [vmem:[#allocation89_spill] sm:$0xff] %v16645_v7  ;;  %9494 = vmatmul.msk.bf16.gmra.mxu0 %vm4345_vm3, %v5771_v42 }
 0x591   : > { %v16647_v40 = vadd.f32 %v6789_v17, %v6658_v38  ;;  %v16666_v17 = vpop.f32.mrf.mxu2 }
 0x593   : > { %20454 = vst [vmem:[#allocation29_spill] sm:$0xff] %v16647_v40  ;;  %v6291_v30 = vpop.f32.mrf.mxu1 }
 0x594   : > { %v6420_v54 = vadd.f32 %v6291_v30, %v20455_v26  ;;  %v20461_v26 = vld [vmem:[#allocation59_spill] sm:$0xff] }
 0x595   : > { %v5984_v9 = vpop.f32.mrf.mxu0 }
 0x596   : > { %v16659_v38 = vadd.f32 %v5984_v9, %v16209_v1  ;;  %9516 = vmatmul.msk.bf16.gmra.mxu1 %vm4345_vm3, %v6122_v57  ;;  %v20462_v1 = vld [vmem:[#allocation10_spill] sm:$0xff]  ;;  %v20465_v57 = vld [vmem:[#allocation73_spill] sm:$0xff] }
 0x598   : > { %v6791_v3 = vpop.f32.mrf.mxu3  ;;  %20456 = vst [vmem:[#allocation75_spill] sm:$0xff] %v16659_v38 }
 0x599   : > { %v16662_v50 = vadd.f32 %v6791_v3, %v6659_v39  ;;  %v20466_v3 = vld [vmem:[#allocation90_spill] sm:$0xff] }
 0x59b   : > { %20457 = vst [vmem:[#allocation136_spill] sm:$0xff] %v16662_v50  ;;  %v6293_v25 = vpop.f32.mrf.mxu1 }
 0x59c   : > { %v6421_v42 = vadd.f32 %v6293_v25, %v20459_v36  ;;  %v20467_v25 = vld [vmem:[#allocation85_spill] sm:$0xff] }
 0x59d   : > { %9586 = vmatmul.msk.bf16.gmra.mxu3 %vm4345_vm3, %v20458_v58  ;;  %v5987_v32 = vpop.f32.mrf.mxu0  ;;  %v6123_v58 = vrot.slane %v20466_v3, 1  ;;  %v20473_v3 = vld [vmem:[#allocation50_spill] sm:$0xff] }
 0x59e   : > { %v16674_v9 = vadd.f32 %v5987_v32, %v20462_v1  ;;  %v20469_v1 = vld [vmem:[#allocation11_spill] sm:$0xff] }
 0x59f   : > { %9563 = vmatmul.msk.bf16.gmra.mxu2 %vm4345_vm3, %v20461_v26  ;;  %v6124_v56 = vsel %vm1130_vm0, %v6121_v28, %v6123_v58  ;;  %v16685_v26 = vpop.f32.mrf.mxu2  ;;  %v20477_v28 = vld [vmem:[#allocation145_spill] sm:$0xff] }
 0x5a0   : > { %v6794_v30 = vpop.f32.mrf.mxu3  ;;  %20463 = vst [vmem:[#allocation131_spill] sm:$0xff] %v16674_v9  ;;  %9609 = vmatmul.msk.bf16.vlgmr.msra.gmra.mxu0 %vm4345_vm3, %v20465_v57  ;;  %v20472_v57 = vld [vmem:[#allocation120_spill] sm:$0xff] }
 0x5a1   : > { %v16676_v39 = vadd.f32 %v6794_v30, %v6660_v11 }
 0x5a3   : > { %20464 = vst [vmem:[#allocation30_spill] sm:$0xff] %v16676_v39  ;;  %v6296_v38 = vpop.f32.mrf.mxu1  ;;  %v6662_v39 = vadd.f32 %v20478_v31, %v6418_v5  ;;  %v20485_v31 = vld [vmem:[#allocation103_spill] sm:$0xff] }
 0x5a4   : > { %v6422_v36 = vadd.f32 %v6296_v38, %v20467_v25  ;;  %v20474_v25 = vld [vmem:[#allocation155_spill] sm:$0xff] }
 0x5a5   : > { %v5989_v7 = vpop.f32.mrf.mxu0  ;;  %v20475_v44 = vunpack.c.l.b16 %v20474_v25 }
 0x5a6   : > { %v16688_v11 = vadd.f32 %v5989_v7, %v20469_v1  ;;  %9517 = vmatmul.msk.bf16.gmra.mxu1 %vm4345_vm3, %v6124_v56  ;;  %v20479_v56 = vld [vmem:[#allocation96_spill] sm:$0xff] }
 0x5a7   : > { %v16698_v8 = vpack.c.b16 %v20475_v44, %v20473_v3  ;;  %v16709_v1 = vpop.f32.mrf.mxu2  ;;  %v20483_v3 = vld [vmem:[#allocation140_spill] sm:$0xff]  ;;  %v20484_v44 = vld [vmem:[#allocation125_spill] sm:$0xff] }
 0x5a8   : > { %v6796_v32 = vpop.f32.mrf.mxu3  ;;  %20470 = vst [vmem:[#allocation170_spill] sm:$0xff] %v16688_v11  ;;  %v6125_v25 = vrot.slane %v20483_v3, 1 }
 0x5a9   : > { %v16691_v30 = vadd.f32 %v6796_v32, %v6661_v29  ;;  %20476 = vst [vmem:[#allocation91_spill] sm:$0xff] %v16698_v8 }
 0x5ab   : > { %20471 = vst [vmem:[#allocation163_spill] sm:$0xff] %v16691_v30  ;;  %v6298_v38 = vpop.f32.mrf.mxu1  ;;  %v6126_v30 = vsel %vm1130_vm0, %v6123_v58, %v6125_v25 }
 0x5ac   : > { %v6423_v9 = vadd.f32 %v6298_v38, %v20477_v28  ;;  %v6663_v28 = vadd.f32 %v20485_v31, %v6419_v46  ;;  %v20491_v46 = vld [vmem:[#allocation139_spill] sm:$0xff] }
 0x5ad   : > { %9587 = vmatmul.msk.bf16.gmra.mxu3 %vm4345_vm3, %v20472_v57  ;;  %v5992_v50 = vpop.f32.mrf.mxu0  ;;  %v20482_v57 = vld [vmem:[#allocation81_spill] sm:$0xff]  ;;  %v6664_v31 = vadd.f32 %v20491_v46, %v6420_v54 }
 0x5ae   : > { %v16705_v29 = vadd.f32 %v5992_v50, %v20479_v56  ;;  %v20486_v50 = vld [vmem:[#allocation162_spill] sm:$0xff] }
 0x5af   : > { %9564 = vmatmul.msk.bf16.gmra.mxu2 %vm4345_vm3, %v16698_v8 }
 0x5b0   : > { %v6799_v7 = vpop.f32.mrf.mxu3  ;;  %20480 = vst [vmem:[#allocation70_spill] sm:$0xff] %v16705_v29  ;;  %9610 = vmatmul.msk.bf16.gmra.mxu0 %vm4345_vm3, %v20482_v57  ;;  %v20489_v57 = vld [vmem:[#allocation150_spill] sm:$0xff] }
 0x5b1   : > { %v16707_v32 = vadd.f32 %v6799_v7, %v6662_v39  ;;  %v16723_v7 = vpop.f32.mrf.mxu2 }
 0x5b3   : > { %20481 = vst [vmem:[#allocation97_spill] sm:$0xff] %v16707_v32  ;;  %v6301_v38 = vpop.f32.mrf.mxu1  ;;  %v20492_v32 = vld [vmem:[#allocation32_spill] sm:$0xff] }
 0x5b4   : > { %v6424_v5 = vadd.f32 %v6301_v38, %v20484_v44  ;;  %v20490_v38 = vld [vmem:[#allocation4_spill] sm:$0xff] }
 0x5b5   : > { %v5994_v11 = vpop.f32.mrf.mxu0 }
 0x5b6   : > { %v16718_v56 = vadd.f32 %v5994_v11, %v20486_v50  ;;  %9518 = vmatmul.msk.bf16.gmra.mxu1 %vm4345_vm3, %v6126_v30  ;;  %v20493_v11 = vld [vmem:[#allocation142_spill] sm:$0xff] }
 0x5b8   : > { %v6801_v8 = vpop.f32.mrf.mxu3  ;;  %20487 = vst [vmem:[#allocation111_spill] sm:$0xff] %v16718_v56 }
 0x5b9   : > { %v16721_v39 = vadd.f32 %v6801_v8, %v6663_v28  ;;  %v20496_v8 = vld [vmem:[#allocation98_spill] sm:$0xff]  ;;  %v20497_v28 = vld [vmem:[#allocation19_spill] sm:$0xff] }
 0x5bb   : > { %20488 = vst [vmem:[#allocation48_spill] sm:$0xff] %v16721_v39  ;;  %v6303_v3 = vpop.f32.mrf.mxu1  ;;  %v16739_v39 = vpop.f32.mrf.mxu2 }
 0x5bc   : > { %v6425_v44 = vadd.f32 %v6303_v3, %v20490_v38  ;;  %20498 = vst [vmem:[#allocation171_spill] sm:$0xff] %v16739_v39  ;;  %v20499_v3 = vld [vmem:[#allocation173_spill] sm:$0xff]  ;;  %v20500_v38 = vld [vmem:[#allocation123_spill] sm:$0xff] }
 0x5bd   : > { %9588 = vmatmul.msk.bf16.gmra.mxu3 %vm4345_vm3, %v20489_v57  ;;  %v5997_v29 = vpop.f32.mrf.mxu0  ;;  %v6127_v57 = vrot.slane %v20497_v28, 1  ;;  %v6665_v46 = vadd.f32 %v20500_v38, %v6421_v42  ;;  %v20505_v28 = vld [vmem:[#allocation135_spill] sm:$0xff] }
 0x5be   : > { %v16732_v50 = vadd.f32 %v5997_v29, %v20493_v11  ;;  %v20501_v29 = vld [vmem:[#allocation66_spill] sm:$0xff] }
 0x5bf   : > { %9565 = vmatmul.msk.bf16.gmra.mxu2 %vm4345_vm3, %v20492_v32  ;;  %v6128_v32 = vsel %vm1130_vm0, %v6125_v25, %v6127_v57 }
 0x5c0   : > { %v6804_v58 = vpop.f32.mrf.mxu3  ;;  %20494 = vst [vmem:[#allocation118_spill] sm:$0xff] %v16732_v50  ;;  %9611 = vmatmul.msk.bf16.gmra.mxu0 %vm4345_vm3, %v20496_v8 }
 0x5c1   : > { %v16734_v30 = vadd.f32 %v6804_v58, %v6664_v31  ;;  %v20504_v58 = vld [vmem:[#allocation177_spill] sm:$0xff] }
 0x5c3   : > { %20495 = vst [vmem:[#allocation60_spill] sm:$0xff] %v16734_v30  ;;  %v6306_v56 = vpop.f32.mrf.mxu1  ;;  %v16754_v38 = vpop.f32.mrf.mxu2  ;;  %v20508_v30 = vld [vmem:[#allocation55_spill] sm:$0xff] }
 0x5c4   : > { %v6426_v54 = vadd.f32 %v6306_v56, %v20499_v3  ;;  %v20506_v56 = vld [vmem:[#allocation160_spill] sm:$0xff]  ;;  %20507 = vst [vmem:[#allocation35_spill] sm:$0xff] %v16754_v38 }
 0x5c5   : > { %v5999_v18 = vpop.f32.mrf.mxu0  ;;  %v6666_v3 = vadd.f32 %v20506_v56, %v6422_v36  ;;  %v20514_v56 = vld [vmem:[#allocation71_spill] sm:$0xff] }
 0x5c6   : > { %v16745_v11 = vadd.f32 %v5999_v18, %v20501_v29  ;;  %9519 = vmatmul.msk.bf16.gmra.mxu1 %vm4345_vm3, %v6128_v32  ;;  %v20509_v18 = vld [vmem:[#allocation132_spill] sm:$0xff]  ;;  %v20511_v32 = vld [vmem:[#allocation121_spill] sm:$0xff] }
 0x5c8   : > { %v6806_v40 = vpop.f32.mrf.mxu3  ;;  %20502 = vst [vmem:[#allocation65_spill] sm:$0xff] %v16745_v11  ;;  %v6667_v11 = vadd.f32 %v20514_v56, %v6423_v9 }
 0x5c9   : > { %v16748_v31 = vadd.f32 %v6806_v40, %v6665_v46  ;;  %v20512_v46 = vld [vmem:[#allocation12_spill] sm:$0xff] }
 0x5cb   : > { %20503 = vst [vmem:[#allocation40_spill] sm:$0xff] %v16748_v31  ;;  %v6308_v8 = vpop.f32.mrf.mxu1 }
 0x5cc   : > { %v6427_v50 = vadd.f32 %v6308_v8, %v20505_v28  ;;  %v20513_v28 = vld [vmem:[#allocation129_spill] sm:$0xff] }
 0x5cd   : > { %9589 = vmatmul.msk.bf16.gmra.mxu3 %vm4345_vm3, %v20504_v58  ;;  %v6002_v42 = vpop.f32.mrf.mxu0  ;;  %v6129_v58 = vrot.slane %v20512_v46, 1  ;;  %v6668_v46 = vadd.f32 %v16407_v45, %v6424_v5 }
 0x5ce   : > { %v16759_v29 = vadd.f32 %v6002_v42, %v20509_v18  ;;  %v20517_v42 = vld [vmem:[#allocation184_spill] sm:$0xff]  ;;  %v20518_v18 = vld [vmem:[#allocation165_spill] sm:$0xff] }
 0x5cf   : > { %9566 = vmatmul.msk.bf16.gmra.mxu2 %vm4345_vm3, %v20508_v30  ;;  %v6130_v38 = vsel %vm1130_vm0, %v6127_v57, %v6129_v58  ;;  %v20515_v30 = vld [vmem:[#allocation138_spill] sm:$0xff] }
 0x5d0   : > { %v6809_v25 = vpop.f32.mrf.mxu3  ;;  %20510 = vst [vmem:[#allocation2_spill] sm:$0xff] %v16759_v29  ;;  %9612 = vmatmul.msk.bf16.gmra.mxu0 %vm4345_vm3, %v20511_v32 }
 0x5d1   : > { %v16761_v40 = vadd.f32 %v6809_v25, %v6666_v3 }
 0x5d3   : > { %v6311_v8 = vpop.f32.mrf.mxu1 }
 0x5d4   : > { %v6428_v36 = vadd.f32 %v6311_v8, %v20513_v28  ;;  %v20519_v28 = vld [vmem:[#allocation159_spill] sm:$0xff] }
 0x5d5   : > { %v6004_v31 = vpop.f32.mrf.mxu0 }
 0x5d6   : > { %v16770_v62 = vadd.f32 %v6004_v31, %v20515_v30  ;;  %9520 = vmatmul.msk.bf16.gmra.mxu1 %vm4345_vm3, %v6130_v38  ;;  %v20521_v30 = vld [vmem:[#allocation153_spill] sm:$0xff] }
 0x5d7   : > { %v20523_v38 = vld [vmem:[#allocation41_spill] sm:$0xff] }
 0x5d8   : > { %v6811_v39 = vpop.f32.mrf.mxu3  ;;  %20516 = vst [vmem:[#allocation115_spill] sm:$0xff] %v16770_v62  ;;  %v6669_v62 = vadd.f32 %v16430_v21, %v6425_v44 }
 0x5d9   : > { %v16773_v3 = vadd.f32 %v6811_v39, %v6667_v11  ;;  %v20522_v39 = vld [vmem:[#allocation57_spill] sm:$0xff] }
 0x5da   : > { %v6131_v11 = vrot.slane %v20522_v39, 1  ;;  %v6670_v39 = vadd.f32 %v16455_v23, %v6426_v54 }
 0x5db   : > { %v6313_v25 = vpop.f32.mrf.mxu1 }
 0x5dc   : > { %v6429_v32 = vadd.f32 %v6313_v25, %v20518_v18  ;;  %v6132_v45 = vsel %vm1130_vm0, %v6129_v58, %v6131_v11  ;;  %v20524_v18 = vld [vmem:[#allocation113_spill] sm:$0xff] }
 0x5dd   : > { %9590 = vmatmul.msk.bf16.gmra.mxu3 %vm4345_vm3, %v20517_v42  ;;  %v6007_v9 = vpop.f32.mrf.mxu0 }
 0x5de   : > { %v16780_v57 = vadd.f32 %v6007_v9, %v20519_v28  ;;  %v20526_v9 = vld [vmem:[#allocation191_spill] sm:$0xff]  ;;  %v20527_v28 = vld [vmem:[#allocation16_spill] sm:$0xff] }
 0x5e0   : > { %v6814_v8 = vpop.f32.mrf.mxu3  ;;  %20520 = vst [vmem:[#allocation8_spill] sm:$0xff] %v16780_v57  ;;  %9613 = vmatmul.msk.bf16.gmra.mxu0 %vm4345_vm3, %v20521_v30 }
 0x5e1   : > { %v16782_v56 = vadd.f32 %v6814_v8, %v6668_v46 }
 0x5e3   : > { %v6316_v31 = vpop.f32.mrf.mxu1 }
 0x5e4   : > { %v6430_v42 = vadd.f32 %v6316_v31, %v20523_v38  ;;  %v20529_v38 = vld [vmem:[#allocation144_spill] sm:$0xff] }
 0x5e5   : > { %v6009_v25 = vpop.f32.mrf.mxu0 }
 0x5e6   : > { %v16791_v29 = vadd.f32 %v6009_v25, %v20524_v18  ;;  %9521 = vmatmul.msk.bf16.gmra.mxu1 %vm4345_vm3, %v6132_v45 }
 0x5e8   : > { %v6816_v5 = vpop.f32.mrf.mxu3  ;;  %20525 = vst [vmem:[#allocation94_spill] sm:$0xff] %v16791_v29 }
 0x5e9   : > { %v16794_v46 = vadd.f32 %v6816_v5, %v6669_v62  ;;  %v20530_v62 = vld [vmem:[#allocation34_spill] sm:$0xff]  ;;  %v20531_v5 = vld [vmem:[#allocation20_spill] sm:$0xff] }
 0x5ea   : > { %v6133_v25 = vrot.slane %v20530_v62, 1  ;;  %v6672_v62 = vadd.f32 %v16499_v41, %v6428_v36 }
 0x5eb   : > { %v6318_v8 = vpop.f32.mrf.mxu1 }
 0x5ec   : > { %v6431_v30 = vadd.f32 %v6318_v8, %v20527_v28  ;;  %v6134_v23 = vsel %vm1130_vm0, %v6131_v11, %v6133_v25 }
 0x5ed   : > { %9591 = vmatmul.msk.bf16.gmra.mxu3 %vm4345_vm3, %v20526_v9  ;;  %v6012_v21 = vpop.f32.mrf.mxu0  ;;  %v6671_v9 = vadd.f32 %v16482_v24, %v6427_v50 }
 0x5ee   : > { %v16801_v58 = vadd.f32 %v6012_v21, %v16399_v60 }
 0x5f0   : > { %v6819_v44 = vpop.f32.mrf.mxu3  ;;  %20528 = vst [vmem:[#allocation23_spill] sm:$0xff] %v16801_v58  ;;  %9614 = vmatmul.msk.bf16.gmra.mxu0 %vm4345_vm3, %v20529_v38 }
 0x5f1   : > { %v16803_v31 = vadd.f32 %v6819_v44, %v6670_v39  ;;  %v20533_v39 = vld [vmem:[#allocation196_spill] sm:$0xff]  ;;  %v20534_v44 = vld [vmem:[#allocation27_spill] sm:$0xff] }
 0x5f3   : > { %v6321_v45 = vpop.f32.mrf.mxu1 }
 0x5f4   : > { %v6432_v18 = vadd.f32 %v6321_v45, %v20531_v5  ;;  %v6135_v5 = vrot.slane %v20245_v61, 1 }
 0x5f5   : > { %v6014_v8 = vpop.f32.mrf.mxu0 }
 0x5f6   : > { %v16812_v28 = vadd.f32 %v6014_v8, %v16418_v19  ;;  %9522 = vmatmul.msk.bf16.gmra.mxu1 %vm4345_vm3, %v6134_v23  ;;  %v20536_v19 = vld [vmem:[#allocation164_spill] sm:$0xff]  ;;  %v20537_v8 = vld [vmem:[#allocation67_spill] sm:$0xff]  ;;  %v6136_v41 = vsel %vm1130_vm0, %v6133_v25, %v6135_v5 }
 0x5f8   : > { %v6821_v54 = vpop.f32.mrf.mxu3  ;;  %20532 = vst [vmem:[#allocation86_spill] sm:$0xff] %v16812_v28 }
 0x5f9   : > { %v16815_v60 = vadd.f32 %v6821_v54, %v6671_v9  ;;  %v6673_v54 = vadd.f32 %v16522_v63, %v6429_v32 }
 0x5fb   : > { %v6323_v21 = vpop.f32.mrf.mxu1 }
 0x5fc   : > { %v6433_v38 = vadd.f32 %v6323_v21, %v20534_v44  ;;  %v20539_v44 = vld [vmem:[#allocation127_spill] sm:$0xff] }
 0x5fd   : > { %9592 = vmatmul.msk.bf16.gmra.mxu3 %vm4345_vm3, %v20533_v39  ;;  %v6017_v24 = vpop.f32.mrf.mxu0 }
 0x5fe   : > { %v16822_v11 = vadd.f32 %v6017_v24, %v16437_v10  ;;  %v6674_v24 = vadd.f32 %v16547_v27, %v6430_v42 }
 0x600   : > { %v6824_v50 = vpop.f32.mrf.mxu3  ;;  %20535 = vst [vmem:[#allocation88_spill] sm:$0xff] %v16822_v11  ;;  %9615 = vmatmul.msk.bf16.gmra.mxu0 %vm4345_vm3, %v20536_v19  ;;  %v6137_v19 = vrot.slane %v15971_v13, 1 }
 0x601   : > { %v16824_v45 = vadd.f32 %v6824_v50, %v6672_v62 }
 0x602   : > { %v6138_v27 = vsel %vm1130_vm0, %v6135_v5, %v6137_v19 }
 0x603   : > { %v6326_v9 = vpop.f32.mrf.mxu1 }
 0x604   : > { %v6434_v23 = vadd.f32 %v6326_v9, %v20537_v8 }
 0x605   : > { %v6019_v39 = vpop.f32.mrf.mxu0 }
 0x606   : > { %v16833_v21 = vadd.f32 %v6019_v39, %v16453_v4  ;;  %9523 = vmatmul.msk.bf16.gmra.mxu1 %vm4345_vm3, %v6136_v41  ;;  %v20541_v4 = vld [vmem:[#allocation15_spill] sm:$0xff]  ;;  %v20543_v41 = vld [vmem:[#allocation56_spill] sm:$0xff] }
 0x608   : > { %v6826_v36 = vpop.f32.mrf.mxu3  ;;  %20538 = vst [vmem:[#allocation38_spill] sm:$0xff] %v16833_v21 }
 0x609   : > { %v16836_v10 = vadd.f32 %v6826_v36, %v6673_v54  ;;  %v6675_v54 = vadd.f32 %v16564_v16, %v6431_v30 }
 0x60b   : > { %v6328_v61 = vpop.f32.mrf.mxu1 }
 0x60c   : > { %v6435_v62 = vadd.f32 %v6328_v61, %v16415_v43  ;;  %v6139_v61 = vrot.slane %v16012_v14, 1 }
 0x60d   : > { %9593 = vmatmul.msk.bf16.gmra.mxu3 %vm4345_vm3, %v20539_v44  ;;  %v6022_v63 = vpop.f32.mrf.mxu0 }
 0x60e   : > { %v16843_v25 = vadd.f32 %v6022_v63, %v16472_v0 }
 0x610   : > { %v6829_v32 = vpop.f32.mrf.mxu3  ;;  %20540 = vst [vmem:[#allocation93_spill] sm:$0xff] %v16843_v25  ;;  %9616 = vmatmul.msk.bf16.gmra.mxu0 %vm4345_vm3, %v20541_v4 }
 0x611   : > { %v16845_v50 = vadd.f32 %v6829_v32, %v6674_v24  ;;  %v6677_v32 = vadd.f32 %v16607_v34, %v6433_v38 }
 0x613   : > { %v6331_v9 = vpop.f32.mrf.mxu1 }
 0x614   : > { %v6436_v8 = vadd.f32 %v6331_v9, %v16435_v12  ;;  %v6676_v12 = vadd.f32 %v16584_v15, %v6432_v18  ;;  %v6140_v15 = vsel %vm1130_vm0, %v6137_v19, %v6139_v61  ;;  %v20545_v9 = vld [vmem:[#allocation154_spill] sm:$0xff] }
 0x615   : > { %v6024_v43 = vpop.f32.mrf.mxu0 }
 0x616   : > { %v16854_v39 = vadd.f32 %v6024_v43, %v16493_v47  ;;  %9524 = vmatmul.msk.bf16.gmra.mxu1 %vm4345_vm3, %v6138_v27  ;;  %v20544_v47 = vld [vmem:[#allocation126_spill] sm:$0xff]  ;;  %v6141_v27 = vrot.slane %v16052_v20, 1 }
 0x618   : > { %v6831_v42 = vpop.f32.mrf.mxu3  ;;  %20542 = vst [vmem:[#allocation82_spill] sm:$0xff] %v16854_v39 }
 0x619   : > { %v16857_v0 = vadd.f32 %v6831_v42, %v6675_v54 }
 0x61b   : > { %v6333_v13 = vpop.f32.mrf.mxu1 }
 0x61c   : > { %v6437_v36 = vadd.f32 %v6333_v13, %v16450_v22  ;;  %v6679_v13 = vadd.f32 %v16652_v51, %v6435_v62 }
 0x61d   : > { %9594 = vmatmul.msk.bf16.gmra.mxu3 %vm4345_vm3, %v20543_v41  ;;  %v7017_v16 = vpop.f32.mrf.mxu0 }
 0x61e   : > { %v16864_v5 = vadd.f32 %v7017_v16, %v16511_v49 }
 0x620   : > { %v6834_v30 = vpop.f32.mrf.mxu3  ;;  %9617 = vmatmul.msk.bf16.gmra.mxu0 %vm4345_vm3, %v20544_v47  ;;  %v20549_v47 = vld [vmem:[#allocation51_spill] sm:$0xff] }
 0x621   : > { %v16866_v44 = vadd.f32 %v6834_v30, %v6676_v12  ;;  %v20547_v12 = vld [vmem:[#allocation133_spill] sm:$0xff]  ;;  %v20548_v30 = vld [vmem:[#allocation175_spill] sm:$0xff] }
 0x623   : > { %v6336_v24 = vpop.f32.mrf.mxu1 }
 0x624   : > { %v6438_v63 = vadd.f32 %v6336_v24, %v16470_v59  ;;  %v6678_v59 = vadd.f32 %v16633_v52, %v6434_v23  ;;  %v6142_v52 = vsel %vm1130_vm0, %v6139_v61, %v6141_v27 }
 0x625   : > { %v7019_v22 = vpop.f32.mrf.mxu0 }
 0x626   : > { %v16875_v4 = vadd.f32 %v7019_v22, %v16528_v33  ;;  %9525 = vmatmul.msk.bf16.gmra.mxu1 %vm4345_vm3, %v6140_v15  ;;  %v20546_v33 = vld [vmem:[#allocation83_spill] sm:$0xff]  ;;  %v20550_v22 = vld [vmem:[#allocation108_spill] sm:$0xff] }
 0x627   : > { %v20551_v15 = vld [vmem:[#allocation167_spill] sm:$0xff] }
 0x628   : > { %v6836_v18 = vpop.f32.mrf.mxu3 }
 0x629   : > { %v16878_v49 = vadd.f32 %v6836_v18, %v6677_v32  ;;  %v6143_v18 = vrot.slane %v20551_v15, 1  ;;  %v20560_v15 = vld [vmem:[#allocation91_spill] sm:$0xff] }
 0x62b   : > { %v6338_v14 = vpop.f32.mrf.mxu1 }
 0x62c   : > { %v6439_v54 = vadd.f32 %v6338_v14, %v16490_v48 }
 0x62d   : > { %9595 = vmatmul.msk.bf16.gmra.mxu3 %vm4345_vm3, %v20545_v9  ;;  %v7022_v34 = vpop.f32.mrf.mxu0  ;;  %v6681_v9 = vadd.f32 %v16685_v26, %v6437_v36 }
 0x62e   : > { %v16885_v19 = vadd.f32 %v7022_v34, %v16544_v53 }
 0x630   : > { %v6839_v38 = vpop.f32.mrf.mxu3  ;;  %9618 = vmatmul.msk.bf16.gmra.mxu0 %vm4345_vm3, %v20546_v33 }
 0x631   : > { %v16887_v43 = vadd.f32 %v6839_v38, %v6678_v59  ;;  %v6144_v59 = vsel %vm1130_vm0, %v6141_v27, %v6143_v18  ;;  %v6682_v38 = vadd.f32 %v16709_v1, %v6438_v63  ;;  %v20553_v27 = vld [vmem:[#allocation112_spill] sm:$0xff]  ;;  %v20555_v63 = vld [vmem:[#allocation62_spill] sm:$0xff] }
 0x633   : > { %v6341_v42 = vpop.f32.mrf.mxu1 }
 0x634   : > { %v6440_v41 = vadd.f32 %v6341_v42, %v16509_v37  ;;  %v6680_v37 = vadd.f32 %v16666_v17, %v6436_v8  ;;  %v20552_v8 = vld [vmem:[#allocation147_spill] sm:$0xff] }
 0x635   : > { %v7024_v48 = vpop.f32.mrf.mxu0 }
 0x636   : > { %v16896_v16 = vadd.f32 %v7024_v48, %v20547_v12  ;;  %9526 = vmatmul.msk.bf16.gmra.mxu1 %vm4345_vm3, %v6142_v52  ;;  %v20554_v12 = vld [vmem:[#allocation14_spill] sm:$0xff] }
 0x638   : > { %v6841_v23 = vpop.f32.mrf.mxu3 }
 0x639   : > { %v16899_v53 = vadd.f32 %v6841_v23, %v6679_v13  ;;  %v6683_v13 = vadd.f32 %v16723_v7, %v6439_v54 }
 0x63b   : > { %v6343_v20 = vpop.f32.mrf.mxu1 }
 0x63c   : > { %v6441_v24 = vadd.f32 %v6343_v20, %v20549_v47 }
 0x63d   : > { %9596 = vmatmul.msk.bf16.gmra.mxu3 %vm4345_vm3, %v20548_v30  ;;  %v7027_v51 = vpop.f32.mrf.mxu0  ;;  %v20556_v30 = vld [vmem:[#allocation171_spill] sm:$0xff] }
 0x63e   : > { %v16906_v61 = vadd.f32 %v7027_v51, %v16579_v55  ;;  %v6684_v20 = vadd.f32 %v20556_v30, %v6440_v41  ;;  %v20558_v51 = vld [vmem:[#allocation49_spill] sm:$0xff] }
 0x640   : > { %v6844_v62 = vpop.f32.mrf.mxu3  ;;  %9619 = vmatmul.msk.bf16.gmra.mxu0 %vm4345_vm3, %v20550_v22 }
 0x641   : > { %v16908_v32 = vadd.f32 %v6844_v62, %v6680_v37  ;;  %v20557_v37 = vld [vmem:[#allocation29_spill] sm:$0xff]  ;;  %v20559_v62 = vld [vmem:[#allocation156_spill] sm:$0xff] }
 0x642   : > { %v6147_v22 = vrot.slane %v20559_v62, 1 }
 0x645   : > { %v7029_v14 = vpop.f32.mrf.mxu0 }
 0x646   : > { %v16916_v17 = vadd.f32 %v7029_v14, %v16596_v6  ;;  %9527 = vmatmul.msk.bf16.gmra.mxu1 %vm4345_vm3, %v6144_v59  ;;  %v6145_v6 = vrot.slane %v16142_v35, 1 }
 0x648   : > { %v6846_v34 = vpop.f32.mrf.mxu3  ;;  %v6146_v52 = vsel %vm1130_vm0, %v6143_v18, %v6145_v6  ;;  %v6716_v18 = vshll.u32 %v20560_v15, 16 }
 0x649   : > { %v16919_v55 = vadd.f32 %v6846_v34, %v6681_v9  ;;  %v20561_v9 = vld [vmem:[#allocation35_spill] sm:$0xff]  ;;  %v6148_v34 = vsel %vm1130_vm0, %v6145_v6, %v6147_v22  ;;  %v20566_v6 = vld [vmem:[#allocation18_spill] sm:$0xff] }
 0x64a   : > { %v6685_v14 = vadd.f32 %v20561_v9, %v6441_v24 }
 0x64d   : > { %9597 = vmatmul.msk.bf16.gmra.mxu3 %vm4345_vm3, %v20552_v8  ;;  %v7032_v33 = vpop.f32.mrf.mxu0  ;;  %v20562_v8 = vld [vmem:[#allocation136_spill] sm:$0xff] }
 0x64e   : > { %v16925_v26 = vadd.f32 %v7032_v33, %v16614_v2 }
 0x650   : > { %v6849_v42 = vpop.f32.mrf.mxu3  ;;  %9620 = vmatmul.msk.bf16.gmra.mxu0 %vm4345_vm3, %v20553_v27  ;;  %v20563_v27 = vld [vmem:[#allocation74_spill] sm:$0xff] }
 0x651   : > { %v16927_v36 = vadd.f32 %v6849_v42, %v6682_v38  ;;  %v6718_v42 = vrot.slane %v6716_v18, 1 }
 0x655   : > { %v7034_v48 = vpop.f32.mrf.mxu0 }
 0x656   : > { %v16935_v1 = vadd.f32 %v7034_v48, %v20554_v12  ;;  %9528 = vmatmul.msk.bf16.gmra.mxu1 %vm4345_vm3, %v6146_v52  ;;  %v20564_v52 = vld [vmem:[#allocation30_spill] sm:$0xff]  ;;  %v6149_v12 = vrot.slane %v20566_v6, 1 }
 0x658   : > { %v6851_v23 = vpop.f32.mrf.mxu3 }
 0x659   : > { %v16938_v2 = vadd.f32 %v6851_v23, %v6683_v13  ;;  %v6719_v13 = vsel %vm4094_vm2, %v20563_v27, %v6718_v42  ;;  %v20565_v23 = vld [vmem:[#allocation87_spill] sm:$0xff] }
 0x65d   : > { %9598 = vmatmul.msk.bf16.gmra.mxu3 %vm4345_vm3, %v20555_v63  ;;  %v7037_v47 = vpop.f32.mrf.mxu0  ;;  %v20567_v63 = vld [vmem:[#allocation32_spill] sm:$0xff] }
 0x65e   : > { %v16944_v7 = vadd.f32 %v7037_v47, %v20557_v37  ;;  %v6723_v30 = vshll.u32 %v20567_v63, 16  ;;  %v6150_v47 = vsel %vm1130_vm0, %v6147_v22, %v6149_v12  ;;  %v20570_v22 = vld [vmem:[#allocation110_spill] sm:$0xff] }
 0x660   : > { %v6854_v35 = vpop.f32.mrf.mxu3  ;;  %9621 = vmatmul.msk.bf16.gmra.mxu0 %vm4345_vm3, %v20558_v51  ;;  %v6725_v37 = vrot.slane %v6723_v30, 1  ;;  %v20568_v51 = vld [vmem:[#allocation163_spill] sm:$0xff] }
 0x661   : > { %v16946_v54 = vadd.f32 %v6854_v35, %v6684_v20  ;;  %v6720_v35 = vshrl.u32 %v20560_v15, 16 }
 0x663   : > { %v6722_v18 = vor.u32 %v6720_v35, %v6718_v42  ;;  %v6727_v42 = vshrl.u32 %v20567_v63, 16  ;;  %v20572_v35 = vld [vmem:[#allocation68_spill] sm:$0xff] }
 0x665   : > { %v7039_v59 = vpop.f32.mrf.mxu0  ;;  %v6726_v9 = vsel %vm4094_vm2, %v6722_v18, %v6725_v37  ;;  %v6729_v6 = vor.u32 %v6727_v42, %v6725_v37 }
 0x666   : > { %v16955_v38 = vadd.f32 %v7039_v59, %v20562_v8  ;;  %9529 = vmatmul.msk.bf16.gmra.mxu1 %vm4345_vm3, %v6148_v34  ;;  %v9870_v59 = vld [vmem:[%s18338_s2] ss:$0 sm:$0xff]  ;;  %v20571_v8 = vld [vmem:[#allocation55_spill] sm:$0xff] }
 0x667   : > { %v20569_v34 = vld [vmem:[#allocation22_spill] sm:$0xff]  ;;  %v6730_v27 = vshll.u32 %v20571_v8, 16 }
 0x668   : > { %v6856_v41 = vpop.f32.mrf.mxu3 }
 0x669   : > { %v16958_v33 = vadd.f32 %v6856_v41, %v6685_v14  ;;  %v3801_v41 = vadd.f32 %v9870_v59, %v20569_v34  ;;  %v20573_v34 = vld [vmem:[#allocation40_spill] sm:$0xff] }
 0x66d   : > { %9599 = vmatmul.msk.bf16.gmra.mxu3 %vm4345_vm3, %v6719_v13  ;;  %v7042_v48 = vpop.f32.mrf.mxu0  ;;  %v3868_v13 = vmax.f32 %v3801_v41, 0.0 }
 0x66e   : > { %v16964_v24 = vadd.f32 %v7042_v48, %v20564_v52  ;;  %v6732_v52 = vrot.slane %v6730_v27, 1  ;;  %v20574_v27 = vld [vmem:[#allocation60_spill] sm:$0xff] }
 0x670   : > { %9622 = vmatmul.msk.bf16.gmra.mxu0 %vm4345_vm3, %v20565_v23  ;;  %v3935_v23 = vpack.c.bf16 %v3868_v13, %v3868_v13  ;;  %v6733_v12 = vsel %vm4094_vm2, %v6729_v6, %v6732_v52 }
 0x672   : > { %v6714_v30 = vunpack.c.l.b16 %v3935_v23 }
 0x675   : > { %v7044_v20 = vpop.f32.mrf.mxu0 }
 0x676   : > { %v7178_v62 = vadd.f32 %v7044_v20, %v20568_v51  ;;  %9530 = vmatmul.msk.bf16.gmra.mxu1 %vm4345_vm3, %v6150_v47  ;;  %v16986_v47 = vpack.c.b16 %v6714_v30, %v6714_v30  ;;  %v6734_v51 = vshrl.u32 %v20571_v8, 16 }
 0x678   : > { %v6738_v18 = vshll.u32 %v16986_v47, 16  ;;  %v6736_v59 = vor.u32 %v6734_v51, %v6732_v52  ;;  %v20575_v51 = vld [vmem:[#allocation114_spill] sm:$0xff] }
 0x67a   : > { %v6740_v37 = vrot.slane %v6738_v18, 1 }
 0x67c   : > { %v6741_v42 = vsel %vm4094_vm2, %v6736_v59, %v6740_v37 }
 0x67d   : > { %9600 = vmatmul.msk.bf16.gmra.mxu3 %vm4345_vm3, %v6726_v9  ;;  %v7047_v14 = vpop.f32.mrf.mxu0 }
 0x680   : > { %9623 = vmatmul.msk.bf16.gmra.mxu0 %vm4345_vm3, %v20570_v22  ;;  %v16996_v22 = vld [vmem:[%s18340_s4] ss:$0 sm:$0xff] }
 0x685   : > { %v7049_v48 = vpop.f32.mrf.mxu0 }
 0x68d   : > { %9601 = vmatmul.msk.bf16.gmra.mxu3 %vm4345_vm3, %v6733_v12  ;;  %v7052_v20 = vpop.f32.mrf.mxu0 }
 0x68e   : > { %v7181_v13 = vadd.f32 %v7052_v20, %v20574_v27  ;;  %v17010_v20 = vld [vmem:[%s18341_s5] ss:$0 sm:$0xff] }
 0x690   : > { %9624 = vmatmul.msk.bf16.gmra.mxu0 %vm4345_vm3, %v20572_v35  ;;  %v7245_v6 = vadd.f32 %v16996_v22, %v7181_v13 }
 0x692   : > { %v7305_v18 = vmax.f32 %v7245_v6, 0.0 }
 0x694   : > { %v7369_v27 = vmul.f32 %v17010_v20, %v7305_v18 }
 0x695   : > { %v7054_v9 = vpop.f32.mrf.mxu0 }
 0x696   : > { %v7182_v41 = vadd.f32 %v7054_v9, %v20573_v34 }
 0x698   : > { %v7246_v23 = vadd.f32 %v16996_v22, %v7182_v41  ;;  %v20576_v41 = vld [vmem:[#allocation97_spill] sm:$0xff] }
 0x699   : > { %v7179_v37 = vadd.f32 %v7047_v14, %v20576_v41  ;;  %v7241_v14 = vadd.f32 %v16996_v22, %v16964_v24 }
 0x69a   : > { %v7306_v30 = vmax.f32 %v7246_v23, 0.0  ;;  %v20577_v23 = vld [vmem:[#allocation48_spill] sm:$0xff] }
 0x69c   : > { %v7370_v59 = vmul.f32 %v17010_v20, %v7306_v30 }
 0x69d   : > { %9602 = vmatmul.msk.bf16.gmra.mxu3 %vm4345_vm3, %v6741_v42  ;;  %v7057_v12 = vpop.f32.mrf.mxu0 }
 0x69e   : > { %v7183_v52 = vadd.f32 %v7057_v12, %v16761_v40  ;;  %v17017_v40 = vld [vmem:[%s18342_s6] ss:$0 sm:$0xff]  ;;  %v7180_v12 = vadd.f32 %v7049_v48, %v20577_v23  ;;  %v7242_v48 = vadd.f32 %v16996_v22, %v7178_v62 }
 0x69f   : > { %v7434_v6 = vadd.f32 %v17017_v40, %v7370_v59 }
 0x6a0   : > { %v7247_v35 = vadd.f32 %v16996_v22, %v7183_v52  ;;  %9625 = vmatmul.msk.bf16.gmra.mxu0 %vm4345_vm3, %v20575_v51  ;;  %v17028_v51 = vadd.f32 %v17017_v40, %v7369_v27  ;;  %v7301_v27 = vmax.f32 %v7241_v14, 0.0  ;;  %v7302_v39 = vmax.f32 %v7242_v48, 0.0 }
 0x6a1   : > { %v7237_v14 = vadd.f32 %v16996_v22, %v16925_v26 }
 0x6a2   : > { %v7307_v9 = vmax.f32 %v7247_v35, 0.0  ;;  %v7243_v35 = vadd.f32 %v16996_v22, %v7179_v37  ;;  %v17038_v37 = vadd.f32 %v16996_v22, %v16864_v5  ;;  %v7365_v26 = vmul.f32 %v17010_v20, %v7301_v27 }
 0x6a4   : > { %v7371_v34 = vmul.f32 %v17010_v20, %v7307_v9  ;;  %v7244_v9 = vadd.f32 %v16996_v22, %v7180_v12 }
 0x6a5   : > { %v7059_v13 = vpop.f32.mrf.mxu0 }
 0x6a6   : > { %v7184_v42 = vadd.f32 %v7059_v13, %v16773_v3  ;;  %v7435_v52 = vadd.f32 %v17017_v40, %v7371_v34  ;;  %v7568_v3 = vrot.slane %v7434_v6, 1  ;;  %v7303_v34 = vmax.f32 %v7243_v35, 0.0 }
 0x6a7   : > { %v7566_v13 = vrot.slane %v17028_v51, 1  ;;  %v7304_v23 = vmax.f32 %v7244_v9, 0.0  ;;  %v7239_v9 = vadd.f32 %v16996_v22, %v16944_v7 }
 0x6a8   : > { %v7248_v30 = vadd.f32 %v16996_v22, %v7184_v42  ;;  %v7570_v41 = vrot.slane %v7435_v52, 1 }
 0x6a9   : > { %v7569_v62 = vsel %vm1130_vm0, %v7566_v13, %v7568_v3 }
 0x6aa   : > { %v7308_v18 = vmax.f32 %v7248_v30, 0.0  ;;  %v7571_v12 = vsel %vm1130_vm0, %v7568_v3, %v7570_v41  ;;  %v17050_v5 = vmax.f32 %v17028_v51, %v7569_v62  ;;  %v7367_v3 = vmul.f32 %v17010_v20, %v7303_v34 }
 0x6ab   : > { %v17047_v25 = vmax.f32 %v7434_v6, %v7571_v12  ;;  %v17064_v6 = vadd.f32 %v16996_v22, %v16875_v4  ;;  %v7240_v51 = vadd.f32 %v16996_v22, %v16955_v38  ;;  %v7233_v34 = vadd.f32 %v16996_v22, %v16885_v19 }
 0x6ac   : > { %v7372_v59 = vmul.f32 %v17010_v20, %v7308_v18  ;;  %v20578_v18 = vld [vmem:[#allocation181_spill] sm:$0xff]  ;;  %v7366_v4 = vmul.f32 %v17010_v20, %v7302_v39  ;;  %v7297_v62 = vmax.f32 %v7237_v14, 0.0  ;;  %v7431_v27 = vadd.f32 %v17017_v40, %v7367_v3 }
 0x6ad   : > { %v7062_v42 = vpop.f32.mrf.mxu0  ;;  %v7429_v39 = vadd.f32 %v17017_v40, %v7365_v26 }
 0x6ae   : > { %v7185_v24 = vadd.f32 %v7062_v42, %v16782_v56  ;;  %v7436_v30 = vadd.f32 %v17017_v40, %v7372_v59  ;;  %v17054_v56 = vadd.f32 %v16996_v22, %v16906_v61  ;;  %v7238_v61 = vadd.f32 %v16996_v22, %v16935_v1 }
 0x6af   : > { %v7368_v42 = vmul.f32 %v17010_v20, %v7304_v23  ;;  %v7299_v1 = vmax.f32 %v7239_v9, 0.0  ;;  %v7236_v23 = vadd.f32 %v16996_v22, %v16916_v17  ;;  %v7430_v21 = vadd.f32 %v17017_v40, %v7366_v4 }
 0x6b0   : > { %v7249_v35 = vadd.f32 %v16996_v22, %v7185_v24  ;;  %9626 = vmatmul.msk.bf16.gmra.mxu0 %vm4345_vm3, %v20578_v18  ;;  %v7572_v7 = vrot.slane %v7436_v30, 1  ;;  %v17076_v24 = vadd.f32 %v16996_v22, %v16896_v16  ;;  %v7295_v12 = vmax.f32 %v17054_v56, 0.0 }
 0x6b1   : > { %v7300_v18 = vmax.f32 %v7240_v51, 0.0  ;;  %v7298_v48 = vmax.f32 %v7238_v61, 0.0  ;;  %v7361_v17 = vmul.f32 %v17010_v20, %v7297_v62  ;;  %v7363_v51 = vmul.f32 %v17010_v20, %v7299_v1 }
 0x6b2   : > { %v7309_v59 = vmax.f32 %v7249_v35, 0.0  ;;  %v7573_v56 = vsel %vm1130_vm0, %v7570_v41, %v7572_v7  ;;  %v7558_v41 = vrot.slane %v7429_v39, 1 }
 0x6b3   : > { %v17090_v3 = vmax.f32 %v7435_v52, %v7573_v56  ;;  %v7364_v61 = vmul.f32 %v17010_v20, %v7300_v18  ;;  %v7362_v4 = vmul.f32 %v17010_v20, %v7298_v48  ;;  %v7293_v18 = vmax.f32 %v7233_v34, 0.0 }
 0x6b4   : > { %v7373_v38 = vmul.f32 %v17010_v20, %v7309_v59  ;;  %v7432_v59 = vadd.f32 %v17017_v40, %v7368_v42 }
 0x6b5   : > { %v7064_v35 = vpop.f32.mrf.mxu0 }
 0x6b6   : > { %v7437_v19 = vadd.f32 %v17017_v40, %v7373_v38  ;;  %v7186_v16 = vadd.f32 %v7064_v35, %v16794_v46  ;;  %v7562_v38 = vrot.slane %v7431_v27, 1  ;;  %v7564_v46 = vrot.slane %v7432_v59, 1 }
 0x6b7   : > { %v7560_v35 = vrot.slane %v7430_v21, 1 }
 0x6b8   : > { %v7574_v14 = vrot.slane %v7437_v19, 1  ;;  %v7250_v9 = vadd.f32 %v16996_v22, %v7186_v16  ;;  %v7567_v52 = vsel %vm1130_vm0, %v7564_v46, %v7566_v13  ;;  %v7565_v16 = vsel %vm1130_vm0, %v7562_v38, %v7564_v46 }
 0x6b9   : > { %v17103_v1 = vmax.f32 %v7432_v59, %v7567_v52  ;;  %v17105_v56 = vmax.f32 %v7431_v27, %v7565_v16  ;;  %v7563_v28 = vsel %vm1130_vm0, %v7560_v35, %v7562_v38  ;;  %v7425_v27 = vadd.f32 %v17017_v40, %v7361_v17 }
 0x6ba   : > { %v7310_v26 = vmax.f32 %v7250_v9, 0.0  ;;  %v7575_v42 = vsel %vm1130_vm0, %v7572_v7, %v7574_v14  ;;  %v7427_v9 = vadd.f32 %v17017_v40, %v7363_v51  ;;  %v17119_v34 = vmax.f32 %v7430_v21, %v7563_v28 }
 0x6bb   : > { %v17097_v11 = vmax.f32 %v7436_v30, %v7575_v42  ;;  %v7561_v30 = vsel %vm1130_vm0, %v7558_v41, %v7560_v35  ;;  %v7296_v42 = vmax.f32 %v7236_v23, 0.0  ;;  %v7790_v59 = vmax.f32 %v17105_v56, %v17047_v25  ;;  %v20579_v35 = vld [vmem:[#allocation188_spill] sm:$0xff] }
 0x6bc   : > { %v7374_v62 = vmul.f32 %v17010_v20, %v7310_v26  ;;  %v17121_v51 = vmax.f32 %v7429_v39, %v7561_v30  ;;  %v7428_v38 = vadd.f32 %v17017_v40, %v7364_v61  ;;  %v7294_v46 = vmax.f32 %v17076_v24, 0.0 }
 0x6bd   : > { %v7067_v7 = vpop.f32.mrf.mxu0  ;;  %v7359_v23 = vmul.f32 %v17010_v20, %v7295_v12  ;;  %v7554_v52 = vrot.slane %v7427_v9, 1  ;;  %v7789_v28 = vmax.f32 %v17119_v34, %v17050_v5  ;;  %v7357_v17 = vmul.f32 %v17010_v20, %v7293_v18 }
 0x6be   : > { %v17111_v13 = vadd.f32 %v17017_v40, %v7374_v62  ;;  %v17114_v48 = vadd.f32 %v7067_v7, %v16803_v31  ;;  %v7426_v31 = vadd.f32 %v17017_v40, %v7362_v4  ;;  %v7788_v21 = vmax.f32 %v17121_v51, %v17103_v1 }
 0x6bf   : > { %v7556_v39 = vrot.slane %v7428_v38, 1  ;;  %v7360_v24 = vmul.f32 %v17010_v20, %v7296_v42  ;;  %v7550_v16 = vrot.slane %v7425_v27, 1  ;;  %v7358_v30 = vmul.f32 %v17010_v20, %v7294_v46 }
 0x6c0   : > { %v18900_v26 = vrot.slane %v17111_v13, 1  ;;  %9627 = vmatmul.msk.bf16.gmra.mxu0 %vm4345_vm3, %v20579_v35  ;;  %v7552_v61 = vrot.slane %v7426_v31, 1  ;;  %v7423_v35 = vadd.f32 %v17017_v40, %v7359_v23  ;;  %v7292_v42 = vmax.f32 %v17064_v6, 0.0 }
 0x6c1   : > { %v7559_v4 = vsel %vm1130_vm0, %v7556_v39, %v7558_v41  ;;  %v7557_v7 = vsel %vm1130_vm0, %v7554_v52, %v7556_v39  ;;  %v7421_v41 = vadd.f32 %v17017_v40, %v7357_v17  ;;  %v7792_v6 = vmax.f32 %v17050_v5, %v17097_v11 }
 0x6c2   : > { %v7577_v12 = vsel %vm1130_vm0, %v7574_v14, %v18900_v26  ;;  %v7727_v57 = vmax.f32 %v7428_v38, %v7559_v4  ;;  %v7726_v18 = vmax.f32 %v7427_v9, %v7557_v7  ;;  %v7555_v26 = vsel %vm1130_vm0, %v7552_v61, %v7554_v52 }
 0x6c3   : > { %v17139_v62 = vmax.f32 %v7437_v19, %v7577_v12  ;;  %v7553_v19 = vsel %vm1130_vm0, %v7550_v16, %v7552_v61  ;;  %v7725_v9 = vmax.f32 %v7426_v31, %v7555_v26  ;;  %v20580_v52 = vmax.f32 %v17038_v37, 0.0 }
 0x6c4   : > { %v7787_v46 = vmax.f32 %v7727_v57, %v17105_v56  ;;  %v7786_v38 = vmax.f32 %v7726_v18, %v17119_v34  ;;  %v7724_v23 = vmax.f32 %v7425_v27, %v7553_v19  ;;  %v7546_v17 = vrot.slane %v7423_v35, 1 }
 0x6c5   : > { %v7069_v29 = vpop.f32.mrf.mxu0  ;;  %v7793_v14 = vmax.f32 %v17047_v25, %v17139_v62  ;;  %v7424_v25 = vadd.f32 %v17017_v40, %v7360_v24  ;;  %v7355_v12 = vmul.f32 %v17010_v20, %v20580_v52  ;;  %v7785_v56 = vmax.f32 %v7725_v9, %v17121_v51 }
 0x6c6   : > { %v17152_v39 = vadd.f32 %v7069_v29, %v16815_v60  ;;  %v7422_v29 = vadd.f32 %v17017_v40, %v7358_v30  ;;  %v7791_v60 = vmax.f32 %v17103_v1, %v17090_v3  ;;  %v7784_v34 = vmax.f32 %v7724_v23, %v7727_v57 }
 0x6c7   : > { %7937 = vmatpush.msra.mxu1 %v7793_v14  ;;  %v7548_v61 = vrot.slane %v7424_v25, 1  ;;  %v7356_v27 = vmul.f32 %v17010_v20, %v7292_v42  ;;  %v7542_v26 = vrot.slane %v7421_v41, 1  ;;  %v7419_v7 = vadd.f32 %v17017_v40, %v7355_v12 }
 0x6c8   : > { %v7544_v5 = vrot.slane %v7422_v29, 1 }
 0x6c9   : > { %7938 = vmatpush.msra.mxu1 %v7792_v6  ;;  %v7551_v37 = vsel %vm1130_vm0, %v7548_v61, %v7550_v16  ;;  %v7549_v31 = vsel %vm1130_vm0, %v7546_v17, %v7548_v61  ;;  %v7420_v6 = vadd.f32 %v17017_v40, %v7356_v27  ;;  %v7539_v52 = vrot.slane %v7419_v7, 1 }
 0x6ca   : > { %v7723_v24 = vmax.f32 %v7424_v25, %v7551_v37  ;;  %v7722_v4 = vmax.f32 %v7423_v35, %v7549_v31  ;;  %v7547_v1 = vsel %vm1130_vm0, %v7544_v5, %v7546_v17  ;;  %v7545_v57 = vsel %vm1130_vm0, %v7542_v26, %v7544_v5  ;;  %v20581_v25 = vld [vmem:[#allocation25_spill] sm:$0xff]  ;;  %v6346_v37 = vpop.f32.mrf.mxu1 }
 0x6cb   : > { %7939 = vmatpush.msra.mxu1 %v7791_v60  ;;  %v7721_v19 = vmax.f32 %v7422_v29, %v7547_v1  ;;  %v7720_v16 = vmax.f32 %v7421_v41, %v7545_v57  ;;  %v7540_v12 = vrot.slane %v7420_v6, 1 }
 0x6cc   : > { %v7783_v42 = vmax.f32 %v7723_v24, %v7726_v18  ;;  %v7782_v14 = vmax.f32 %v7722_v4, %v7725_v9 }
 0x6cd   : > { %v7072_v30 = vpop.f32.mrf.mxu0  ;;  %7940 = vmatpush.msra.mxu1 %v7790_v59  ;;  %v7781_v35 = vmax.f32 %v7721_v19, %v7724_v23  ;;  %v7780_v59 = vmax.f32 %v7720_v16, %v7723_v24  ;;  %v7543_v17 = vsel %vm1130_vm0, %v7540_v12, %v7542_v26  ;;  %v20582_v23 = vld [vmem:[#allocation174_spill] sm:$0xff]  ;;  %v20584_v26 = vld [vmem:[#allocation137_spill] sm:$0xff]  ;;  %v17193_v24 = vpop.f32.mrf.mxu2 }
 0x6ce   : > { %v17173_v51 = vadd.f32 %v7072_v30, %v16824_v45  ;;  %v7541_v45 = vsel %vm1130_vm0, %v7539_v52, %v7540_v12  ;;  %v7719_v18 = vmax.f32 %v7420_v6, %v7543_v17  ;;  %v20586_v17 = vld [vmem:[#allocation53_spill] sm:$0xff] }
 0x6cf   : > { %7941 = vmatpush.msra.mxu1 %v7789_v28  ;;  %v7718_v9 = vmax.f32 %v7419_v7, %v7541_v45 }
 0x6d0   : > { %9628 = vmatmul.msk.bf16.gmra.mxu0 %vm4345_vm3, %v20581_v25  ;;  %v7779_v41 = vmax.f32 %v7719_v18, %v7722_v4  ;;  %v17195_v4 = vpop.f32.mrf.mxu3 }
 0x6d1   : > { %7942 = vmatpush.msra.mxu1 %v7788_v21  ;;  %v7778_v60 = vmax.f32 %v7718_v9, %v7721_v19 }
 0x6d2   : > { %v17197_v7 = vpop.f32.mrf.mxu1 }
 0x6d3   : > { %7943 = vmatpush.msra.mxu1 %v7787_v46 }
 0x6d5   : > { %v7074_v29 = vpop.f32.mrf.mxu0  ;;  %7944 = vmatpush.msra.mxu1 %v7786_v38  ;;  %v17201_v30 = vpop.f32.mrf.mxu2 }
 0x6d6   : > { %v17181_v28 = vadd.f32 %v7074_v29, %v16836_v10 }
 0x6d7   : > { %7945 = vmatpush.msra.mxu1 %v7785_v56  ;;  %v20583_v56 = vld [vmem:[#allocation5_spill] sm:$0xff] }
 0x6d8   : > { %v17203_v1 = vpop.f32.mrf.mxu3 }
 0x6d9   : > { %7946 = vmatpush.msra.mxu1 %v7784_v34 }
 0x6db   : > { %7947 = vmatpush.msra.mxu1 %v7783_v42  ;;  %v17206_v42 = vpop.f32.mrf.mxu1 }
 0x6dd   : > { %v7077_v21 = vpop.f32.mrf.mxu0  ;;  %7948 = vmatpush.msra.mxu1 %v7782_v14  ;;  %v17210_v6 = vpop.f32.mrf.mxu2 }
 0x6de   : > { %v7191_v46 = vadd.f32 %v7077_v21, %v16845_v50 }
 0x6df   : > { %7949 = vmatpush.msra.mxu1 %v7781_v35 }
 0x6e0   : > { %9629 = vmatmul.msk.bf16.gmra.mxu0 %vm4345_vm3, %v20582_v23  ;;  %v17214_v52 = vpop.f32.mrf.mxu3 }
 0x6e1   : > { %7950 = vmatpush.msra.mxu1 %v7780_v59 }
 0x6e3   : > { %7951 = vmatpush.msra.mxu1 %v7779_v41  ;;  %v17221_v9 = vpop.f32.mrf.mxu1 }
 0x6e5   : > { %v7079_v61 = vpop.f32.mrf.mxu0  ;;  %7952 = vmatpush.msra.mxu1 %v7778_v60 }
 0x6e6   : > { %v7192_v10 = vadd.f32 %v7079_v61, %v16857_v0 }
 0x6ed   : > { %v7082_v38 = vpop.f32.mrf.mxu0 }
 0x6ee   : > { %v7193_v5 = vadd.f32 %v7082_v38, %v16866_v44  ;;  %v20585_v44 = vld [vmem:[#allocation161_spill] sm:$0xff] }
 0x6f0   : > { %9630 = vmatmul.msk.bf16.gmra.mxu0 %vm4345_vm3, %v20583_v56 }
 0x6f5   : > { %v7084_v34 = vpop.f32.mrf.mxu0 }
 0x6f6   : > { %v7194_v27 = vadd.f32 %v7084_v34, %v16878_v49 }
 0x6fd   : > { %v7087_v50 = vpop.f32.mrf.mxu0 }
 0x700   : > { %9631 = vmatmul.msk.bf16.gmra.mxu0 %vm4345_vm3, %v20584_v26 }
 0x705   : > { %v7089_v31 = vpop.f32.mrf.mxu0 }
 0x70d   : > { %v7092_v0 = vpop.f32.mrf.mxu0 }
 0x70e   : > { %v7197_v14 = vadd.f32 %v7092_v0, %v16908_v32  ;;  %v7195_v32 = vadd.f32 %v7087_v50, %v16887_v43  ;;  %v17230_v43 = vpop.f32.mrf.mxu2  ;;  %v17235_v50 = vpop.f32.mrf.mxu3 }
 0x710   : > { %9632 = vmatmul.msk.bf16.gmra.mxu0 %vm4345_vm3, %v20585_v44  ;;  %v7261_v25 = vadd.f32 %v16996_v22, %v7197_v14  ;;  %v7259_v21 = vadd.f32 %v16996_v22, %v7195_v32 }
 0x712   : > { %v7321_v45 = vmax.f32 %v7261_v25, 0.0 }
 0x714   : > { %v7385_v23 = vmul.f32 %v17010_v20, %v7321_v45 }
 0x715   : > { %v7094_v49 = vpop.f32.mrf.mxu0 }
 0x716   : > { %v7198_v57 = vadd.f32 %v7094_v49, %v16919_v55  ;;  %v7196_v55 = vadd.f32 %v7089_v31, %v16899_v53  ;;  %v7257_v53 = vadd.f32 %v16996_v22, %v7193_v5  ;;  %v7319_v31 = vmax.f32 %v7259_v21, 0.0 }
 0x717   : > { %v7449_v0 = vadd.f32 %v17017_v40, %v7385_v23  ;;  %v7255_v49 = vadd.f32 %v16996_v22, %v7191_v46  ;;  %v7251_v46 = vadd.f32 %v16996_v22, %v17114_v48 }
 0x718   : > { %v7262_v19 = vadd.f32 %v16996_v22, %v7198_v57  ;;  %v7260_v41 = vadd.f32 %v16996_v22, %v7196_v55  ;;  %v7317_v5 = vmax.f32 %v7257_v53, 0.0  ;;  %v18901_v55 = vrot.slane %v20560_v15, 1  ;;  %v17265_v53 = vpop.f32.mrf.mxu2 }
 0x719   : > { %v7598_v32 = vrot.slane %v7449_v0, 1 }
 0x71a   : > { %v7322_v59 = vmax.f32 %v7262_v19, 0.0  ;;  %v7320_v26 = vmax.f32 %v7260_v41, 0.0  ;;  %v20588_v41 = vld [vmem:[#allocation172_spill] sm:$0xff] }
 0x71c   : > { %v7386_v29 = vmul.f32 %v17010_v20, %v7322_v59  ;;  %v7258_v59 = vadd.f32 %v16996_v22, %v7194_v27  ;;  %v7381_v27 = vmul.f32 %v17010_v20, %v7317_v5 }
 0x71d   : > { %v7097_v16 = vpop.f32.mrf.mxu0 }
 0x71e   : > { %v7199_v35 = vadd.f32 %v7097_v16, %v16927_v36  ;;  %v7450_v38 = vadd.f32 %v17017_v40, %v7386_v29  ;;  %v20587_v16 = vld [vmem:[#allocation47_spill] sm:$0xff]  ;;  %v7318_v23 = vmax.f32 %v7258_v59, 0.0 }
 0x71f   : > { %v6442_v25 = vadd.f32 %v6346_v37, %v20587_v16  ;;  %v7253_v37 = vadd.f32 %v16996_v22, %v17173_v51 }
 0x720   : > { %v7263_v12 = vadd.f32 %v16996_v22, %v7199_v35  ;;  %9633 = vmatmul.msk.bf16.gmra.mxu0 %vm4345_vm3, %v20586_v17  ;;  %v7600_v57 = vrot.slane %v7450_v38, 1  ;;  %v17242_v35 = vpop.f32.mrf.mxu1 }
 0x721   : > { %v7313_v5 = vmax.f32 %v7253_v37, 0.0 }
 0x722   : > { %v7323_v18 = vmax.f32 %v7263_v12, 0.0  ;;  %v7384_v12 = vmul.f32 %v17010_v20, %v7320_v26  ;;  %v7601_v21 = vsel %vm1130_vm0, %v7598_v32, %v7600_v57 }
 0x724   : > { %v7387_v36 = vmul.f32 %v17010_v20, %v7323_v18  ;;  %v7315_v18 = vmax.f32 %v7255_v49, 0.0  ;;  %v7448_v51 = vadd.f32 %v17017_v40, %v7384_v12  ;;  %v17268_v49 = vpop.f32.mrf.mxu3  ;;  %v7445_v12 = vadd.f32 %v17017_v40, %v7381_v27 }
 0x725   : > { %v7099_v60 = vpop.f32.mrf.mxu0 }
 0x726   : > { %v7200_v61 = vadd.f32 %v7099_v60, %v16938_v2  ;;  %v7451_v56 = vadd.f32 %v17017_v40, %v7387_v36  ;;  %v7256_v2 = vadd.f32 %v16996_v22, %v7192_v10  ;;  %v7383_v10 = vmul.f32 %v17010_v20, %v7319_v31 }
 0x728   : > { %v7264_v34 = vadd.f32 %v16996_v22, %v7200_v61  ;;  %v7602_v14 = vrot.slane %v7451_v56, 1  ;;  %v7316_v29 = vmax.f32 %v7256_v2, 0.0  ;;  %v17262_v61 = vmax.f32 %v7449_v0, %v7601_v21  ;;  %v17290_v27 = vpop.f32.mrf.mxu1 }
 0x729   : > { %v7447_v26 = vadd.f32 %v17017_v40, %v7383_v10  ;;  %v7252_v2 = vadd.f32 %v16996_v22, %v17152_v39  ;;  %v7596_v0 = vrot.slane %v7448_v51, 1 }
 0x72a   : > { %v7324_v44 = vmax.f32 %v7264_v34, 0.0  ;;  %v7603_v60 = vsel %vm1130_vm0, %v7600_v57, %v7602_v14  ;;  %v7311_v34 = vmax.f32 %v7251_v46, 0.0  ;;  %v7379_v57 = vmul.f32 %v17010_v20, %v7315_v18 }
 0x72b   : > { %v7599_v39 = vsel %vm1130_vm0, %v7596_v0, %v7598_v32 }
 0x72c   : > { %v7388_v19 = vmul.f32 %v17010_v20, %v7324_v44  ;;  %v17285_v18 = vmax.f32 %v7448_v51, %v7599_v39 }
 0x72d   : > { %v7102_v17 = vpop.f32.mrf.mxu0 }
 0x72e   : > { %v7201_v45 = vadd.f32 %v7102_v17, %v16946_v54  ;;  %v7452_v48 = vadd.f32 %v17017_v40, %v7388_v19  ;;  %v17260_v54 = vmax.f32 %v7450_v38, %v7603_v60  ;;  %v7254_v38 = vadd.f32 %v16996_v22, %v17181_v28 }
 0x72f   : > { %v7380_v19 = vmul.f32 %v17010_v20, %v7316_v29  ;;  %v7382_v17 = vmul.f32 %v17010_v20, %v7318_v23  ;;  %v20589_v29 = vld [vmem:[#allocation101_spill] sm:$0xff]  ;;  %v7377_v60 = vmul.f32 %v17010_v20, %v7313_v5 }
 0x730   : > { %v7265_v36 = vadd.f32 %v16996_v22, %v7201_v45  ;;  %9634 = vmatmul.msk.bf16.gmra.mxu0 %vm4345_vm3, %v20588_v41  ;;  %v7604_v44 = vrot.slane %v7452_v48, 1  ;;  %v7594_v45 = vrot.slane %v7447_v26, 1  ;;  %v7312_v41 = vmax.f32 %v7252_v2, 0.0 }
 0x731   : > { %v7314_v32 = vmax.f32 %v7254_v38, 0.0  ;;  %v7446_v51 = vadd.f32 %v17017_v40, %v7382_v17 }
 0x732   : > { %v7325_v31 = vmax.f32 %v7265_v36, 0.0  ;;  %v7605_v59 = vsel %vm1130_vm0, %v7602_v14, %v7604_v44  ;;  %v6443_v36 = vadd.f32 %v17197_v7, %v20589_v29  ;;  %v6686_v14 = vadd.f32 %v17193_v24, %v6442_v25 }
 0x733   : > { %v17281_v10 = vmax.f32 %v7451_v56, %v7605_v59  ;;  %v7597_v23 = vsel %vm1130_vm0, %v7594_v45, %v7596_v0  ;;  %v7444_v7 = vadd.f32 %v17017_v40, %v7380_v19  ;;  %v7375_v24 = vmul.f32 %v17010_v20, %v7311_v34 }
 0x734   : > { %v7389_v16 = vmul.f32 %v17010_v20, %v7325_v31  ;;  %v7590_v31 = vrot.slane %v7445_v12, 1  ;;  %v7443_v25 = vadd.f32 %v17017_v40, %v7379_v57  ;;  %v7592_v0 = vrot.slane %v7446_v51, 1 }
 0x735   : > { %v7104_v46 = vpop.f32.mrf.mxu0  ;;  %v7588_v59 = vrot.slane %v7444_v7, 1  ;;  %v6955_v17 = vadd.f32 %v17195_v4, %v6686_v14  ;;  %v7376_v19 = vmul.f32 %v17010_v20, %v7312_v41  ;;  %v7441_v34 = vadd.f32 %v17017_v40, %v7377_v60 }
 0x736   : > { %v7453_v28 = vadd.f32 %v17017_v40, %v7389_v16  ;;  %v7202_v37 = vadd.f32 %v7104_v46, %v16958_v33  ;;  %v17295_v33 = vmax.f32 %v7447_v26, %v7597_v23  ;;  %v17306_v26 = vpop.f32.mrf.mxu2  ;;  %v17312_v46 = vpop.f32.mrf.mxu3  ;;  %v7595_v39 = vsel %vm1130_vm0, %v7592_v0, %v7594_v45 }
 0x737   : > { %v7591_v29 = vsel %vm1130_vm0, %v7588_v59, %v7590_v31  ;;  %v17323_v14 = vmax.f32 %v7446_v51, %v7595_v39  ;;  %v7439_v60 = vadd.f32 %v17017_v40, %v7375_v24  ;;  %v7586_v23 = vrot.slane %v7443_v25, 1  ;;  %v17340_v24 = vpop.f32.mrf.mxu1 }
 0x738   : > { %v7606_v56 = vrot.slane %v7453_v28, 1  ;;  %v7266_v21 = vadd.f32 %v16996_v22, %v7202_v37  ;;  %v7593_v37 = vsel %vm1130_vm0, %v7590_v31, %v7592_v0  ;;  %v7582_v31 = vrot.slane %v7441_v34, 1 }
 0x739   : > { %v17325_v41 = vmax.f32 %v7445_v12, %v7593_v37  ;;  %v7805_v51 = vmax.f32 %v17323_v14, %v17262_v61  ;;  %v7578_v16 = vrot.slane %v7439_v60, 1 }
 0x73a   : > { %v7326_v2 = vmax.f32 %v7266_v21, 0.0  ;;  %v7607_v5 = vsel %vm1130_vm0, %v7604_v44, %v7606_v56 }
 0x73b   : > { %v17302_v38 = vmax.f32 %v7452_v48, %v7607_v5  ;;  %v7378_v48 = vmul.f32 %v17010_v20, %v7314_v32  ;;  %v20590_v32 = vld [vmem:[#allocation143_spill] sm:$0xff]  ;;  %v7804_v12 = vmax.f32 %v17325_v41, %v17285_v18 }
 0x73c   : > { %v7390_v57 = vmul.f32 %v17010_v20, %v7326_v2  ;;  %v6983_v45 = vsel %vm1130_vm0, %v20590_v32, %v18901_v55  ;;  %v17332_v2 = vmax.f32 %v7444_v7, %v7591_v29 }
 0x73d   : > { %v7107_v44 = vpop.f32.mrf.mxu0  ;;  %v7442_v7 = vadd.f32 %v17017_v40, %v7378_v48 }
 0x73e   : > { %v17319_v21 = vadd.f32 %v17017_v40, %v7390_v57  ;;  %v17321_v4 = vadd.f32 %v7107_v44, %v6955_v17  ;;  %v7803_v0 = vmax.f32 %v17332_v2, %v17295_v33  ;;  %v7589_v17 = vsel %vm1130_vm0, %v7586_v23, %v7588_v59 }
 0x73f   : > { %v7440_v57 = vadd.f32 %v17017_v40, %v7376_v19  ;;  %v6687_v44 = vadd.f32 %v17201_v30, %v6443_v36  ;;  %v7742_v37 = vmax.f32 %v7443_v25, %v7589_v17  ;;  %v7584_v32 = vrot.slane %v7442_v7, 1  ;;  %v17360_v25 = vpop.f32.mrf.mxu2 }
 0x740   : > { %v7608_v5 = vrot.slane %v17319_v21, 1  ;;  %9635 = vmatmul.msk.bf16.gmra.mxu0 %vm4345_vm3, %v6983_v45 }
 0x741   : > { %v7580_v45 = vrot.slane %v7440_v57, 1  ;;  %v6956_v55 = vadd.f32 %v17203_v1, %v6687_v44  ;;  %v7802_v59 = vmax.f32 %v7742_v37, %v17323_v14  ;;  %v7587_v30 = vsel %vm1130_vm0, %v7584_v32, %v7586_v23  ;;  %v17366_v14 = vpop.f32.mrf.mxu3 }
 0x742   : > { %v7609_v39 = vsel %vm1130_vm0, %v7606_v56, %v7608_v5  ;;  %v7585_v36 = vsel %vm1130_vm0, %v7582_v31, %v7584_v32  ;;  %v7741_v1 = vmax.f32 %v7442_v7, %v7587_v30  ;;  %v7808_v44 = vmax.f32 %v17262_v61, %v17302_v38 }
 0x743   : > { %v17351_v29 = vmax.f32 %v7453_v28, %v7609_v39  ;;  %v7583_v56 = vsel %vm1130_vm0, %v7580_v45, %v7582_v31  ;;  %v20591_v28 = vld [vmem:[#allocation54_spill] sm:$0xff]  ;;  %v7740_v17 = vmax.f32 %v7441_v34, %v7585_v36  ;;  %v7807_v32 = vmax.f32 %v17285_v18, %v17281_v10 }
 0x744   : > { %v6444_v19 = vadd.f32 %v17206_v42, %v20591_v28  ;;  %v7739_v23 = vmax.f32 %v7440_v57, %v7583_v56  ;;  %v7801_v39 = vmax.f32 %v7741_v1, %v17325_v41  ;;  %v6363_v57 = vpop.f32.mrf.mxu1  ;;  %v6984_v41 = vrot.slane %v20567_v63, 1  ;;  %v20594_v36 = vld [vmem:[#allocation46_spill] sm:$0xff]  ;;  %v20596_v28 = vld [vmem:[#allocation39_spill] sm:$0xff] }
 0x745   : > { %v7109_v58 = vpop.f32.mrf.mxu0  ;;  %v7809_v40 = vmax.f32 %v17260_v54, %v17351_v29  ;;  %v7800_v31 = vmax.f32 %v7740_v17, %v17332_v2 }
 0x746   : > { %v17364_v48 = vadd.f32 %v7109_v58, %v6956_v55  ;;  %v7799_v42 = vmax.f32 %v7739_v23, %v7742_v37  ;;  %v7581_v58 = vsel %vm1130_vm0, %v7578_v16, %v7580_v45  ;;  %v20592_v55 = vrot.slane %v17111_v13, 1 }
 0x747   : > { %7995 = vmatpush.msra.mxu2 %v7809_v40  ;;  %v6688_v7 = vadd.f32 %v17210_v6, %v6444_v19  ;;  %v7738_v40 = vmax.f32 %v7439_v60, %v7581_v58  ;;  %v20593_v45 = vmax.f32 %v17295_v33, %v17260_v54  ;;  %v6607_v63 = vpop.f32.mrf.mxu2 }
 0x748   : > { %v7579_v34 = vsel %vm1130_vm0, %v20592_v55, %v7578_v16  ;;  %v6445_v16 = vadd.f32 %v17221_v9, %v20594_v36  ;;  %v20598_v55 = vld [vmem:[#allocation89_spill] sm:$0xff] }
 0x749   : > { %7996 = vmatpush.msra.mxu2 %v7808_v44  ;;  %v7737_v61 = vmax.f32 %v17111_v13, %v7579_v34  ;;  %v6957_v2 = vadd.f32 %v17214_v52, %v6688_v7  ;;  %v7798_v30 = vmax.f32 %v7738_v40, %v7741_v1  ;;  %v20595_v13 = vrot.slane %v20560_v15, 1  ;;  %v6876_v52 = vpop.f32.mrf.mxu3 }
 0x74a   : > { %v6689_v56 = vadd.f32 %v17230_v43, %v6445_v16  ;;  %v6986_v43 = vrot.slane %v20571_v8, 1  ;;  %v7795_v8 = vmax.f32 %v17097_v11, %v7738_v40  ;;  %v6448_v34 = vadd.f32 %v17340_v24, %v20598_v55 }
 0x74b   : > { %7997 = vmatpush.msra.mxu2 %v7807_v32  ;;  %v7797_v18 = vmax.f32 %v7737_v61, %v7740_v17  ;;  %v6985_v60 = vsel %vm1130_vm0, %v20595_v13, %v6984_v41  ;;  %v6988_v11 = vrot.slane %v16986_v47, 1 }
 0x74c   : > { %v6958_v54 = vadd.f32 %v17235_v50, %v6689_v56  ;;  %v17395_v33 = vpop.f32.mrf.mxu1  ;;  %v6692_v7 = vadd.f32 %v17360_v25, %v6448_v34 }
 0x74d   : > { %v7112_v37 = vpop.f32.mrf.mxu0  ;;  %7998 = vmatpush.msra.mxu2 %v20593_v45 }
 0x74e   : > { %v17387_v6 = vadd.f32 %v7112_v37, %v6957_v2 }
 0x74f   : > { %7999 = vmatpush.msra.mxu2 %v7805_v51  ;;  %v6446_v51 = vadd.f32 %v17242_v35, %v20596_v28  ;;  %v17401_v19 = vpop.f32.mrf.mxu2 }
 0x750   : > { %9636 = vmatmul.msk.bf16.gmra.mxu0 %vm4345_vm3, %v6985_v60 }
 0x751   : > { %8000 = vmatpush.msra.mxu2 %v7804_v12  ;;  %v6690_v12 = vadd.f32 %v17265_v53, %v6446_v51  ;;  %v17404_v1 = vpop.f32.mrf.mxu3  ;;  %v7796_v53 = vmax.f32 %v17139_v62, %v7739_v23  ;;  %v20600_v51 = vld [vmem:[#allocation111_spill] sm:$0xff] }
 0x753   : > { %8001 = vmatpush.msra.mxu2 %v7803_v0  ;;  %v6959_v50 = vadd.f32 %v17268_v49, %v6690_v12 }
 0x754   : > { %v6368_v44 = vpop.f32.mrf.mxu1 }
 0x755   : > { %v7114_v9 = vpop.f32.mrf.mxu0  ;;  %8002 = vmatpush.msra.mxu2 %v7802_v59  ;;  %v20597_v59 = vld [vmem:[#allocation64_spill] sm:$0xff] }
 0x756   : > { %v17399_v15 = vadd.f32 %v7114_v9, %v6958_v54  ;;  %v6447_v35 = vadd.f32 %v17290_v27, %v20597_v59 }
 0x757   : > { %8003 = vmatpush.msra.mxu2 %v7801_v39  ;;  %v6987_v39 = vsel %vm1130_vm0, %v6984_v41, %v6986_v43  ;;  %v6612_v32 = vpop.f32.mrf.mxu2 }
 0x758   : > { %v6691_v49 = vadd.f32 %v17306_v26, %v6447_v35  ;;  %v6961_v26 = vadd.f32 %v17366_v14, %v6692_v7 }
 0x759   : > { %8004 = vmatpush.msra.mxu2 %v7800_v31  ;;  %v7794_v31 = vmax.f32 %v17090_v3, %v7737_v61  ;;  %v20599_v61 = vld [vmem:[#allocation75_spill] sm:$0xff] }
 0x75a   : > { %v6960_v27 = vadd.f32 %v17312_v46, %v6691_v49  ;;  %v6449_v41 = vadd.f32 %v6363_v57, %v20599_v61  ;;  %v20603_v49 = vld [vmem:[#allocation118_spill] sm:$0xff] }
 0x75b   : > { %8005 = vmatpush.msra.mxu2 %v7799_v42  ;;  %v6881_v42 = vpop.f32.mrf.mxu3 }
 0x75c   : > { %v6371_v23 = vpop.f32.mrf.mxu1  ;;  %v6693_v24 = vadd.f32 %v6607_v63, %v6449_v41  ;;  %v7835_v63 = vld [vmem:[%s18347_s11] sm:$0xff] }
 0x75d   : > { %v7117_v0 = vpop.f32.mrf.mxu0  ;;  %8006 = vmatpush.msra.mxu2 %v7798_v30  ;;  %v6989_v30 = vsel %vm1130_vm0, %v6986_v43, %v6988_v11  ;;  %7953 = vmatmul.f32.vlgmr.msra.gmra.mxu1 %v7835_v63 }
 0x75e   : > { %v17410_v17 = vadd.f32 %v7117_v0, %v6959_v50  ;;  %v6962_v37 = vadd.f32 %v6876_v52, %v6693_v24  ;;  %v20601_v52 = vld [vmem:[#allocation70_spill] sm:$0xff] }
 0x75f   : > { %8007 = vmatpush.msra.mxu2 %v7797_v18  ;;  %v6615_v3 = vpop.f32.mrf.mxu2  ;;  %v6452_v43 = vadd.f32 %v6371_v23, %v20601_v52  ;;  %v20602_v0 = vld [vmem:[#allocation170_spill] sm:$0xff] }
 0x760   : > { %9637 = vmatmul.msk.bf16.gmra.mxu0 %vm4345_vm3, %v6987_v39  ;;  %v6451_v59 = vadd.f32 %v6368_v44, %v20602_v0  ;;  %v7839_v23 = vld [vmem:[%s18347_s11 + $0x20] sm:$0xff] }
 0x761   : > { %8008 = vmatpush.msra.mxu2 %v7796_v53  ;;  %v6696_v39 = vadd.f32 %v6615_v3, %v6452_v43  ;;  %v17462_v52 = vld [vmem:[%s18340_s4] ss:$0 sm:$0xff] }
 0x762   : > { %v6695_v34 = vadd.f32 %v6612_v32, %v6451_v59 }
 0x763   : > { %8009 = vmatpush.msra.mxu2 %v7795_v8  ;;  %v6884_v2 = vpop.f32.mrf.mxu3 }
 0x764   : > { %v6373_v18 = vpop.f32.mrf.mxu1  ;;  %v6965_v7 = vadd.f32 %v6884_v2, %v6696_v39 }
 0x765   : > { %v7119_v58 = vpop.f32.mrf.mxu0  ;;  %8010 = vmatpush.msra.mxu2 %v7794_v31  ;;  %v6453_v12 = vadd.f32 %v6373_v18, %v20600_v51  ;;  %7956 = vmatmul.f32.gmra.mxu1 %v7839_v23  ;;  %v7847_v23 = vld [vmem:[%s18347_s11 + $0x60] sm:$0xff] }
 0x766   : > { %v17421_v62 = vadd.f32 %v7119_v58, %v6960_v27  ;;  %v20604_v58 = vld [vmem:[#allocation131_spill] sm:$0xff] }
 0x767   : > { %v6617_v47 = vpop.f32.mrf.mxu2  ;;  %v6450_v55 = vadd.f32 %v17395_v33, %v20604_v58 }
 0x768   : > { %v6697_v35 = vadd.f32 %v6617_v47, %v6453_v12  ;;  %v20607_v12 = vld [vmem:[#allocation115_spill] sm:$0xff]  ;;  %v7272_v58 = vadd.f32 %v17462_v52, %v17421_v62 }
 0x769   : > { %v6694_v61 = vadd.f32 %v17401_v19, %v6450_v55 }
 0x76b   : > { %v6886_v36 = vpop.f32.mrf.mxu3  ;;  %v6963_v33 = vadd.f32 %v17404_v1, %v6694_v61 }
 0x76c   : > { %v6376_v14 = vpop.f32.mrf.mxu1  ;;  %v6966_v27 = vadd.f32 %v6886_v36, %v6697_v35 }
 0x76d   : > { %v7122_v40 = vpop.f32.mrf.mxu0  ;;  %v6454_v31 = vadd.f32 %v6376_v14, %v20603_v49 }
 0x76e   : > { %v17427_v46 = vadd.f32 %v7122_v40, %v6961_v26  ;;  %v6964_v40 = vadd.f32 %v6881_v42, %v6695_v34  ;;  %v17481_v34 = vld [vmem:[%s18341_s5] ss:$0 sm:$0xff] }
 0x76f   : > { %v6620_v13 = vpop.f32.mrf.mxu2 }
 0x770   : > { %9638 = vmatmul.msk.bf16.gmra.mxu0 %vm4345_vm3, %v6989_v30  ;;  %v6698_v3 = vadd.f32 %v6620_v13, %v6454_v31 }
 0x773   : > { %v6889_v60 = vpop.f32.mrf.mxu3 }
 0x774   : > { %v6378_v56 = vpop.f32.mrf.mxu1  ;;  %v6967_v24 = vadd.f32 %v6889_v60, %v6698_v3  ;;  %v7843_v60 = vld [vmem:[%s18347_s11 + $0x40] sm:$0xff] }
 0x775   : > { %v7124_v45 = vpop.f32.mrf.mxu0  ;;  %7959 = vmatmul.f32.gmra.mxu1 %v7843_v60 }
 0x776   : > { %v17431_v25 = vadd.f32 %v7124_v45, %v6962_v37  ;;  %v20605_v37 = vld [vmem:[#allocation65_spill] sm:$0xff] }
 0x777   : > { %v6622_v54 = vpop.f32.mrf.mxu2  ;;  %v6455_v45 = vadd.f32 %v6378_v56, %v20605_v37 }
 0x779   : > { %v6699_v63 = vadd.f32 %v6622_v54, %v6455_v45  ;;  %v7274_v54 = vadd.f32 %v17462_v52, %v17431_v25  ;;  %v17491_v25 = vld [vmem:[%s18342_s6] ss:$0 sm:$0xff] }
 0x77b   : > { %v6891_v9 = vpop.f32.mrf.mxu3 }
 0x77c   : > { %v6381_v50 = vpop.f32.mrf.mxu1  ;;  %v6968_v59 = vadd.f32 %v6891_v9, %v6699_v63 }
 0x77d   : > { %v7127_v16 = vpop.f32.mrf.mxu0  ;;  %7962 = vmatmul.f32.gmra.mxu1 %v7847_v23 }
 0x77e   : > { %v7211_v36 = vadd.f32 %v7127_v16, %v6963_v33 }
 0x77f   : > { %v6625_v8 = vpop.f32.mrf.mxu2 }
 0x780   : > { %v7275_v43 = vadd.f32 %v17462_v52, %v7211_v36 }
 0x782   : > { %v7335_v55 = vmax.f32 %v7275_v43, 0.0  ;;  %v7851_v43 = vld [vmem:[%s18347_s11 + $0x80] sm:$0xff] }
 0x783   : > { %v6894_v11 = vpop.f32.mrf.mxu3 }
 0x784   : > { %v6383_v41 = vpop.f32.mrf.mxu1 }
 0x785   : > { %v7129_v57 = vpop.f32.mrf.mxu0  ;;  %v6457_v56 = vadd.f32 %v6383_v41, %v20607_v12  ;;  %7965 = vmatmul.f32.gmra.mxu1 %v7851_v43 }
 0x786   : > { %v7212_v30 = vadd.f32 %v7129_v57, %v6964_v40  ;;  %v7268_v40 = vadd.f32 %v17462_v52, %v17364_v48  ;;  %v7332_v48 = vmax.f32 %v7272_v58, 0.0 }
 0x787   : > { %v6627_v14 = vpop.f32.mrf.mxu2 }
 0x788   : > { %v7276_v42 = vadd.f32 %v16996_v22, %v7212_v30  ;;  %v7270_v30 = vadd.f32 %v17462_v52, %v17399_v15  ;;  %v7328_v15 = vmax.f32 %v7268_v40, 0.0 }
 0x78a   : > { %v7336_v0 = vmax.f32 %v7276_v42, 0.0 }
 0x78b   : > { %v17455_v57 = vpop.f32.mrf.mxu3 }
 0x78c   : > { %v17469_v39 = vpop.f32.mrf.mxu1 }
 0x78d   : > { %v7132_v28 = vpop.f32.mrf.mxu0 }
 0x78e   : > { %v7213_v44 = vadd.f32 %v7132_v28, %v6965_v7  ;;  %v20606_v28 = vld [vmem:[#allocation2_spill] sm:$0xff]  ;;  %v7400_v7 = vmul.f32 %v17481_v34, %v7336_v0 }
 0x78f   : > { %v6456_v51 = vadd.f32 %v6381_v50, %v20606_v28  ;;  %v17504_v61 = vpop.f32.mrf.mxu2 }
 0x790   : > { %v7277_v32 = vadd.f32 %v16996_v22, %v7213_v44  ;;  %v7334_v44 = vmax.f32 %v7274_v54, 0.0 }
 0x791   : > { %v6700_v31 = vadd.f32 %v6625_v8, %v6456_v51  ;;  %v7396_v51 = vmul.f32 %v17481_v34, %v7332_v48 }
 0x792   : > { %v7337_v1 = vmax.f32 %v7277_v32, 0.0 }
 0x793   : > { %v6969_v41 = vadd.f32 %v6894_v11, %v6700_v31  ;;  %v17510_v33 = vpop.f32.mrf.mxu3 }
 0x794   : > { %v17519_v28 = vpop.f32.mrf.mxu1 }
 0x795   : > { %v7134_v53 = vpop.f32.mrf.mxu0 }
 0x796   : > { %v7214_v26 = vadd.f32 %v7134_v53, %v6966_v27  ;;  %v7401_v53 = vmul.f32 %v17010_v20, %v7337_v1  ;;  %v17474_v27 = vadd.f32 %v6627_v14, %v6457_v56 }
 0x798   : > { %v7278_v18 = vadd.f32 %v16996_v22, %v7214_v26  ;;  %v7465_v3 = vadd.f32 %v17491_v25, %v7401_v53 }
 0x79a   : > { %v7338_v13 = vmax.f32 %v7278_v18, 0.0  ;;  %v7630_v42 = vrot.slane %v7465_v3, 1 }
 0x79c   : > { %v7402_v35 = vmul.f32 %v17010_v20, %v7338_v13  ;;  %v7330_v13 = vmax.f32 %v7270_v30, 0.0 }
 0x79d   : > { %v7137_v2 = vpop.f32.mrf.mxu0 }
 0x79e   : > { %v7215_v47 = vadd.f32 %v7137_v2, %v6967_v24  ;;  %v7466_v62 = vadd.f32 %v17491_v25, %v7402_v35  ;;  %v7271_v24 = vadd.f32 %v17462_v52, %v17410_v17  ;;  %v7464_v2 = vadd.f32 %v17491_v25, %v7400_v7 }
 0x79f   : > { %v7398_v17 = vmul.f32 %v17481_v34, %v7334_v44  ;;  %v7460_v7 = vadd.f32 %v17491_v25, %v7396_v51 }
 0x7a0   : > { %v7279_v19 = vadd.f32 %v16996_v22, %v7215_v47  ;;  %v7273_v22 = vadd.f32 %v17462_v52, %v17427_v46  ;;  %v7632_v45 = vrot.slane %v7466_v62, 1  ;;  %v7628_v63 = vrot.slane %v7464_v2, 1 }
 0x7a1   : > { %v7462_v35 = vadd.f32 %v17491_v25, %v7398_v17 }
 0x7a2   : > { %v7339_v16 = vmax.f32 %v7279_v19, 0.0  ;;  %v7333_v9 = vmax.f32 %v7273_v22, 0.0  ;;  %v7331_v19 = vmax.f32 %v7271_v24, 0.0  ;;  %v7631_v53 = vsel %vm1130_vm0, %v7628_v63, %v7630_v42 }
 0x7a3   : > { %v17538_v58 = vmax.f32 %v7464_v2, %v7631_v53 }
 0x7a4   : > { %v7403_v50 = vmul.f32 %v17010_v20, %v7339_v16  ;;  %v17486_v20 = vadd.f32 %v17462_v52, %v17321_v4  ;;  %v7269_v4 = vadd.f32 %v17462_v52, %v17387_v6  ;;  %v7397_v32 = vmul.f32 %v17481_v34, %v7333_v9 }
 0x7a5   : > { %v7139_v49 = vpop.f32.mrf.mxu0  ;;  %v7399_v6 = vmul.f32 %v17481_v34, %v7335_v55  ;;  %v7394_v9 = vmul.f32 %v17481_v34, %v7330_v13  ;;  %v7395_v55 = vmul.f32 %v17481_v34, %v7331_v19 }
 0x7a6   : > { %v7216_v46 = vadd.f32 %v7139_v49, %v6968_v59  ;;  %v7467_v8 = vadd.f32 %v17491_v25, %v7403_v50  ;;  %v7327_v37 = vmax.f32 %v17486_v20, 0.0  ;;  %v7329_v36 = vmax.f32 %v7269_v4, 0.0  ;;  %v17550_v4 = vpop.f32.mrf.mxu3 }
 0x7a7   : > { %v7461_v12 = vadd.f32 %v17491_v25, %v7397_v32  ;;  %v7463_v56 = vadd.f32 %v17491_v25, %v7399_v6  ;;  %v7633_v59 = vsel %vm1130_vm0, %v7630_v42, %v7632_v45  ;;  %v7459_v32 = vadd.f32 %v17491_v25, %v7395_v55 }
 0x7a8   : > { %v7280_v26 = vadd.f32 %v17462_v52, %v7216_v46  ;;  %v7634_v11 = vrot.slane %v7467_v8, 1  ;;  %v17533_v54 = vmax.f32 %v7465_v3, %v7633_v59  ;;  %v7393_v49 = vmul.f32 %v17481_v34, %v7329_v36 }
 0x7a9   : > { %v7626_v23 = vrot.slane %v7463_v56, 1  ;;  %v7622_v44 = vrot.slane %v7461_v12, 1  ;;  %v7624_v3 = vrot.slane %v7462_v35, 1  ;;  %v7391_v24 = vmul.f32 %v17481_v34, %v7327_v37  ;;  %v7855_v37 = vld [vmem:[%s18347_s11 + $0xa0] sm:$0xff] }
 0x7aa   : > { %v7340_v18 = vmax.f32 %v7280_v26, 0.0  ;;  %v7635_v0 = vsel %vm1130_vm0, %v7632_v45, %v7634_v11  ;;  %v6970_v26 = vadd.f32 %v17455_v57, %v17474_v27  ;;  %v7457_v57 = vadd.f32 %v17491_v25, %v7393_v49  ;;  %7968 = vmatmul.f32.gmra.mxu1 %v7855_v37 }
 0x7ab   : > { %v17531_v50 = vmax.f32 %v7466_v62, %v7635_v0  ;;  %v17545_v62 = vpop.f32.mrf.mxu2  ;;  %v7458_v27 = vadd.f32 %v17491_v25, %v7394_v9  ;;  %v7620_v6 = vrot.slane %v7460_v7, 1  ;;  %v7625_v42 = vsel %vm1130_vm0, %v7622_v44, %v7624_v3 }
 0x7ac   : > { %v7404_v47 = vmul.f32 %v17481_v34, %v7340_v18  ;;  %v7618_v0 = vrot.slane %v7459_v32, 1 }
 0x7ad   : > { %v7142_v14 = vpop.f32.mrf.mxu0  ;;  %v7616_v53 = vrot.slane %v7458_v27, 1 }
 0x7ae   : > { %v7468_v60 = vadd.f32 %v17491_v25, %v7404_v47  ;;  %v7217_v1 = vadd.f32 %v7142_v14, %v6969_v41  ;;  %v7627_v47 = vsel %vm1130_vm0, %v7624_v3, %v7626_v23  ;;  %v7623_v14 = vsel %vm1130_vm0, %v7620_v6, %v7622_v44  ;;  %v6904_v9 = vpop.f32.mrf.mxu3 }
 0x7af   : > { %v17568_v17 = vmax.f32 %v7462_v35, %v7627_v47  ;;  %v17575_v51 = vmax.f32 %v7460_v7, %v7623_v14  ;;  %v7614_v35 = vrot.slane %v7457_v57, 1  ;;  %v7455_v7 = vadd.f32 %v17491_v25, %v7391_v24 }
 0x7b0   : > { %v7636_v16 = vrot.slane %v7468_v60, 1  ;;  %v7281_v22 = vadd.f32 %v17462_v52, %v7217_v1  ;;  %v17573_v1 = vmax.f32 %v7461_v12, %v7625_v42  ;;  %v7619_v44 = vsel %vm1130_vm0, %v7616_v53, %v7618_v0 }
 0x7b1   : > { %v7821_v43 = vmax.f32 %v17568_v17, %v17533_v54  ;;  %v7610_v37 = vrot.slane %v7455_v7, 1 }
 0x7b2   : > { %v7341_v31 = vmax.f32 %v7281_v22, 0.0  ;;  %v7637_v46 = vsel %vm1130_vm0, %v7634_v11, %v7636_v16  ;;  %v7629_v11 = vsel %vm1130_vm0, %v7626_v23, %v7628_v63  ;;  %v7621_v23 = vsel %vm1130_vm0, %v7618_v0, %v7620_v6  ;;  %v20609_v0 = vld [vmem:[#allocation94_spill] sm:$0xff] }
 0x7b3   : > { %v17543_v20 = vmax.f32 %v7467_v8, %v7637_v46  ;;  %v7392_v8 = vmul.f32 %v17481_v34, %v7328_v15  ;;  %v6391_v15 = vpop.f32.mrf.mxu1  ;;  %v17566_v36 = vmax.f32 %v7463_v56, %v7629_v11  ;;  %v17603_v3 = vmax.f32 %v7459_v32, %v7621_v23 }
 0x7b4   : > { %v7405_v40 = vmul.f32 %v17481_v34, %v7341_v31  ;;  %v6635_v31 = vpop.f32.mrf.mxu2  ;;  %v7611_v14 = vsel %vm1130_vm0, %v7608_v5, %v7610_v37 }
 0x7b5   : > { %v7144_v41 = vpop.f32.mrf.mxu0  ;;  %v7823_v30 = vmax.f32 %v17538_v58, %v17543_v20  ;;  %v7456_v63 = vadd.f32 %v17491_v25, %v7392_v8  ;;  %v7822_v56 = vmax.f32 %v17566_v36, %v17531_v50  ;;  %v7819_v12 = vmax.f32 %v17575_v51, %v17566_v36 }
 0x7b6   : > { %v7469_v18 = vadd.f32 %v17491_v25, %v7405_v40  ;;  %v7218_v48 = vadd.f32 %v7144_v41, %v6970_v26  ;;  %v7859_v40 = vld [vmem:[%s18347_s11 + $0xc0] sm:$0xff]  ;;  %v7617_v41 = vsel %vm1130_vm0, %v7614_v35, %v7616_v53  ;;  %v7818_v32 = vmax.f32 %v17603_v3, %v17568_v17 }
 0x7b7   : > { %v7612_v55 = vrot.slane %v7456_v63, 1  ;;  %7971 = vmatmul.f32.gmra.mxu1 %v7859_v40  ;;  %v7863_v17 = vld [vmem:[%s18347_s11 + $0xe0] sm:$0xff] }
 0x7b8   : > { %v7638_v2 = vrot.slane %v7469_v18, 1  ;;  %v7282_v45 = vadd.f32 %v17462_v52, %v7218_v48  ;;  %v17612_v48 = vmax.f32 %v7457_v57, %v7617_v41 }
 0x7b9   : > { %v7615_v8 = vsel %vm1130_vm0, %v7612_v55, %v7614_v35  ;;  %v7613_v42 = vsel %vm1130_vm0, %v7610_v37, %v7612_v55 }
 0x7ba   : > { %v7342_v13 = vmax.f32 %v7282_v45, 0.0  ;;  %v7639_v19 = vsel %vm1130_vm0, %v7636_v16, %v7638_v2  ;;  %v7820_v16 = vmax.f32 %v17573_v1, %v17538_v58  ;;  %v17614_v6 = vmax.f32 %v7456_v63, %v7615_v8 }
 0x7bb   : > { %v17578_v22 = vmax.f32 %v7468_v60, %v7639_v19  ;;  %v6393_v45 = vpop.f32.mrf.mxu1  ;;  %v7816_v47 = vmax.f32 %v17612_v48, %v17575_v51  ;;  %v17635_v19 = vmax.f32 %v7455_v7, %v7613_v42 }
 0x7bc   : > { %v7406_v59 = vmul.f32 %v17481_v34, %v7342_v13  ;;  %v6906_v13 = vpop.f32.mrf.mxu3 }
 0x7bd   : > { %v17589_v49 = vpop.f32.mrf.mxu0  ;;  %v7824_v60 = vmax.f32 %v17533_v54, %v17578_v22  ;;  %v17605_v54 = vmax.f32 %v7458_v27, %v7619_v44 }
 0x7be   : > { %v17594_v46 = vadd.f32 %v17491_v25, %v7406_v59  ;;  %v6459_v59 = vadd.f32 %v17519_v28, %v20609_v0 }
 0x7bf   : > { %v7817_v27 = vmax.f32 %v17605_v54, %v17573_v1  ;;  %7974 = vmatmul.f32.gmra.mxu1 %v7863_v17  ;;  %v17638_v1 = vmax.f32 %v17319_v21, %v7611_v14  ;;  %v7814_v63 = vmax.f32 %v17635_v19, %v17605_v54  ;;  %v20610_v21 = vld [vmem:[#allocation8_spill] sm:$0xff]  ;;  %v20613_v17 = vld [vmem:[#allocation38_spill] sm:$0xff] }
 0x7c0   : > { %v7640_v26 = vrot.slane %v17594_v46, 1  ;;  %v6703_v58 = vadd.f32 %v17545_v62, %v6459_v59 }
 0x7c1   : > { %v7813_v5 = vmax.f32 %v17638_v1, %v17612_v48 }
 0x7c2   : > { %v7641_v24 = vsel %vm1130_vm0, %v7638_v2, %v7640_v26  ;;  %v7815_v2 = vmax.f32 %v17614_v6, %v17603_v3  ;;  %v6972_v44 = vadd.f32 %v17550_v4, %v6703_v58 }
 0x7c3   : > { %v17616_v11 = vmax.f32 %v7469_v18, %v7641_v24  ;;  %v6637_v18 = vpop.f32.mrf.mxu2  ;;  %v6396_v35 = vpop.f32.mrf.mxu1 }
 0x7c5   : > { %v7149_v57 = vpop.f32.mrf.mxu0  ;;  %v7825_v36 = vmax.f32 %v17531_v50, %v17616_v11  ;;  %v20608_v50 = vld [vmem:[#allocation23_spill] sm:$0xff] }
 0x7c6   : > { %v6460_v51 = vadd.f32 %v6391_v15, %v20608_v50  ;;  %v20611_v15 = vld [vmem:[#allocation86_spill] sm:$0xff]  ;;  %v7220_v62 = vadd.f32 %v7149_v57, %v6972_v44 }
 0x7c7   : > { %8053 = vmatpush.msrb.mxu3 %v7825_v36  ;;  %v6461_v55 = vadd.f32 %v6393_v45, %v20611_v15 }
 0x7c8   : > { %v6704_v7 = vadd.f32 %v6635_v31, %v6460_v51  ;;  %v7284_v24 = vadd.f32 %v17462_v52, %v7220_v62  ;;  %v7812_v51 = vmax.f32 %v17351_v29, %v17614_v6  ;;  %v7810_v29 = vmax.f32 %v17281_v10, %v17638_v1 }
 0x7c9   : > { %8054 = vmatpush.msrb.mxu3 %v7824_v60  ;;  %v6458_v60 = vadd.f32 %v17469_v39, %v20610_v21  ;;  %v6705_v28 = vadd.f32 %v6637_v18, %v6461_v55  ;;  %v6909_v39 = vpop.f32.mrf.mxu3 }
 0x7ca   : > { %v7344_v36 = vmax.f32 %v7284_v24, 0.0 }
 0x7cb   : > { %8055 = vmatpush.msrb.mxu3 %v7823_v30  ;;  %v6973_v30 = vadd.f32 %v6904_v9, %v6704_v7  ;;  %v6640_v23 = vpop.f32.mrf.mxu2  ;;  %v6702_v40 = vadd.f32 %v17504_v61, %v6458_v60  ;;  %v6974_v31 = vadd.f32 %v6906_v13, %v6705_v28  ;;  %v6398_v8 = vpop.f32.mrf.mxu1 }
 0x7cc   : > { %v6463_v14 = vadd.f32 %v6398_v8, %v20613_v17 }
 0x7cd   : > { %v7152_v53 = vpop.f32.mrf.mxu0  ;;  %8056 = vmatpush.msrb.mxu3 %v7822_v56  ;;  %v7867_v56 = vld [vmem:[%s18347_s11 + $0x100] sm:$0xff] }
 0x7ce   : > { %v7221_v3 = vadd.f32 %v7152_v53, %v6973_v30  ;;  %7977 = vmatmul.f32.gmra.mxu1 %v7867_v56 }
 0x7cf   : > { %8057 = vmatpush.msrb.mxu3 %v7821_v43  ;;  %v6971_v43 = vadd.f32 %v17510_v33, %v6702_v40  ;;  %v7871_v33 = vld [vmem:[%s18347_s11 + $0x120] sm:$0xff] }
 0x7d0   : > { %v7285_v4 = vadd.f32 %v17462_v52, %v7221_v3 }
 0x7d1   : > { %8058 = vmatpush.msrb.mxu3 %v7820_v16  ;;  %v20612_v16 = vld [vmem:[#allocation88_spill] sm:$0xff]  ;;  %v7219_v61 = vadd.f32 %v17589_v49, %v6971_v43  ;;  %v6911_v18 = vpop.f32.mrf.mxu3 }
 0x7d2   : > { %v6462_v54 = vadd.f32 %v6396_v35, %v20612_v16 }
 0x7d3   : > { %8059 = vmatpush.msrb.mxu3 %v7819_v12  ;;  %v7283_v45 = vadd.f32 %v17462_v52, %v7219_v61  ;;  %v6642_v49 = vpop.f32.mrf.mxu2  ;;  %v6401_v35 = vpop.f32.mrf.mxu1 }
 0x7d4   : > { %v6706_v48 = vadd.f32 %v6640_v23, %v6462_v54  ;;  %v6707_v53 = vadd.f32 %v6642_v49, %v6463_v14  ;;  %v7879_v54 = vld [vmem:[%s18347_s11 + $0x160] sm:$0xff] }
 0x7d5   : > { %v7154_v9 = vpop.f32.mrf.mxu0  ;;  %8060 = vmatpush.msrb.mxu3 %v7818_v32  ;;  %v7345_v32 = vmax.f32 %v7285_v4, 0.0  ;;  %v7343_v13 = vmax.f32 %v7283_v45, 0.0  ;;  %v20615_v49 = vld [vmem:[#allocation82_spill] sm:$0xff] }
 0x7d6   : > { %v7222_v41 = vadd.f32 %v7154_v9, %v6974_v31  ;;  %7980 = vmatmul.f32.gmra.mxu1 %v7871_v33  ;;  %v6975_v57 = vadd.f32 %v6909_v39, %v6706_v48  ;;  %v6976_v6 = vadd.f32 %v6911_v18, %v6707_v53  ;;  %v7836_v48 = vld [vmem:[%s18347_s11 + $0x8] sm:$0xff]  ;;  %v7837_v18 = vld [vmem:[%s18347_s11 + $0x10] sm:$0xff] }
 0x7d7   : > { %8061 = vmatpush.msrb.mxu3 %v7817_v27  ;;  %v7407_v21 = vmul.f32 %v17481_v34, %v7343_v13  ;;  %8011 = vmatmul.f32.vlgmr.msra.gmra.mxu2 %v7836_v48  ;;  %v7846_v48 = vld [vmem:[%s18347_s11 + $0x58] sm:$0xff] }
 0x7d8   : > { %v7286_v12 = vadd.f32 %v17462_v52, %v7222_v41 }
 0x7d9   : > { %8062 = vmatpush.msrb.mxu3 %v7816_v47  ;;  %v7409_v47 = vmul.f32 %v17481_v34, %v7345_v32  ;;  %v7471_v23 = vadd.f32 %v17491_v25, %v7407_v21  ;;  %v6914_v28 = vpop.f32.mrf.mxu3 }
 0x7da   : > { %v7346_v37 = vmax.f32 %v7286_v12, 0.0 }
 0x7db   : > { %8063 = vmatpush.msrb.mxu3 %v7815_v2  ;;  %v7408_v2 = vmul.f32 %v17481_v34, %v7344_v36  ;;  %v7473_v60 = vadd.f32 %v17491_v25, %v7409_v47  ;;  %v6645_v44 = vpop.f32.mrf.mxu2  ;;  %v7642_v9 = vrot.slane %v7471_v23, 1  ;;  %v6403_v41 = vpop.f32.mrf.mxu1 }
 0x7dc   : > { %v7410_v27 = vmul.f32 %v17481_v34, %v7346_v37 }
 0x7dd   : > { %v7157_v42 = vpop.f32.mrf.mxu0  ;;  %8064 = vmatpush.msrb.mxu3 %v7814_v63  ;;  %v7811_v63 = vmax.f32 %v17302_v38, %v17635_v19  ;;  %v7472_v15 = vadd.f32 %v17491_v25, %v7408_v2  ;;  %v7875_v38 = vld [vmem:[%s18347_s11 + $0x140] sm:$0xff]  ;;  %v20614_v19 = vld [vmem:[#allocation93_spill] sm:$0xff]  ;;  %v7646_v40 = vrot.slane %v7473_v60, 1 }
 0x7de   : > { %v7223_v50 = vadd.f32 %v7157_v42, %v6975_v57  ;;  %v7474_v0 = vadd.f32 %v17491_v25, %v7410_v27  ;;  %v6464_v58 = vadd.f32 %v6401_v35, %v20614_v19  ;;  %7983 = vmatmul.f32.gmra.mxu1 %v7875_v38  ;;  %v6465_v57 = vadd.f32 %v6403_v41, %v20615_v49  ;;  %v7860_v41 = vld [vmem:[%s18347_s11 + $0xc8] sm:$0xff]  ;;  %v7850_v49 = vld [vmem:[%s18347_s11 + $0x78] sm:$0xff] }
 0x7df   : > { %8065 = vmatpush.msrb.mxu3 %v7813_v5  ;;  %v7644_v3 = vrot.slane %v7472_v15, 1  ;;  %v7643_v42 = vsel %vm1130_vm0, %v7640_v26, %v7642_v9 }
 0x7e0   : > { %v7287_v59 = vadd.f32 %v17462_v52, %v7223_v50  ;;  %v7648_v55 = vrot.slane %v7474_v0, 1  ;;  %v6708_v31 = vadd.f32 %v6645_v44, %v6464_v58  ;;  %v17722_v14 = vmax.f32 %v17594_v46, %v7643_v42  ;;  %v7883_v46 = vld [vmem:[%s18347_s11 + $0x180] sm:$0xff]  ;;  %v7873_v42 = vld [vmem:[%s18347_s11 + $0x130] sm:$0xff] }
 0x7e1   : > { %8066 = vmatpush.msrb.mxu3 %v7812_v51  ;;  %v7647_v4 = vsel %vm1130_vm0, %v7644_v3, %v7646_v40  ;;  %v7645_v45 = vsel %vm1130_vm0, %v7642_v9, %v7644_v3  ;;  %v6916_v2 = vpop.f32.mrf.mxu3 }
 0x7e2   : > { %v7347_v5 = vmax.f32 %v7287_v59, 0.0  ;;  %v7649_v43 = vsel %vm1130_vm0, %v7646_v40, %v7648_v55  ;;  %v17702_v24 = vmax.f32 %v7472_v15, %v7647_v4  ;;  %v6977_v12 = vadd.f32 %v6914_v28, %v6708_v31 }
 0x7e3   : > { %8067 = vmatpush.msrb.mxu3 %v7811_v63  ;;  %v17693_v62 = vmax.f32 %v7473_v60, %v7649_v43  ;;  %v17709_v37 = vmax.f32 %v7471_v23, %v7645_v45  ;;  %v6647_v51 = vpop.f32.mrf.mxu2  ;;  %v7840_v60 = vld [vmem:[%s18347_s11 + $0x28] sm:$0xff]  ;;  %v7849_v43 = vld [vmem:[%s18347_s11 + $0x70] sm:$0xff]  ;;  %v17775_v9 = vpop.f32.mrf.mxu1 }
 0x7e4   : > { %v7411_v7 = vmul.f32 %v17481_v34, %v7347_v5  ;;  %v7828_v50 = vmax.f32 %v17616_v11, %v17702_v24  ;;  %v6709_v59 = vadd.f32 %v6647_v51, %v6465_v57  ;;  %v7826_v5 = vmax.f32 %v17543_v20, %v17722_v14  ;;  %8014 = vmatmul.f32.gmra.mxu2 %v7840_v60  ;;  %v7887_v20 = vld [vmem:[%s18347_s11 + $0x1a0] sm:$0xff]  ;;  %v7865_v45 = vld [vmem:[%s18347_s11 + $0xf0] sm:$0xff]  ;;  %v7862_v51 = vld [vmem:[%s18347_s11 + $0xd8] sm:$0xff] }
 0x7e5   : > { %v7159_v30 = vpop.f32.mrf.mxu0  ;;  %8068 = vmatpush.msrb.mxu3 %v7810_v29  ;;  %v7827_v63 = vmax.f32 %v17578_v22, %v17709_v37  ;;  %v7841_v22 = vld [vmem:[%s18347_s11 + $0x30] sm:$0xff] }
 0x7e6   : > { %v7475_v10 = vadd.f32 %v17491_v25, %v7411_v7  ;;  %v7224_v1 = vadd.f32 %v7159_v30, %v6976_v6  ;;  %7986 = vmatmul.f32.gmra.mxu1 %v7879_v54  ;;  %8069 = vmatmul.f32.vlgmr.msrb.gmra.mxu3 %v7837_v18  ;;  %v6978_v21 = vadd.f32 %v6916_v2, %v6709_v59  ;;  %v7844_v30 = vld [vmem:[%s18347_s11 + $0x48] sm:$0xff]  ;;  %v7838_v54 = vld [vmem:[%s18347_s11 + $0x18] sm:$0xff]  ;;  %v7869_v57 = vld [vmem:[%s18347_s11 + $0x110] sm:$0xff] }
 0x7e7   : > { %v7854_v18 = vld [vmem:[%s18347_s11 + $0x98] sm:$0xff] }
 0x7e8   : > { %v7650_v56 = vrot.slane %v7475_v10, 1  ;;  %v7288_v39 = vadd.f32 %v17462_v52, %v7224_v1 }
 0x7ea   : > { %v7348_v16 = vmax.f32 %v7288_v39, 0.0  ;;  %v7651_v61 = vsel %vm1130_vm0, %v7648_v55, %v7650_v56 }
 0x7eb   : > { %v17700_v8 = vmax.f32 %v7474_v0, %v7651_v61  ;;  %v7829_v0 = vmax.f32 %v17722_v14, %v17693_v62  ;;  %v7857_v61 = vld [vmem:[%s18347_s11 + $0xb0] sm:$0xff]  ;;  %v17786_v4 = vpop.f32.mrf.mxu1  ;;  %v7858_v14 = vld [vmem:[%s18347_s11 + $0xb8] sm:$0xff] }
 0x7ec   : > { %v7412_v33 = vmul.f32 %v17481_v34, %v7348_v16  ;;  %8017 = vmatmul.f32.gmra.mxu2 %v7844_v30  ;;  %v7856_v16 = vld [vmem:[%s18347_s11 + $0xa8] sm:$0xff] }
 0x7ed   : > { %v7162_v32 = vpop.f32.mrf.mxu0  ;;  %v7830_v17 = vmax.f32 %v17709_v37, %v17700_v8  ;;  %v7868_v37 = vld [vmem:[%s18347_s11 + $0x108] sm:$0xff] }
 0x7ee   : > { %v7476_v36 = vadd.f32 %v17491_v25, %v7412_v33  ;;  %v7225_v27 = vadd.f32 %v7162_v32, %v6977_v12  ;;  %7989 = vmatmul.f32.gmra.mxu1 %v7883_v46  ;;  %8072 = vmatmul.f32.gmra.mxu3 %v7841_v22  ;;  %v7864_v33 = vld [vmem:[%s18347_s11 + $0xe8] sm:$0xff]  ;;  %v7874_v46 = vld [vmem:[%s18347_s11 + $0x138] sm:$0xff] }
 0x7f0   : > { %v7652_v13 = vrot.slane %v7476_v36, 1  ;;  %v7289_v47 = vadd.f32 %v17462_v52, %v7225_v27  ;;  %v7872_v27 = vld [vmem:[%s18347_s11 + $0x128] sm:$0xff] }
 0x7f2   : > { %v7653_v26 = vsel %vm1130_vm0, %v7650_v56, %v7652_v13  ;;  %v7349_v35 = vmax.f32 %v7289_v47, 0.0  ;;  %v7848_v56 = vld [vmem:[%s18347_s11 + $0x68] sm:$0xff] }
 0x7f3   : > { %v7774_v53 = vmax.f32 %v7475_v10, %v7653_v26  ;;  %v7845_v10 = vld [vmem:[%s18347_s11 + $0x50] sm:$0xff]  ;;  %v17798_v12 = vpop.f32.mrf.mxu1  ;;  %v7876_v47 = vld [vmem:[%s18347_s11 + $0x148] sm:$0xff]  ;;  %v7870_v26 = vld [vmem:[%s18347_s11 + $0x118] sm:$0xff] }
 0x7f4   : > { %v7413_v11 = vmul.f32 %v17481_v34, %v7349_v35  ;;  %8020 = vmatmul.f32.gmra.mxu2 %v7848_v56 }
 0x7f5   : > { %v7164_v29 = vpop.f32.mrf.mxu0  ;;  %v7831_v6 = vmax.f32 %v17702_v24, %v7774_v53  ;;  %v7861_v24 = vld [vmem:[%s18347_s11 + $0xd0] sm:$0xff] }
 0x7f6   : > { %v7477_v15 = vadd.f32 %v17491_v25, %v7413_v11  ;;  %v7226_v55 = vadd.f32 %v7164_v29, %v6978_v21  ;;  %7992 = vmatmul.f32.gmra.mxu1 %v7887_v20  ;;  %8075 = vmatmul.f32.gmra.mxu3 %v7845_v10  ;;  %v7888_v20 = vld [vmem:[%s18347_s11 + $0x1a8] sm:$0xff] }
 0x7f8   : > { %v7654_v7 = vrot.slane %v7477_v15, 1  ;;  %v7290_v38 = vadd.f32 %v17462_v52, %v7226_v55  ;;  %v7880_v55 = vld [vmem:[%s18347_s11 + $0x168] sm:$0xff] }
 0x7fa   : > { %v7350_v19 = vmax.f32 %v7290_v38, 0.0  ;;  %v7655_v58 = vsel %vm1130_vm0, %v7652_v13, %v7654_v7 }
 0x7fb   : > { %v7775_v23 = vmax.f32 %v7476_v36, %v7655_v58  ;;  %v17810_v32 = vpop.f32.mrf.mxu1  ;;  %v9821_v58 = vld [vmem:[%s18343_s7 + $0x18] sm:$0xff] }
 0x7fc   : > { %v7414_v40 = vmul.f32 %v17481_v34, %v7350_v19  ;;  %8297 = vmatpush.bf16.msrb.mxu2 %v9821_v58 }
 0x7fd   : > { %v7832_v52 = vmax.f32 %v17693_v62, %v7775_v23  ;;  %v7853_v62 = vld [vmem:[%s18347_s11 + $0x90] sm:$0xff] }
 0x7fe   : > { %v7478_v1 = vadd.f32 %v17491_v25, %v7414_v40  ;;  %8078 = vmatmul.f32.gmra.mxu3 %v7849_v43  ;;  %v7852_v25 = vld [vmem:[%s18347_s11 + $0x88] sm:$0xff] }
 0x7ff   : > { %8023 = vmatmul.f32.gmra.mxu2 %v7852_v25 }
 0x800   : > { %v7656_v44 = vrot.slane %v7478_v1, 1 }
 0x802   : > { %v7777_v28 = vmax.f32 %v7478_v1, %v7656_v44  ;;  %v7657_v3 = vsel %vm1130_vm0, %v7654_v7, %v7656_v44  ;;  %v7884_v7 = vld [vmem:[%s18347_s11 + $0x188] sm:$0xff]  ;;  %v9820_v44 = vld [vmem:[%s18343_s7 + $0x10] sm:$0xff] }
 0x803   : > { %v7776_v34 = vmax.f32 %v7477_v15, %v7657_v3  ;;  %v17822_v36 = vpop.f32.mrf.mxu1  ;;  %8298 = vmatpush.bf16.msrb.mxu2 %v9820_v44 }
 0x804   : > { %v7834_v39 = vmax.f32 %v7774_v53, %v7777_v28  ;;  %v7878_v53 = vld [vmem:[%s18347_s11 + $0x158] sm:$0xff] }
 0x805   : > { %v7833_v31 = vmax.f32 %v17700_v8, %v7776_v34  ;;  %v7842_v8 = vld [vmem:[%s18347_s11 + $0x38] sm:$0xff] }
 0x806   : > { %9639 = vmatpush.msk.msrb.mxu1 %vm1130_vm0, %v7834_v39  ;;  %8081 = vmatmul.f32.gmra.mxu3 %v7853_v62 }
 0x807   : > { %8026 = vmatmul.f32.gmra.mxu2 %v7856_v16 }
 0x808   : > { %8119 = vmatpush.msrb.mxu1 %v7833_v31 }
 0x80a   : > { %8120 = vmatpush.msrb.mxu1 %v7832_v52 }
 0x80c   : > { %8121 = vmatpush.msrb.mxu1 %v7831_v6 }
 0x80e   : > { %8122 = vmatpush.msrb.mxu1 %v7830_v17  ;;  %8084 = vmatmul.f32.gmra.mxu3 %v7857_v61 }
 0x80f   : > { %8029 = vmatmul.f32.gmra.mxu2 %v7860_v41 }
 0x810   : > { %8123 = vmatpush.msrb.mxu1 %v7829_v0  ;;  %v7866_v0 = vld [vmem:[%s18347_s11 + $0xf8] sm:$0xff] }
 0x812   : > { %8124 = vmatpush.msrb.mxu1 %v7828_v50  ;;  %v7877_v50 = vld [vmem:[%s18347_s11 + $0x150] sm:$0xff] }
 0x814   : > { %8125 = vmatpush.msrb.mxu1 %v7827_v63 }
 0x816   : > { %8126 = vmatpush.msrb.mxu1 %v7826_v5  ;;  %8087 = vmatmul.f32.gmra.mxu3 %v7861_v24 }
 0x817   : > { %9640 = vmatmul.msk.f32.vlgmr.msrb.gmra.mxu1 %vm7891_vm4, %v7838_v54  ;;  %8032 = vmatmul.f32.gmra.mxu2 %v7864_v33 }
 0x81e   : > { %8090 = vmatmul.f32.gmra.mxu3 %v7865_v45 }
 0x81f   : > { %9641 = vmatmul.msk.f32.gmra.mxu1 %vm7891_vm4, %v7842_v8  ;;  %8035 = vmatmul.f32.gmra.mxu2 %v7868_v37 }
 0x826   : > { %8093 = vmatmul.f32.gmra.mxu3 %v7869_v57 }
 0x827   : > { %9642 = vmatmul.msk.f32.gmra.mxu1 %vm7891_vm4, %v7846_v48  ;;  %8038 = vmatmul.f32.gmra.mxu2 %v7872_v27  ;;  %v17834_v17 = vpop.f32.mrf.mxu1 }
 0x82e   : > { %8096 = vmatmul.f32.gmra.mxu3 %v7873_v42 }
 0x82f   : > { %9643 = vmatmul.msk.f32.gmra.mxu1 %vm7891_vm4, %v7850_v49  ;;  %8041 = vmatmul.f32.gmra.mxu2 %v7876_v47 }
 0x834   : > { %v17840_v13 = vpop.f32.mrf.mxu1 }
 0x836   : > { %8099 = vmatmul.f32.gmra.mxu3 %v7877_v50 }
 0x837   : > { %9644 = vmatmul.msk.f32.gmra.mxu1 %vm7891_vm4, %v7854_v18  ;;  %8044 = vmatmul.f32.gmra.mxu2 %v7880_v55 }
 0x83c   : > { %v17852_v2 = vpop.f32.mrf.mxu1 }
 0x83f   : > { %9645 = vmatmul.msk.f32.gmra.mxu1 %vm7891_vm4, %v7858_v14  ;;  %8047 = vmatmul.f32.gmra.mxu2 %v7884_v7  ;;  %v7885_v7 = vld [vmem:[%s18347_s11 + $0x190] sm:$0xff] }
 0x847   : > { %9646 = vmatmul.msk.f32.gmra.mxu1 %vm7891_vm4, %v7862_v51  ;;  %8050 = vmatmul.f32.gmra.mxu2 %v7888_v20 }
 0x84b   : > { %v17859_v59 = vpop.f32.mrf.mxu1 }
 0x84f   : > { %9647 = vmatmul.msk.f32.gmra.mxu1 %vm7891_vm4, %v7866_v0 }
 0x853   : > { %v17865_v35 = vpop.f32.mrf.mxu1 }
 0x857   : > { %9648 = vmatmul.msk.f32.gmra.mxu1 %vm7891_vm4, %v7870_v26 }
 0x85a   : > { %v8012_v5 = vpop.f32.mrf.mxu2 }
 0x85b   : > { %v17871_v63 = vpop.f32.mrf.mxu1  ;;  %v8013_v52 = vadd.f32 %v8012_v5, %v17775_v9 }
 0x85f   : > { %9649 = vmatmul.msk.f32.gmra.mxu1 %vm7891_vm4, %v7874_v46 }
 0x863   : > { %v17877_v21 = vpop.f32.mrf.mxu1 }
 0x867   : > { %9650 = vmatmul.msk.f32.gmra.mxu1 %vm7891_vm4, %v7878_v53  ;;  %v8015_v6 = vpop.f32.mrf.mxu2 }
 0x868   : > { %v8016_v40 = vadd.f32 %v8015_v6, %v17786_v4 }
 0x869   : > { %v8070_v29 = vpop.f32.mrf.mxu3 }
 0x86a   : > { %v8071_v28 = vadd.f32 %v8070_v29, %v8013_v52  ;;  %v7889_v52 = vld [vmem:[%s18347_s11 + $0x1b0] sm:$0xff] }
 0x86b   : > { %v17879_v11 = vpop.f32.mrf.mxu1 }
 0x86f   : > { %v8018_v22 = vpop.f32.mrf.mxu2 }
 0x870   : > { %v8019_v56 = vadd.f32 %v8018_v22, %v17798_v12 }
 0x871   : > { %v8073_v15 = vpop.f32.mrf.mxu3 }
 0x872   : > { %v8074_v1 = vadd.f32 %v8073_v15, %v8016_v40 }
 0x873   : > { %v7993_v60 = vpop.f32.mrf.mxu1 }
 0x877   : > { %v8021_v30 = vpop.f32.mrf.mxu2 }
 0x878   : > { %v8022_v8 = vadd.f32 %v8021_v30, %v17810_v32  ;;  %v7881_v32 = vld [vmem:[%s18347_s11 + $0x170] sm:$0xff] }
 0x879   : > { %v8076_v38 = vpop.f32.mrf.mxu3  ;;  %8102 = vmatmul.f32.gmra.mxu3 %v7881_v32 }
 0x87a   : > { %v8077_v43 = vadd.f32 %v8076_v38, %v8019_v56 }
 0x881   : > { %v8079_v23 = vpop.f32.mrf.mxu3  ;;  %8105 = vmatmul.f32.gmra.mxu3 %v7885_v7 }
 0x882   : > { %v8024_v39 = vpop.f32.mrf.mxu2  ;;  %v8080_v12 = vadd.f32 %v8079_v23, %v8022_v8 }
 0x883   : > { %v8025_v18 = vadd.f32 %v8024_v39, %v17822_v36 }
 0x889   : > { %v8082_v62 = vpop.f32.mrf.mxu3  ;;  %8108 = vmatmul.f32.gmra.mxu3 %v7889_v52 }
 0x88a   : > { %v8027_v45 = vpop.f32.mrf.mxu2  ;;  %v8083_v14 = vadd.f32 %v8082_v62, %v8025_v18 }
 0x88b   : > { %v8028_v15 = vadd.f32 %v8027_v45, %v17834_v17 }
 0x891   : > { %v8085_v49 = vpop.f32.mrf.mxu3 }
 0x892   : > { %v8030_v53 = vpop.f32.mrf.mxu2  ;;  %v8086_v38 = vadd.f32 %v8085_v49, %v8028_v15 }
 0x893   : > { %v8031_v23 = vadd.f32 %v8030_v53, %v17840_v13  ;;  %v9818_v13 = vld [vmem:[%s18343_s7] sm:$0xff] }
 0x894   : > { %v8128_v19 = vpop.f32.mrf.mxu1 }
 0x895   : > { %v8129_v34 = vadd.f32 %v8128_v19, %v8071_v28 }
 0x897   : > { %v8169_v54 = vpack.c.bf16 %v8129_v34, %v8129_v34 }
 0x899   : > { %v8202_v41 = vunpack.c.l.b16 %v8169_v54  ;;  %v8088_v29 = vpop.f32.mrf.mxu3 }
 0x89a   : > { %v8033_v30 = vpop.f32.mrf.mxu2 }
 0x89b   : > { %v8034_v62 = vadd.f32 %v8033_v30, %v17852_v2 }
 0x89c   : > { %v8131_v10 = vpop.f32.mrf.mxu1 }
 0x89d   : > { %v8132_v3 = vadd.f32 %v8131_v10, %v8074_v1  ;;  %v8089_v10 = vadd.f32 %v8088_v29, %v8031_v23  ;;  %v9819_v1 = vld [vmem:[%s18343_s7 + $0x8] sm:$0xff] }
 0x89e   : > { %8353 = vmatpush.bf16.msra.mxu3 %v9819_v1 }
 0x89f   : > { %v8170_v31 = vpack.c.bf16 %v8132_v3, %v8132_v3 }
 0x8a1   : > { %v8203_v9 = vunpack.c.l.b16 %v8170_v31  ;;  %v8091_v40 = vpop.f32.mrf.mxu3 }
 0x8a2   : > { %8354 = vmatpush.bf16.msra.mxu3 %v9818_v13  ;;  %v8036_v54 = vpop.f32.mrf.mxu2 }
 0x8a3   : > { %v17902_v33 = vpack.c.b16 %v8203_v9, %v8202_v41  ;;  %v8037_v45 = vadd.f32 %v8036_v54, %v17859_v59 }
 0x8a4   : > { %v8134_v25 = vpop.f32.mrf.mxu1 }
 0x8a5   : > { %v8135_v16 = vadd.f32 %v8134_v25, %v8077_v43  ;;  %v8222_v57 = vshll.u32 %v17902_v33, 16  ;;  %v8220_v26 = vshrl.u32 %v17902_v33, 16  ;;  %9679 = vmatmul.msk.bf16.vlgmr.msra.gmra.mxu3 %vm8275_vm5, %v17902_v33 }
 0x8a7   : > { %v8171_v61 = vpack.c.bf16 %v8135_v16, %v8135_v16  ;;  %v8224_v47 = vrot.slane %v8222_v57, 1 }
 0x8a9   : > { %v8204_v4 = vunpack.c.l.b16 %v8171_v61  ;;  %v8225_v5 = vor.u32 %v8224_v47, %v8220_v26  ;;  %v8094_v41 = vpop.f32.mrf.mxu3 }
 0x8aa   : > { %v8095_v49 = vadd.f32 %v8094_v41, %v8037_v45  ;;  %v9825_v41 = vld [vmem:[%s18343_s7 + $0x38] sm:$0xff] }
 0x8ab   : > { %v17900_v24 = vpack.c.b16 %v8204_v4, %v8203_v9  ;;  %v8092_v9 = vadd.f32 %v8091_v40, %v8034_v62  ;;  %8525 = vmatpush.bf16.msrb.mxu3 %v9825_v41 }
 0x8ac   : > { %v8137_v48 = vpop.f32.mrf.mxu1 }
 0x8ad   : > { %v8138_v37 = vadd.f32 %v8137_v48, %v8080_v12  ;;  %v7882_v12 = vld [vmem:[%s18347_s11 + $0x178] sm:$0xff] }
 0x8ae   : > { %9651 = vmatmul.msk.f32.gmra.mxu1 %vm7891_vm4, %v7882_v12  ;;  %v8570_v12 = vshrl.u32 %v17900_v24, 16 }
 0x8af   : > { %v8172_v27 = vpack.c.bf16 %v8138_v37, %v8138_v37 }
 0x8b1   : > { %v8205_v42 = vunpack.c.l.b16 %v8172_v27  ;;  %v8039_v27 = vpop.f32.mrf.mxu2  ;;  %v8097_v32 = vpop.f32.mrf.mxu3 }
 0x8b2   : > { %v8040_v59 = vadd.f32 %v8039_v27, %v17865_v35  ;;  %v9822_v35 = vld [vmem:[%s18343_s7 + $0x20] sm:$0xff]  ;;  %v8481_v27 = vrot.slane %v17900_v24, 1 }
 0x8b3   : > { %v17909_v50 = vpack.c.b16 %v8205_v42, %v8204_v4 }
 0x8b4   : > { %v8140_v51 = vpop.f32.mrf.mxu1 }
 0x8b5   : > { %v8141_v0 = vadd.f32 %v8140_v51, %v8083_v14  ;;  %v8227_v46 = vshll.u32 %v17909_v50, 16  ;;  %v8231_v56 = vshrl.u32 %v17909_v50, 16  ;;  %9680 = vmatmul.msk.bf16.gmra.mxu3 %vm8275_vm5, %v17909_v50  ;;  %v8387_v62 = vrot.slane %v17909_v50, 1 }
 0x8b7   : > { %v8173_v60 = vpack.c.bf16 %v8141_v0, %v8141_v0  ;;  %v8229_v36 = vrot.slane %v8227_v46, 1 }
 0x8b9   : > { %v8206_v6 = vunpack.c.l.b16 %v8173_v60  ;;  %v8230_v55 = vsel %vm4094_vm2, %v8225_v5, %v8229_v36  ;;  %v8233_v43 = vor.u32 %v8231_v56, %v8229_v36  ;;  %v8098_v5 = vadd.f32 %v8097_v32, %v8040_v59  ;;  %v9823_v36 = vld [vmem:[%s18343_s7 + $0x28] sm:$0xff]  ;;  %v8042_v15 = vpop.f32.mrf.mxu2  ;;  %v8100_v7 = vpop.f32.mrf.mxu3  ;;  %v7890_v59 = vld [vmem:[%s18347_s11 + $0x1b8] sm:$0xff] }
 0x8ba   : > { %9666 = vmatmul.msk.bf16.vlgmr.msrb.gmra.mxu2 %vm8275_vm5, %v8230_v55 }
 0x8bb   : > { %v17917_v22 = vpack.c.b16 %v8206_v6, %v8205_v42  ;;  %8430 = vmatpush.bf16.msra.mxu2 %v9823_v36 }
 0x8bc   : > { %v8143_v19 = vpop.f32.mrf.mxu1 }
 0x8bd   : > { %v8144_v58 = vadd.f32 %v8143_v19, %v8086_v38  ;;  %v8043_v19 = vadd.f32 %v8042_v15, %v17871_v63  ;;  %v8581_v45 = vshll.u32 %v17917_v22, 16 }
 0x8bf   : > { %v8174_v20 = vpack.c.bf16 %v8144_v58, %v8144_v58  ;;  %8431 = vmatpush.bf16.msra.mxu2 %v9822_v35 }
 0x8c1   : > { %v8207_v17 = vunpack.c.l.b16 %v8174_v20  ;;  %v8101_v20 = vadd.f32 %v8100_v7, %v8043_v19 }
 0x8c3   : > { %v17930_v44 = vpack.c.b16 %v8207_v17, %v8206_v6 }
 0x8c4   : > { %v8146_v28 = vpop.f32.mrf.mxu1 }
 0x8c5   : > { %v8147_v3 = vadd.f32 %v8146_v28, %v8089_v10  ;;  %v8235_v34 = vshll.u32 %v17930_v44, 16  ;;  %v8239_v42 = vshrl.u32 %v17930_v44, 16  ;;  %9681 = vmatmul.msk.bf16.gmra.mxu3 %vm8275_vm5, %v17930_v44 }
 0x8c7   : > { %v8175_v39 = vpack.c.bf16 %v8147_v3, %v8147_v3  ;;  %v8237_v31 = vrot.slane %v8235_v34, 1 }
 0x8c9   : > { %v8208_v25 = vunpack.c.l.b16 %v8175_v39  ;;  %v8238_v16 = vsel %vm4094_vm2, %v8233_v43, %v8237_v31  ;;  %v8241_v51 = vor.u32 %v8239_v42, %v8237_v31 }
 0x8ca   : > { %9667 = vmatmul.msk.bf16.gmra.mxu2 %vm8275_vm5, %v8238_v16  ;;  %v8386_v16 = vrot.slane %v17902_v33, 1  ;;  %v9824_v33 = vld [vmem:[%s18343_s7 + $0x30] sm:$0xff] }
 0x8cb   : > { %v17943_v61 = vpack.c.b16 %v8208_v25, %v8207_v17  ;;  %8526 = vmatpush.bf16.msrb.mxu3 %v9824_v33 }
 0x8cc   : > { %v8149_v4 = vpop.f32.mrf.mxu1  ;;  %v8388_v54 = vsel %vm1130_vm0, %v8386_v16, %v8387_v62 }
 0x8cd   : > { %v8150_v8 = vadd.f32 %v8149_v4, %v8092_v9  ;;  %v18008_v9 = vpop.f32.mrf.mxu2  ;;  %v7886_v4 = vld [vmem:[%s18347_s11 + $0x198] sm:$0xff]  ;;  %v8484_v7 = vrot.slane %v17943_v61, 1 }
 0x8ce   : > { %9652 = vmatmul.msk.f32.gmra.mxu1 %vm7891_vm4, %v7886_v4 }
 0x8cf   : > { %v8176_v2 = vpack.c.bf16 %v8150_v8, %v8150_v8 }
 0x8d1   : > { %v8209_v48 = vunpack.c.l.b16 %v8176_v2  ;;  %v8573_v2 = vshll.u32 %v17900_v24, 16 }
 0x8d3   : > { %v17953_v37 = vpack.c.b16 %v8209_v48, %v8208_v25  ;;  %v8575_v32 = vrot.slane %v8573_v2, 2 }
 0x8d4   : > { %v8152_v57 = vpop.f32.mrf.mxu1 }
 0x8d5   : > { %v8153_v18 = vadd.f32 %v8152_v57, %v8095_v49  ;;  %v8243_v14 = vshll.u32 %v17953_v37, 16  ;;  %v8247_v23 = vshrl.u32 %v17953_v37, 16  ;;  %9682 = vmatmul.msk.bf16.gmra.mxu3 %vm8275_vm5, %v17953_v37  ;;  %v8048_v8 = vpop.f32.mrf.mxu2  ;;  %v8389_v49 = vrot.slane %v17930_v44, 1 }
 0x8d6   : > { %v8482_v57 = vrot.slane %v17917_v22, 1  ;;  %9653 = vmatmul.msk.f32.gmra.mxu1 %vm7891_vm4, %v7890_v59  ;;  %v8391_v15 = vrot.slane %v17953_v37, 1  ;;  %v8049_v4 = vadd.f32 %v8048_v8, %v17879_v11  ;;  %v8702_v11 = vrot.slane %v17943_v61, 2 }
 0x8d7   : > { %v8177_v47 = vpack.c.bf16 %v8153_v18, %v8153_v18  ;;  %v8245_v0 = vrot.slane %v8243_v14, 1  ;;  %v8572_v18 = vrot.slane %v8570_v12, 1 }
 0x8d8   : > { %v8485_v19 = vsel %vm1130_vm0, %v8482_v57, %v8484_v7 }
 0x8d9   : > { %v8210_v26 = vunpack.c.l.b16 %v8177_v47  ;;  %v8246_v53 = vsel %vm4094_vm2, %v8241_v51, %v8245_v0  ;;  %v8249_v10 = vor.u32 %v8247_v23, %v8245_v0  ;;  %v8583_v51 = vrot.slane %v8581_v45, 2 }
 0x8da   : > { %9668 = vmatmul.msk.bf16.gmra.mxu2 %vm8275_vm5, %v8246_v53  ;;  %v8390_v0 = vsel %vm1130_vm0, %v8387_v62, %v8389_v49  ;;  %v8483_v53 = vsel %vm1130_vm0, %v8481_v27, %v8482_v57  ;;  %v8576_v36 = vor.u32 %v8575_v32, %v8572_v18 }
 0x8db   : > { %v17963_v60 = vpack.c.b16 %v8210_v26, %v8209_v48  ;;  %v8578_v48 = vshrl.u32 %v17917_v22, 16 }
 0x8dc   : > { %v8155_v29 = vpop.f32.mrf.mxu1 }
 0x8dd   : > { %v8156_v6 = vadd.f32 %v8155_v29, %v8098_v5  ;;  %v8580_v47 = vrot.slane %v8578_v48, 1  ;;  %v9827_v5 = vld [vmem:[%s18343_s7 + $0x48] sm:$0xff]  ;;  %v8596_v33 = vshrl.u32 %v17963_v60, 16  ;;  %v8599_v12 = vshll.u32 %v17963_v60, 16 }
 0x8de   : > { %8655 = vmatpush.bf16.msra.mxu1 %v9827_v5 }
 0x8df   : > { %v8178_v55 = vpack.c.bf16 %v8156_v6, %v8156_v6  ;;  %v8584_v29 = vor.u32 %v8583_v51, %v8580_v47  ;;  %v9826_v6 = vld [vmem:[%s18343_s7 + $0x40] sm:$0xff]  ;;  %v8598_v45 = vrot.slane %v8596_v33, 1 }
 0x8e1   : > { %v17974_v38 = vunpack.c.l.b16 %v8178_v55  ;;  %v8585_v35 = vsel %vm8568_vm6, %v8576_v36, %v8584_v29  ;;  %v8392_v55 = vsel %vm1130_vm0, %v8389_v49, %v8391_v15  ;;  %v8601_v49 = vrot.slane %v8599_v12, 2 }
 0x8e2   : > { %8656 = vmatpush.bf16.msra.mxu1 %v9826_v6 }
 0x8e3   : > { %v17978_v58 = vpack.c.b16 %v17974_v38, %v8210_v26  ;;  %v8051_v26 = vpop.f32.mrf.mxu2  ;;  %v8602_v57 = vor.u32 %v8601_v49, %v8598_v45  ;;  %v9830_v45 = vld [vmem:[%s18343_s7 + $0x60] sm:$0xff] }
 0x8e4   : > { %v8158_v30 = vpop.f32.mrf.mxu1  ;;  %v8046_v26 = vadd.f32 %v18008_v9, %v17877_v21 }
 0x8e5   : > { %v8251_v17 = vshll.u32 %v17978_v58, 16  ;;  %v8159_v40 = vadd.f32 %v8158_v30, %v8101_v20  ;;  %v8255_v39 = vshrl.u32 %v17978_v58, 16  ;;  %9683 = vmatmul.msk.bf16.gmra.mxu3 %vm8275_vm5, %v17978_v58  ;;  %9730 = vmatmul.msk.bf16.vlgmr.msra.gmra.mxu1 %vm8275_vm5, %v8585_v35  ;;  %v9829_v20 = vld [vmem:[%s18343_s7 + $0x58] sm:$0xff]  ;;  %v8587_v30 = vshrl.u32 %v17943_v61, 16 }
 0x8e6   : > { %8743 = vmatpush.bf16.msrb.mxu2 %v9829_v20 }
 0x8e7   : > { %v8253_v52 = vrot.slane %v8251_v17, 1  ;;  %v8179_v1 = vpack.c.bf16 %v8159_v40, %v8159_v40  ;;  %v8590_v40 = vshll.u32 %v17943_v61, 16 }
 0x8e9   : > { %v8254_v63 = vsel %vm4094_vm2, %v8249_v10, %v8253_v52  ;;  %v17987_v28 = vunpack.c.l.b16 %v8179_v1  ;;  %v8257_v31 = vor.u32 %v8255_v39, %v8253_v52  ;;  %v8589_v10 = vrot.slane %v8587_v30, 1 }
 0x8ea   : > { %9669 = vmatmul.msk.bf16.gmra.mxu2 %vm8275_vm5, %v8254_v63  ;;  %v8592_v52 = vrot.slane %v8590_v40, 2  ;;  %v8700_v1 = vrot.slane %v17917_v22, 2  ;;  %v8704_v30 = vrot.slane %v17963_v60, 2 }
 0x8eb   : > { %v17994_v3 = vpack.c.b16 %v17987_v28, %v17987_v28  ;;  %v18080_v8 = vpack.c.b16 %v17987_v28, %v17974_v38 }
 0x8ec   : > { %v8593_v63 = vor.u32 %v8592_v52, %v8589_v10  ;;  %v8703_v51 = vsel %vm1537_vm1, %v8700_v1, %v8702_v11 }
 0x8ed   : > { %v8259_v13 = vshll.u32 %v17994_v3, 16  ;;  %v8395_v32 = vrot.slane %v17994_v3, 1  ;;  %v8488_v3 = vrot.slane %v18080_v8, 1  ;;  %v8605_v5 = vshrl.u32 %v18080_v8, 16 }
 0x8ee   : > { %v8603_v27 = vsel %vm8568_vm6, %v8593_v63, %v8602_v57  ;;  %v8608_v36 = vshll.u32 %v18080_v8, 16  ;;  %v8706_v33 = vrot.slane %v18080_v8, 2 }
 0x8ef   : > { %v8261_v43 = vrot.slane %v8259_v13, 1  ;;  %v8699_v13 = vrot.slane %v17900_v24, 2  ;;  %v8486_v24 = vrot.slane %v17963_v60, 1  ;;  %v8607_v21 = vrot.slane %v8605_v5, 1 }
 0x8f0   : > { %v8610_v9 = vrot.slane %v8608_v36, 2  ;;  %v8707_v49 = vsel %vm1537_vm1, %v8704_v30, %v8706_v33 }
 0x8f1   : > { %v8262_v25 = vsel %vm4094_vm2, %v8257_v31, %v8261_v43  ;;  %v8594_v43 = vsel %vm8568_vm6, %v8584_v29, %v8593_v63  ;;  %v8393_v31 = vrot.slane %v17978_v58, 1  ;;  %v8701_v62 = vsel %vm1537_vm1, %v8699_v13, %v8700_v1 }
 0x8f2   : > { %v8487_v22 = vsel %vm1130_vm0, %v8484_v7, %v8486_v24  ;;  %v8489_v61 = vsel %vm1130_vm0, %v8486_v24, %v8488_v3  ;;  %v8705_v1 = vsel %vm1537_vm1, %v8702_v11, %v8704_v30  ;;  %v8878_v11 = vrot.slane %v8231_v56, 2  ;;  %v9832_v56 = vld [vmem:[%s18343_s7 + $0x70] sm:$0xff] }
 0x8f5   : > { %9713 = vmatmul.msk.bf16.vlgmr.msrb.gmra.mxu3 %vm8275_vm5, %v8483_v53  ;;  %9731 = vmatmul.msk.bf16.gmra.mxu1 %vm8275_vm5, %v8594_v43 }
 0x8fa   : > { %9670 = vmatmul.msk.bf16.gmra.mxu2 %vm8275_vm5, %v8262_v25  ;;  %v9828_v25 = vld [vmem:[%s18343_s7 + $0x50] sm:$0xff] }
 0x8fb   : > { %8744 = vmatpush.bf16.msrb.mxu2 %v9828_v25 }
 0x8fc   : > { %v8103_v16 = vpop.f32.mrf.mxu3 }
 0x8fd   : > { %v8104_v59 = vadd.f32 %v8103_v16, %v8046_v26 }
 0x904   : > { %v8106_v2 = vpop.f32.mrf.mxu3 }
 0x905   : > { %9714 = vmatmul.msk.bf16.gmra.mxu3 %vm8275_vm5, %v8485_v19  ;;  %v18073_v48 = vadd.f32 %v8106_v2, %v8049_v4  ;;  %9732 = vmatmul.msk.bf16.gmra.mxu1 %vm8275_vm5, %v8603_v27  ;;  %v8881_v27 = vrot.slane %v8239_v42, 2 }
 0x90a   : > { %9696 = vmatmul.msk.bf16.vlgmr.msra.gmra.mxu2 %vm8275_vm5, %v8388_v54  ;;  %v8394_v54 = vsel %vm1130_vm0, %v8391_v15, %v8393_v31 }
 0x90c   : > { %v8109_v47 = vpop.f32.mrf.mxu3 }
 0x915   : > { %9715 = vmatmul.msk.bf16.gmra.mxu3 %vm8275_vm5, %v8487_v22 }
 0x91a   : > { %9697 = vmatmul.msk.bf16.gmra.mxu2 %vm8275_vm5, %v8390_v0  ;;  %v8396_v0 = vsel %vm1130_vm0, %v8393_v31, %v8395_v32  ;;  %v8790_v32 = vrot.slane %v17909_v50, 2 }
 0x925   : > { %9716 = vmatmul.msk.bf16.gmra.mxu3 %vm8275_vm5, %v8489_v61 }
 0x928   : > { %v8356_v29 = vpop.f32.mrf.mxu3 }
 0x92a   : > { %9698 = vmatmul.msk.bf16.gmra.mxu2 %vm8275_vm5, %v8392_v55  ;;  %v8611_v55 = vor.u32 %v8610_v9, %v8607_v21  ;;  %v9835_v21 = vld [vmem:[%s18343_s7 + $0x88] sm:$0xff]  ;;  %v8885_v9 = vrot.slane %v8247_v23, 2  ;;  %v8795_v23 = vrot.slane %v17978_v58, 2 }
 0x92b   : > { %v8161_v38 = vpop.f32.mrf.mxu1  ;;  %9032 = vmatpush.bf16.msra.mxu2 %v9835_v21 }
 0x92c   : > { %v8162_v6 = vadd.f32 %v8161_v38, %v8104_v59  ;;  %v8612_v19 = vsel %vm8568_vm6, %v8602_v57, %v8611_v55  ;;  %v8882_v57 = vrot.slane %v8235_v34, 3  ;;  %v9833_v34 = vld [vmem:[%s18343_s7 + $0x78] sm:$0xff] }
 0x92d   : > { %9733 = vmatmul.msk.bf16.gmra.mxu1 %vm8275_vm5, %v8612_v19 }
 0x92e   : > { %v8180_v15 = vpack.c.bf16 %v8162_v6, %v8162_v6  ;;  %v8883_v26 = vor.u32 %v8882_v57, %v8881_v27  ;;  %8944 = vmatpush.bf16.msrb.mxu1 %v9833_v34 }
 0x930   : > { %v18095_v7 = vunpack.c.l.b16 %v8180_v15  ;;  %v8358_v10 = vpop.f32.mrf.mxu3  ;;  %v8886_v15 = vrot.slane %v8243_v14, 3 }
 0x932   : > { %v18101_v40 = vpack.c.b16 %v18095_v7, %v18095_v7  ;;  %8945 = vmatpush.bf16.msrb.mxu1 %v9832_v56 }
 0x934   : > { %v8490_v63 = vrot.slane %v18101_v40, 1  ;;  %v8614_v60 = vshrl.u32 %v18101_v40, 16  ;;  %v8617_v31 = vshll.u32 %v18101_v40, 16 }
 0x936   : > { %v8491_v13 = vsel %vm1130_vm0, %v8488_v3, %v8490_v63  ;;  %v8619_v24 = vrot.slane %v8617_v31, 2 }
 0x937   : > { %9717 = vmatmul.msk.bf16.gmra.mxu3 %vm8275_vm5, %v8491_v13 }
 0x938   : > { %v8361_v25 = vpop.f32.mrf.mxu3 }
 0x93a   : > { %9699 = vmatmul.msk.bf16.gmra.mxu2 %vm8275_vm5, %v8394_v54  ;;  %v8616_v54 = vrot.slane %v8614_v60, 1  ;;  %v8890_v60 = vrot.slane %v8251_v17, 3 }
 0x93c   : > { %v8620_v22 = vor.u32 %v8619_v24, %v8616_v54 }
 0x93d   : > { %v8300_v41 = vpop.f32.mrf.mxu2 }
 0x93e   : > { %v18093_v35 = vadd.f32 %v8356_v29, %v8300_v41  ;;  %v8621_v4 = vsel %vm8568_vm6, %v8611_v55, %v8620_v22  ;;  %v9831_v41 = vld [vmem:[%s18343_s7 + $0x68] sm:$0xff]  ;;  %v8887_v55 = vor.u32 %v8886_v15, %v8885_v9  ;;  %v8708_v22 = vrot.slane %v18101_v40, 2 }
 0x93f   : > { %9734 = vmatmul.msk.bf16.gmra.mxu1 %vm8275_vm5, %v8621_v4  ;;  %8834 = vmatpush.bf16.msra.mxu3 %v9831_v41  ;;  %v18192_v4 = vpack.c.b16 %v18095_v7, %v17987_v28 }
 0x940   : > { %v8363_v12 = vpop.f32.mrf.mxu3 }
 0x941   : > { %v8797_v28 = vrot.slane %v18192_v4, 2  ;;  %v8894_v27 = vshrl.u32 %v18192_v4, 16  ;;  %v8897_v8 = vshll.u32 %v18192_v4, 16 }
 0x943   : > { %8835 = vmatpush.bf16.msra.mxu3 %v9830_v45 }
 0x945   : > { %v8302_v18 = vpop.f32.mrf.mxu2 }
 0x946   : > { %v18104_v52 = vadd.f32 %v8358_v10, %v8302_v18  ;;  %v8791_v18 = vrot.slane %v17930_v44, 2  ;;  %v9834_v10 = vld [vmem:[%s18343_s7 + $0x80] sm:$0xff] }
 0x947   : > { %9033 = vmatpush.bf16.msra.mxu2 %v9834_v10 }
 0x948   : > { %v8366_v42 = vpop.f32.mrf.mxu3 }
 0x94a   : > { %9700 = vmatmul.msk.bf16.gmra.mxu2 %vm8275_vm5, %v8396_v0  ;;  %v8792_v0 = vsel %vm1537_vm1, %v8790_v32, %v8791_v18  ;;  %v8899_v32 = vrot.slane %v8897_v8, 3 }
 0x94b   : > { %9764 = vmatmul.msk.bf16.vlgmr.msra.gmra.mxu3 %vm8275_vm5, %v8792_v0 }
 0x94d   : > { %v8305_v53 = vpop.f32.mrf.mxu2 }
 0x94e   : > { %v18113_v16 = vadd.f32 %v8361_v25, %v8305_v53  ;;  %v8164_v25 = vpop.f32.mrf.mxu1 }
 0x94f   : > { %v8165_v40 = vadd.f32 %v8164_v25, %v18073_v48 }
 0x950   : > { %v8368_v38 = vpop.f32.mrf.mxu3 }
 0x955   : > { %v8307_v20 = vpop.f32.mrf.mxu2 }
 0x956   : > { %v18121_v2 = vadd.f32 %v8363_v12, %v8307_v20  ;;  %v8888_v20 = vsel %vm8877_vm7, %v8883_v26, %v8887_v55  ;;  %v8167_v17 = vpop.f32.mrf.mxu1  ;;  %v8709_v12 = vsel %vm1537_vm1, %v8706_v33, %v8708_v22 }
 0x958   : > { %v18162_v6 = vpop.f32.mrf.mxu3 }
 0x95a   : > { %9747 = vmatmul.msk.bf16.vlgmr.msrb.gmra.mxu2 %vm8275_vm5, %v8701_v62 }
 0x95d   : > { %v8310_v43 = vpop.f32.mrf.mxu2 }
 0x95e   : > { %v18147_v3 = vadd.f32 %v8366_v42, %v8310_v43  ;;  %v8889_v43 = vrot.slane %v8255_v39, 2 }
 0x960   : > { %v18172_v30 = vpop.f32.mrf.mxu3  ;;  %v8891_v54 = vor.u32 %v8890_v60, %v8889_v43  ;;  %v8991_v43 = vrot.slane %v17953_v37, 3 }
 0x962   : > { %v8658_v0 = vpop.f32.mrf.mxu1 }
 0x965   : > { %v8312_v62 = vpop.f32.mrf.mxu2 }
 0x966   : > { %v18156_v5 = vadd.f32 %v8368_v38, %v8312_v62  ;;  %v8892_v62 = vsel %vm8877_vm7, %v8887_v55, %v8891_v54 }
 0x968   : > { %v8376_v13 = vpop.f32.mrf.mxu3 }
 0x96a   : > { %9748 = vmatmul.msk.bf16.gmra.mxu2 %vm8275_vm5, %v8703_v51  ;;  %v8879_v51 = vrot.slane %v8227_v46, 3  ;;  %v8793_v46 = vrot.slane %v17953_v37, 2 }
 0x96c   : > { %v8880_v59 = vor.u32 %v8879_v51, %v8878_v11  ;;  %v8794_v29 = vsel %vm1537_vm1, %v8791_v18, %v8793_v46  ;;  %v8796_v14 = vsel %vm1537_vm1, %v8793_v46, %v8795_v23  ;;  %v8896_v18 = vrot.slane %v8894_v27, 2 }
 0x96d   : > { %v18138_v47 = vpop.f32.mrf.mxu2  ;;  %9765 = vmatmul.msk.bf16.gmra.mxu3 %vm8275_vm5, %v8794_v29  ;;  %v8989_v51 = vrot.slane %v17930_v44, 3  ;;  %v8660_v44 = vpop.f32.mrf.mxu1 }
 0x96e   : > { %v8884_v61 = vsel %vm8877_vm7, %v8880_v59, %v8883_v26  ;;  %v8900_v48 = vor.u32 %v8899_v32, %v8896_v18  ;;  %v8372_v22 = vadd.f32 %v18162_v6, %v18138_v47 }
 0x96f   : > { %9781 = vmatmul.msk.bf16.vlgmr.msrb.gmra.mxu1 %vm8275_vm5, %v8884_v61  ;;  %v8988_v61 = vrot.slane %v17909_v50, 3 }
 0x970   : > { %v8378_v41 = vpop.f32.mrf.mxu3  ;;  %v8901_v56 = vsel %vm8877_vm7, %v8891_v54, %v8900_v48 }
 0x971   : > { %v8990_v46 = vsel %vm8987_vm8, %v8988_v61, %v8989_v51 }
 0x975   : > { %v18153_v53 = vpop.f32.mrf.mxu2 }
 0x978   : > { %v8528_v57 = vpop.f32.mrf.mxu3 }
 0x97a   : > { %9749 = vmatmul.msk.bf16.gmra.mxu2 %vm8275_vm5, %v8705_v1 }
 0x97d   : > { %v8320_v36 = vpop.f32.mrf.mxu2  ;;  %9766 = vmatmul.msk.bf16.gmra.mxu3 %vm8275_vm5, %v8796_v14  ;;  %v8663_v14 = vpop.f32.mrf.mxu1 }
 0x97e   : > { %v18187_v31 = vadd.f32 %v8376_v13, %v8320_v36 }
 0x97f   : > { %9782 = vmatmul.msk.bf16.gmra.mxu1 %vm8275_vm5, %v8888_v20 }
 0x980   : > { %v8530_v59 = vpop.f32.mrf.mxu3 }
 0x985   : > { %v8322_v19 = vpop.f32.mrf.mxu2 }
 0x986   : > { %v18197_v39 = vadd.f32 %v8378_v41, %v8322_v19 }
 0x988   : > { %v8533_v20 = vpop.f32.mrf.mxu3 }
 0x98a   : > { %9750 = vmatmul.msk.bf16.gmra.mxu2 %vm8275_vm5, %v8707_v49  ;;  %v8181_v49 = vpack.c.bf16 %v8165_v40, %v8165_v40 }
 0x98c   : > { %v8787_v11 = vunpack.c.l.b16 %v8181_v49 }
 0x98d   : > { %v8433_v1 = vpop.f32.mrf.mxu2 }
 0x98e   : > { %v8458_v63 = vadd.f32 %v8433_v1, %v18093_v35  ;;  %v8789_v26 = vpack.c.b16 %v8787_v11, %v8787_v11 }
 0x98f   : > { %9783 = vmatmul.msk.bf16.gmra.mxu1 %vm8275_vm5, %v8892_v62 }
 0x990   : > { %v8553_v33 = vadd.f32 %v8528_v57, %v8458_v63  ;;  %v8903_v36 = vshrl.u32 %v8789_v26, 16  ;;  %v8906_v29 = vshll.u32 %v8789_v26, 16  ;;  %v8799_v21 = vrot.slane %v8789_v26, 2  ;;  %v8535_v25 = vpop.f32.mrf.mxu3 }
 0x991   : > { %v8997_v49 = vrot.slane %v8789_v26, 3 }
 0x992   : > { %v18210_v34 = vadd.f32 %v8658_v0, %v8553_v33  ;;  %v8905_v50 = vrot.slane %v8903_v36, 2  ;;  %v8908_v19 = vrot.slane %v8906_v29, 3 }
 0x994   : > { %v8909_v10 = vor.u32 %v8908_v19, %v8905_v50 }
 0x995   : > { %v8435_v24 = vpop.f32.mrf.mxu2 }
 0x996   : > { %v8459_v35 = vadd.f32 %v8435_v24, %v18104_v52  ;;  %v8798_v52 = vsel %vm1537_vm1, %v8795_v23, %v8797_v28  ;;  %v8910_v1 = vsel %vm8877_vm7, %v8900_v48, %v8909_v10  ;;  %v8665_v24 = vpop.f32.mrf.mxu1 }
 0x997   : > { %9767 = vmatmul.msk.bf16.gmra.mxu3 %vm8275_vm5, %v8798_v52 }
 0x998   : > { %v8554_v38 = vadd.f32 %v8530_v59, %v8459_v35  ;;  %v8538_v17 = vpop.f32.mrf.mxu3 }
 0x99a   : > { %9751 = vmatmul.msk.bf16.gmra.mxu2 %vm8275_vm5, %v8709_v12  ;;  %v18219_v9 = vadd.f32 %v8660_v44, %v8554_v38 }
 0x99d   : > { %v8438_v7 = vpop.f32.mrf.mxu2 }
 0x99e   : > { %v8460_v45 = vadd.f32 %v8438_v7, %v18113_v16  ;;  %v8668_v37 = vpop.f32.mrf.mxu1  ;;  %v8993_v7 = vrot.slane %v17978_v58, 3 }
 0x99f   : > { %9784 = vmatmul.msk.bf16.gmra.mxu1 %vm8275_vm5, %v8901_v56 }
 0x9a0   : > { %v8555_v23 = vadd.f32 %v8533_v20, %v8460_v45  ;;  %v8995_v45 = vrot.slane %v18192_v4, 3  ;;  %v8540_v57 = vpop.f32.mrf.mxu3  ;;  %v8994_v6 = vsel %vm8987_vm8, %v8991_v43, %v8993_v7 }
 0x9a2   : > { %v8685_v63 = vadd.f32 %v8663_v14, %v8555_v23  ;;  %v8998_v47 = vsel %vm8987_vm8, %v8995_v45, %v8997_v49 }
 0x9a5   : > { %v8440_v42 = vpop.f32.mrf.mxu2 }
 0x9a6   : > { %v8461_v16 = vadd.f32 %v8440_v42, %v18121_v2  ;;  %v8800_v2 = vsel %vm1537_vm1, %v8797_v28, %v8799_v21  ;;  %v8670_v8 = vpop.f32.mrf.mxu1  ;;  %v8996_v42 = vsel %vm8987_vm8, %v8993_v7, %v8995_v45 }
 0x9a7   : > { %9768 = vmatmul.msk.bf16.gmra.mxu3 %vm8275_vm5, %v8800_v2 }
 0x9a8   : > { %v8556_v54 = vadd.f32 %v8535_v25, %v8461_v16 }
 0x9aa   : > { %9798 = vmatmul.msk.bf16.vlgmr.msra.gmra.mxu2 %vm8275_vm5, %v8990_v46  ;;  %v8686_v35 = vadd.f32 %v8665_v24, %v8556_v54 }
 0x9ad   : > { %v8443_v15 = vpop.f32.mrf.mxu2 }
 0x9ae   : > { %v8462_v55 = vadd.f32 %v8443_v15, %v18147_v3  ;;  %v8992_v3 = vsel %vm8987_vm8, %v8989_v51, %v8991_v43  ;;  %v8673_v58 = vpop.f32.mrf.mxu1 }
 0x9af   : > { %9785 = vmatmul.msk.bf16.gmra.mxu1 %vm8275_vm5, %v8910_v1 }
 0x9b0   : > { %v8557_v12 = vadd.f32 %v8538_v17, %v8462_v55 }
 0x9b2   : > { %v8687_v40 = vadd.f32 %v8668_v37, %v8557_v12 }
 0x9b5   : > { %v8445_v13 = vpop.f32.mrf.mxu2 }
 0x9b6   : > { %v8463_v60 = vadd.f32 %v8445_v13, %v18156_v5  ;;  %v8374_v5 = vadd.f32 %v18172_v30, %v18153_v53  ;;  %v8543_v30 = vpop.f32.mrf.mxu3  ;;  %v8675_v16 = vpop.f32.mrf.mxu1 }
 0x9b8   : > { %v8558_v27 = vadd.f32 %v8540_v57, %v8463_v60 }
 0x9ba   : > { %9799 = vmatmul.msk.bf16.gmra.mxu2 %vm8275_vm5, %v8992_v3  ;;  %v8688_v33 = vadd.f32 %v8670_v8, %v8558_v27 }
 0x9bd   : > { %v8448_v62 = vpop.f32.mrf.mxu2 }
 0x9be   : > { %v8464_v41 = vadd.f32 %v8448_v62, %v8372_v22  ;;  %v8545_v0 = vpop.f32.mrf.mxu3  ;;  %v8678_v38 = vpop.f32.mrf.mxu1 }
 0x9c0   : > { %v8559_v32 = vadd.f32 %v8543_v30, %v8464_v41 }
 0x9c2   : > { %v8689_v11 = vadd.f32 %v8673_v58, %v8559_v32 }
 0x9c5   : > { %v8450_v28 = vpop.f32.mrf.mxu2 }
 0x9c6   : > { %v8465_v52 = vadd.f32 %v8450_v28, %v8374_v5  ;;  %v8548_v61 = vpop.f32.mrf.mxu3  ;;  %v8680_v44 = vpop.f32.mrf.mxu1 }
 0x9c8   : > { %v8560_v51 = vadd.f32 %v8545_v0, %v8465_v52 }
 0x9ca   : > { %9800 = vmatmul.msk.bf16.gmra.mxu2 %vm8275_vm5, %v8994_v6  ;;  %v8690_v26 = vadd.f32 %v8675_v16, %v8560_v51 }
 0x9cd   : > { %v8453_v18 = vpop.f32.mrf.mxu2 }
 0x9ce   : > { %v8466_v53 = vadd.f32 %v8453_v18, %v18187_v31  ;;  %v8550_v21 = vpop.f32.mrf.mxu3 }
 0x9d0   : > { %v8561_v31 = vadd.f32 %v8548_v61, %v8466_v53 }
 0x9d2   : > { %v8691_v46 = vadd.f32 %v8678_v38, %v8561_v31 }
 0x9d5   : > { %v8455_v48 = vpop.f32.mrf.mxu2 }
 0x9d6   : > { %v8467_v4 = vadd.f32 %v8455_v48, %v18197_v39  ;;  %v8837_v50 = vpop.f32.mrf.mxu3 }
 0x9d8   : > { %v8562_v39 = vadd.f32 %v8550_v21, %v8467_v4 }
 0x9da   : > { %9801 = vmatmul.msk.bf16.gmra.mxu2 %vm8275_vm5, %v8996_v42  ;;  %v8692_v2 = vadd.f32 %v8680_v44, %v8562_v39 }
 0x9dd   : > { %v8746_v56 = vpop.f32.mrf.mxu2 }
 0x9de   : > { %v8771_v59 = vadd.f32 %v8746_v56, %v18210_v34  ;;  %v8839_v1 = vpop.f32.mrf.mxu3  ;;  %v18253_v56 = vld [vmem:[%s18344_s8] ss:$0 sm:$0xff] }
 0x9e0   : > { %v8862_v19 = vadd.f32 %v8837_v50, %v8771_v59 }
 0x9e5   : > { %v8748_v36 = vpop.f32.mrf.mxu2 }
 0x9e6   : > { %v8772_v29 = vadd.f32 %v8748_v36, %v18219_v9 }
 0x9e8   : > { %v8863_v14 = vadd.f32 %v8839_v1, %v8772_v29 }
 0x9ea   : > { %9802 = vmatmul.msk.bf16.gmra.mxu2 %vm8275_vm5, %v8998_v47 }
 0x9ec   : > { %v8947_v20 = vpop.f32.mrf.mxu1 }
 0x9ed   : > { %v8751_v15 = vpop.f32.mrf.mxu2  ;;  %v8972_v34 = vadd.f32 %v8947_v20, %v8862_v19 }
 0x9ee   : > { %v8773_v55 = vadd.f32 %v8751_v15, %v8685_v63 }
 0x9f0   : > { %v8842_v25 = vpop.f32.mrf.mxu3 }
 0x9f1   : > { %v8864_v3 = vadd.f32 %v8842_v25, %v8773_v55  ;;  %v18261_v55 = vld [vmem:[%s18345_s9] ss:$0 sm:$0xff] }
 0x9f4   : > { %v8949_v13 = vpop.f32.mrf.mxu1 }
 0x9f5   : > { %v8753_v10 = vpop.f32.mrf.mxu2  ;;  %v8973_v60 = vadd.f32 %v8949_v13, %v8863_v14 }
 0x9f6   : > { %v8774_v23 = vadd.f32 %v8753_v10, %v8686_v35 }
 0x9f8   : > { %v8844_v45 = vpop.f32.mrf.mxu3 }
 0x9f9   : > { %v8865_v48 = vadd.f32 %v8844_v45, %v8774_v23 }
 0x9fc   : > { %v8952_v54 = vpop.f32.mrf.mxu1 }
 0x9fd   : > { %v8756_v43 = vpop.f32.mrf.mxu2  ;;  %v8974_v22 = vadd.f32 %v8952_v54, %v8864_v3 }
 0x9fe   : > { %v8775_v9 = vadd.f32 %v8756_v43, %v8687_v40  ;;  %v18271_v43 = vld [vmem:[%s18346_s10] ss:$0 sm:$0xff] }
 0xa00   : > { %v8847_v47 = vpop.f32.mrf.mxu3 }
 0xa04   : > { %v8954_v57 = vpop.f32.mrf.mxu1 }
 0xa05   : > { %v8758_v24 = vpop.f32.mrf.mxu2 }
 0xa06   : > { %v8776_v62 = vadd.f32 %v8758_v24, %v8688_v33 }
 0xa08   : > { %v8849_v18 = vpop.f32.mrf.mxu3 }
 0xa09   : > { %v8867_v32 = vadd.f32 %v8849_v18, %v8776_v62 }
 0xa0c   : > { %v8957_v8 = vpop.f32.mrf.mxu1 }
 0xa0d   : > { %v8761_v41 = vpop.f32.mrf.mxu2 }
 0xa0e   : > { %v8777_v63 = vadd.f32 %v8761_v41, %v8689_v11  ;;  %v8866_v11 = vadd.f32 %v8847_v47, %v8775_v9 }
 0xa10   : > { %v8976_v51 = vadd.f32 %v8957_v8, %v8866_v11 }
 0xa14   : > { %v8959_v53 = vpop.f32.mrf.mxu1 }
 0xa15   : > { %v8763_v17 = vpop.f32.mrf.mxu2  ;;  %v8977_v4 = vadd.f32 %v8959_v53, %v8867_v32 }
 0xa16   : > { %v8778_v12 = vadd.f32 %v8763_v17, %v8690_v26  ;;  %v8975_v26 = vadd.f32 %v8954_v57, %v8865_v48 }
 0xa1a   : > { %v8852_v58 = vpop.f32.mrf.mxu3 }
 0xa1b   : > { %v8868_v59 = vadd.f32 %v8852_v58, %v8777_v63 }
 0xa1c   : > { %v8962_v0 = vpop.f32.mrf.mxu1 }
 0xa1d   : > { %v8766_v37 = vpop.f32.mrf.mxu2  ;;  %v8978_v36 = vadd.f32 %v8962_v0, %v8868_v59 }
 0xa1e   : > { %v18246_v5 = vadd.f32 %v8766_v37, %v8691_v46 }
 0xa22   : > { %v8854_v38 = vpop.f32.mrf.mxu3 }
 0xa23   : > { %v8869_v19 = vadd.f32 %v8854_v38, %v8778_v12 }
 0xa24   : > { %v8964_v15 = vpop.f32.mrf.mxu1 }
 0xa25   : > { %v8768_v35 = vpop.f32.mrf.mxu2  ;;  %v8979_v9 = vadd.f32 %v8964_v15, %v8869_v19 }
 0xa26   : > { %v18248_v28 = vadd.f32 %v8768_v35, %v8692_v2 }
 0xa2a   : > { %v8857_v3 = vpop.f32.mrf.mxu3 }
 0xa2b   : > { %v8870_v37 = vadd.f32 %v8857_v3, %v18246_v5 }
 0xa2c   : > { %v8967_v57 = vpop.f32.mrf.mxu1 }
 0xa2d   : > { %v9035_v7 = vpop.f32.mrf.mxu2  ;;  %v8980_v8 = vadd.f32 %v8967_v57, %v8870_v37 }
 0xa2e   : > { %v9060_v52 = vadd.f32 %v9035_v7, %v8972_v34 }
 0xa30   : > { %v9074_v34 = vadd.f32 %v18253_v56, %v9060_v52 }
 0xa32   : > { %v9084_v24 = vmax.f32 %v9074_v34, 0.0 }
 0xa34   : > { %v8969_v15 = vpop.f32.mrf.mxu1 }
 0xa35   : > { %v9037_v40 = vpop.f32.mrf.mxu2 }
 0xa36   : > { %v9061_v49 = vadd.f32 %v9037_v40, %v8973_v60  ;;  %v9098_v40 = vmul.f32 %v18261_v55, %v9084_v24 }
 0xa38   : > { %v9075_v23 = vadd.f32 %v18253_v56, %v9061_v49 }
 0xa3d   : > { %v9040_v6 = vpop.f32.mrf.mxu2 }
 0xa3e   : > { %v9062_v27 = vadd.f32 %v9040_v6, %v8974_v22  ;;  %v9085_v22 = vmax.f32 %v9075_v23, 0.0 }
 0xa40   : > { %v9076_v50 = vadd.f32 %v18253_v56, %v9062_v27  ;;  %v9099_v49 = vmul.f32 %v18261_v55, %v9085_v22 }
 0xa42   : > { %v9086_v60 = vmax.f32 %v9076_v50, 0.0  ;;  %v9113_v32 = vadd.f32 %v18271_v43, %v9099_v49 }
 0xa44   : > { %v9100_v35 = vmul.f32 %v18261_v55, %v9086_v60 }
 0xa45   : > { %v9042_v33 = vpop.f32.mrf.mxu2 }
 0xa46   : > { %v9063_v31 = vadd.f32 %v9042_v33, %v8975_v26  ;;  %v9114_v33 = vadd.f32 %v18271_v43, %v9100_v35 }
 0xa48   : > { %v9077_v39 = vadd.f32 %v18253_v56, %v9063_v31 }
 0xa4a   : > { %v9087_v1 = vmax.f32 %v9077_v39, 0.0  ;;  %v9133_v39 = vrot.slane %v9113_v32, 1 }
 0xa4c   : > { %v9101_v41 = vmul.f32 %v18261_v55, %v9087_v1 }
 0xa4d   : > { %v9045_v30 = vpop.f32.mrf.mxu2 }
 0xa4e   : > { %v9064_v61 = vadd.f32 %v9045_v30, %v8976_v51  ;;  %v9115_v47 = vadd.f32 %v18271_v43, %v9101_v41  ;;  %v9112_v30 = vadd.f32 %v18271_v43, %v9098_v40 }
 0xa50   : > { %v9078_v29 = vadd.f32 %v18253_v56, %v9064_v61  ;;  %v9137_v48 = vrot.slane %v9115_v47, 1  ;;  %v9135_v61 = vrot.slane %v9114_v33, 1 }
 0xa52   : > { %v9088_v20 = vmax.f32 %v9078_v29, 0.0 }
 0xa54   : > { %v9102_v25 = vmul.f32 %v18261_v55, %v9088_v20 }
 0xa55   : > { %v9047_v42 = vpop.f32.mrf.mxu2 }
 0xa56   : > { %v9065_v16 = vadd.f32 %v9047_v42, %v8977_v4  ;;  %v9116_v7 = vadd.f32 %v18271_v43, %v9102_v25  ;;  %v8859_v4 = vpop.f32.mrf.mxu3 }
 0xa58   : > { %v9079_v46 = vadd.f32 %v18253_v56, %v9065_v16  ;;  %v9139_v5 = vrot.slane %v9116_v7, 1  ;;  %v8871_v16 = vadd.f32 %v8859_v4, %v18248_v28  ;;  %v9138_v28 = vsel %vm1130_vm0, %v9135_v61, %v9137_v48 }
 0xa5a   : > { %v9089_v44 = vmax.f32 %v9079_v46, 0.0  ;;  %v9140_v46 = vsel %vm1130_vm0, %v9137_v48, %v9139_v5  ;;  %v8981_v34 = vadd.f32 %v8969_v15, %v8871_v16 }
 0xa5c   : > { %v9103_v14 = vmul.f32 %v18261_v55, %v9089_v44 }
 0xa5d   : > { %v9050_v21 = vpop.f32.mrf.mxu2 }
 0xa5e   : > { %v9066_v2 = vadd.f32 %v9050_v21, %v8978_v36  ;;  %v9117_v63 = vadd.f32 %v18271_v43, %v9103_v14  ;;  %v9132_v36 = vrot.slane %v9112_v30, 1  ;;  %v9164_v21 = vmax.f32 %v9115_v47, %v9140_v46 }
 0xa5f   : > { %v9136_v14 = vsel %vm1130_vm0, %v9133_v39, %v9135_v61 }
 0xa60   : > { %v9080_v10 = vadd.f32 %v18253_v56, %v9066_v2  ;;  %v9141_v6 = vrot.slane %v9117_v63, 1  ;;  %v9183_v19 = vrot.slane %v9164_v21, 2  ;;  %v9162_v3 = vmax.f32 %v9113_v32, %v9136_v14 }
 0xa62   : > { %v9090_v13 = vmax.f32 %v9080_v10, 0.0  ;;  %v9142_v51 = vsel %vm1130_vm0, %v9139_v5, %v9141_v6  ;;  %v9163_v10 = vmax.f32 %v9114_v33, %v9138_v28 }
 0xa63   : > { %v18296_v59 = vmax.f32 %v9116_v7, %v9142_v51 }
 0xa64   : > { %v9104_v54 = vmul.f32 %v18261_v55, %v9090_v13 }
 0xa65   : > { %v9052_v62 = vpop.f32.mrf.mxu2  ;;  %v9185_v29 = vrot.slane %v18296_v59, 2 }
 0xa66   : > { %v9118_v17 = vadd.f32 %v18271_v43, %v9104_v54  ;;  %v9067_v12 = vadd.f32 %v9052_v62, %v8979_v9  ;;  %v9181_v9 = vrot.slane %v9163_v10, 2  ;;  %v9134_v62 = vsel %vm1130_vm0, %v9132_v36, %v9133_v39 }
 0xa67   : > { %v9186_v25 = vsel %vm1537_vm1, %v9183_v19, %v9185_v29 }
 0xa68   : > { %v9143_v52 = vrot.slane %v9118_v17, 1  ;;  %v9081_v45 = vadd.f32 %v18253_v56, %v9067_v12  ;;  %v9208_v22 = vmax.f32 %v9163_v10, %v9186_v25  ;;  %v9161_v12 = vmax.f32 %v9112_v30, %v9134_v62 }
 0xa6a   : > { %v9091_v27 = vmax.f32 %v9081_v45, 0.0  ;;  %v9144_v53 = vsel %vm1130_vm0, %v9141_v6, %v9143_v52 }
 0xa6b   : > { %v18290_v11 = vmax.f32 %v9117_v63, %v9144_v53  ;;  %v9180_v63 = vrot.slane %v9162_v3, 2 }
 0xa6c   : > { %v9105_v18 = vmul.f32 %v18261_v55, %v9091_v27 }
 0xa6d   : > { %v9055_v58 = vpop.f32.mrf.mxu2  ;;  %v9187_v26 = vrot.slane %v18290_v11, 2  ;;  %v9182_v45 = vsel %vm1537_vm1, %v9180_v63, %v9181_v9 }
 0xa6e   : > { %v9119_v0 = vadd.f32 %v18271_v43, %v9105_v18  ;;  %v9068_v42 = vadd.f32 %v9055_v58, %v8980_v8  ;;  %v9206_v57 = vmax.f32 %v9161_v12, %v9182_v45 }
 0xa6f   : > { %v9188_v20 = vsel %vm1537_vm1, %v9185_v29, %v9187_v26 }
 0xa70   : > { %v9145_v31 = vrot.slane %v9119_v0, 1  ;;  %v9082_v38 = vadd.f32 %v18253_v56, %v9068_v42  ;;  %v9209_v1 = vmax.f32 %v9164_v21, %v9188_v20  ;;  %v9216_v42 = vld [vmem:[%s18348_s12 + $0x8] sm:$0xff] }
 0xa72   : > { %v9092_v44 = vmax.f32 %v9082_v38, 0.0  ;;  %v9146_v2 = vsel %vm1130_vm0, %v9143_v52, %v9145_v31 }
 0xa73   : > { %v9167_v50 = vmax.f32 %v9118_v17, %v9146_v2  ;;  %v9184_v17 = vsel %vm1537_vm1, %v9181_v9, %v9183_v19 }
 0xa74   : > { %v9106_v23 = vmul.f32 %v18261_v55, %v9092_v44  ;;  %v9207_v52 = vmax.f32 %v9162_v3, %v9184_v17 }
 0xa75   : > { %v9057_v13 = vpop.f32.mrf.mxu2  ;;  %v9189_v60 = vrot.slane %v9167_v50, 2 }
 0xa76   : > { %v9120_v54 = vadd.f32 %v18271_v43, %v9106_v23  ;;  %v9069_v24 = vadd.f32 %v9057_v13, %v8981_v34 }
 0xa77   : > { %v9190_v41 = vsel %vm1537_vm1, %v9187_v26, %v9189_v60 }
 0xa78   : > { %v9147_v37 = vrot.slane %v9120_v54, 1  ;;  %v9083_v35 = vadd.f32 %v18253_v56, %v9069_v24  ;;  %v9210_v7 = vmax.f32 %v18296_v59, %v9190_v41 }
 0xa7a   : > { %v9093_v40 = vmax.f32 %v9083_v35, 0.0  ;;  %v9148_v49 = vsel %vm1130_vm0, %v9145_v31, %v9147_v37 }
 0xa7b   : > { %v9168_v47 = vmax.f32 %v9119_v0, %v9148_v49 }
 0xa7c   : > { %v9107_v6 = vmul.f32 %v18261_v55, %v9093_v40 }
 0xa7d   : > { %v9191_v27 = vrot.slane %v9168_v47, 2 }
 0xa7e   : > { %v9121_v8 = vadd.f32 %v18271_v43, %v9107_v6 }
 0xa7f   : > { %v9192_v33 = vsel %vm1537_vm1, %v9189_v60, %v9191_v27 }
 0xa80   : > { %v9149_v5 = vrot.slane %v9121_v8, 1  ;;  %v9211_v56 = vmax.f32 %v18290_v11, %v9192_v33  ;;  %v9215_v11 = vld [vmem:[%s18348_s12] sm:$0xff] }
 0xa82   : > { %v9150_v18 = vsel %vm1130_vm0, %v9147_v37, %v9149_v5  ;;  %v9170_v53 = vmax.f32 %v9121_v8, %v9149_v5 }
 0xa83   : > { %v9169_v30 = vmax.f32 %v9120_v54, %v9150_v18 }
 0xa84   : > { %v9195_v32 = vrot.slane %v9170_v53, 2 }
 0xa85   : > { %v9193_v58 = vrot.slane %v9169_v30, 2 }
 0xa86   : > { %v9214_v48 = vmax.f32 %v9169_v30, %v9195_v32 }
 0xa87   : > { %v9196_v4 = vsel %vm1537_vm1, %v9193_v58, %v9195_v32  ;;  %v9194_v0 = vsel %vm1537_vm1, %v9191_v27, %v9193_v58 }
 0xa88   : > { %9803 = vmatpush.msk.msrb.mxu3 %vm8987_vm8, %v9214_v48  ;;  %v9213_v55 = vmax.f32 %v9168_v47, %v9196_v4  ;;  %v9212_v43 = vmax.f32 %v9167_v50, %v9194_v0 }
 0xa8a   : > { %9236 = vmatpush.msrb.mxu3 %v9213_v55 }
 0xa8c   : > { %9237 = vmatpush.msrb.mxu3 %v9212_v43 }
 0xa8e   : > { %9238 = vmatpush.msrb.mxu3 %v9211_v56 }
 0xa90   : > { %9239 = vmatpush.msrb.mxu3 %v9210_v7 }
 0xa92   : > { %9240 = vmatpush.msrb.mxu3 %v9209_v1 }
 0xa94   : > { %9241 = vmatpush.msrb.mxu3 %v9208_v22 }
 0xa96   : > { %9242 = vmatpush.msrb.mxu3 %v9207_v52 }
 0xa98   : > { %9243 = vmatpush.msrb.mxu3 %v9206_v57 }
 0xa99   : > { %9804 = vmatmul.msk.f32.vlgmr.msrb.gmra.mxu3 %vm9217_vm9, %v9215_v11 }
 0xaa1   : > { %9805 = vmatmul.msk.f32.gmra.mxu3 %vm9217_vm9, %v9216_v42 }
 0xb1c   : > { %v9245_v51 = vpop.f32.mrf.mxu3 }
 0xb1d   : > { %9252 = vst.msk [vmem:[%s440_s23] sm:$0xff] %vm9251_vm10, %v9245_v51 }
 0xb24   : > { %v9248_v16 = vpop.f32.mrf.mxu3 }
 0xb25   : > { %9253 = vst.msk [vmem:[%s440_s23 + $0x8] sm:$0xff] %vm9251_vm10, %v9248_v16 }
 0xb26 PF: > { %s23_s25 = sadd.s32 1, %s9880_s25  }
 0xb27   : > { %p20_p4 = scmp.ge.s32.totalorder %s23_s25, 4  }
 0xb29   :  { %22 = sbr.rel (!%p20_p4) target bundleno = 1 (0x1), region = 118 }

</bundles_post_ra>
